<compile_context>
chip_gen: v5e
topology: v5e:2x2
jax: 0.10.0
libtpu: 0.0.40
codegen_flags: <defaults>
</compile_context>

<pallas_src>
import functools

import jax
import jax.numpy as jnp
from jax.experimental import pallas as pl
from jax.experimental.pallas import tpu as pltpu

_VMEM_LIMIT = 16 * 1024 * 1024  # true working-set need; safe on v5e/v6e/v7x


def _round_up(x, m):
    return (x + m - 1) // m * m


# ----------------------------- Pallas kernel -------------------------------
# Fused conv-as-GEMM, single K step:
#   out = epilogue( patches_block @ weight_block )
#     bn=False : + bias, optional LeakyReLU(0.2)
#     bn=True  : training-mode BatchNorm over the (full, optionally masked)
#                M rows of this Cout tile, scale/shift, LeakyReLU(0.2)
def _conv_fused_kernel(a_ref, w_ref, s1_ref, s2_ref, o_ref,
                       *, bn, act, m_valid, eps=1e-5):
    y = jnp.dot(a_ref[...], w_ref[...], preferred_element_type=jnp.float32)
    if bn:
        # Per-channel batch statistics -> splitting Cout across the grid keeps
        # them exact; the full M extent must live in this one block.
        if m_valid == a_ref.shape[0]:
            mean = jnp.mean(y, axis=0, keepdims=True)
            d = y - mean
            var = jnp.mean(d * d, axis=0, keepdims=True)
        else:
            rows = jax.lax.broadcasted_iota(jnp.int32, y.shape, 0)
            valid = rows < m_valid
            inv_cnt = 1.0 / float(m_valid)
            ym = jnp.where(valid, y, 0.0)
            mean = jnp.sum(ym, axis=0, keepdims=True) * inv_cnt
            d = jnp.where(valid, y - mean, 0.0)
            var = jnp.sum(d * d, axis=0, keepdims=True) * inv_cnt
        y = (y - mean) * jax.lax.rsqrt(var + eps) * s1_ref[...] + s2_ref[...]
    else:
        y = y + s1_ref[...]
    if act:
        y = jnp.where(y > 0, y, 0.2 * y)  # LeakyReLU(0.2)
    o_ref[...] = y.astype(o_ref.dtype)


# ------------------------------ JAX glue -----------------------------------

def _im2col_nhwc(x, k, s, p):
    """x: (N,H,W,C) -> patches (N*Ho*Wo, k*k*C), column order (kh, kw, C)."""
    N, H, W, C = x.shape
    xp = jnp.pad(x, ((0, 0), (p, p), (p, p), (0, 0)))
    Ho = (H + 2 * p - k) // s + 1
    Wo = (W + 2 * p - k) // s + 1
    cols = []
    for i in range(k):
        for j in range(k):
            cols.append(xp[:, i:i + s * Ho:s, j:j + s * Wo:s, :])  # (N,Ho,Wo,C)
    patches = jnp.stack(cols, axis=3)                              # (N,Ho,Wo,k*k,C)
    return patches.reshape(N * Ho * Wo, k * k * C), Ho, Wo


def conv_block_pallas(x, wm, s1, s2, *, k, stride, padding, cout, bn, act,
                      out_f32):
    """Fused Conv2d(+bias | +BatchNorm)(+LeakyReLU) on an NHWC bf16 slab.

    x:  (N, H, W, Cin) bf16
    wm: pre-packed weight (K_pad, Cout_pad) bf16, row order (kh, kw, Cin)
    s1: bias or gamma, (1, Cout_pad) f32;  s2: beta (or zeros), (1, Cout_pad) f32
    Returns (N, Ho, Wo, cout) in bf16 (or f32 for the final layer).
    """
    N = x.shape[0]
    patches, Ho, Wo = _im2col_nhwc(x, k, stride, padding)
    M, K = patches.shape
    K_pad, Cout_pad = wm.shape
    M_pad = _round_up(M, 16)                 # bf16 sublane packing
    if M_pad != M or K_pad != K:
        patches = jnp.pad(patches, ((0, M_pad - M), (0, K_pad - K)))

    tn = 128                                 # Cout_pad is always a 128 multiple
    if bn:
        tm = M_pad                           # full M block -> exact batch stats
    else:
        tm = 128 if M_pad % 128 == 0 else M_pad
    assert (not bn) or tm == M_pad, "BN layers require the full M extent in one block"
    grid = (M_pad // tm, Cout_pad // tn)

    out_dtype = jnp.float32 if out_f32 else jnp.bfloat16
    y = pl.pallas_call(
        functools.partial(_conv_fused_kernel, bn=bn, act=act, m_valid=M),
        out_shape=jax.ShapeDtypeStruct((M_pad, Cout_pad), out_dtype),
        grid_spec=pltpu.PrefetchScalarGridSpec(
            num_scalar_prefetch=0,
            grid=grid,
            in_specs=[
                pl.BlockSpec((tm, K_pad), lambda i, j: (i, 0)),
                pl.BlockSpec((K_pad, tn), lambda i, j: (0, j)),
                pl.BlockSpec((1, tn), lambda i, j: (0, j)),
                pl.BlockSpec((1, tn), lambda i, j: (0, j)),
            ],
            out_specs=pl.BlockSpec((tm, tn), lambda i, j: (i, j)),
        ),
        compiler_params=pltpu.CompilerParams(
            dimension_semantics=("parallel", "parallel"),
            vmem_limit_bytes=_VMEM_LIMIT,
        ),
    )(patches, wm, s1, s2)

    return y[:M, :cout].reshape(N, Ho, Wo, cout)


# --------------------------- model construction ----------------------------

def build_discriminator(key, input_c=3, num_filters=64, n_down=3):
    """Static layer specs + PRE-PACKED params matching Discriminator(...)."""
    layer_defs = [dict(ni=input_c, nf=num_filters, s=2, norm=False, act=True)]
    for i in range(n_down):
        layer_defs.append(dict(ni=num_filters * 2 ** i,
                               nf=num_filters * 2 ** (i + 1),
                               s=1 if i == n_down - 1 else 2,
                               norm=True, act=True))
    layer_defs.append(dict(ni=num_filters * 2 ** n_down, nf=1,
                           s=1, norm=False, act=False))

    specs = []    # static python config (closed over, not traced)
    params = []   # arrays only (jit-friendly pytree), pre-packed for the kernel
    k = 4
    for d in layer_defs:
        key, wk, bk, gk = jax.random.split(key, 4)
        ni, nf = d["ni"], d["nf"]
        K = k * k * ni
        K_pad = _round_up(K, 128)
        Cout_pad = _round_up(nf, 128)

        # PyTorch-layout weight -> packed (K_pad, Cout_pad) bf16, done once.
        w = 0.02 * jax.random.normal(wk, (nf, ni, k, k), jnp.float32)
        wm = jnp.transpose(w, (2, 3, 1, 0)).reshape(K, nf)
        wm = jnp.pad(wm, ((0, K_pad - K), (0, Cout_pad - nf))).astype(jnp.bfloat16)

        if d["norm"]:
            gamma = 1.0 + 0.02 * jax.random.normal(gk, (nf,), jnp.float32)
            beta = jnp.zeros((nf,), jnp.float32)
            s1 = jnp.pad(gamma, (0, Cout_pad - nf), constant_values=1.0)
            s2 = jnp.pad(beta, (0, Cout_pad - nf))
        else:
            bias = 0.02 * jax.random.normal(bk, (nf,), jnp.float32)
            s1 = jnp.pad(bias, (0, Cout_pad - nf))
            s2 = jnp.zeros((Cout_pad,), jnp.float32)

        params.append({"wm": wm,
                       "s1": s1.reshape(1, Cout_pad).astype(jnp.float32),
                       "s2": s2.reshape(1, Cout_pad).astype(jnp.float32)})
        specs.append(dict(k=k, stride=d["s"], padding=1, cout=nf,
                          bn=d["norm"], act=d["act"]))
    return tuple(specs), params


def discriminator_forward(specs, params, x_nchw):
    """Forward pass. NCHW in/out (PyTorch convention); NHWC bf16 internally."""
    x = jnp.transpose(x_nchw, (0, 2, 3, 1)).astype(jnp.bfloat16)   # once
    n_layers = len(specs)
    for idx, (spec, p) in enumerate(zip(specs, params)):
        x = conv_block_pallas(
            x, p["wm"], p["s1"], p["s2"],
            k=spec["k"], stride=spec["stride"], padding=spec["padding"],
            cout=spec["cout"], bn=spec["bn"], act=spec["act"],
            out_f32=(idx == n_layers - 1))
    return jnp.transpose(x, (0, 3, 1, 2))                          # once


if __name__ == "__main__":
    key = jax.random.PRNGKey(0)
    k_data, k_d = jax.random.split(key)

    # Small input consistent with the module: (N=2, C=3, H=32, W=32)
    # (k=4 convs with n_down=3 need >=32 spatial to keep all outputs valid).
    x = jax.random.normal(k_data, (2, 3, 32, 32), jnp.float32)

    specs, params = build_discriminator(k_d, input_c=3, num_filters=64, n_down=3)

    fwd = jax.jit(lambda prms, xx: discriminator_forward(specs, prms, xx))
    logits = fwd(params, x)
    jax.block_until_ready(logits)

    assert logits.shape == (2, 1, 2, 2)   # PatchGAN logits for 32x32 input
    assert bool(jnp.all(jnp.isfinite(logits)))
    print("KERNEL_OK")
</pallas_src>

<mosaic_0001>
module attributes {stable_mosaic.version = 11 : i64} {
  func.func @_conv_fused_kernel(%arg0: i32, %arg1: i32, %arg2: memref<128x128xbf16, #tpu.memory_space<vmem>>, %arg3: memref<128x128xbf16, #tpu.memory_space<vmem>>, %arg4: memref<1x128xf32, #tpu.memory_space<vmem>>, %arg5: memref<1x128xf32, #tpu.memory_space<vmem>>, %arg6: memref<128x128xbf16, #tpu.memory_space<vmem>>) attributes {dimension_semantics = [#tpu.dimension_semantics<parallel>, #tpu.dimension_semantics<parallel>], iteration_bounds = array<i64: 4, 1>, scalar_prefetch = 0 : i64, scratch_operands = 0 : i64, tpu.core_type = #tpu.core_type<tc>, window_params = [{transform_indices = @transform_0, window_bounds = array<i64: 128, 128>}, {transform_indices = @transform_1, window_bounds = array<i64: 128, 128>}, {transform_indices = @transform_2, window_bounds = array<i64: 1, 128>}, {transform_indices = @transform_3, window_bounds = array<i64: 1, 128>}, {transform_indices = @transform_4, window_bounds = array<i64: 128, 128>}]} {
    %c0 = arith.constant 0 : index
    %c0_0 = arith.constant 0 : index
    %0 = vector.load %arg2[%c0, %c0_0] : memref<128x128xbf16, #tpu.memory_space<vmem>>, vector<128x128xbf16>
    %c0_1 = arith.constant 0 : index
    %c0_2 = arith.constant 0 : index
    %1 = vector.load %arg3[%c0_1, %c0_2] : memref<128x128xbf16, #tpu.memory_space<vmem>>, vector<128x128xbf16>
    %cst = arith.constant dense<0.000000e+00> : vector<128x128xf32>
    %2 = tpu.matmul %0, %1, %cst {dimension_numbers = #tpu.dot_dimension_numbers<[1], [0], [0], [1], [0, 0, 1, 1], [], []>} : vector<128x128xbf16>, vector<128x128xbf16>, vector<128x128xf32> -> vector<128x128xf32>
    %c0_3 = arith.constant 0 : index
    %c0_4 = arith.constant 0 : index
    %3 = vector.load %arg4[%c0_3, %c0_4] : memref<1x128xf32, #tpu.memory_space<vmem>>, vector<1x128xf32>
    %4 = vector.broadcast %3 : vector<1x128xf32> to vector<128x128xf32>
    %5 = arith.addf %2, %4 : vector<128x128xf32>
    %cst_5 = arith.constant 0.000000e+00 : f32
    %6 = vector.broadcast %cst_5 : f32 to vector<128x128xf32>
    %7 = arith.cmpf ogt, %5, %6 : vector<128x128xf32>
    %cst_6 = arith.constant 2.000000e-01 : f32
    %8 = vector.broadcast %cst_6 : f32 to vector<128x128xf32>
    %9 = arith.mulf %8, %5 : vector<128x128xf32>
    %10 = arith.select %7, %5, %9 : vector<128x128xi1>, vector<128x128xf32>
    %11 = arith.truncf %10 : vector<128x128xf32> to vector<128x128xbf16>
    %c0_7 = arith.constant 0 : index
    %c0_8 = arith.constant 0 : index
    %12 = vector.load %arg6[%c0_7, %c0_8] : memref<128x128xbf16, #tpu.memory_space<vmem>>, vector<128x128xbf16>
    tpu.vector_store %arg6[%c0_7, %c0_8], %11 {strides = array<i32>} : memref<128x128xbf16, #tpu.memory_space<vmem>>, vector<128x128xbf16>,
    return
  }
  func.func @transform_0(%arg0: i32, %arg1: i32) -> (i32, i32) {
    %c0_i32 = arith.constant 0 : i32
    %c0_i32_0 = arith.constant 0 : i32
    return %arg0, %c0_i32 : i32, i32
  }
  func.func @transform_1(%arg0: i32, %arg1: i32) -> (i32, i32) {
    %c0_i32 = arith.constant 0 : i32
    %c0_i32_0 = arith.constant 0 : i32
    return %c0_i32, %arg1 : i32, i32
  }
  func.func @transform_2(%arg0: i32, %arg1: i32) -> (i32, i32) {
    %c0_i32 = arith.constant 0 : i32
    %c0_i32_0 = arith.constant 0 : i32
    return %c0_i32, %arg1 : i32, i32
  }
  func.func @transform_3(%arg0: i32, %arg1: i32) -> (i32, i32) {
    %c0_i32 = arith.constant 0 : i32
    %c0_i32_0 = arith.constant 0 : i32
    return %c0_i32, %arg1 : i32, i32
  }
  func.func @transform_4(%arg0: i32, %arg1: i32) -> (i32, i32) {
    %c0_i32 = arith.constant 0 : i32
    return %arg0, %arg1 : i32, i32
  }
}

module attributes {stable_mosaic.version = 11 : i64} {
  func.func @_conv_fused_kernel(%arg0: i32, %arg1: i32, %arg2: memref<128x1024xbf16, #tpu.memory_space<vmem>>, %arg3: memref<1024x128xbf16, #tpu.memory_space<vmem>>, %arg4: memref<1x128xf32, #tpu.memory_space<vmem>>, %arg5: memref<1x128xf32, #tpu.memory_space<vmem>>, %arg6: memref<128x128xbf16, #tpu.memory_space<vmem>>) attributes {dimension_semantics = [#tpu.dimension_semantics<parallel>, #tpu.dimension_semantics<parallel>], iteration_bounds = array<i64: 1, 1>, scalar_prefetch = 0 : i64, scratch_operands = 0 : i64, tpu.core_type = #tpu.core_type<tc>, window_params = [{transform_indices = @transform_0, window_bounds = array<i64: 128, 1024>}, {transform_indices = @transform_1, window_bounds = array<i64: 1024, 128>}, {transform_indices = @transform_2, window_bounds = array<i64: 1, 128>}, {transform_indices = @transform_3, window_bounds = array<i64: 1, 128>}, {transform_indices = @transform_4, window_bounds = array<i64: 128, 128>}]} {
    %c0 = arith.constant 0 : index
    %c0_0 = arith.constant 0 : index
    %0 = vector.load %arg2[%c0, %c0_0] : memref<128x1024xbf16, #tpu.memory_space<vmem>>, vector<128x1024xbf16>
    %c0_1 = arith.constant 0 : index
    %c0_2 = arith.constant 0 : index
    %1 = vector.load %arg3[%c0_1, %c0_2] : memref<1024x128xbf16, #tpu.memory_space<vmem>>, vector<1024x128xbf16>
    %cst = arith.constant dense<0.000000e+00> : vector<128x128xf32>
    %2 = tpu.matmul %0, %1, %cst {dimension_numbers = #tpu.dot_dimension_numbers<[1], [0], [0], [1], [0, 0, 1, 1], [], []>} : vector<128x1024xbf16>, vector<1024x128xbf16>, vector<128x128xf32> -> vector<128x128xf32>
    %cst_3 = arith.constant dense<0.000000e+00> : vector<128xf32>
    %3 = vector.multi_reduction <add>, %2, %cst_3 [0] : vector<128x128xf32> to vector<128xf32>
    %4 = vector.shape_cast %3 : vector<128xf32> to vector<1x128xf32>
    %cst_4 = arith.constant 1.280000e+02 : f32
    %5 = vector.broadcast %cst_4 : f32 to vector<1x128xf32>
    %6 = arith.divf %4, %5 : vector<1x128xf32>
    %7 = vector.broadcast %6 : vector<1x128xf32> to vector<128x128xf32>
    %8 = arith.subf %2, %7 : vector<128x128xf32>
    %9 = arith.mulf %8, %8 : vector<128x128xf32>
    %cst_5 = arith.constant dense<0.000000e+00> : vector<128xf32>
    %10 = vector.multi_reduction <add>, %9, %cst_5 [0] : vector<128x128xf32> to vector<128xf32>
    %11 = vector.shape_cast %10 : vector<128xf32> to vector<1x128xf32>
    %cst_6 = arith.constant 1.280000e+02 : f32
    %12 = vector.broadcast %cst_6 : f32 to vector<1x128xf32>
    %13 = arith.divf %11, %12 : vector<1x128xf32>
    %14 = vector.broadcast %6 : vector<1x128xf32> to vector<128x128xf32>
    %15 = arith.subf %2, %14 : vector<128x128xf32>
    %cst_7 = arith.constant 9.99999974E-6 : f32
    %16 = vector.broadcast %cst_7 : f32 to vector<1x128xf32>
    %17 = arith.addf %13, %16 : vector<1x128xf32>
    %18 = math.rsqrt %17 : vector<1x128xf32>
    %19 = vector.broadcast %18 : vector<1x128xf32> to vector<128x128xf32>
    %20 = arith.mulf %15, %19 : vector<128x128xf32>
    %c0_8 = arith.constant 0 : index
    %c0_9 = arith.constant 0 : index
    %21 = vector.load %arg4[%c0_8, %c0_9] : memref<1x128xf32, #tpu.memory_space<vmem>>, vector<1x128xf32>
    %22 = vector.broadcast %21 : vector<1x128xf32> to vector<128x128xf32>
    %23 = arith.mulf %20, %22 : vector<128x128xf32>
    %c0_10 = arith.constant 0 : index
    %c0_11 = arith.constant 0 : index
    %24 = vector.load %arg5[%c0_10, %c0_11] : memref<1x128xf32, #tpu.memory_space<vmem>>, vector<1x128xf32>
    %25 = vector.broadcast %24 : vector<1x128xf32> to vector<128x128xf32>
    %26 = arith.addf %23, %25 : vector<128x128xf32>
    %cst_12 = arith.constant 0.000000e+00 : f32
    %27 = vector.broadcast %cst_12 : f32 to vector<128x128xf32>
    %28 = arith.cmpf ogt, %26, %27 : vector<128x128xf32>
    %cst_13 = arith.constant 2.000000e-01 : f32
    %29 = vector.broadcast %cst_13 : f32 to vector<128x128xf32>
    %30 = arith.mulf %29, %26 : vector<128x128xf32>
    %31 = arith.select %28, %26, %30 : vector<128x128xi1>, vector<128x128xf32>
    %32 = arith.truncf %31 : vector<128x128xf32> to vector<128x128xbf16>
    %c0_14 = arith.constant 0 : index
    %c0_15 = arith.constant 0 : index
    %33 = vector.load %arg6[%c0_14, %c0_15] : memref<128x128xbf16, #tpu.memory_space<vmem>>, vector<128x128xbf16>
    tpu.vector_store %arg6[%c0_14, %c0_15], %32 {strides = array<i32>} : memref<128x128xbf16, #tpu.memory_space<vmem>>, vector<128x128xbf16>,
    return
  }
  func.func @transform_0(%arg0: i32, %arg1: i32) -> (i32, i32) {
    %c0_i32 = arith.constant 0 : i32
    %c0_i32_0 = arith.constant 0 : i32
    return %arg0, %c0_i32 : i32, i32
  }
  func.func @transform_1(%arg0: i32, %arg1: i32) -> (i32, i32) {
    %c0_i32 = arith.constant 0 : i32
    %c0_i32_0 = arith.constant 0 : i32
    return %c0_i32, %arg1 : i32, i32
  }
  func.func @transform_2(%arg0: i32, %arg1: i32) -> (i32, i32) {
    %c0_i32 = arith.constant 0 : i32
    %c0_i32_0 = arith.constant 0 : i32
    return %c0_i32, %arg1 : i32, i32
  }
  func.func @transform_3(%arg0: i32, %arg1: i32) -> (i32, i32) {
    %c0_i32 = arith.constant 0 : i32
    %c0_i32_0 = arith.constant 0 : i32
    return %c0_i32, %arg1 : i32, i32
  }
  func.func @transform_4(%arg0: i32, %arg1: i32) -> (i32, i32) {
    %c0_i32 = arith.constant 0 : i32
    return %arg0, %arg1 : i32, i32
  }
}

module attributes {stable_mosaic.version = 11 : i64} {
  func.func @_conv_fused_kernel(%arg0: i32, %arg1: i32, %arg2: memref<32x2048xbf16, #tpu.memory_space<vmem>>, %arg3: memref<2048x128xbf16, #tpu.memory_space<vmem>>, %arg4: memref<1x128xf32, #tpu.memory_space<vmem>>, %arg5: memref<1x128xf32, #tpu.memory_space<vmem>>, %arg6: memref<32x128xbf16, #tpu.memory_space<vmem>>) attributes {dimension_semantics = [#tpu.dimension_semantics<parallel>, #tpu.dimension_semantics<parallel>], iteration_bounds = array<i64: 1, 2>, scalar_prefetch = 0 : i64, scratch_operands = 0 : i64, tpu.core_type = #tpu.core_type<tc>, window_params = [{transform_indices = @transform_0, window_bounds = array<i64: 32, 2048>}, {transform_indices = @transform_1, window_bounds = array<i64: 2048, 128>}, {transform_indices = @transform_2, window_bounds = array<i64: 1, 128>}, {transform_indices = @transform_3, window_bounds = array<i64: 1, 128>}, {transform_indices = @transform_4, window_bounds = array<i64: 32, 128>}]} {
    %c0 = arith.constant 0 : index
    %c0_0 = arith.constant 0 : index
    %0 = vector.load %arg2[%c0, %c0_0] : memref<32x2048xbf16, #tpu.memory_space<vmem>>, vector<32x2048xbf16>
    %c0_1 = arith.constant 0 : index
    %c0_2 = arith.constant 0 : index
    %1 = vector.load %arg3[%c0_1, %c0_2] : memref<2048x128xbf16, #tpu.memory_space<vmem>>, vector<2048x128xbf16>
    %cst = arith.constant dense<0.000000e+00> : vector<32x128xf32>
    %2 = tpu.matmul %0, %1, %cst {dimension_numbers = #tpu.dot_dimension_numbers<[1], [0], [0], [1], [0, 0, 1, 1], [], []>} : vector<32x2048xbf16>, vector<2048x128xbf16>, vector<32x128xf32> -> vector<32x128xf32>
    %cst_3 = arith.constant dense<0.000000e+00> : vector<128xf32>
    %3 = vector.multi_reduction <add>, %2, %cst_3 [0] : vector<32x128xf32> to vector<128xf32>
    %4 = vector.shape_cast %3 : vector<128xf32> to vector<1x128xf32>
    %cst_4 = arith.constant 3.200000e+01 : f32
    %5 = vector.broadcast %cst_4 : f32 to vector<1x128xf32>
    %6 = arith.divf %4, %5 : vector<1x128xf32>
    %7 = vector.broadcast %6 : vector<1x128xf32> to vector<32x128xf32>
    %8 = arith.subf %2, %7 : vector<32x128xf32>
    %9 = arith.mulf %8, %8 : vector<32x128xf32>
    %cst_5 = arith.constant dense<0.000000e+00> : vector<128xf32>
    %10 = vector.multi_reduction <add>, %9, %cst_5 [0] : vector<32x128xf32> to vector<128xf32>
    %11 = vector.shape_cast %10 : vector<128xf32> to vector<1x128xf32>
    %cst_6 = arith.constant 3.200000e+01 : f32
    %12 = vector.broadcast %cst_6 : f32 to vector<1x128xf32>
    %13 = arith.divf %11, %12 : vector<1x128xf32>
    %14 = vector.broadcast %6 : vector<1x128xf32> to vector<32x128xf32>
    %15 = arith.subf %2, %14 : vector<32x128xf32>
    %cst_7 = arith.constant 9.99999974E-6 : f32
    %16 = vector.broadcast %cst_7 : f32 to vector<1x128xf32>
    %17 = arith.addf %13, %16 : vector<1x128xf32>
    %18 = math.rsqrt %17 : vector<1x128xf32>
    %19 = vector.broadcast %18 : vector<1x128xf32> to vector<32x128xf32>
    %20 = arith.mulf %15, %19 : vector<32x128xf32>
    %c0_8 = arith.constant 0 : index
    %c0_9 = arith.constant 0 : index
    %21 = vector.load %arg4[%c0_8, %c0_9] : memref<1x128xf32, #tpu.memory_space<vmem>>, vector<1x128xf32>
    %22 = vector.broadcast %21 : vector<1x128xf32> to vector<32x128xf32>
    %23 = arith.mulf %20, %22 : vector<32x128xf32>
    %c0_10 = arith.constant 0 : index
    %c0_11 = arith.constant 0 : index
    %24 = vector.load %arg5[%c0_10, %c0_11] : memref<1x128xf32, #tpu.memory_space<vmem>>, vector<1x128xf32>
    %25 = vector.broadcast %24 : vector<1x128xf32> to vector<32x128xf32>
    %26 = arith.addf %23, %25 : vector<32x128xf32>
    %cst_12 = arith.constant 0.000000e+00 : f32
    %27 = vector.broadcast %cst_12 : f32 to vector<32x128xf32>
    %28 = arith.cmpf ogt, %26, %27 : vector<32x128xf32>
    %cst_13 = arith.constant 2.000000e-01 : f32
    %29 = vector.broadcast %cst_13 : f32 to vector<32x128xf32>
    %30 = arith.mulf %29, %26 : vector<32x128xf32>
    %31 = arith.select %28, %26, %30 : vector<32x128xi1>, vector<32x128xf32>
    %32 = arith.truncf %31 : vector<32x128xf32> to vector<32x128xbf16>
    %c0_14 = arith.constant 0 : index
    %c0_15 = arith.constant 0 : index
    %33 = vector.load %arg6[%c0_14, %c0_15] : memref<32x128xbf16, #tpu.memory_space<vmem>>, vector<32x128xbf16>
    tpu.vector_store %arg6[%c0_14, %c0_15], %32 {strides = array<i32>} : memref<32x128xbf16, #tpu.memory_space<vmem>>, vector<32x128xbf16>,
    return
  }
  func.func @transform_0(%arg0: i32, %arg1: i32) -> (i32, i32) {
    %c0_i32 = arith.constant 0 : i32
    %c0_i32_0 = arith.constant 0 : i32
    return %arg0, %c0_i32 : i32, i32
  }
  func.func @transform_1(%arg0: i32, %arg1: i32) -> (i32, i32) {
    %c0_i32 = arith.constant 0 : i32
    %c0_i32_0 = arith.constant 0 : i32
    return %c0_i32, %arg1 : i32, i32
  }
  func.func @transform_2(%arg0: i32, %arg1: i32) -> (i32, i32) {
    %c0_i32 = arith.constant 0 : i32
    %c0_i32_0 = arith.constant 0 : i32
    return %c0_i32, %arg1 : i32, i32
  }
  func.func @transform_3(%arg0: i32, %arg1: i32) -> (i32, i32) {
    %c0_i32 = arith.constant 0 : i32
    %c0_i32_0 = arith.constant 0 : i32
    return %c0_i32, %arg1 : i32, i32
  }
  func.func @transform_4(%arg0: i32, %arg1: i32) -> (i32, i32) {
    %c0_i32 = arith.constant 0 : i32
    return %arg0, %arg1 : i32, i32
  }
}

module attributes {stable_mosaic.version = 11 : i64} {
  func.func @_conv_fused_kernel(%arg0: i32, %arg1: i32, %arg2: memref<32x4096xbf16, #tpu.memory_space<vmem>>, %arg3: memref<4096x128xbf16, #tpu.memory_space<vmem>>, %arg4: memref<1x128xf32, #tpu.memory_space<vmem>>, %arg5: memref<1x128xf32, #tpu.memory_space<vmem>>, %arg6: memref<32x128xbf16, #tpu.memory_space<vmem>>) attributes {dimension_semantics = [#tpu.dimension_semantics<parallel>, #tpu.dimension_semantics<parallel>], iteration_bounds = array<i64: 1, 4>, scalar_prefetch = 0 : i64, scratch_operands = 0 : i64, tpu.core_type = #tpu.core_type<tc>, window_params = [{transform_indices = @transform_0, window_bounds = array<i64: 32, 4096>}, {transform_indices = @transform_1, window_bounds = array<i64: 4096, 128>}, {transform_indices = @transform_2, window_bounds = array<i64: 1, 128>}, {transform_indices = @transform_3, window_bounds = array<i64: 1, 128>}, {transform_indices = @transform_4, window_bounds = array<i64: 32, 128>}]} {
    %c0 = arith.constant 0 : index
    %c0_0 = arith.constant 0 : index
    %0 = vector.load %arg2[%c0, %c0_0] : memref<32x4096xbf16, #tpu.memory_space<vmem>>, vector<32x4096xbf16>
    %c0_1 = arith.constant 0 : index
    %c0_2 = arith.constant 0 : index
    %1 = vector.load %arg3[%c0_1, %c0_2] : memref<4096x128xbf16, #tpu.memory_space<vmem>>, vector<4096x128xbf16>
    %cst = arith.constant dense<0.000000e+00> : vector<32x128xf32>
    %2 = tpu.matmul %0, %1, %cst {dimension_numbers = #tpu.dot_dimension_numbers<[1], [0], [0], [1], [0, 0, 1, 1], [], []>} : vector<32x4096xbf16>, vector<4096x128xbf16>, vector<32x128xf32> -> vector<32x128xf32>
    %3 = tpu.iota {dimensions = array<i32: 0>} : vector<32x128xi32>
    %c18_i32 = arith.constant 18 : i32
    %4 = vector.broadcast %c18_i32 : i32 to vector<32x128xi32>
    %5 = arith.cmpi slt, %3, %4 : vector<32x128xi32>
    %cst_3 = arith.constant 0.000000e+00 : f32
    %6 = vector.broadcast %cst_3 : f32 to vector<32x128xf32>
    %7 = arith.select %5, %2, %6 : vector<32x128xi1>, vector<32x128xf32>
    %cst_4 = arith.constant dense<0.000000e+00> : vector<128xf32>
    %8 = vector.multi_reduction <add>, %7, %cst_4 [0] : vector<32x128xf32> to vector<128xf32>
    %9 = vector.shape_cast %8 : vector<128xf32> to vector<1x128xf32>
    %cst_5 = arith.constant 0.055555556 : f32
    %10 = vector.broadcast %cst_5 : f32 to vector<1x128xf32>
    %11 = arith.mulf %9, %10 : vector<1x128xf32>
    %12 = vector.broadcast %11 : vector<1x128xf32> to vector<32x128xf32>
    %13 = arith.subf %2, %12 : vector<32x128xf32>
    %cst_6 = arith.constant 0.000000e+00 : f32
    %14 = vector.broadcast %cst_6 : f32 to vector<32x128xf32>
    %15 = arith.select %5, %13, %14 : vector<32x128xi1>, vector<32x128xf32>
    %16 = arith.mulf %15, %15 : vector<32x128xf32>
    %cst_7 = arith.constant dense<0.000000e+00> : vector<128xf32>
    %17 = vector.multi_reduction <add>, %16, %cst_7 [0] : vector<32x128xf32> to vector<128xf32>
    %18 = vector.shape_cast %17 : vector<128xf32> to vector<1x128xf32>
    %cst_8 = arith.constant 0.055555556 : f32
    %19 = vector.broadcast %cst_8 : f32 to vector<1x128xf32>
    %20 = arith.mulf %18, %19 : vector<1x128xf32>
    %21 = vector.broadcast %11 : vector<1x128xf32> to vector<32x128xf32>
    %22 = arith.subf %2, %21 : vector<32x128xf32>
    %cst_9 = arith.constant 9.99999974E-6 : f32
    %23 = vector.broadcast %cst_9 : f32 to vector<1x128xf32>
    %24 = arith.addf %20, %23 : vector<1x128xf32>
    %25 = math.rsqrt %24 : vector<1x128xf32>
    %26 = vector.broadcast %25 : vector<1x128xf32> to vector<32x128xf32>
    %27 = arith.mulf %22, %26 : vector<32x128xf32>
    %c0_10 = arith.constant 0 : index
    %c0_11 = arith.constant 0 : index
    %28 = vector.load %arg4[%c0_10, %c0_11] : memref<1x128xf32, #tpu.memory_space<vmem>>, vector<1x128xf32>
    %29 = vector.broadcast %28 : vector<1x128xf32> to vector<32x128xf32>
    %30 = arith.mulf %27, %29 : vector<32x128xf32>
    %c0_12 = arith.constant 0 : index
    %c0_13 = arith.constant 0 : index
    %31 = vector.load %arg5[%c0_12, %c0_13] : memref<1x128xf32, #tpu.memory_space<vmem>>, vector<1x128xf32>
    %32 = vector.broadcast %31 : vector<1x128xf32> to vector<32x128xf32>
    %33 = arith.addf %30, %32 : vector<32x128xf32>
    %cst_14 = arith.constant 0.000000e+00 : f32
    %34 = vector.broadcast %cst_14 : f32 to vector<32x128xf32>
    %35 = arith.cmpf ogt, %33, %34 : vector<32x128xf32>
    %cst_15 = arith.constant 2.000000e-01 : f32
    %36 = vector.broadcast %cst_15 : f32 to vector<32x128xf32>
    %37 = arith.mulf %36, %33 : vector<32x128xf32>
    %38 = arith.select %35, %33, %37 : vector<32x128xi1>, vector<32x128xf32>
    %39 = arith.truncf %38 : vector<32x128xf32> to vector<32x128xbf16>
    %c0_16 = arith.constant 0 : index
    %c0_17 = arith.constant 0 : index
    %40 = vector.load %arg6[%c0_16, %c0_17] : memref<32x128xbf16, #tpu.memory_space<vmem>>, vector<32x128xbf16>
    tpu.vector_store %arg6[%c0_16, %c0_17], %39 {strides = array<i32>} : memref<32x128xbf16, #tpu.memory_space<vmem>>, vector<32x128xbf16>,
    return
  }
  func.func @transform_0(%arg0: i32, %arg1: i32) -> (i32, i32) {
    %c0_i32 = arith.constant 0 : i32
    %c0_i32_0 = arith.constant 0 : i32
    return %arg0, %c0_i32 : i32, i32
  }
  func.func @transform_1(%arg0: i32, %arg1: i32) -> (i32, i32) {
    %c0_i32 = arith.constant 0 : i32
    %c0_i32_0 = arith.constant 0 : i32
    return %c0_i32, %arg1 : i32, i32
  }
  func.func @transform_2(%arg0: i32, %arg1: i32) -> (i32, i32) {
    %c0_i32 = arith.constant 0 : i32
    %c0_i32_0 = arith.constant 0 : i32
    return %c0_i32, %arg1 : i32, i32
  }
  func.func @transform_3(%arg0: i32, %arg1: i32) -> (i32, i32) {
    %c0_i32 = arith.constant 0 : i32
    %c0_i32_0 = arith.constant 0 : i32
    return %c0_i32, %arg1 : i32, i32
  }
  func.func @transform_4(%arg0: i32, %arg1: i32) -> (i32, i32) {
    %c0_i32 = arith.constant 0 : i32
    return %arg0, %arg1 : i32, i32
  }
}

module attributes {stable_mosaic.version = 11 : i64} {
  func.func @_conv_fused_kernel(%arg0: i32, %arg1: i32, %arg2: memref<16x8192xbf16, #tpu.memory_space<vmem>>, %arg3: memref<8192x128xbf16, #tpu.memory_space<vmem>>, %arg4: memref<1x128xf32, #tpu.memory_space<vmem>>, %arg5: memref<1x128xf32, #tpu.memory_space<vmem>>, %arg6: memref<16x128xf32, #tpu.memory_space<vmem>>) attributes {dimension_semantics = [#tpu.dimension_semantics<parallel>, #tpu.dimension_semantics<parallel>], iteration_bounds = array<i64: 1, 1>, scalar_prefetch = 0 : i64, scratch_operands = 0 : i64, tpu.core_type = #tpu.core_type<tc>, window_params = [{transform_indices = @transform_0, window_bounds = array<i64: 16, 8192>}, {transform_indices = @transform_1, window_bounds = array<i64: 8192, 128>}, {transform_indices = @transform_2, window_bounds = array<i64: 1, 128>}, {transform_indices = @transform_3, window_bounds = array<i64: 1, 128>}, {transform_indices = @transform_4, window_bounds = array<i64: 16, 128>}]} {
    %c0 = arith.constant 0 : index
    %c0_0 = arith.constant 0 : index
    %0 = vector.load %arg2[%c0, %c0_0] : memref<16x8192xbf16, #tpu.memory_space<vmem>>, vector<16x8192xbf16>
    %c0_1 = arith.constant 0 : index
    %c0_2 = arith.constant 0 : index
    %1 = vector.load %arg3[%c0_1, %c0_2] : memref<8192x128xbf16, #tpu.memory_space<vmem>>, vector<8192x128xbf16>
    %cst = arith.constant dense<0.000000e+00> : vector<16x128xf32>
    %2 = tpu.matmul %0, %1, %cst {dimension_numbers = #tpu.dot_dimension_numbers<[1], [0], [0], [1], [0, 0, 1, 1], [], []>} : vector<16x8192xbf16>, vector<8192x128xbf16>, vector<16x128xf32> -> vector<16x128xf32>
    %c0_3 = arith.constant 0 : index
    %c0_4 = arith.constant 0 : index
    %3 = vector.load %arg4[%c0_3, %c0_4] : memref<1x128xf32, #tpu.memory_space<vmem>>, vector<1x128xf32>
    %4 = vector.broadcast %3 : vector<1x128xf32> to vector<16x128xf32>
    %5 = arith.addf %2, %4 : vector<16x128xf32>
    %c0_5 = arith.constant 0 : index
    %c0_6 = arith.constant 0 : index
    %6 = vector.load %arg6[%c0_5, %c0_6] : memref<16x128xf32, #tpu.memory_space<vmem>>, vector<16x128xf32>
    tpu.vector_store %arg6[%c0_5, %c0_6], %5 {strides = array<i32>} : memref<16x128xf32, #tpu.memory_space<vmem>>, vector<16x128xf32>,
    return
  }
  func.func @transform_0(%arg0: i32, %arg1: i32) -> (i32, i32) {
    %c0_i32 = arith.constant 0 : i32
    %c0_i32_0 = arith.constant 0 : i32
    return %arg0, %c0_i32 : i32, i32
  }
  func.func @transform_1(%arg0: i32, %arg1: i32) -> (i32, i32) {
    %c0_i32 = arith.constant 0 : i32
    %c0_i32_0 = arith.constant 0 : i32
    return %c0_i32, %arg1 : i32, i32
  }
  func.func @transform_2(%arg0: i32, %arg1: i32) -> (i32, i32) {
    %c0_i32 = arith.constant 0 : i32
    %c0_i32_0 = arith.constant 0 : i32
    return %c0_i32, %arg1 : i32, i32
  }
  func.func @transform_3(%arg0: i32, %arg1: i32) -> (i32, i32) {
    %c0_i32 = arith.constant 0 : i32
    %c0_i32_0 = arith.constant 0 : i32
    return %c0_i32, %arg1 : i32, i32
  }
  func.func @transform_4(%arg0: i32, %arg1: i32) -> (i32, i32) {
    %c0_i32 = arith.constant 0 : i32
    return %arg0, %arg1 : i32, i32
  }
}

</mosaic_0001>

<bundles_post_ra>
// kernel: _lambda_.5
= control target key start
LH: loop header
LB: loop body
LE: loop exit
PB: predicated region body
PF: predicated region fallthrough
CT: control target
= control target key end

     0   :  { %9 = vsyncpa [#allocation3], 0  ;;  %s1148_s0 = inlined_call_operand.vmem [shape: bf16[512,128], index: 0, kind: input, shape index: {}]   ;;  %s1149_s1 = inlined_call_operand.hbm [shape: bf16[128,128], index: 1, kind: input, shape index: {}]   ;;  %s1150_s2 = inlined_call_operand.hbm [shape: f32[1,128], index: 2, kind: input, shape index: {}]   ;;  %s1151_s3 = inlined_call_operand.hbm [shape: f32[1,128], index: 3, kind: input, shape index: {}]   ;;  %s1152_s4 = inlined_call_operand.vmem [shape: bf16[512,128], index: 4, kind: output, shape index: {}]  }
   0x1   :  { %10 = vsyncpa [#allocation5], 0  ;;  %s1035_s15 = smov 0   ;;  %s1037_s16 = smov 0  }
   0x2   :  { %s1039_s17 = smov 0  }
   0x3 LB: > { %s194_s20 = sshll.u32 %s1150_s2, 4  ;;  %s657_s21 = sadd.s32 4294967295, %s1003_s17   ;;  %s1003_s17 = sphi %s1039_s17, %s16_s17   ;;  %s999_s16 = sphi %s1037_s16, %s1157_s16   ;;  %s995_s15 = sphi %s1035_s15, %s1156_s15   ;;  %s195_s20 = int_to_ptr.hbm [resolvable:$true] %s194_s20 }
   0x4   : > { %p659_p0 = scmp.ge.s32.totalorder %s1003_s17, 1  ;;  %p165_p1 = scmp.lt.s32.totalorder %s1003_s17, 5 }
   0x5   : > { %p1056_p2 = scmp.eq.s32.totalorder %s657_s21, 0  ;;  %s1005_s24 = smov [#allocation4]  }
   0x6   : > { %p1060_p3 = pnand %p659_p0, %p165_p1  ;;  %s196_s25 = sshll.u32 %s1005_s24, 4  ;;  %s197_s25 = int_to_ptr.vmem [resolvable:$true] %s196_s25 }
   0x7   : > { %s28_s27 = sadd.s32 1, %s999_s16  ;;  %s178_s30 = sshll.u32 %s1149_s1, 4  ;;  %s179_s30 = int_to_ptr.hbm [resolvable:$true] %s178_s30 }
   0x8   : > { %p837_p4 = pneg %p1060_p3  ;;  %p30_p6 = scmp.ge.s32.totalorder %s28_s27, 4 }
   0x9   : > { %s1006_s5 = smov [#allocation2]   ;;  %s207_s9 = sshll.u32 %s1151_s3, 4  ;;  %s208_s9 = int_to_ptr.hbm [resolvable:$true] %s207_s9 }
   0xa   : > { %p1068_p5 = pnand %p1056_p2, %p837_p4  ;;  %s1159_s27 = smov (%p30_p6, %s28_s27), 0 }
   0xb   : > { %s180_s6 = sshll.u32 %s1006_s5, 4  ;;  %s1007_s10 = smov 64   ;;  %s181_s6 = int_to_ptr.vmem [resolvable:$true] %s180_s6 }
   0xc   : > { %843 = dma.hbm_to_vmem [thread:$0]  (!%p1068_p5), %s195_s20, 16, %s197_s25, [#allocation5]  }
   0xd   : > { %s1008_s11 = smov 4   ;;  %s1009_s12 = smov [#allocation6]  }
   0xe   : > { %840 = dma.hbm_to_vmem [thread:$0]  (!%p1068_p5), %s179_s30, 1024, %s181_s6, [#allocation3], %s1007_s10, %s1007_s10, %s1008_s11  }
   0xf   : > { %s209_s13 = sshll.u32 %s1009_s12, 4  ;;  %231 = sbr.rel (%p1060_p3) target bundleno = 221 (0xdd), region = 36  ;;  %s210_s13 = int_to_ptr.vmem [resolvable:$true] %s209_s13 }
  0x10   : > { %846 = dma.hbm_to_vmem [thread:$0]  (!%p1068_p5), %s208_s9, 16, %s210_s13, [#allocation5]  }
  0x14   : > { %986 = dma.done.wait (%p1056_p2), [#allocation3], 1024  }
  0x15   : > { %988 = vsyncadd (%p1056_p2), [#allocation3], 4294966272 }
  0x16   : > { %990 = dma.done.wait (%p1056_p2), [#allocation5], 32  }
  0x17   : > { %992 = vsyncadd (%p1056_p2), [#allocation5], 4294967264  ;;  %v753_v0 = vld [vmem:[#allocation2 + $0x38] sm:$0xff]  ;;  %v752_v1 = vld [vmem:[#allocation2 + $0x30] sm:$0xff]  ;;  %s668_s14 = sshll.u32 %s995_s15, 4 }
  0x18   : > { %418 = vmatpush.bf16.msra.mxu0 %v753_v0  ;;  %801 = vmatpush.bf16.msra.mxu1 %v753_v0  ;;  %v751_v2 = vld [vmem:[#allocation2 + $0x28] sm:$0xff]  ;;  %v750_v3 = vld [vmem:[#allocation2 + $0x20] sm:$0xff]  ;;  %v749_v4 = vld [vmem:[#allocation2 + $0x18] sm:$0xff]  ;;  %p272_p7 = scmp.lt.s32.totalorder %s668_s14, 63 }
  0x19   : > { %802 = vmatpush.bf16.msra.mxu2 %v753_v0  ;;  %803 = vmatpush.bf16.msra.mxu3 %v753_v0  ;;  %v748_v5 = vld [vmem:[#allocation2 + $0x10] sm:$0xff]  ;;  %v747_v6 = vld [vmem:[#allocation2 + $0x8] sm:$0xff]  ;;  %v746_v7 = vld [vmem:[#allocation2] sm:$0xff] }
  0x1a   : > { %s1161_s14 = smov (!%p272_p7, %s668_s14), 63  ;;  %v1106_v18 = vld [vmem:[#allocation4] ss:$0 sm:$0xff] }
  0x1b   : > { %s669_s15 = sshll.u32 %s1161_s14, 2 }
  0x1c   : > { %419 = vmatpush.bf16.msra.mxu0 %v752_v1  ;;  %804 = vmatpush.bf16.msra.mxu1 %v752_v1  ;;  %s275_s20 = scalar_lea.vmem %s1148_s0, %s669_s15  ;;  %s1119_s23 = scalar_lea.vmem %s1152_s4, %s669_s15 }
  0x1d   : > { %805 = vmatpush.bf16.msra.mxu2 %v752_v1  ;;  %806 = vmatpush.bf16.msra.mxu3 %v752_v1  ;;  %v738_v8 = vld [vmem:[%s275_s20] sm:$0xff]  ;;  %v740_v9 = vld [vmem:[%s275_s20 + $0x10] sm:$0xff]  ;;  %v739_v12 = vld [vmem:[%s275_s20 + $0x8] sm:$0xff] }
  0x1e   : > { %v742_v10 = vld [vmem:[%s275_s20 + $0x20] sm:$0xff]  ;;  %v744_v11 = vld [vmem:[%s275_s20 + $0x30] sm:$0xff]  ;;  %v741_v13 = vld [vmem:[%s275_s20 + $0x18] sm:$0xff] }
  0x1f   : > { %v743_v14 = vld [vmem:[%s275_s20 + $0x28] sm:$0xff]  ;;  %v745_v15 = vld [vmem:[%s275_s20 + $0x38] sm:$0xff] }
  0x20   : > { %420 = vmatpush.bf16.msra.mxu0 %v751_v2  ;;  %807 = vmatpush.bf16.msra.mxu1 %v751_v2 }
  0x21   : > { %808 = vmatpush.bf16.msra.mxu2 %v751_v2  ;;  %809 = vmatpush.bf16.msra.mxu3 %v751_v2 }
  0x24   : > { %421 = vmatpush.bf16.msra.mxu0 %v750_v3  ;;  %810 = vmatpush.bf16.msra.mxu1 %v750_v3 }
  0x25   : > { %811 = vmatpush.bf16.msra.mxu2 %v750_v3  ;;  %812 = vmatpush.bf16.msra.mxu3 %v750_v3 }
  0x28   : > { %422 = vmatpush.bf16.msra.mxu0 %v749_v4  ;;  %813 = vmatpush.bf16.msra.mxu1 %v749_v4 }
  0x29   : > { %814 = vmatpush.bf16.msra.mxu2 %v749_v4  ;;  %815 = vmatpush.bf16.msra.mxu3 %v749_v4 }
  0x2c   : > { %423 = vmatpush.bf16.msra.mxu0 %v748_v5  ;;  %816 = vmatpush.bf16.msra.mxu1 %v748_v5 }
  0x2d   : > { %817 = vmatpush.bf16.msra.mxu2 %v748_v5  ;;  %818 = vmatpush.bf16.msra.mxu3 %v748_v5 }
  0x30   : > { %424 = vmatpush.bf16.msra.mxu0 %v747_v6  ;;  %819 = vmatpush.bf16.msra.mxu1 %v747_v6 }
  0x31   : > { %820 = vmatpush.bf16.msra.mxu2 %v747_v6  ;;  %821 = vmatpush.bf16.msra.mxu3 %v747_v6 }
  0x34   : > { %425 = vmatpush.bf16.msra.mxu0 %v746_v7  ;;  %822 = vmatpush.bf16.msra.mxu1 %v746_v7 }
  0x35   : > { %823 = vmatpush.bf16.msra.mxu2 %v746_v7  ;;  %824 = vmatpush.bf16.msra.mxu3 %v746_v7 }
  0x37   : > { %426 = vmatmul.bf16.vlgmr.msra.gmra.mxu0 %v738_v8  ;;  %436 = vmatmul.bf16.vlgmr.msra.gmra.mxu1 %v740_v9 }
  0x38   : > { %446 = vmatmul.bf16.vlgmr.msra.gmra.mxu2 %v742_v10  ;;  %456 = vmatmul.bf16.vlgmr.msra.gmra.mxu3 %v744_v11 }
  0x47   : > { %431 = vmatmul.bf16.gmra.mxu0 %v739_v12  ;;  %441 = vmatmul.bf16.gmra.mxu1 %v741_v13 }
  0x48   : > { %451 = vmatmul.bf16.gmra.mxu2 %v743_v14  ;;  %461 = vmatmul.bf16.gmra.mxu3 %v745_v15 }
  0xb4   : > { %v427_v16 = vpop.f32.mrf.mxu0  ;;  %v437_v17 = vpop.f32.mrf.mxu1 }
  0xb5   : > { %v428_v19 = vadd.f32 %v1106_v18, %v427_v16  ;;  %v438_v20 = vadd.f32 %v1106_v18, %v437_v17 }
  0xb7   : > { %v483_v25 = vmul.f32 0.2, %v428_v19  ;;  %v487_v26 = vmul.f32 0.2, %v438_v20  ;;  %vm467_vm0 = vcmp.gt.f32.partialorder %v428_v19, 0.0  ;;  %vm471_vm1 = vcmp.gt.f32.partialorder %v438_v20, 0.0 }
  0xb9   : > { %v499_v33 = vsel %vm467_vm0, %v428_v19, %v483_v25  ;;  %v503_v34 = vsel %vm471_vm1, %v438_v20, %v487_v26 }
  0xbb   : > { %v447_v21 = vpop.f32.mrf.mxu2  ;;  %v457_v22 = vpop.f32.mrf.mxu3 }
  0xbc   : > { %v429_v23 = vpop.f32.mrf.mxu0  ;;  %v439_v24 = vpop.f32.mrf.mxu1  ;;  %v448_v31 = vadd.f32 %v1106_v18, %v447_v21  ;;  %v458_v32 = vadd.f32 %v1106_v18, %v457_v22 }
  0xbd   : > { %v430_v27 = vadd.f32 %v1106_v18, %v429_v23  ;;  %v440_v28 = vadd.f32 %v1106_v18, %v439_v24 }
  0xbe   : > { %v491_v41 = vmul.f32 0.2, %v448_v31  ;;  %v495_v42 = vmul.f32 0.2, %v458_v32  ;;  %vm475_vm4 = vcmp.gt.f32.partialorder %v448_v31, 0.0  ;;  %vm479_vm5 = vcmp.gt.f32.partialorder %v458_v32, 0.0 }
  0xbf   : > { %vm468_vm2 = vcmp.gt.f32.partialorder %v430_v27, 0.0  ;;  %v484_v29 = vmul.f32 0.2, %v430_v27  ;;  %vm472_vm3 = vcmp.gt.f32.partialorder %v440_v28, 0.0  ;;  %v488_v30 = vmul.f32 0.2, %v440_v28 }
  0xc0   : > { %v507_v49 = vsel %vm475_vm4, %v448_v31, %v491_v41  ;;  %v511_v50 = vsel %vm479_vm5, %v458_v32, %v495_v42 }
  0xc1   : > { %v500_v35 = vsel %vm468_vm2, %v430_v27, %v484_v29  ;;  %v504_v36 = vsel %vm472_vm3, %v440_v28, %v488_v30 }
  0xc2   : > { %v757_v37 = vpack.c.bf16 %v500_v35, %v499_v33  ;;  %v767_v38 = vpack.c.bf16 %v504_v36, %v503_v34 }
  0xc3   : > { %v449_v39 = vpop.f32.mrf.mxu2  ;;  %v459_v40 = vpop.f32.mrf.mxu3 }
  0xc4   : > { %758 = vst [vmem:[%s1119_s23] sm:$0xff] %v757_v37   ;;  %v450_v43 = vadd.f32 %v1106_v18, %v449_v39  ;;  %v460_v44 = vadd.f32 %v1106_v18, %v459_v40  ;;  %v432_v45 = vpop.f32.mrf.mxu0  ;;  %v442_v46 = vpop.f32.mrf.mxu1 }
  0xc5   : > { %795 = vst [vmem:[%s1119_s23 + $0x10] sm:$0xff] %v767_v38   ;;  %v433_v55 = vadd.f32 %v1106_v18, %v432_v45  ;;  %v443_v56 = vadd.f32 %v1106_v18, %v442_v46 }
  0xc6   : > { %vm476_vm6 = vcmp.gt.f32.partialorder %v450_v43, 0.0  ;;  %v492_v47 = vmul.f32 0.2, %v450_v43  ;;  %vm480_vm7 = vcmp.gt.f32.partialorder %v460_v44, 0.0  ;;  %v496_v48 = vmul.f32 0.2, %v460_v44 }
  0xc7   : > { %v485_v61 = vmul.f32 0.2, %v433_v55  ;;  %v489_v62 = vmul.f32 0.2, %v443_v56  ;;  %vm469_vm8 = vcmp.gt.f32.partialorder %v433_v55, 0.0  ;;  %vm473_vm9 = vcmp.gt.f32.partialorder %v443_v56, 0.0 }
  0xc8   : > { %v508_v51 = vsel %vm476_vm6, %v450_v43, %v492_v47  ;;  %v512_v52 = vsel %vm480_vm7, %v460_v44, %v496_v48 }
  0xc9   : > { %v777_v53 = vpack.c.bf16 %v508_v51, %v507_v49  ;;  %v787_v54 = vpack.c.bf16 %v512_v52, %v511_v50  ;;  %v501_v5 = vsel %vm469_vm8, %v433_v55, %v485_v61  ;;  %v505_v6 = vsel %vm473_vm9, %v443_v56, %v489_v62 }
  0xcb   : > { %797 = vst [vmem:[%s1119_s23 + $0x20] sm:$0xff] %v777_v53   ;;  %v452_v57 = vpop.f32.mrf.mxu2  ;;  %v462_v58 = vpop.f32.mrf.mxu3 }
  0xcc   : > { %799 = vst [vmem:[%s1119_s23 + $0x30] sm:$0xff] %v787_v54   ;;  %v434_v59 = vpop.f32.mrf.mxu0  ;;  %v444_v60 = vpop.f32.mrf.mxu1  ;;  %v453_v3 = vadd.f32 %v1106_v18, %v452_v57  ;;  %v463_v4 = vadd.f32 %v1106_v18, %v462_v58 }
  0xcd   : > { %v435_v63 = vadd.f32 %v1106_v18, %v434_v59  ;;  %v445_v0 = vadd.f32 %v1106_v18, %v444_v60 }
  0xce   : > { %v493_v13 = vmul.f32 0.2, %v453_v3  ;;  %v497_v14 = vmul.f32 0.2, %v463_v4  ;;  %vm477_vm12 = vcmp.gt.f32.partialorder %v453_v3, 0.0  ;;  %vm481_vm13 = vcmp.gt.f32.partialorder %v463_v4, 0.0 }
  0xcf   : > { %vm470_vm10 = vcmp.gt.f32.partialorder %v435_v63, 0.0  ;;  %v486_v1 = vmul.f32 0.2, %v435_v63  ;;  %vm474_vm11 = vcmp.gt.f32.partialorder %v445_v0, 0.0  ;;  %v490_v2 = vmul.f32 0.2, %v445_v0 }
  0xd0   : > { %v509_v20 = vsel %vm477_vm12, %v453_v3, %v493_v13  ;;  %v513_v21 = vsel %vm481_vm13, %v463_v4, %v497_v14 }
  0xd1   : > { %v502_v7 = vsel %vm470_vm10, %v435_v63, %v486_v1  ;;  %v506_v8 = vsel %vm474_vm11, %v445_v0, %v490_v2 }
  0xd2   : > { %v762_v9 = vpack.c.bf16 %v502_v7, %v501_v5  ;;  %v772_v10 = vpack.c.bf16 %v506_v8, %v505_v6 }
  0xd3   : > { %v454_v11 = vpop.f32.mrf.mxu2  ;;  %v464_v12 = vpop.f32.mrf.mxu3 }
  0xd4   : > { %794 = vst [vmem:[%s1119_s23 + $0x8] sm:$0xff] %v762_v9   ;;  %v455_v15 = vadd.f32 %v1106_v18, %v454_v11  ;;  %v465_v16 = vadd.f32 %v1106_v18, %v464_v12 }
  0xd5   : > { %796 = vst [vmem:[%s1119_s23 + $0x18] sm:$0xff] %v772_v10  }
  0xd6   : > { %vm478_vm14 = vcmp.gt.f32.partialorder %v455_v15, 0.0  ;;  %v494_v17 = vmul.f32 0.2, %v455_v15  ;;  %vm482_vm15 = vcmp.gt.f32.partialorder %v465_v16, 0.0  ;;  %v498_v19 = vmul.f32 0.2, %v465_v16 }
  0xd8   : > { %v510_v22 = vsel %vm478_vm14, %v455_v15, %v494_v17  ;;  %v514_v23 = vsel %vm482_vm15, %v465_v16, %v498_v19 }
  0xd9   : > { %v782_v24 = vpack.c.bf16 %v510_v22, %v509_v20  ;;  %v792_v25 = vpack.c.bf16 %v514_v23, %v513_v21 }
  0xdb   : > { %798 = vst [vmem:[%s1119_s23 + $0x28] sm:$0xff] %v782_v24  }
  0xdc   : > { %800 = vst [vmem:[%s1119_s23 + $0x38] sm:$0xff] %v792_v25  }
  0xdd PF: > { %s16_s17 = sadd.s32 1, %s1003_s17   ;;  %s1156_s15 = smov %s999_s16 }
  0xde   : > { %p13_p8 = scmp.ge.s32.totalorder %s16_s17, 6   ;;  %s1157_s16 = smov %s1159_s27 }
  0xe0   :  { %15 = sbr.rel (!%p13_p8) target bundleno = 3 (0x3), region = 82 }
  0xe5   :  { %575 = vsyncpa [#allocation3], 1 }
  0xe6   :  { %577 = vsyncpa [#allocation3 + $0x1], 1 }
  0xe7   :  { %578 = vsyncpa [#allocation5], 1 }

// kernel: _lambda_.6
= control target key start
LH: loop header
LB: loop body
LE: loop exit
PB: predicated region body
PF: predicated region fallthrough
CT: control target
= control target key end

     0   :  { %s3057_s1 = inlined_call_operand.vmem [shape: bf16[1024,128], index: 1, kind: input, shape index: {}]   ;;  %s3058_s0 = inlined_call_operand.vmem [shape: bf16[128,1024], index: 0, kind: input, shape index: {}]   ;;  %s3059_s2 = inlined_call_operand.vmem [shape: f32[1,128], index: 2, kind: input, shape index: {}]   ;;  %s3060_s3 = inlined_call_operand.vmem [shape: f32[1,128], index: 3, kind: input, shape index: {}]   ;;  %s3061_s4 = inlined_call_operand.vmem [shape: bf16[128,128], index: 4, kind: output, shape index: {}]  }
   0x1   :  { %v2122_v0 = vld [vmem:[%s3057_s1 + $0x38] sm:$0xff]  ;;  %v2121_v4 = vld [vmem:[%s3057_s1 + $0x30] sm:$0xff]  ;;  %v2120_v8 = vld [vmem:[%s3057_s1 + $0x28] sm:$0xff] }
   0x2   :  { %v2130_v1 = vld [vmem:[%s3057_s1 + $0x78] sm:$0xff]  ;;  %913 = vmatpush.bf16.msra.mxu0 %v2122_v0  ;;  %v2129_v5 = vld [vmem:[%s3057_s1 + $0x70] sm:$0xff]  ;;  %v2128_v9 = vld [vmem:[%s3057_s1 + $0x68] sm:$0xff] }
   0x3   :  { %v2138_v2 = vld [vmem:[%s3057_s1 + $0xb8] sm:$0xff]  ;;  %962 = vmatpush.bf16.msra.mxu1 %v2130_v1  ;;  %v2137_v6 = vld [vmem:[%s3057_s1 + $0xb0] sm:$0xff]  ;;  %v2136_v10 = vld [vmem:[%s3057_s1 + $0xa8] sm:$0xff] }
   0x4   :  { %v2146_v3 = vld [vmem:[%s3057_s1 + $0xf8] sm:$0xff]  ;;  %1011 = vmatpush.bf16.msra.mxu2 %v2138_v2  ;;  %v2145_v7 = vld [vmem:[%s3057_s1 + $0xf0] sm:$0xff]  ;;  %v2144_v11 = vld [vmem:[%s3057_s1 + $0xe8] sm:$0xff] }
   0x5   :  { %1060 = vmatpush.bf16.msra.mxu3 %v2146_v3  ;;  %v2119_v12 = vld [vmem:[%s3057_s1 + $0x20] sm:$0xff]  ;;  %v2118_v16 = vld [vmem:[%s3057_s1 + $0x18] sm:$0xff]  ;;  %v2117_v20 = vld [vmem:[%s3057_s1 + $0x10] sm:$0xff] }
   0x6   :  { %914 = vmatpush.bf16.msra.mxu0 %v2121_v4  ;;  %v2127_v13 = vld [vmem:[%s3057_s1 + $0x60] sm:$0xff]  ;;  %v2126_v17 = vld [vmem:[%s3057_s1 + $0x58] sm:$0xff]  ;;  %v2125_v21 = vld [vmem:[%s3057_s1 + $0x50] sm:$0xff] }
   0x7   :  { %963 = vmatpush.bf16.msra.mxu1 %v2129_v5  ;;  %v2135_v14 = vld [vmem:[%s3057_s1 + $0xa0] sm:$0xff]  ;;  %v2134_v18 = vld [vmem:[%s3057_s1 + $0x98] sm:$0xff]  ;;  %v2133_v22 = vld [vmem:[%s3057_s1 + $0x90] sm:$0xff] }
   0x8   :  { %1012 = vmatpush.bf16.msra.mxu2 %v2137_v6  ;;  %v2143_v15 = vld [vmem:[%s3057_s1 + $0xe0] sm:$0xff]  ;;  %v2142_v19 = vld [vmem:[%s3057_s1 + $0xd8] sm:$0xff]  ;;  %v2141_v23 = vld [vmem:[%s3057_s1 + $0xd0] sm:$0xff] }
   0x9   :  { %1061 = vmatpush.bf16.msra.mxu3 %v2145_v7  ;;  %v2116_v24 = vld [vmem:[%s3057_s1 + $0x8] sm:$0xff]  ;;  %v2115_v28 = vld [vmem:[%s3057_s1] sm:$0xff]  ;;  %v2170_v40 = vld [vmem:[%s3057_s1 + $0x1b8] sm:$0xff] }
   0xa   :  { %915 = vmatpush.bf16.msra.mxu0 %v2120_v8  ;;  %v2124_v25 = vld [vmem:[%s3057_s1 + $0x48] sm:$0xff]  ;;  %v2123_v29 = vld [vmem:[%s3057_s1 + $0x40] sm:$0xff]  ;;  %v2154_v41 = vld [vmem:[%s3057_s1 + $0x138] sm:$0xff] }
   0xb   :  { %964 = vmatpush.bf16.msra.mxu1 %v2128_v9  ;;  %v2132_v26 = vld [vmem:[%s3057_s1 + $0x88] sm:$0xff]  ;;  %v2131_v30 = vld [vmem:[%s3057_s1 + $0x80] sm:$0xff]  ;;  %v2178_v46 = vld [vmem:[%s3057_s1 + $0x1f8] sm:$0xff] }
   0xc   :  { %1013 = vmatpush.bf16.msra.mxu2 %v2136_v10  ;;  %v2140_v27 = vld [vmem:[%s3057_s1 + $0xc8] sm:$0xff]  ;;  %v2139_v31 = vld [vmem:[%s3057_s1 + $0xc0] sm:$0xff]  ;;  %v2162_v47 = vld [vmem:[%s3057_s1 + $0x178] sm:$0xff] }
   0xd   :  { %1062 = vmatpush.bf16.msra.mxu3 %v2144_v11  ;;  %v1541_v32 = vld [vmem:[%s3058_s0] sm:$0xf]  ;;  %v2051_v34 = vld [vmem:[%s3058_s0 + $0x4] sm:$0xf]  ;;  %v1549_v36 = vld [vmem:[%s3058_s0 + $0x8] sm:$0xf] }
   0xe   :  { %916 = vmatpush.bf16.msra.mxu0 %v2119_v12  ;;  %v2055_v33 = vld [vmem:[%s3058_s0 + $0x1c] sm:$0xf0]  ;;  %v1543_v35 = vld [vmem:[%s3058_s0 + $0x20] sm:$0xf0]  ;;  %v2056_v37 = vld [vmem:[%s3058_s0 + $0x24] sm:$0xf0] }
   0xf   :  { %965 = vmatpush.bf16.msra.mxu1 %v2127_v13  ;;  %v2052_v38 = vld [vmem:[%s3058_s0 + $0xc] sm:$0xf]  ;;  %v1542_v42 = vor.u32 %v2055_v33, %v1541_v32  ;;  %v1546_v43 = vor.u32 %v2051_v34, %v1543_v35  ;;  %v1550_v44 = vor.u32 %v2056_v37, %v1549_v36  ;;  %v2169_v48 = vld [vmem:[%s3057_s1 + $0x1b0] sm:$0xff]  ;;  %v1573_v56 = vld [vmem:[%s3058_s0 + $0x40] sm:$0xf] }
  0x10   :  { %1014 = vmatpush.bf16.msra.mxu2 %v2135_v14  ;;  %v1551_v39 = vld [vmem:[%s3058_s0 + $0x28] sm:$0xf0]  ;;  %v2153_v49 = vld [vmem:[%s3057_s1 + $0x130] sm:$0xff]  ;;  %v2063_v57 = vld [vmem:[%s3058_s0 + $0x5c] sm:$0xf0] }
  0x11   :  { %1063 = vmatpush.bf16.msra.mxu3 %v2143_v15  ;;  %v1554_v45 = vor.u32 %v2052_v38, %v1551_v39  ;;  %v2177_v50 = vld [vmem:[%s3057_s1 + $0x1f0] sm:$0xff]  ;;  %v2168_v52 = vld [vmem:[%s3057_s1 + $0x1a8] sm:$0xff]  ;;  %v2059_v58 = vld [vmem:[%s3058_s0 + $0x44] sm:$0xf]  ;;  %v1574_v0 = vor.u32 %v2063_v57, %v1573_v56 }
  0x12   :  { %917 = vmatpush.bf16.msra.mxu0 %v2118_v16  ;;  %v2161_v51 = vld [vmem:[%s3057_s1 + $0x170] sm:$0xff]  ;;  %v2152_v53 = vld [vmem:[%s3057_s1 + $0x128] sm:$0xff]  ;;  %v1575_v59 = vld [vmem:[%s3058_s0 + $0x60] sm:$0xf0] }
  0x13   :  { %966 = vmatpush.bf16.msra.mxu1 %v2126_v17  ;;  %v2176_v54 = vld [vmem:[%s3057_s1 + $0x1e8] sm:$0xff]  ;;  %v1578_v1 = vor.u32 %v2059_v58, %v1575_v59  ;;  %v2167_v4 = vld [vmem:[%s3057_s1 + $0x1a0] sm:$0xff]  ;;  %v2165_v36 = vld [vmem:[%s3057_s1 + $0x190] sm:$0xff] }
  0x14   :  { %1015 = vmatpush.bf16.msra.mxu2 %v2134_v18  ;;  %v2160_v55 = vld [vmem:[%s3057_s1 + $0x168] sm:$0xff]  ;;  %v2151_v5 = vld [vmem:[%s3057_s1 + $0x120] sm:$0xff]  ;;  %v2149_v37 = vld [vmem:[%s3057_s1 + $0x110] sm:$0xff] }
  0x15   :  { %1064 = vmatpush.bf16.msra.mxu3 %v2142_v19  ;;  %v1581_v60 = vld [vmem:[%s3058_s0 + $0x48] sm:$0xf]  ;;  %v2060_v62 = vld [vmem:[%s3058_s0 + $0x4c] sm:$0xf]  ;;  %v2175_v6 = vld [vmem:[%s3057_s1 + $0x1e0] sm:$0xff] }
  0x16   :  { %918 = vmatpush.bf16.msra.mxu0 %v2117_v20  ;;  %v2064_v61 = vld [vmem:[%s3058_s0 + $0x64] sm:$0xf0]  ;;  %v1583_v63 = vld [vmem:[%s3058_s0 + $0x68] sm:$0xf0]  ;;  %v2159_v7 = vld [vmem:[%s3057_s1 + $0x160] sm:$0xff] }
  0x17   :  { %967 = vmatpush.bf16.msra.mxu1 %v2125_v21  ;;  %v1582_v2 = vor.u32 %v2064_v61, %v1581_v60  ;;  %v1586_v3 = vor.u32 %v2060_v62, %v1583_v63  ;;  %v1605_v8 = vld [vmem:[%s3058_s0 + $0x80] sm:$0xf]  ;;  %v2067_v10 = vld [vmem:[%s3058_s0 + $0x84] sm:$0xf]  ;;  %v1613_v12 = vld [vmem:[%s3058_s0 + $0x88] sm:$0xf] }
  0x18   :  { %1016 = vmatpush.bf16.msra.mxu2 %v2133_v22  ;;  %v2071_v9 = vld [vmem:[%s3058_s0 + $0x9c] sm:$0xf0]  ;;  %v1607_v11 = vld [vmem:[%s3058_s0 + $0xa0] sm:$0xf0]  ;;  %v2072_v13 = vld [vmem:[%s3058_s0 + $0xa4] sm:$0xf0] }
  0x19   :  { %1065 = vmatpush.bf16.msra.mxu3 %v2141_v23  ;;  %v2068_v14 = vld [vmem:[%s3058_s0 + $0x8c] sm:$0xf]  ;;  %v1606_v16 = vor.u32 %v2071_v9, %v1605_v8  ;;  %v1610_v17 = vor.u32 %v2067_v10, %v1607_v11  ;;  %v1614_v18 = vor.u32 %v2072_v13, %v1613_v12  ;;  %v2166_v20 = vld [vmem:[%s3057_s1 + $0x198] sm:$0xff]  ;;  %v2173_v38 = vld [vmem:[%s3057_s1 + $0x1d0] sm:$0xff] }
  0x1a   :  { %919 = vmatpush.bf16.msra.mxu0 %v2116_v24  ;;  %v1615_v15 = vld [vmem:[%s3058_s0 + $0xa8] sm:$0xf0]  ;;  %v2150_v21 = vld [vmem:[%s3057_s1 + $0x118] sm:$0xff]  ;;  %v1637_v24 = vld [vmem:[%s3058_s0 + $0xc0] sm:$0xf] }
  0x1b   :  { %968 = vmatpush.bf16.msra.mxu1 %v2124_v25  ;;  %v1618_v19 = vor.u32 %v2068_v14, %v1615_v15  ;;  %v2174_v22 = vld [vmem:[%s3057_s1 + $0x1d8] sm:$0xff]  ;;  %v2079_v25 = vld [vmem:[%s3058_s0 + $0xdc] sm:$0xf0]  ;;  %v2157_v39 = vld [vmem:[%s3057_s1 + $0x150] sm:$0xff] }
  0x1c   :  { %1017 = vmatpush.bf16.msra.mxu2 %v2132_v26  ;;  %v2158_v23 = vld [vmem:[%s3057_s1 + $0x158] sm:$0xff]  ;;  %v2075_v26 = vld [vmem:[%s3058_s0 + $0xc4] sm:$0xf]  ;;  %v1638_v32 = vor.u32 %v2079_v25, %v1637_v24  ;;  %v1701_v56 = vld [vmem:[%s3058_s0 + $0x140] sm:$0xf] }
  0x1d   :  { %1066 = vmatpush.bf16.msra.mxu3 %v2140_v27  ;;  %v1639_v27 = vld [vmem:[%s3058_s0 + $0xe0] sm:$0xf0]  ;;  %v2095_v57 = vld [vmem:[%s3058_s0 + $0x15c] sm:$0xf0]  ;;  %v1709_v60 = vld [vmem:[%s3058_s0 + $0x148] sm:$0xf] }
  0x1e   :  { %920 = vmatpush.bf16.msra.mxu0 %v2115_v28  ;;  %v1645_v28 = vld [vmem:[%s3058_s0 + $0xc8] sm:$0xf]  ;;  %v1642_v33 = vor.u32 %v2075_v26, %v1639_v27  ;;  %v2091_v58 = vld [vmem:[%s3058_s0 + $0x144] sm:$0xf]  ;;  %v2092_v62 = vld [vmem:[%s3058_s0 + $0x14c] sm:$0xf] }
  0x1f   :  { %969 = vmatpush.bf16.msra.mxu1 %v2123_v29  ;;  %v2080_v29 = vld [vmem:[%s3058_s0 + $0xe4] sm:$0xf0]  ;;  %v1703_v59 = vld [vmem:[%s3058_s0 + $0x160] sm:$0xf0]  ;;  %v1711_v63 = vld [vmem:[%s3058_s0 + $0x168] sm:$0xf0] }
  0x20   :  { %1018 = vmatpush.bf16.msra.mxu2 %v2131_v30  ;;  %v2076_v30 = vld [vmem:[%s3058_s0 + $0xcc] sm:$0xf]  ;;  %v1646_v34 = vor.u32 %v2080_v29, %v1645_v28  ;;  %v2096_v61 = vld [vmem:[%s3058_s0 + $0x164] sm:$0xf0]  ;;  %v1733_v8 = vld [vmem:[%s3058_s0 + $0x180] sm:$0xf] }
  0x21   :  { %1067 = vmatpush.bf16.msra.mxu3 %v2139_v31  ;;  %921 = vmatmul.bf16.vlgmr.msra.gmra.mxu0 %v1542_v42  ;;  %v1647_v31 = vld [vmem:[%s3058_s0 + $0xe8] sm:$0xf0]  ;;  %v2083_v42 = vld [vmem:[%s3058_s0 + $0x104] sm:$0xf]  ;;  %v2103_v9 = vld [vmem:[%s3058_s0 + $0x19c] sm:$0xf0] }
  0x22   :  { %1109 = vmatpush.bf16.msrb.mxu0 %v2154_v41  ;;  %970 = vmatmul.bf16.vlgmr.msra.gmra.mxu1 %v1546_v43  ;;  %v1650_v35 = vor.u32 %v2076_v30, %v1647_v31  ;;  %v2087_v41 = vld [vmem:[%s3058_s0 + $0x11c] sm:$0xf0]  ;;  %v1671_v43 = vld [vmem:[%s3058_s0 + $0x120] sm:$0xf0]  ;;  %v1741_v12 = vld [vmem:[%s3058_s0 + $0x188] sm:$0xf] }
  0x23   :  { %1019 = vmatmul.bf16.vlgmr.msra.gmra.mxu2 %v1550_v44  ;;  %1158 = vmatpush.bf16.msrb.mxu1 %v2162_v47  ;;  %v1677_v44 = vld [vmem:[%s3058_s0 + $0x108] sm:$0xf]  ;;  %v1679_v47 = vld [vmem:[%s3058_s0 + $0x128] sm:$0xf0]  ;;  %v2099_v10 = vld [vmem:[%s3058_s0 + $0x184] sm:$0xf] }
  0x24   :  { %1207 = vmatpush.bf16.msrb.mxu2 %v2170_v40  ;;  %1068 = vmatmul.bf16.vlgmr.msra.gmra.mxu3 %v1554_v45  ;;  %v1669_v40 = vld [vmem:[%s3058_s0 + $0x100] sm:$0xf]  ;;  %v2088_v45 = vld [vmem:[%s3058_s0 + $0x124] sm:$0xf0]  ;;  %v1735_v11 = vld [vmem:[%s3058_s0 + $0x1a0] sm:$0xf0] }
  0x25   :  { %1256 = vmatpush.bf16.msrb.mxu3 %v2178_v46  ;;  %v2084_v46 = vld [vmem:[%s3058_s0 + $0x10c] sm:$0xf]  ;;  %v2104_v13 = vld [vmem:[%s3058_s0 + $0x1a4] sm:$0xf0] }
  0x26   :  { %1110 = vmatpush.bf16.msrb.mxu0 %v2153_v49  ;;  %v1674_v49 = vor.u32 %v2083_v42, %v1671_v43  ;;  %v2100_v14 = vld [vmem:[%s3058_s0 + $0x18c] sm:$0xf]  ;;  %v1773_v24 = vld [vmem:[%s3058_s0 + $0x1c8] sm:$0xf] }
  0x27   :  { %1159 = vmatpush.bf16.msrb.mxu1 %v2161_v51  ;;  %v1682_v51 = vor.u32 %v2084_v46, %v1679_v47  ;;  %v1743_v15 = vld [vmem:[%s3058_s0 + $0x1a8] sm:$0xf0]  ;;  %v2112_v25 = vld [vmem:[%s3058_s0 + $0x1e4] sm:$0xf0] }
  0x28   :  { %1208 = vmatpush.bf16.msrb.mxu2 %v2169_v48  ;;  %v1670_v48 = vor.u32 %v2087_v41, %v1669_v40  ;;  %v2108_v26 = vld [vmem:[%s3058_s0 + $0x1cc] sm:$0xf]  ;;  %v1774_v30 = vor.u32 %v2112_v25, %v1773_v24 }
  0x29   :  { %1257 = vmatpush.bf16.msrb.mxu3 %v2177_v50  ;;  %v1678_v50 = vor.u32 %v2088_v45, %v1677_v44  ;;  %v1775_v27 = vld [vmem:[%s3058_s0 + $0x1e8] sm:$0xf0] }
  0x2a   :  { %1111 = vmatpush.bf16.msrb.mxu0 %v2152_v53  ;;  %v2148_v53 = vld [vmem:[%s3057_s1 + $0x108] sm:$0xff]  ;;  %v1778_v31 = vor.u32 %v2108_v26, %v1775_v27 }
  0x2b   :  { %1160 = vmatpush.bf16.msrb.mxu1 %v2160_v55  ;;  %v2156_v55 = vld [vmem:[%s3057_s1 + $0x148] sm:$0xff] }
  0x2c   :  { %1209 = vmatpush.bf16.msrb.mxu2 %v2168_v52  ;;  %v2164_v52 = vld [vmem:[%s3057_s1 + $0x188] sm:$0xff] }
  0x2d   :  { %1258 = vmatpush.bf16.msrb.mxu3 %v2176_v54  ;;  %v2172_v54 = vld [vmem:[%s3057_s1 + $0x1c8] sm:$0xff] }
  0x2e   :  { %1112 = vmatpush.bf16.msrb.mxu0 %v2151_v5  ;;  %v2147_v5 = vld [vmem:[%s3057_s1 + $0x100] sm:$0xff] }
  0x2f   :  { %1161 = vmatpush.bf16.msrb.mxu1 %v2159_v7  ;;  %v2155_v7 = vld [vmem:[%s3057_s1 + $0x140] sm:$0xff] }
  0x30   :  { %1210 = vmatpush.bf16.msrb.mxu2 %v2167_v4  ;;  %v2163_v4 = vld [vmem:[%s3057_s1 + $0x180] sm:$0xff] }
  0x31   :  { %926 = vmatmul.bf16.gmra.mxu0 %v1574_v0  ;;  %1259 = vmatpush.bf16.msrb.mxu3 %v2175_v6  ;;  %v1702_v0 = vor.u32 %v2095_v57, %v1701_v56  ;;  %v2171_v6 = vld [vmem:[%s3057_s1 + $0x1c0] sm:$0xff]  ;;  %v2061_v56 = vld [vmem:[%s3058_s0 + $0x54] sm:$0xf] }
  0x32   :  { %975 = vmatmul.bf16.gmra.mxu1 %v1578_v1  ;;  %1113 = vmatpush.bf16.msrb.mxu0 %v2150_v21  ;;  %v1706_v1 = vor.u32 %v2091_v58, %v1703_v59  ;;  %v2111_v21 = vld [vmem:[%s3058_s0 + $0x1dc] sm:$0xf0]  ;;  %v1591_v57 = vld [vmem:[%s3058_s0 + $0x70] sm:$0xf0]  ;;  %v1597_v58 = vld [vmem:[%s3058_s0 + $0x58] sm:$0xf] }
  0x33   :  { %1024 = vmatmul.bf16.gmra.mxu2 %v1582_v2  ;;  %1162 = vmatpush.bf16.msrb.mxu1 %v2158_v23  ;;  %v1710_v2 = vor.u32 %v2096_v61, %v1709_v60  ;;  %v1767_v23 = vld [vmem:[%s3058_s0 + $0x1e0] sm:$0xf0]  ;;  %v2066_v59 = vld [vmem:[%s3058_s0 + $0x74] sm:$0xf0]  ;;  %v2062_v60 = vld [vmem:[%s3058_s0 + $0x5c] sm:$0xf] }
  0x34   :  { %1073 = vmatmul.bf16.gmra.mxu3 %v1586_v3  ;;  %1211 = vmatpush.bf16.msrb.mxu2 %v2166_v20  ;;  %v1714_v3 = vor.u32 %v2092_v62, %v1711_v63  ;;  %v1765_v20 = vld [vmem:[%s3058_s0 + $0x1c0] sm:$0xf]  ;;  %v1599_v61 = vld [vmem:[%s3058_s0 + $0x78] sm:$0xf0] }
  0x35   :  { %1260 = vmatpush.bf16.msrb.mxu3 %v2174_v22  ;;  %v2107_v22 = vld [vmem:[%s3058_s0 + $0x1c4] sm:$0xf]  ;;  %v1766_v28 = vor.u32 %v2111_v21, %v1765_v20  ;;  %v1629_v20 = vld [vmem:[%s3058_s0 + $0x98] sm:$0xf] }
  0x36   :  { %1114 = vmatpush.bf16.msrb.mxu0 %v2149_v37  ;;  %v1770_v29 = vor.u32 %v2107_v22, %v1767_v23  ;;  %v2058_v37 = vld [vmem:[%s3058_s0 + $0x34] sm:$0xf0]  ;;  %v2070_v22 = vld [vmem:[%s3058_s0 + $0x9c] sm:$0xf] }
  0x37   :  { %1163 = vmatpush.bf16.msrb.mxu1 %v2157_v39  ;;  %v1567_v39 = vld [vmem:[%s3058_s0 + $0x38] sm:$0xf0]  ;;  %v2074_v21 = vld [vmem:[%s3058_s0 + $0xb4] sm:$0xf0] }
  0x38   :  { %1212 = vmatpush.bf16.msrb.mxu2 %v2165_v36  ;;  %v1565_v36 = vld [vmem:[%s3058_s0 + $0x18] sm:$0xf]  ;;  %v1631_v23 = vld [vmem:[%s3058_s0 + $0xb8] sm:$0xf0] }
  0x39   :  { %1261 = vmatpush.bf16.msrb.mxu3 %v2173_v38  ;;  %v2054_v38 = vld [vmem:[%s3058_s0 + $0x1c] sm:$0xf]  ;;  %v1566_v44 = vor.u32 %v2058_v37, %v1565_v36 }
  0x3a   :  { %1115 = vmatpush.bf16.msrb.mxu0 %v2148_v53  ;;  %v1570_v45 = vor.u32 %v2054_v38, %v1567_v39 }
  0x3b   :  { %1164 = vmatpush.bf16.msrb.mxu1 %v2156_v55  ;;  %v2065_v55 = vld [vmem:[%s3058_s0 + $0x6c] sm:$0xf0] }
  0x3c   :  { %1213 = vmatpush.bf16.msrb.mxu2 %v2164_v52 }
  0x3d   :  { %1262 = vmatpush.bf16.msrb.mxu3 %v2172_v54  ;;  %v1589_v54 = vld [vmem:[%s3058_s0 + $0x50] sm:$0xf] }
  0x3e   :  { %1116 = vmatpush.bf16.msrb.mxu0 %v2147_v5  ;;  %v1598_v5 = vor.u32 %v2066_v59, %v1597_v58 }
  0x3f   :  { %1165 = vmatpush.bf16.msrb.mxu1 %v2155_v7 }
  0x40   :  { %1214 = vmatpush.bf16.msrb.mxu2 %v2163_v4 }
  0x41   :  { %931 = vmatmul.bf16.gmra.mxu0 %v1606_v16  ;;  %1263 = vmatpush.bf16.msrb.mxu3 %v2171_v6  ;;  %v1734_v16 = vor.u32 %v2103_v9, %v1733_v8  ;;  %v1602_v6 = vor.u32 %v2062_v60, %v1599_v61 }
  0x42   :  { %980 = vmatmul.bf16.gmra.mxu1 %v1610_v17  ;;  %v1738_v17 = vor.u32 %v2099_v10, %v1735_v11 }
  0x43   :  { %1029 = vmatmul.bf16.gmra.mxu2 %v1614_v18  ;;  %v1742_v18 = vor.u32 %v2104_v13, %v1741_v12 }
  0x44   :  { %1078 = vmatmul.bf16.gmra.mxu3 %v1618_v19  ;;  %v1746_v19 = vor.u32 %v2100_v14, %v1743_v15 }
  0x51   :  { %936 = vmatmul.bf16.gmra.mxu0 %v1638_v32  ;;  %v1557_v32 = vld [vmem:[%s3058_s0 + $0x10] sm:$0xf] }
  0x52   :  { %985 = vmatmul.bf16.gmra.mxu1 %v1642_v33  ;;  %v2057_v33 = vld [vmem:[%s3058_s0 + $0x2c] sm:$0xf0] }
  0x53   :  { %1034 = vmatmul.bf16.gmra.mxu2 %v1646_v34  ;;  %v2053_v34 = vld [vmem:[%s3058_s0 + $0x14] sm:$0xf]  ;;  %v1558_v40 = vor.u32 %v2057_v33, %v1557_v32  ;;  %v1634_v32 = vor.u32 %v2070_v22, %v1631_v23 }
  0x54   :  { %1083 = vmatmul.bf16.gmra.mxu3 %v1650_v35  ;;  %v1559_v35 = vld [vmem:[%s3058_s0 + $0x30] sm:$0xf0] }
  0x55   :  { %v1562_v41 = vor.u32 %v2053_v34, %v1559_v35 }
  0x61   :  { %941 = vmatmul.bf16.gmra.mxu0 %v1670_v48 }
  0x62   :  { %990 = vmatmul.bf16.gmra.mxu1 %v1674_v49 }
  0x63   :  { %1039 = vmatmul.bf16.gmra.mxu2 %v1678_v50 }
  0x64   :  { %1088 = vmatmul.bf16.gmra.mxu3 %v1682_v51 }
  0x71   :  { %946 = vmatmul.bf16.gmra.mxu0 %v1702_v0  ;;  %v1590_v0 = vor.u32 %v2065_v55, %v1589_v54 }
  0x72   :  { %995 = vmatmul.bf16.gmra.mxu1 %v1706_v1  ;;  %v1594_v1 = vor.u32 %v2061_v56, %v1591_v57 }
  0x73   :  { %1044 = vmatmul.bf16.gmra.mxu2 %v1710_v2 }
  0x74   :  { %1093 = vmatmul.bf16.gmra.mxu3 %v1714_v3 }
  0x81   :  { %951 = vmatmul.bf16.gmra.mxu0 %v1734_v16  ;;  %v1621_v16 = vld [vmem:[%s3058_s0 + $0x90] sm:$0xf] }
  0x82   :  { %1000 = vmatmul.bf16.gmra.mxu1 %v1738_v17  ;;  %v2073_v17 = vld [vmem:[%s3058_s0 + $0xac] sm:$0xf0] }
  0x83   :  { %1049 = vmatmul.bf16.gmra.mxu2 %v1742_v18  ;;  %v2069_v18 = vld [vmem:[%s3058_s0 + $0x94] sm:$0xf]  ;;  %v1622_v26 = vor.u32 %v2073_v17, %v1621_v16 }
  0x84   :  { %1098 = vmatmul.bf16.gmra.mxu3 %v1746_v19  ;;  %v1623_v19 = vld [vmem:[%s3058_s0 + $0xb0] sm:$0xf0] }
  0x85   :  { %v1626_v27 = vor.u32 %v2069_v18, %v1623_v19 }
  0x91   :  { %956 = vmatmul.bf16.gmra.mxu0 %v1766_v28 }
  0x92   :  { %1005 = vmatmul.bf16.gmra.mxu1 %v1770_v29 }
  0x93   :  { %1054 = vmatmul.bf16.gmra.mxu2 %v1774_v30 }
  0x94   :  { %1103 = vmatmul.bf16.gmra.mxu3 %v1778_v31  ;;  %v1630_v31 = vor.u32 %v2074_v21, %v1629_v20 }
  0x9e   :  { %v922_v42 = vpop.f32.mrf.mxu0 }
  0x9f   :  { %v971_v43 = vpop.f32.mrf.mxu1 }
  0xa0   :  { %v972_v46 = vadd.f32 %v971_v43, %v922_v42  ;;  %v1653_v42 = vld [vmem:[%s3058_s0 + $0xd0] sm:$0xf] }
  0xa1   :  { %1117 = vmatmul.bf16.vlgmr.msrb.gmra.mxu0 %v1558_v40  ;;  %v2081_v43 = vld [vmem:[%s3058_s0 + $0xec] sm:$0xf0] }
  0xa2   :  { %1166 = vmatmul.bf16.vlgmr.msrb.gmra.mxu1 %v1562_v41 }
  0xa3   :  { %1215 = vmatmul.bf16.vlgmr.msrb.gmra.mxu2 %v1566_v44  ;;  %v2077_v44 = vld [vmem:[%s3058_s0 + $0xd4] sm:$0xf] }
  0xa4   :  { %1264 = vmatmul.bf16.vlgmr.msrb.gmra.mxu3 %v1570_v45  ;;  %v1655_v45 = vld [vmem:[%s3058_s0 + $0xf0] sm:$0xf0] }
  0xa5   :  { %v1658_v54 = vor.u32 %v2077_v44, %v1655_v45 }
  0xa6   :  { %v1020_v47 = vpop.f32.mrf.mxu2  ;;  %v924_v50 = vpop.f32.mrf.mxu0 }
  0xa7   :  { %v1069_v48 = vpop.f32.mrf.mxu3  ;;  %v1021_v49 = vadd.f32 %v1020_v47, %v972_v46  ;;  %v973_v51 = vpop.f32.mrf.mxu1  ;;  %v1661_v46 = vld [vmem:[%s3058_s0 + $0xd8] sm:$0xf] }
  0xa8   :  { %v974_v52 = vadd.f32 %v973_v51, %v924_v50  ;;  %v2082_v47 = vld [vmem:[%s3058_s0 + $0xf4] sm:$0xf0] }
  0xa9   :  { %v2667_v53 = vadd.f32 %v1069_v48, %v1021_v49  ;;  %v2078_v48 = vld [vmem:[%s3058_s0 + $0xdc] sm:$0xf]  ;;  %v1662_v58 = vor.u32 %v2082_v47, %v1661_v46 }
  0xaa   :  { %v1663_v49 = vld [vmem:[%s3058_s0 + $0xf8] sm:$0xf0] }
  0xab   :  { %v1666_v59 = vor.u32 %v2078_v48, %v1663_v49 }
  0xae   :  { %v1022_v62 = vpop.f32.mrf.mxu2  ;;  %v927_v3 = vpop.f32.mrf.mxu0 }
  0xaf   :  { %v1071_v63 = vpop.f32.mrf.mxu3  ;;  %v1023_v2 = vadd.f32 %v1022_v62, %v974_v52  ;;  %v976_v4 = vpop.f32.mrf.mxu1  ;;  %v1654_v52 = vor.u32 %v2081_v43, %v1653_v42  ;;  %v1727_v42 = vld [vmem:[%s3058_s0 + $0x178] sm:$0xf0] }
  0xb0   :  { %v977_v7 = vadd.f32 %v976_v4, %v927_v3 }
  0xb1   :  { %v2693_v8 = vadd.f32 %v1071_v63, %v1023_v2  ;;  %1122 = vmatmul.bf16.gmra.mxu0 %v1590_v0 }
  0xb2   :  { %1171 = vmatmul.bf16.gmra.mxu1 %v1594_v1 }
  0xb3   :  { %1220 = vmatmul.bf16.gmra.mxu2 %v1598_v5  ;;  %v1685_v5 = vld [vmem:[%s3058_s0 + $0x110] sm:$0xf] }
  0xb4   :  { %1269 = vmatmul.bf16.gmra.mxu3 %v1602_v6  ;;  %v2089_v6 = vld [vmem:[%s3058_s0 + $0x12c] sm:$0xf0] }
  0xb5   :  { %v1686_v17 = vor.u32 %v2089_v6, %v1685_v5  ;;  %v2106_v5 = vld [vmem:[%s3058_s0 + $0x1b4] sm:$0xf0]  ;;  %v2102_v6 = vld [vmem:[%s3058_s0 + $0x19c] sm:$0xf] }
  0xb6   :  { %v1025_v9 = vpop.f32.mrf.mxu2  ;;  %v929_v12 = vpop.f32.mrf.mxu0 }
  0xb7   :  { %v1074_v10 = vpop.f32.mrf.mxu3  ;;  %v1026_v11 = vadd.f32 %v1025_v9, %v977_v7  ;;  %v978_v13 = vpop.f32.mrf.mxu1  ;;  %v2085_v7 = vld [vmem:[%s3058_s0 + $0x114] sm:$0xf] }
  0xb8   :  { %v979_v14 = vadd.f32 %v978_v13, %v929_v12  ;;  %v1687_v9 = vld [vmem:[%s3058_s0 + $0x130] sm:$0xf0]  ;;  %v2086_v12 = vld [vmem:[%s3058_s0 + $0x11c] sm:$0xf] }
  0xb9   :  { %v2695_v15 = vadd.f32 %v1074_v10, %v1026_v11  ;;  %v1693_v10 = vld [vmem:[%s3058_s0 + $0x118] sm:$0xf]  ;;  %v1695_v13 = vld [vmem:[%s3058_s0 + $0x138] sm:$0xf0]  ;;  %v1690_v18 = vor.u32 %v2085_v7, %v1687_v9 }
  0xba   :  { %v2090_v11 = vld [vmem:[%s3058_s0 + $0x134] sm:$0xf0]  ;;  %v1698_v23 = vor.u32 %v2086_v12, %v1695_v13  ;;  %v1759_v7 = vld [vmem:[%s3058_s0 + $0x1b8] sm:$0xf0] }
  0xbb   :  { %v1694_v22 = vor.u32 %v2090_v11, %v1693_v10 }
  0xbe   :  { %v1027_v24 = vpop.f32.mrf.mxu2  ;;  %v932_v29 = vpop.f32.mrf.mxu0 }
  0xbf   :  { %v1076_v25 = vpop.f32.mrf.mxu3  ;;  %v1028_v28 = vadd.f32 %v1027_v24, %v979_v14  ;;  %v981_v30 = vpop.f32.mrf.mxu1 }
  0xc0   :  { %v982_v33 = vadd.f32 %v981_v30, %v932_v29 }
  0xc1   :  { %v2721_v34 = vadd.f32 %v1076_v25, %v1028_v28  ;;  %1127 = vmatmul.bf16.gmra.mxu0 %v1622_v26 }
  0xc2   :  { %1176 = vmatmul.bf16.gmra.mxu1 %v1626_v27 }
  0xc3   :  { %1225 = vmatmul.bf16.gmra.mxu2 %v1630_v31 }
  0xc4   :  { %1274 = vmatmul.bf16.gmra.mxu3 %v1634_v32 }
  0xc6   :  { %v1030_v35 = vpop.f32.mrf.mxu2  ;;  %v934_v38 = vpop.f32.mrf.mxu0 }
  0xc7   :  { %v1079_v36 = vpop.f32.mrf.mxu3  ;;  %v1031_v37 = vadd.f32 %v1030_v35, %v982_v33  ;;  %v983_v39 = vpop.f32.mrf.mxu1  ;;  %v1717_v33 = vld [vmem:[%s3058_s0 + $0x150] sm:$0xf] }
  0xc8   :  { %v984_v40 = vadd.f32 %v983_v39, %v934_v38  ;;  %v2097_v35 = vld [vmem:[%s3058_s0 + $0x16c] sm:$0xf0]  ;;  %v1725_v38 = vld [vmem:[%s3058_s0 + $0x158] sm:$0xf] }
  0xc9   :  { %v2723_v41 = vadd.f32 %v1079_v36, %v1031_v37  ;;  %v2093_v36 = vld [vmem:[%s3058_s0 + $0x154] sm:$0xf]  ;;  %v2098_v39 = vld [vmem:[%s3058_s0 + $0x174] sm:$0xf0]  ;;  %v1718_v45 = vor.u32 %v2097_v35, %v1717_v33 }
  0xca   :  { %v1719_v37 = vld [vmem:[%s3058_s0 + $0x170] sm:$0xf0]  ;;  %v1789_v35 = vld [vmem:[%s3058_s0 + $0x1d8] sm:$0xf] }
  0xcb   :  { %v1722_v46 = vor.u32 %v2093_v36, %v1719_v37  ;;  %v1783_v33 = vld [vmem:[%s3058_s0 + $0x1f0] sm:$0xf0]  ;;  %v2114_v36 = vld [vmem:[%s3058_s0 + $0x1f4] sm:$0xf0]  ;;  %v2110_v37 = vld [vmem:[%s3058_s0 + $0x1dc] sm:$0xf] }
  0xce   :  { %v1032_v50 = vpop.f32.mrf.mxu2  ;;  %v937_v56 = vpop.f32.mrf.mxu0 }
  0xcf   :  { %v1081_v51 = vpop.f32.mrf.mxu3  ;;  %v1033_v55 = vadd.f32 %v1032_v50, %v984_v40  ;;  %v986_v57 = vpop.f32.mrf.mxu1  ;;  %v2094_v40 = vld [vmem:[%s3058_s0 + $0x15c] sm:$0xf]  ;;  %v1726_v50 = vor.u32 %v2098_v39, %v1725_v38 }
  0xd0   :  { %v987_v60 = vadd.f32 %v986_v57, %v937_v56  ;;  %v1791_v38 = vld [vmem:[%s3058_s0 + $0x1f8] sm:$0xf0] }
  0xd1   :  { %v2749_v61 = vadd.f32 %v1081_v51, %v1033_v55  ;;  %1132 = vmatmul.bf16.gmra.mxu0 %v1654_v52  ;;  %v1730_v51 = vor.u32 %v2094_v40, %v1727_v42 }
  0xd2   :  { %1181 = vmatmul.bf16.gmra.mxu1 %v1658_v54 }
  0xd3   :  { %1230 = vmatmul.bf16.gmra.mxu2 %v1662_v58 }
  0xd4   :  { %1279 = vmatmul.bf16.gmra.mxu3 %v1666_v59 }
  0xd6   :  { %v1035_v62 = vpop.f32.mrf.mxu2  ;;  %v939_v1 = vpop.f32.mrf.mxu0 }
  0xd7   :  { %v1084_v63 = vpop.f32.mrf.mxu3  ;;  %v1036_v0 = vadd.f32 %v1035_v62, %v987_v60  ;;  %v988_v2 = vpop.f32.mrf.mxu1 }
  0xd8   :  { %v989_v3 = vadd.f32 %v988_v2, %v939_v1  ;;  %v2101_v1 = vld [vmem:[%s3058_s0 + $0x194] sm:$0xf] }
  0xd9   :  { %v2751_v4 = vadd.f32 %v1084_v63, %v1036_v0  ;;  %v1749_v63 = vld [vmem:[%s3058_s0 + $0x190] sm:$0xf]  ;;  %v1751_v2 = vld [vmem:[%s3058_s0 + $0x1b0] sm:$0xf0] }
  0xda   :  { %v2105_v0 = vld [vmem:[%s3058_s0 + $0x1ac] sm:$0xf0]  ;;  %v1754_v12 = vor.u32 %v2101_v1, %v1751_v2 }
  0xdb   :  { %v1750_v11 = vor.u32 %v2105_v0, %v1749_v63 }
  0xde   :  { %v1037_v14 = vpop.f32.mrf.mxu2  ;;  %v942_v20 = vpop.f32.mrf.mxu0 }
  0xdf   :  { %v1086_v16 = vpop.f32.mrf.mxu3  ;;  %v1038_v19 = vadd.f32 %v1037_v14, %v989_v3  ;;  %v991_v21 = vpop.f32.mrf.mxu1  ;;  %v1757_v3 = vld [vmem:[%s3058_s0 + $0x198] sm:$0xf] }
  0xe0   :  { %v992_v24 = vadd.f32 %v991_v21, %v942_v20 }
  0xe1   :  { %v2777_v25 = vadd.f32 %v1086_v16, %v1038_v19  ;;  %1137 = vmatmul.bf16.gmra.mxu0 %v1686_v17  ;;  %v1758_v17 = vor.u32 %v2106_v5, %v1757_v3 }
  0xe2   :  { %1186 = vmatmul.bf16.gmra.mxu1 %v1690_v18  ;;  %v1762_v18 = vor.u32 %v2102_v6, %v1759_v7 }
  0xe3   :  { %1235 = vmatmul.bf16.gmra.mxu2 %v1694_v22 }
  0xe4   :  { %1284 = vmatmul.bf16.gmra.mxu3 %v1698_v23 }
  0xe6   :  { %v1040_v26 = vpop.f32.mrf.mxu2  ;;  %v944_v29 = vpop.f32.mrf.mxu0 }
  0xe7   :  { %v1089_v27 = vpop.f32.mrf.mxu3  ;;  %v1041_v28 = vadd.f32 %v1040_v26, %v992_v24  ;;  %v993_v30 = vpop.f32.mrf.mxu1 }
  0xe8   :  { %v994_v31 = vadd.f32 %v993_v30, %v944_v29  ;;  %v1781_v29 = vld [vmem:[%s3058_s0 + $0x1d0] sm:$0xf] }
  0xe9   :  { %v2779_v32 = vadd.f32 %v1089_v27, %v1041_v28  ;;  %v2113_v30 = vld [vmem:[%s3058_s0 + $0x1ec] sm:$0xf0] }
  0xea   :  { %v1782_v42 = vor.u32 %v2113_v30, %v1781_v29 }
  0xee   :  { %v1042_v43 = vpop.f32.mrf.mxu2  ;;  %v947_v48 = vpop.f32.mrf.mxu0 }
  0xef   :  { %v1091_v44 = vpop.f32.mrf.mxu3  ;;  %v1043_v47 = vadd.f32 %v1042_v43, %v994_v31  ;;  %v996_v49 = vpop.f32.mrf.mxu1  ;;  %v2109_v31 = vld [vmem:[%s3058_s0 + $0x1d4] sm:$0xf] }
  0xf0   :  { %v997_v52 = vadd.f32 %v996_v49, %v947_v48  ;;  %v1786_v43 = vor.u32 %v2109_v31, %v1783_v33  ;;  %v1794_v48 = vor.u32 %v2110_v37, %v1791_v38 }
  0xf1   :  { %v2805_v54 = vadd.f32 %v1091_v44, %v1043_v47  ;;  %1142 = vmatmul.bf16.gmra.mxu0 %v1718_v45  ;;  %v1790_v47 = vor.u32 %v2114_v36, %v1789_v35 }
  0xf2   :  { %1191 = vmatmul.bf16.gmra.mxu1 %v1722_v46 }
  0xf3   :  { %1240 = vmatmul.bf16.gmra.mxu2 %v1726_v50 }
  0xf4   :  { %1289 = vmatmul.bf16.gmra.mxu3 %v1730_v51 }
  0xf6   :  { %v1045_v55 = vpop.f32.mrf.mxu2  ;;  %v949_v58 = vpop.f32.mrf.mxu0 }
  0xf7   :  { %v1094_v56 = vpop.f32.mrf.mxu3  ;;  %v1046_v57 = vadd.f32 %v1045_v55, %v997_v52  ;;  %v998_v59 = vpop.f32.mrf.mxu1 }
  0xf8   :  { %v999_v60 = vadd.f32 %v998_v59, %v949_v58 }
  0xf9   :  { %v2807_v62 = vadd.f32 %v1094_v56, %v1046_v57 }
  0xfe   :  { %v1047_v9 = vpop.f32.mrf.mxu2  ;;  %v952_v14 = vpop.f32.mrf.mxu0 }
  0xff   :  { %v1096_v10 = vpop.f32.mrf.mxu3  ;;  %v1048_v13 = vadd.f32 %v1047_v9, %v999_v60  ;;  %v1001_v16 = vpop.f32.mrf.mxu1 }
 0x100   :  { %v1002_v19 = vadd.f32 %v1001_v16, %v952_v14 }
 0x101   :  { %v2833_v20 = vadd.f32 %v1096_v10, %v1048_v13  ;;  %1147 = vmatmul.bf16.gmra.mxu0 %v1750_v11 }
 0x102   :  { %1196 = vmatmul.bf16.gmra.mxu1 %v1754_v12 }
 0x103   :  { %1245 = vmatmul.bf16.gmra.mxu2 %v1758_v17 }
 0x104   :  { %1294 = vmatmul.bf16.gmra.mxu3 %v1762_v18 }
 0x106   :  { %v1050_v21 = vpop.f32.mrf.mxu2  ;;  %v954_v24 = vpop.f32.mrf.mxu0 }
 0x107   :  { %v1099_v22 = vpop.f32.mrf.mxu3  ;;  %v1051_v23 = vadd.f32 %v1050_v21, %v1002_v19  ;;  %v1003_v26 = vpop.f32.mrf.mxu1 }
 0x108   :  { %v1004_v27 = vadd.f32 %v1003_v26, %v954_v24 }
 0x109   :  { %v2835_v28 = vadd.f32 %v1099_v22, %v1051_v23 }
 0x10e   :  { %v1052_v39 = vpop.f32.mrf.mxu2  ;;  %v957_v45 = vpop.f32.mrf.mxu0 }
 0x10f   :  { %v1101_v40 = vpop.f32.mrf.mxu3  ;;  %v1053_v44 = vadd.f32 %v1052_v39, %v1004_v27  ;;  %v1006_v46 = vpop.f32.mrf.mxu1 }
 0x110   :  { %v1007_v49 = vadd.f32 %v1006_v46, %v957_v45 }
 0x111   :  { %v2861_v50 = vadd.f32 %v1101_v40, %v1053_v44  ;;  %1152 = vmatmul.bf16.gmra.mxu0 %v1782_v42 }
 0x112   :  { %1201 = vmatmul.bf16.gmra.mxu1 %v1786_v43 }
 0x113   :  { %1250 = vmatmul.bf16.gmra.mxu2 %v1790_v47 }
 0x114   :  { %1299 = vmatmul.bf16.gmra.mxu3 %v1794_v48 }
 0x116   :  { %v1055_v51 = vpop.f32.mrf.mxu2  ;;  %v959_v56 = vpop.f32.mrf.mxu0 }
 0x117   :  { %v1104_v52 = vpop.f32.mrf.mxu3  ;;  %v1056_v55 = vadd.f32 %v1055_v51, %v1007_v49  ;;  %v1008_v57 = vpop.f32.mrf.mxu1 }
 0x118   :  { %v1009_v58 = vadd.f32 %v1008_v57, %v959_v56 }
 0x119   :  { %v2863_v59 = vadd.f32 %v1104_v52, %v1056_v55 }
 0x11e   :  { %v1057_v60 = vpop.f32.mrf.mxu2  ;;  %v1118_v1 = vpop.f32.mrf.mxu0 }
 0x11f   :  { %v1106_v63 = vpop.f32.mrf.mxu3  ;;  %v1058_v0 = vadd.f32 %v1057_v60, %v1009_v58  ;;  %v1167_v2 = vpop.f32.mrf.mxu1  ;;  %v1119_v3 = vadd.f32 %v1118_v1, %v2667_v53 }
 0x121   :  { %v2866_v5 = vadd.f32 %v1106_v63, %v1058_v0  ;;  %v1168_v6 = vadd.f32 %v1167_v2, %v1119_v3 }
 0x126   :  { %v1216_v7 = vpop.f32.mrf.mxu2  ;;  %v1120_v11 = vpop.f32.mrf.mxu0 }
 0x127   :  { %v1265_v9 = vpop.f32.mrf.mxu3  ;;  %v1217_v10 = vadd.f32 %v1216_v7, %v1168_v6  ;;  %v1169_v12 = vpop.f32.mrf.mxu1  ;;  %v1121_v13 = vadd.f32 %v1120_v11, %v2693_v8 }
 0x129   :  { %v2869_v14 = vadd.f32 %v1265_v9, %v1217_v10  ;;  %v1170_v16 = vadd.f32 %v1169_v12, %v1121_v13 }
 0x12e   :  { %v1218_v17 = vpop.f32.mrf.mxu2  ;;  %v1123_v21 = vpop.f32.mrf.mxu0 }
 0x12f   :  { %v1267_v18 = vpop.f32.mrf.mxu3  ;;  %v1219_v19 = vadd.f32 %v1218_v17, %v1170_v16  ;;  %v1172_v22 = vpop.f32.mrf.mxu1  ;;  %v1124_v53 = vadd.f32 %v1123_v21, %v2695_v15 }
 0x131   :  { %v2872_v23 = vadd.f32 %v1267_v18, %v1219_v19  ;;  %v1173_v24 = vadd.f32 %v1172_v22, %v1124_v53 }
 0x133   :  { %v1305_v26 = vadd.f32 %v2872_v23, %v2869_v14 }
 0x136   :  { %v1221_v27 = vpop.f32.mrf.mxu2  ;;  %v1125_v8 = vpop.f32.mrf.mxu0 }
 0x137   :  { %v1270_v29 = vpop.f32.mrf.mxu3  ;;  %v1222_v30 = vadd.f32 %v1221_v27, %v1173_v24  ;;  %v1174_v31 = vpop.f32.mrf.mxu1  ;;  %v1126_v33 = vadd.f32 %v1125_v8, %v2721_v34 }
 0x139   :  { %v2877_v35 = vadd.f32 %v1270_v29, %v1222_v30  ;;  %v1175_v36 = vadd.f32 %v1174_v31, %v1126_v33 }
 0x13b   :  { %v1306_v37 = vadd.f32 %v1305_v26, %v2877_v35 }
 0x13e   :  { %v1223_v38 = vpop.f32.mrf.mxu2  ;;  %v1128_v40 = vpop.f32.mrf.mxu0 }
 0x13f   :  { %v1272_v15 = vpop.f32.mrf.mxu3  ;;  %v1224_v39 = vadd.f32 %v1223_v38, %v1175_v36  ;;  %v1177_v42 = vpop.f32.mrf.mxu1  ;;  %v1129_v43 = vadd.f32 %v1128_v40, %v2723_v41 }
 0x141   :  { %v2881_v44 = vadd.f32 %v1272_v15, %v1224_v39  ;;  %v1178_v45 = vadd.f32 %v1177_v42, %v1129_v43 }
 0x143   :  { %v1307_v46 = vadd.f32 %v1306_v37, %v2881_v44 }
 0x146   :  { %v1226_v47 = vpop.f32.mrf.mxu2  ;;  %v1130_v49 = vpop.f32.mrf.mxu0 }
 0x147   :  { %v1275_v48 = vpop.f32.mrf.mxu3  ;;  %v1227_v34 = vadd.f32 %v1226_v47, %v1178_v45  ;;  %v1179_v51 = vpop.f32.mrf.mxu1  ;;  %v1131_v55 = vadd.f32 %v1130_v49, %v2749_v61 }
 0x149   :  { %v2884_v52 = vadd.f32 %v1275_v48, %v1227_v34  ;;  %v1180_v57 = vadd.f32 %v1179_v51, %v1131_v55 }
 0x14b   :  { %v1308_v56 = vadd.f32 %v1307_v46, %v2884_v52 }
 0x14e   :  { %v1228_v58 = vpop.f32.mrf.mxu2  ;;  %v1133_v63 = vpop.f32.mrf.mxu0 }
 0x14f   :  { %v1277_v60 = vpop.f32.mrf.mxu3  ;;  %v1229_v41 = vadd.f32 %v1228_v58, %v1180_v57  ;;  %v1182_v0 = vpop.f32.mrf.mxu1  ;;  %v1134_v2 = vadd.f32 %v1133_v63, %v2751_v4 }
 0x151   :  { %v2888_v1 = vadd.f32 %v1277_v60, %v1229_v41  ;;  %v1183_v6 = vadd.f32 %v1182_v0, %v1134_v2 }
 0x153   :  { %v1309_v3 = vadd.f32 %v1308_v56, %v2888_v1 }
 0x156   :  { %v1231_v7 = vpop.f32.mrf.mxu2  ;;  %v1135_v11 = vpop.f32.mrf.mxu0 }
 0x157   :  { %v1280_v9 = vpop.f32.mrf.mxu3  ;;  %v1232_v10 = vadd.f32 %v1231_v7, %v1183_v6  ;;  %v1184_v61 = vpop.f32.mrf.mxu1  ;;  %v1136_v13 = vadd.f32 %v1135_v11, %v2777_v25 }
 0x159   :  { %v2892_v12 = vadd.f32 %v1280_v9, %v1232_v10  ;;  %v1185_v17 = vadd.f32 %v1184_v61, %v1136_v13 }
 0x15b   :  { %v1310_v16 = vadd.f32 %v1309_v3, %v2892_v12 }
 0x15e   :  { %v1233_v18 = vpop.f32.mrf.mxu2  ;;  %v1138_v22 = vpop.f32.mrf.mxu0 }
 0x15f   :  { %v1282_v19 = vpop.f32.mrf.mxu3  ;;  %v1234_v21 = vadd.f32 %v1233_v18, %v1185_v17  ;;  %v1187_v4 = vpop.f32.mrf.mxu1  ;;  %v1139_v24 = vadd.f32 %v1138_v22, %v2779_v32 }
 0x161   :  { %v2896_v53 = vadd.f32 %v1282_v19, %v1234_v21  ;;  %v1188_v27 = vadd.f32 %v1187_v4, %v1139_v24 }
 0x163   :  { %v1311_v26 = vadd.f32 %v1310_v16, %v2896_v53 }
 0x166   :  { %v1236_v29 = vpop.f32.mrf.mxu2  ;;  %v1140_v31 = vpop.f32.mrf.mxu0 }
 0x167   :  { %v1285_v30 = vpop.f32.mrf.mxu3  ;;  %v1237_v8 = vadd.f32 %v1236_v29, %v1188_v27  ;;  %v1189_v25 = vpop.f32.mrf.mxu1  ;;  %v1141_v36 = vadd.f32 %v1140_v31, %v2805_v54 }
 0x169   :  { %v2900_v33 = vadd.f32 %v1285_v30, %v1237_v8  ;;  %v1190_v38 = vadd.f32 %v1189_v25, %v1141_v36  ;;  %v2233_v30 = vmov 128.0  }
 0x16a   :  { %2229 = vrcp.f32 %v2233_v30 }
 0x16b   :  { %v1312_v37 = vadd.f32 %v1311_v26, %v2900_v33 }
 0x16e   :  { %v1238_v15 = vpop.f32.mrf.mxu2  ;;  %v1143_v42 = vpop.f32.mrf.mxu0 }
 0x16f   :  { %v1287_v39 = vpop.f32.mrf.mxu3  ;;  %v1239_v40 = vadd.f32 %v1238_v15, %v1190_v38  ;;  %v1192_v32 = vpop.f32.mrf.mxu1  ;;  %v1144_v45 = vadd.f32 %v1143_v42, %v2807_v62 }
 0x170   :  { %v2230_v38 = vpop.eup %2229 }
 0x171   :  { %v2904_v43 = vadd.f32 %v1287_v39, %v1239_v40  ;;  %v1193_v47 = vadd.f32 %v1192_v32, %v1144_v45  ;;  %v1327_v32 = vmul.f32 128.0, %v2230_v38  ;;  %vm1331_vm0 = vweird.f32 %v2230_v38 }
 0x173   :  { %v1313_v46 = vadd.f32 %v1312_v37, %v2904_v43 }
 0x176   :  { %v1241_v48 = vpop.f32.mrf.mxu2  ;;  %v1145_v51 = vpop.f32.mrf.mxu0 }
 0x177   :  { %v1290_v34 = vpop.f32.mrf.mxu3  ;;  %v1242_v49 = vadd.f32 %v1241_v48, %v1193_v47  ;;  %v1194_v54 = vpop.f32.mrf.mxu1  ;;  %v1146_v56 = vadd.f32 %v1145_v51, %v2833_v20  ;;  %v1328_v47 = vsub.f32 1.0, %v1327_v32 }
 0x179   :  { %v2908_v55 = vadd.f32 %v1290_v34, %v1242_v49  ;;  %v1195_v58 = vadd.f32 %v1194_v54, %v1146_v56  ;;  %v1329_v49 = vmul.f32 %v2230_v38, %v1328_v47 }
 0x17b   :  { %v1314_v57 = vadd.f32 %v1313_v46, %v2908_v55  ;;  %v1330_v56 = vadd.f32 %v2230_v38, %v1329_v49 }
 0x17e   :  { %v1243_v60 = vpop.f32.mrf.mxu2  ;;  %v1148_v0 = vpop.f32.mrf.mxu0 }
 0x17f   :  { %v1292_v41 = vpop.f32.mrf.mxu3  ;;  %v1244_v63 = vadd.f32 %v1243_v60, %v1195_v58  ;;  %v1197_v62 = vpop.f32.mrf.mxu1  ;;  %v1149_v3 = vadd.f32 %v1148_v0, %v2835_v28 }
 0x181   :  { %v2912_v2 = vadd.f32 %v1292_v41, %v1244_v63  ;;  %v1198_v7 = vadd.f32 %v1197_v62, %v1149_v3 }
 0x183   :  { %v1315_v6 = vadd.f32 %v1314_v57, %v2912_v2 }
 0x186   :  { %v1246_v9 = vpop.f32.mrf.mxu2  ;;  %v1150_v61 = vpop.f32.mrf.mxu0 }
 0x187   :  { %v1295_v10 = vpop.f32.mrf.mxu3  ;;  %v1247_v11 = vadd.f32 %v1246_v9, %v1198_v7  ;;  %v1199_v20 = vpop.f32.mrf.mxu1  ;;  %v1151_v16 = vadd.f32 %v1150_v61, %v2861_v50 }
 0x189   :  { %v1296_v13 = vadd.f32 %v1295_v10, %v1247_v11  ;;  %v1200_v18 = vadd.f32 %v1199_v20, %v1151_v16 }
 0x18b   :  { %v1316_v17 = vadd.f32 %v1315_v6, %v1296_v13 }
 0x18e   :  { %v1248_v19 = vpop.f32.mrf.mxu2  ;;  %v1153_v4 = vpop.f32.mrf.mxu0 }
 0x18f   :  { %v1297_v21 = vpop.f32.mrf.mxu3  ;;  %v1249_v22 = vadd.f32 %v1248_v19, %v1200_v18  ;;  %v1154_v28 = vadd.f32 %v1153_v4, %v2863_v59  ;;  %v1202_v26 = vpop.f32.mrf.mxu1 }
 0x191   :  { %v1298_v24 = vadd.f32 %v1297_v21, %v1249_v22  ;;  %v1203_v29 = vadd.f32 %v1202_v26, %v1154_v28 }
 0x193   :  { %v1317_v27 = vadd.f32 %v1316_v17, %v1298_v24 }
 0x196   :  { %v1251_v8 = vpop.f32.mrf.mxu2  ;;  %v1155_v36 = vpop.f32.mrf.mxu0 }
 0x197   :  { %v1300_v31 = vpop.f32.mrf.mxu3  ;;  %v1252_v25 = vadd.f32 %v1251_v8, %v1203_v29  ;;  %v1156_v50 = vadd.f32 %v1155_v36, %v2866_v5  ;;  %v1204_v39 = vpop.f32.mrf.mxu1  ;;  %v1332_v5 = vsel %vm1331_vm0, %v2230_v38, %v1330_v56 }
 0x199   :  { %v1301_v37 = vadd.f32 %v1300_v31, %v1252_v25  ;;  %v1205_v40 = vadd.f32 %v1204_v39, %v1156_v50 }
 0x19b   :  { %v1318_v15 = vadd.f32 %v1317_v27, %v1301_v37 }
 0x19e   :  { %v1253_v42 = vpop.f32.mrf.mxu2 }
 0x19f   :  { %v1254_v45 = vadd.f32 %v1253_v42, %v1205_v40  ;;  %v1302_v59 = vpop.f32.mrf.mxu3 }
 0x1a1   :  { %v1303_v46 = vadd.f32 %v1302_v59, %v1254_v45 }
 0x1a3   :  { %v1319_v48 = vadd.f32 %v1318_v15, %v1303_v46 }
 0x1a5   :  { %v1320_v34 = vrot.slane %v1319_v48, 4 }
 0x1a7   :  { %v1321_v51 = vadd.f32 %v1320_v34, %v1319_v48 }
 0x1a9   :  { %v1322_v54 = vrot.slane %v1321_v51, 2 }
 0x1ab   :  { %v1323_v57 = vadd.f32 %v1322_v54, %v1321_v51 }
 0x1ad   :  { %v1324_v58 = vrot.slane %v1323_v57, 1 }
 0x1af   :  { %v1325_v60 = vadd.f32 %v1324_v58, %v1323_v57 }
 0x1b1   :  { %v1333_v41 = vmul.f32 %v1332_v5, %v1325_v60 }
 0x1b3   :  { %v2920_v63 = vsub.f32 %v2869_v14, %v1333_v41  ;;  %v2923_v0 = vsub.f32 %v2872_v23, %v1333_v41  ;;  %v2926_v62 = vsub.f32 %v2877_v35, %v1333_v41  ;;  %v2929_v3 = vsub.f32 %v2881_v44, %v1333_v41 }
 0x1b4   :  { %v2932_v6 = vsub.f32 %v2884_v52, %v1333_v41  ;;  %v2935_v7 = vsub.f32 %v2888_v1, %v1333_v41  ;;  %v2938_v9 = vsub.f32 %v2892_v12, %v1333_v41  ;;  %v2941_v14 = vsub.f32 %v2896_v53, %v1333_v41 }
 0x1b5   :  { %v2944_v23 = vsub.f32 %v2900_v33, %v1333_v41  ;;  %v2947_v35 = vsub.f32 %v2904_v43, %v1333_v41  ;;  %v2950_v44 = vsub.f32 %v2908_v55, %v1333_v41  ;;  %v2953_v52 = vsub.f32 %v2912_v2, %v1333_v41 }
 0x1b6   :  { %v2955_v1 = vsub.f32 %v1296_v13, %v1333_v41  ;;  %v2957_v10 = vsub.f32 %v1298_v24, %v1333_v41  ;;  %v2959_v12 = vsub.f32 %v1301_v37, %v1333_v41  ;;  %v2961_v53 = vsub.f32 %v1303_v46, %v1333_v41 }
 0x1b7   :  { %v1350_v33 = vmul.f32 %v2920_v63, %v2920_v63  ;;  %v1351_v43 = vmul.f32 %v2923_v0, %v2923_v0  ;;  %v1352_v55 = vmul.f32 %v2926_v62, %v2926_v62  ;;  %v1353_v2 = vmul.f32 %v2929_v3, %v2929_v3 }
 0x1b8   :  { %v1354_v20 = vmul.f32 %v2932_v6, %v2932_v6  ;;  %v1355_v16 = vmul.f32 %v2935_v7, %v2935_v7  ;;  %v1356_v18 = vmul.f32 %v2938_v9, %v2938_v9  ;;  %v1357_v21 = vmul.f32 %v2941_v14, %v2941_v14 }
 0x1b9   :  { %v1366_v11 = vadd.f32 %v1351_v43, %v1350_v33  ;;  %v1358_v4 = vmul.f32 %v2944_v23, %v2944_v23  ;;  %v1359_v28 = vmul.f32 %v2947_v35, %v2947_v35  ;;  %v1360_v27 = vmul.f32 %v2950_v44, %v2950_v44 }
 0x1ba   :  { %v1361_v30 = vmul.f32 %v2953_v52, %v2953_v52  ;;  %v1362_v31 = vmul.f32 %v2955_v1, %v2955_v1  ;;  %v1363_v36 = vmul.f32 %v2957_v10, %v2957_v10  ;;  %v1364_v50 = vmul.f32 %v2959_v12, %v2959_v12 }
 0x1bb   :  { %v1367_v61 = vadd.f32 %v1366_v11, %v1352_v55  ;;  %v1365_v15 = vmul.f32 %v2961_v53, %v2961_v53  ;;  %v2227_v55 = vld [vmem:[%s3059_s2] ss:$0 sm:$0xff] }
 0x1bd   :  { %v1368_v13 = vadd.f32 %v1367_v61, %v1353_v2 }
 0x1bf   :  { %v1369_v17 = vadd.f32 %v1368_v13, %v1354_v20 }
 0x1c1   :  { %v1370_v19 = vadd.f32 %v1369_v17, %v1355_v16 }
 0x1c3   :  { %v1371_v22 = vadd.f32 %v1370_v19, %v1356_v18 }
 0x1c5   :  { %v1372_v24 = vadd.f32 %v1371_v22, %v1357_v21 }
 0x1c7   :  { %v1373_v26 = vadd.f32 %v1372_v24, %v1358_v4 }
 0x1c9   :  { %v1374_v29 = vadd.f32 %v1373_v26, %v1359_v28 }
 0x1cb   :  { %v1375_v8 = vadd.f32 %v1374_v29, %v1360_v27 }
 0x1cd   :  { %v1376_v25 = vadd.f32 %v1375_v8, %v1361_v30 }
 0x1cf   :  { %v1377_v37 = vadd.f32 %v1376_v25, %v1362_v31 }
 0x1d1   :  { %v1378_v38 = vadd.f32 %v1377_v37, %v1363_v36 }
 0x1d3   :  { %v1379_v39 = vadd.f32 %v1378_v38, %v1364_v50 }
 0x1d5   :  { %v1380_v40 = vadd.f32 %v1379_v39, %v1365_v15 }
 0x1d7   :  { %v1381_v42 = vrot.slane %v1380_v40, 4 }
 0x1d9   :  { %v1382_v32 = vadd.f32 %v1381_v42, %v1380_v40 }
 0x1db   :  { %v1383_v45 = vrot.slane %v1382_v32, 2 }
 0x1dd   :  { %v1384_v59 = vadd.f32 %v1383_v45, %v1382_v32 }
 0x1df   :  { %v1385_v46 = vrot.slane %v1384_v59, 1 }
 0x1e1   :  { %v1386_v47 = vadd.f32 %v1385_v46, %v1384_v59 }
 0x1e3   :  { %v1387_v48 = vmul.f32 %v1386_v47, %v1332_v5 }
 0x1e5   :  { %v1388_v34 = vadd.f32 1e-05, %v1387_v48 }
 0x1e7   :  { %2231 = vrsqrt.f32 %v1388_v34  ;;  %vm1395_vm2 = vweird.f32 %v1388_v34 }
 0x1ed   :  { %v2232_v49 = vpop.eup %2231 }
 0x1ee   :  { %v1390_v51 = vmul.f32 %v2232_v49, %v1388_v34  ;;  %vm1396_vm1 = vweird.f32 %v2232_v49 }
 0x1ef   :  { %vm1397_vm3 = vmor %vm1395_vm2, %vm1396_vm1 }
 0x1f0   :  { %v1391_v54 = vmul.f32 %v2232_v49, %v1390_v51 }
 0x1f2   :  { %v1392_v56 = vmul.f32 0.5, %v1391_v54 }
 0x1f4   :  { %v1393_v57 = vsub.f32 1.5, %v1392_v56 }
 0x1f6   :  { %v1394_v58 = vmul.f32 %v2232_v49, %v1393_v57 }
 0x1f8   :  { %v1398_v60 = vsel %vm1397_vm3, %v2232_v49, %v1394_v58 }
 0x1f9   :  { %v1399_v41 = vmul.f32 %v1398_v60, %v2920_v63  ;;  %v1400_v33 = vmul.f32 %v1398_v60, %v2923_v0  ;;  %v1401_v43 = vmul.f32 %v1398_v60, %v2926_v62  ;;  %v1402_v5 = vmul.f32 %v1398_v60, %v2929_v3 }
 0x1fa   :  { %v1403_v11 = vmul.f32 %v1398_v60, %v2932_v6  ;;  %v1404_v2 = vmul.f32 %v1398_v60, %v2935_v7  ;;  %v1405_v61 = vmul.f32 %v1398_v60, %v2938_v9  ;;  %v1406_v20 = vmul.f32 %v1398_v60, %v2941_v14 }
 0x1fb   :  { %v1407_v63 = vmul.f32 %v1398_v60, %v2944_v23  ;;  %v1408_v0 = vmul.f32 %v1398_v60, %v2947_v35  ;;  %v1409_v62 = vmul.f32 %v1398_v60, %v2950_v44  ;;  %v1410_v3 = vmul.f32 %v1398_v60, %v2953_v52  ;;  %v2228_v23 = vld [vmem:[%s3060_s3] ss:$0 sm:$0xff] }
 0x1fc   :  { %v1411_v13 = vmul.f32 %v1398_v60, %v2955_v1  ;;  %v1412_v16 = vmul.f32 %v1398_v60, %v2957_v10  ;;  %v1413_v6 = vmul.f32 %v1398_v60, %v2959_v12  ;;  %v1414_v7 = vmul.f32 %v1398_v60, %v2961_v53 }
 0x1fd   :  { %v1419_v17 = vmul.f32 %v2227_v55, %v1399_v41  ;;  %v1420_v9 = vmul.f32 %v2227_v55, %v1400_v33  ;;  %v1421_v18 = vmul.f32 %v2227_v55, %v1401_v43  ;;  %v1422_v14 = vmul.f32 %v2227_v55, %v1402_v5 }
 0x1fe   :  { %v1423_v35 = vmul.f32 %v2227_v55, %v1403_v11  ;;  %v1424_v44 = vmul.f32 %v2227_v55, %v1404_v2  ;;  %v1425_v19 = vmul.f32 %v2227_v55, %v1405_v61  ;;  %v1426_v52 = vmul.f32 %v2227_v55, %v1406_v20 }
 0x1ff   :  { %v1427_v21 = vmul.f32 %v2227_v55, %v1407_v63  ;;  %v1428_v1 = vmul.f32 %v2227_v55, %v1408_v0  ;;  %v1429_v22 = vmul.f32 %v2227_v55, %v1409_v62  ;;  %v1430_v10 = vmul.f32 %v2227_v55, %v1410_v3 }
 0x200   :  { %v1431_v4 = vmul.f32 %v2227_v55, %v1411_v13  ;;  %v1432_v12 = vmul.f32 %v2227_v55, %v1412_v16  ;;  %v1433_v24 = vmul.f32 %v2227_v55, %v1413_v6  ;;  %v1434_v53 = vmul.f32 %v2227_v55, %v1414_v7 }
 0x201   :  { %v1439_v28 = vadd.f32 %v2228_v23, %v1419_v17  ;;  %v1440_v26 = vadd.f32 %v2228_v23, %v1420_v9  ;;  %v1441_v27 = vadd.f32 %v2228_v23, %v1421_v18  ;;  %v1442_v29 = vadd.f32 %v2228_v23, %v1422_v14 }
 0x202   :  { %v1443_v30 = vadd.f32 %v2228_v23, %v1423_v35  ;;  %v1444_v8 = vadd.f32 %v2228_v23, %v1424_v44  ;;  %v1445_v31 = vadd.f32 %v2228_v23, %v1425_v19  ;;  %v1446_v25 = vadd.f32 %v2228_v23, %v1426_v52 }
 0x203   :  { %v1447_v36 = vadd.f32 %v2228_v23, %v1427_v21  ;;  %v1448_v37 = vadd.f32 %v2228_v23, %v1428_v1  ;;  %v1449_v50 = vadd.f32 %v2228_v23, %v1429_v22  ;;  %v1450_v38 = vadd.f32 %v2228_v23, %v1430_v10 }
 0x204   :  { %v1451_v15 = vadd.f32 %v2228_v23, %v1431_v4  ;;  %v1452_v39 = vadd.f32 %v2228_v23, %v1432_v12  ;;  %v1453_v40 = vadd.f32 %v2228_v23, %v1433_v24  ;;  %v1454_v42 = vadd.f32 %v2228_v23, %v1434_v53 }
 0x205   :  { %vm1455_vm4 = vcmp.gt.f32.partialorder %v1439_v28, 0.0  ;;  %vm1456_vm5 = vcmp.gt.f32.partialorder %v1440_v26, 0.0  ;;  %vm1457_vm6 = vcmp.gt.f32.partialorder %v1441_v27, 0.0  ;;  %vm1458_vm7 = vcmp.gt.f32.partialorder %v1442_v29, 0.0 }
 0x206   :  { %vm1459_vm8 = vcmp.gt.f32.partialorder %v1443_v30, 0.0  ;;  %vm1460_vm9 = vcmp.gt.f32.partialorder %v1444_v8, 0.0  ;;  %vm1461_vm10 = vcmp.gt.f32.partialorder %v1445_v31, 0.0  ;;  %vm1462_vm11 = vcmp.gt.f32.partialorder %v1446_v25, 0.0 }
 0x207   :  { %vm1463_vm12 = vcmp.gt.f32.partialorder %v1447_v36, 0.0  ;;  %vm1464_vm13 = vcmp.gt.f32.partialorder %v1448_v37, 0.0  ;;  %vm1465_vm14 = vcmp.gt.f32.partialorder %v1449_v50, 0.0  ;;  %vm1466_vm15 = vcmp.gt.f32.partialorder %v1450_v38, 0.0 }
 0x208   :  { %vm1467_vm0 = vcmp.gt.f32.partialorder %v1451_v15, 0.0  ;;  %vm1468_vm1 = vcmp.gt.f32.partialorder %v1452_v39, 0.0  ;;  %vm1469_vm2 = vcmp.gt.f32.partialorder %v1453_v40, 0.0  ;;  %vm1470_vm3 = vcmp.gt.f32.partialorder %v1454_v42, 0.0 }
 0x209   :  { %v1471_v32 = vmul.f32 0.2, %v1439_v28  ;;  %v1472_v45 = vmul.f32 0.2, %v1440_v26  ;;  %v1473_v59 = vmul.f32 0.2, %v1441_v27 }
 0x20a   :  { %v1474_v46 = vmul.f32 0.2, %v1442_v29  ;;  %v1475_v47 = vmul.f32 0.2, %v1443_v30  ;;  %v1476_v48 = vmul.f32 0.2, %v1444_v8 }
 0x20b   :  { %v1477_v34 = vmul.f32 0.2, %v1445_v31  ;;  %v1478_v49 = vmul.f32 0.2, %v1446_v25  ;;  %v1479_v51 = vmul.f32 0.2, %v1447_v36  ;;  %v1487_v54 = vsel %vm1455_vm4, %v1439_v28, %v1471_v32 }
 0x20c   :  { %v1480_v56 = vmul.f32 0.2, %v1448_v37  ;;  %v1481_v57 = vmul.f32 0.2, %v1449_v50  ;;  %v1482_v58 = vmul.f32 0.2, %v1450_v38  ;;  %v1488_v60 = vsel %vm1456_vm5, %v1440_v26, %v1472_v45 }
 0x20d   :  { %v1483_v41 = vmul.f32 0.2, %v1451_v15  ;;  %v1484_v33 = vmul.f32 0.2, %v1452_v39  ;;  %v1485_v43 = vmul.f32 0.2, %v1453_v40  ;;  %v1489_v5 = vsel %vm1457_vm6, %v1441_v27, %v1473_v59 }
 0x20e   :  { %v1486_v55 = vmul.f32 0.2, %v1454_v42  ;;  %v1490_v11 = vsel %vm1458_vm7, %v1442_v29, %v1474_v46  ;;  %v1491_v2 = vsel %vm1459_vm8, %v1443_v30, %v1475_v47  ;;  %v1492_v61 = vsel %vm1460_vm9, %v1444_v8, %v1476_v48 }
 0x20f   :  { %v1493_v20 = vsel %vm1461_vm10, %v1445_v31, %v1477_v34  ;;  %v1494_v63 = vsel %vm1462_vm11, %v1446_v25, %v1478_v49  ;;  %v1495_v0 = vsel %vm1463_vm12, %v1447_v36, %v1479_v51  ;;  %v1496_v62 = vsel %vm1464_vm13, %v1448_v37, %v1480_v56 }
 0x210   :  { %v1497_v3 = vsel %vm1465_vm14, %v1449_v50, %v1481_v57  ;;  %v1498_v13 = vsel %vm1466_vm15, %v1450_v38, %v1482_v58  ;;  %v1499_v16 = vsel %vm1467_vm0, %v1451_v15, %v1483_v41  ;;  %v1500_v6 = vsel %vm1468_vm1, %v1452_v39, %v1484_v33 }
 0x211   :  { %v1501_v7 = vsel %vm1469_vm2, %v1453_v40, %v1485_v43  ;;  %v1502_v17 = vsel %vm1470_vm3, %v1454_v42, %v1486_v55  ;;  %v2182_v9 = vpack.c.bf16 %v1488_v60, %v1487_v54  ;;  %v2187_v18 = vpack.c.bf16 %v1490_v11, %v1489_v5 }
 0x212   :  { %v2192_v14 = vpack.c.bf16 %v1492_v61, %v1491_v2  ;;  %v2197_v23 = vpack.c.bf16 %v1494_v63, %v1493_v20  ;;  %v2202_v35 = vpack.c.bf16 %v1496_v62, %v1495_v0  ;;  %v2207_v44 = vpack.c.bf16 %v1498_v13, %v1497_v3 }
 0x213   :  { %2183 = vst [vmem:[%s3061_s4] sm:$0xff] %v2182_v9   ;;  %v2212_v19 = vpack.c.bf16 %v1500_v6, %v1499_v16  ;;  %v2217_v52 = vpack.c.bf16 %v1502_v17, %v1501_v7 }
 0x214   :  { %2219 = vst [vmem:[%s3061_s4 + $0x8] sm:$0xff] %v2187_v18  }
 0x215   :  { %2220 = vst [vmem:[%s3061_s4 + $0x10] sm:$0xff] %v2192_v14  }
 0x216   :  { %2221 = vst [vmem:[%s3061_s4 + $0x18] sm:$0xff] %v2197_v23  }
 0x217   :  { %2222 = vst [vmem:[%s3061_s4 + $0x20] sm:$0xff] %v2202_v35  }
 0x218   :  { %2223 = vst [vmem:[%s3061_s4 + $0x28] sm:$0xff] %v2207_v44  }
 0x219   :  { %2224 = vst [vmem:[%s3061_s4 + $0x30] sm:$0xff] %v2212_v19  }
 0x21a   :  { %2225 = vst [vmem:[%s3061_s4 + $0x38] sm:$0xff] %v2217_v52  }

// kernel: _lambda_.7
= control target key start
LH: loop header
LB: loop body
LE: loop exit
PB: predicated region body
PF: predicated region fallthrough
CT: control target
= control target key end

     0   :  { %s5090_s15 = smov 0   ;;  %s5092_s16 = smov 0   ;;  %s6026_s0 = inlined_call_operand.vmem [shape: bf16[32,2048], index: 0, kind: input, shape index: {}]   ;;  %s6027_s1 = inlined_call_operand.vmem [shape: bf16[2048,256], index: 1, kind: input, shape index: {}]   ;;  %s6028_s2 = inlined_call_operand.vmem [shape: f32[1,256], index: 2, kind: input, shape index: {}]   ;;  %s6029_s3 = inlined_call_operand.vmem [shape: f32[1,256], index: 3, kind: input, shape index: {}]   ;;  %s6030_s4 = inlined_call_operand.vmem [shape: bf16[32,256], index: 4, kind: output, shape index: {}]  }
   0x1   :  { %s5094_s17 = smov 0   ;;  %s5096_s18 = smov 0  }
   0x2   :  { %s5098_s19 = smov 0  }
   0x3 LB: > { %s23_s20 = sadd.s32 1, %s5058_s18  ;;  %s4152_s21 = sadd.s32 4294967295, %s5062_s19   ;;  %s5062_s19 = sphi %s5098_s19, %s14_s19   ;;  %s5058_s18 = sphi %s5096_s18, %s6035_s18   ;;  %s5054_s17 = sphi %s5094_s17, %s6034_s17   ;;  %s5050_s16 = sphi %s5092_s16, %s6033_s16   ;;  %s5046_s15 = sphi %s5090_s15, %s6032_s15  }
   0x4   : > { %p24_p0 = scmp.ge.s32.totalorder %s23_s20, 2  ;;  %p66_p1 = scmp.ne.s32.totalorder %s5050_s16, %s5046_s15 }
   0x5   : > { %p67_p2 = scmp.eq.s32.totalorder %s5062_s19, 0  ;;  %p150_p4 = scmp.eq.s32.totalorder %s4152_s21, 1 }
   0x6   : > { %s6037_s20 = smov (%p24_p0, %s23_s20), 0  ;;  %s59_s23 = sadd.s32 1, %s5050_s16 }
   0x7   : > { %p68_p3 = por %p67_p2, %p66_p1  ;;  %s56_s22 = ssub.s32 %s5058_s18, %s6037_s20 }
   0x8   : > { %p57_p5 = scmp.eq.s32.totalorder %s56_s22, 0  ;;  %p5125_p6 = por %p150_p4, %p66_p1 }
   0x9   : > { %p4156_p7 = scmp.ge.s32.totalorder %s5062_s19, 2 }
   0xa   : > { %s5130_s25 = scalar_select %p57_p5, %s5050_s16, %s59_s23  }
   0xb   : > { %182 = sbr.rel (%p4156_p7) target bundleno = 276 (0x114), region = 20 }
  0x10   : > { %185 = sbr.rel (!%p68_p3) target bundleno = 276 (0x114), region = 24  ;;  %s187_s26 = sand.u32 (%p68_p3), 1, %s5050_s16  }
  0x11   : > { %s4158_s27 = sshll.u32 (%p68_p3), %s5058_s18, 2  ;;  %s4157_s28 = sshll.u32 (%p68_p3), %s187_s26, 10 }
  0x12   : > { %s5138_s5 = scalar_lea.vmem (%p68_p3), %s6027_s1, %s4158_s27  ;;  %s5142_s6 = scalar_lea.vmem (%p68_p3), [#allocation2], %s4157_s28 }
  0x13   : > { %v208_v0 = vld [vmem:[%s5138_s5] sm:$0xf] (%p68_p3)  ;;  %v210_v1 = vld [vmem:[%s5138_s5 + $0x8] sm:$0xf] (%p68_p3)  ;;  %v212_v2 = vld [vmem:[%s5138_s5 + $0x10] sm:$0xf] (%p68_p3) }
  0x14   : > { %209 = vst [vmem:[%s5142_s6] sm:$0xf] (%p68_p3), %v208_v0  ;;  %v214_v3 = vld [vmem:[%s5138_s5 + $0x18] sm:$0xf] (%p68_p3)  ;;  %v216_v4 = vld [vmem:[%s5138_s5 + $0x20] sm:$0xf] (%p68_p3) }
  0x15   : > { %211 = vst [vmem:[%s5142_s6 + $0x4] sm:$0xf] %v210_v1  ;;  %v218_v5 = vld [vmem:[%s5138_s5 + $0x28] sm:$0xf]  ;;  %v220_v6 = vld [vmem:[%s5138_s5 + $0x30] sm:$0xf] }
  0x16   : > { %213 = vst [vmem:[%s5142_s6 + $0x8] sm:$0xf] %v212_v2  ;;  %v222_v7 = vld [vmem:[%s5138_s5 + $0x38] sm:$0xf]  ;;  %v224_v8 = vld [vmem:[%s5138_s5 + $0x40] sm:$0xf] }
  0x17   : > { %215 = vst [vmem:[%s5142_s6 + $0xc] sm:$0xf] %v214_v3  ;;  %v226_v9 = vld [vmem:[%s5138_s5 + $0x48] sm:$0xf]  ;;  %v228_v10 = vld [vmem:[%s5138_s5 + $0x50] sm:$0xf] }
  0x18   : > { %217 = vst [vmem:[%s5142_s6 + $0x10] sm:$0xf] %v216_v4  ;;  %v230_v11 = vld [vmem:[%s5138_s5 + $0x58] sm:$0xf]  ;;  %v232_v12 = vld [vmem:[%s5138_s5 + $0x60] sm:$0xf] }
  0x19   : > { %219 = vst [vmem:[%s5142_s6 + $0x14] sm:$0xf] %v218_v5  ;;  %v234_v13 = vld [vmem:[%s5138_s5 + $0x68] sm:$0xf]  ;;  %v236_v14 = vld [vmem:[%s5138_s5 + $0x70] sm:$0xf] }
  0x1a   : > { %221 = vst [vmem:[%s5142_s6 + $0x18] sm:$0xf] %v220_v6  ;;  %v238_v15 = vld [vmem:[%s5138_s5 + $0x78] sm:$0xf]  ;;  %v240_v16 = vld [vmem:[%s5138_s5 + $0x80] sm:$0xf] }
  0x1b   : > { %223 = vst [vmem:[%s5142_s6 + $0x1c] sm:$0xf] %v222_v7  ;;  %v242_v17 = vld [vmem:[%s5138_s5 + $0x88] sm:$0xf]  ;;  %v244_v18 = vld [vmem:[%s5138_s5 + $0x90] sm:$0xf] }
  0x1c   : > { %225 = vst [vmem:[%s5142_s6 + $0x20] sm:$0xf] %v224_v8  ;;  %v246_v19 = vld [vmem:[%s5138_s5 + $0x98] sm:$0xf]  ;;  %v248_v20 = vld [vmem:[%s5138_s5 + $0xa0] sm:$0xf] }
  0x1d   : > { %227 = vst [vmem:[%s5142_s6 + $0x24] sm:$0xf] %v226_v9  ;;  %v250_v21 = vld [vmem:[%s5138_s5 + $0xa8] sm:$0xf]  ;;  %v252_v22 = vld [vmem:[%s5138_s5 + $0xb0] sm:$0xf] }
  0x1e   : > { %229 = vst [vmem:[%s5142_s6 + $0x28] sm:$0xf] %v228_v10  ;;  %v254_v23 = vld [vmem:[%s5138_s5 + $0xb8] sm:$0xf]  ;;  %v256_v24 = vld [vmem:[%s5138_s5 + $0xc0] sm:$0xf] }
  0x1f   : > { %231 = vst [vmem:[%s5142_s6 + $0x2c] sm:$0xf] %v230_v11  ;;  %v258_v25 = vld [vmem:[%s5138_s5 + $0xc8] sm:$0xf]  ;;  %v260_v26 = vld [vmem:[%s5138_s5 + $0xd0] sm:$0xf] }
  0x20   : > { %233 = vst [vmem:[%s5142_s6 + $0x30] sm:$0xf] %v232_v12  ;;  %v262_v27 = vld [vmem:[%s5138_s5 + $0xd8] sm:$0xf]  ;;  %v264_v28 = vld [vmem:[%s5138_s5 + $0xe0] sm:$0xf] }
  0x21   : > { %235 = vst [vmem:[%s5142_s6 + $0x34] sm:$0xf] %v234_v13  ;;  %v266_v29 = vld [vmem:[%s5138_s5 + $0xe8] sm:$0xf]  ;;  %v268_v30 = vld [vmem:[%s5138_s5 + $0xf0] sm:$0xf] }
  0x22   : > { %237 = vst [vmem:[%s5142_s6 + $0x38] sm:$0xf] %v236_v14  ;;  %v270_v31 = vld [vmem:[%s5138_s5 + $0xf8] sm:$0xf]  ;;  %v272_v32 = vld [vmem:[%s5138_s5 + $0x100] sm:$0xf] }
  0x23   : > { %239 = vst [vmem:[%s5142_s6 + $0x3c] sm:$0xf] %v238_v15  ;;  %v274_v33 = vld [vmem:[%s5138_s5 + $0x108] sm:$0xf]  ;;  %v276_v34 = vld [vmem:[%s5138_s5 + $0x110] sm:$0xf] }
  0x24   : > { %241 = vst [vmem:[%s5142_s6 + $0x40] sm:$0xf] %v240_v16  ;;  %v278_v35 = vld [vmem:[%s5138_s5 + $0x118] sm:$0xf]  ;;  %v280_v36 = vld [vmem:[%s5138_s5 + $0x120] sm:$0xf] }
  0x25   : > { %243 = vst [vmem:[%s5142_s6 + $0x44] sm:$0xf] %v242_v17  ;;  %v282_v37 = vld [vmem:[%s5138_s5 + $0x128] sm:$0xf]  ;;  %v284_v38 = vld [vmem:[%s5138_s5 + $0x130] sm:$0xf] }
  0x26   : > { %245 = vst [vmem:[%s5142_s6 + $0x48] sm:$0xf] %v244_v18  ;;  %v286_v39 = vld [vmem:[%s5138_s5 + $0x138] sm:$0xf]  ;;  %v288_v40 = vld [vmem:[%s5138_s5 + $0x140] sm:$0xf] }
  0x27   : > { %247 = vst [vmem:[%s5142_s6 + $0x4c] sm:$0xf] %v246_v19  ;;  %v290_v41 = vld [vmem:[%s5138_s5 + $0x148] sm:$0xf]  ;;  %v292_v42 = vld [vmem:[%s5138_s5 + $0x150] sm:$0xf] }
  0x28   : > { %249 = vst [vmem:[%s5142_s6 + $0x50] sm:$0xf] %v248_v20  ;;  %v294_v43 = vld [vmem:[%s5138_s5 + $0x158] sm:$0xf]  ;;  %v296_v44 = vld [vmem:[%s5138_s5 + $0x160] sm:$0xf] }
  0x29   : > { %251 = vst [vmem:[%s5142_s6 + $0x54] sm:$0xf] %v250_v21  ;;  %v298_v45 = vld [vmem:[%s5138_s5 + $0x168] sm:$0xf]  ;;  %v300_v46 = vld [vmem:[%s5138_s5 + $0x170] sm:$0xf] }
  0x2a   : > { %253 = vst [vmem:[%s5142_s6 + $0x58] sm:$0xf] %v252_v22  ;;  %v302_v47 = vld [vmem:[%s5138_s5 + $0x178] sm:$0xf]  ;;  %v304_v48 = vld [vmem:[%s5138_s5 + $0x180] sm:$0xf] }
  0x2b   : > { %255 = vst [vmem:[%s5142_s6 + $0x5c] sm:$0xf] %v254_v23  ;;  %v306_v49 = vld [vmem:[%s5138_s5 + $0x188] sm:$0xf]  ;;  %v308_v50 = vld [vmem:[%s5138_s5 + $0x190] sm:$0xf] }
  0x2c   : > { %257 = vst [vmem:[%s5142_s6 + $0x60] sm:$0xf] %v256_v24  ;;  %v310_v51 = vld [vmem:[%s5138_s5 + $0x198] sm:$0xf]  ;;  %v312_v52 = vld [vmem:[%s5138_s5 + $0x1a0] sm:$0xf] }
  0x2d   : > { %259 = vst [vmem:[%s5142_s6 + $0x64] sm:$0xf] %v258_v25  ;;  %v314_v53 = vld [vmem:[%s5138_s5 + $0x1a8] sm:$0xf]  ;;  %v316_v54 = vld [vmem:[%s5138_s5 + $0x1b0] sm:$0xf] }
  0x2e   : > { %261 = vst [vmem:[%s5142_s6 + $0x68] sm:$0xf] %v260_v26  ;;  %v318_v55 = vld [vmem:[%s5138_s5 + $0x1b8] sm:$0xf]  ;;  %v320_v56 = vld [vmem:[%s5138_s5 + $0x1c0] sm:$0xf] }
  0x2f   : > { %263 = vst [vmem:[%s5142_s6 + $0x6c] sm:$0xf] %v262_v27  ;;  %v322_v57 = vld [vmem:[%s5138_s5 + $0x1c8] sm:$0xf]  ;;  %v324_v58 = vld [vmem:[%s5138_s5 + $0x1d0] sm:$0xf] }
  0x30   : > { %265 = vst [vmem:[%s5142_s6 + $0x70] sm:$0xf] %v264_v28  ;;  %v326_v59 = vld [vmem:[%s5138_s5 + $0x1d8] sm:$0xf]  ;;  %v328_v60 = vld [vmem:[%s5138_s5 + $0x1e0] sm:$0xf] }
  0x31   : > { %267 = vst [vmem:[%s5142_s6 + $0x74] sm:$0xf] %v266_v29  ;;  %v330_v61 = vld [vmem:[%s5138_s5 + $0x1e8] sm:$0xf]  ;;  %v332_v62 = vld [vmem:[%s5138_s5 + $0x1f0] sm:$0xf] }
  0x32   : > { %269 = vst [vmem:[%s5142_s6 + $0x78] sm:$0xf] %v268_v30  ;;  %v334_v63 = vld [vmem:[%s5138_s5 + $0x1f8] sm:$0xf]  ;;  %v336_v0 = vld [vmem:[%s5138_s5 + $0x200] sm:$0xf] }
  0x33   : > { %271 = vst [vmem:[%s5142_s6 + $0x7c] sm:$0xf] %v270_v31  ;;  %v338_v1 = vld [vmem:[%s5138_s5 + $0x208] sm:$0xf]  ;;  %v340_v2 = vld [vmem:[%s5138_s5 + $0x210] sm:$0xf] }
  0x34   : > { %273 = vst [vmem:[%s5142_s6 + $0x80] sm:$0xf] %v272_v32  ;;  %v342_v3 = vld [vmem:[%s5138_s5 + $0x218] sm:$0xf]  ;;  %v344_v4 = vld [vmem:[%s5138_s5 + $0x220] sm:$0xf] }
  0x35   : > { %275 = vst [vmem:[%s5142_s6 + $0x84] sm:$0xf] %v274_v33  ;;  %v346_v5 = vld [vmem:[%s5138_s5 + $0x228] sm:$0xf]  ;;  %v348_v6 = vld [vmem:[%s5138_s5 + $0x230] sm:$0xf] }
  0x36   : > { %277 = vst [vmem:[%s5142_s6 + $0x88] sm:$0xf] %v276_v34  ;;  %v350_v7 = vld [vmem:[%s5138_s5 + $0x238] sm:$0xf]  ;;  %v352_v8 = vld [vmem:[%s5138_s5 + $0x240] sm:$0xf] }
  0x37   : > { %279 = vst [vmem:[%s5142_s6 + $0x8c] sm:$0xf] %v278_v35  ;;  %v354_v9 = vld [vmem:[%s5138_s5 + $0x248] sm:$0xf]  ;;  %v356_v10 = vld [vmem:[%s5138_s5 + $0x250] sm:$0xf] }
  0x38   : > { %281 = vst [vmem:[%s5142_s6 + $0x90] sm:$0xf] %v280_v36  ;;  %v358_v11 = vld [vmem:[%s5138_s5 + $0x258] sm:$0xf]  ;;  %v360_v12 = vld [vmem:[%s5138_s5 + $0x260] sm:$0xf] }
  0x39   : > { %283 = vst [vmem:[%s5142_s6 + $0x94] sm:$0xf] %v282_v37  ;;  %v362_v13 = vld [vmem:[%s5138_s5 + $0x268] sm:$0xf]  ;;  %v364_v14 = vld [vmem:[%s5138_s5 + $0x270] sm:$0xf] }
  0x3a   : > { %285 = vst [vmem:[%s5142_s6 + $0x98] sm:$0xf] %v284_v38  ;;  %v366_v15 = vld [vmem:[%s5138_s5 + $0x278] sm:$0xf]  ;;  %v368_v16 = vld [vmem:[%s5138_s5 + $0x280] sm:$0xf] }
  0x3b   : > { %287 = vst [vmem:[%s5142_s6 + $0x9c] sm:$0xf] %v286_v39  ;;  %v370_v17 = vld [vmem:[%s5138_s5 + $0x288] sm:$0xf]  ;;  %v372_v18 = vld [vmem:[%s5138_s5 + $0x290] sm:$0xf] }
  0x3c   : > { %289 = vst [vmem:[%s5142_s6 + $0xa0] sm:$0xf] %v288_v40  ;;  %v374_v19 = vld [vmem:[%s5138_s5 + $0x298] sm:$0xf]  ;;  %v376_v20 = vld [vmem:[%s5138_s5 + $0x2a0] sm:$0xf] }
  0x3d   : > { %291 = vst [vmem:[%s5142_s6 + $0xa4] sm:$0xf] %v290_v41  ;;  %v378_v21 = vld [vmem:[%s5138_s5 + $0x2a8] sm:$0xf]  ;;  %v380_v22 = vld [vmem:[%s5138_s5 + $0x2b0] sm:$0xf] }
  0x3e   : > { %293 = vst [vmem:[%s5142_s6 + $0xa8] sm:$0xf] %v292_v42  ;;  %v382_v23 = vld [vmem:[%s5138_s5 + $0x2b8] sm:$0xf]  ;;  %v384_v24 = vld [vmem:[%s5138_s5 + $0x2c0] sm:$0xf] }
  0x3f   : > { %295 = vst [vmem:[%s5142_s6 + $0xac] sm:$0xf] %v294_v43  ;;  %v386_v25 = vld [vmem:[%s5138_s5 + $0x2c8] sm:$0xf]  ;;  %v388_v26 = vld [vmem:[%s5138_s5 + $0x2d0] sm:$0xf] }
  0x40   : > { %297 = vst [vmem:[%s5142_s6 + $0xb0] sm:$0xf] %v296_v44  ;;  %v390_v27 = vld [vmem:[%s5138_s5 + $0x2d8] sm:$0xf]  ;;  %v392_v28 = vld [vmem:[%s5138_s5 + $0x2e0] sm:$0xf] }
  0x41   : > { %299 = vst [vmem:[%s5142_s6 + $0xb4] sm:$0xf] %v298_v45  ;;  %v394_v29 = vld [vmem:[%s5138_s5 + $0x2e8] sm:$0xf]  ;;  %v396_v30 = vld [vmem:[%s5138_s5 + $0x2f0] sm:$0xf] }
  0x42   : > { %301 = vst [vmem:[%s5142_s6 + $0xb8] sm:$0xf] %v300_v46  ;;  %v398_v31 = vld [vmem:[%s5138_s5 + $0x2f8] sm:$0xf]  ;;  %v400_v32 = vld [vmem:[%s5138_s5 + $0x300] sm:$0xf] }
  0x43   : > { %303 = vst [vmem:[%s5142_s6 + $0xbc] sm:$0xf] %v302_v47  ;;  %v402_v33 = vld [vmem:[%s5138_s5 + $0x308] sm:$0xf]  ;;  %v404_v34 = vld [vmem:[%s5138_s5 + $0x310] sm:$0xf] }
  0x44   : > { %305 = vst [vmem:[%s5142_s6 + $0xc0] sm:$0xf] %v304_v48  ;;  %v406_v35 = vld [vmem:[%s5138_s5 + $0x318] sm:$0xf]  ;;  %v408_v36 = vld [vmem:[%s5138_s5 + $0x320] sm:$0xf] }
  0x45   : > { %307 = vst [vmem:[%s5142_s6 + $0xc4] sm:$0xf] %v306_v49  ;;  %v410_v37 = vld [vmem:[%s5138_s5 + $0x328] sm:$0xf]  ;;  %v412_v38 = vld [vmem:[%s5138_s5 + $0x330] sm:$0xf] }
  0x46   : > { %309 = vst [vmem:[%s5142_s6 + $0xc8] sm:$0xf] %v308_v50  ;;  %v414_v39 = vld [vmem:[%s5138_s5 + $0x338] sm:$0xf]  ;;  %v416_v40 = vld [vmem:[%s5138_s5 + $0x340] sm:$0xf] }
  0x47   : > { %311 = vst [vmem:[%s5142_s6 + $0xcc] sm:$0xf] %v310_v51  ;;  %v418_v41 = vld [vmem:[%s5138_s5 + $0x348] sm:$0xf]  ;;  %v420_v42 = vld [vmem:[%s5138_s5 + $0x350] sm:$0xf] }
  0x48   : > { %313 = vst [vmem:[%s5142_s6 + $0xd0] sm:$0xf] %v312_v52  ;;  %v422_v43 = vld [vmem:[%s5138_s5 + $0x358] sm:$0xf]  ;;  %v424_v44 = vld [vmem:[%s5138_s5 + $0x360] sm:$0xf] }
  0x49   : > { %315 = vst [vmem:[%s5142_s6 + $0xd4] sm:$0xf] %v314_v53  ;;  %v426_v45 = vld [vmem:[%s5138_s5 + $0x368] sm:$0xf]  ;;  %v428_v46 = vld [vmem:[%s5138_s5 + $0x370] sm:$0xf] }
  0x4a   : > { %317 = vst [vmem:[%s5142_s6 + $0xd8] sm:$0xf] %v316_v54  ;;  %v430_v47 = vld [vmem:[%s5138_s5 + $0x378] sm:$0xf]  ;;  %v432_v48 = vld [vmem:[%s5138_s5 + $0x380] sm:$0xf] }
  0x4b   : > { %319 = vst [vmem:[%s5142_s6 + $0xdc] sm:$0xf] %v318_v55  ;;  %v434_v49 = vld [vmem:[%s5138_s5 + $0x388] sm:$0xf]  ;;  %v436_v50 = vld [vmem:[%s5138_s5 + $0x390] sm:$0xf] }
  0x4c   : > { %321 = vst [vmem:[%s5142_s6 + $0xe0] sm:$0xf] %v320_v56  ;;  %v438_v51 = vld [vmem:[%s5138_s5 + $0x398] sm:$0xf]  ;;  %v440_v52 = vld [vmem:[%s5138_s5 + $0x3a0] sm:$0xf] }
  0x4d   : > { %323 = vst [vmem:[%s5142_s6 + $0xe4] sm:$0xf] %v322_v57  ;;  %v442_v53 = vld [vmem:[%s5138_s5 + $0x3a8] sm:$0xf]  ;;  %v444_v54 = vld [vmem:[%s5138_s5 + $0x3b0] sm:$0xf] }
  0x4e   : > { %325 = vst [vmem:[%s5142_s6 + $0xe8] sm:$0xf] %v324_v58  ;;  %v446_v55 = vld [vmem:[%s5138_s5 + $0x3b8] sm:$0xf]  ;;  %v448_v56 = vld [vmem:[%s5138_s5 + $0x3c0] sm:$0xf] }
  0x4f   : > { %327 = vst [vmem:[%s5142_s6 + $0xec] sm:$0xf] %v326_v59  ;;  %v450_v57 = vld [vmem:[%s5138_s5 + $0x3c8] sm:$0xf]  ;;  %v452_v58 = vld [vmem:[%s5138_s5 + $0x3d0] sm:$0xf] }
  0x50   : > { %329 = vst [vmem:[%s5142_s6 + $0xf0] sm:$0xf] %v328_v60  ;;  %v454_v59 = vld [vmem:[%s5138_s5 + $0x3d8] sm:$0xf]  ;;  %v456_v60 = vld [vmem:[%s5138_s5 + $0x3e0] sm:$0xf] }
  0x51   : > { %331 = vst [vmem:[%s5142_s6 + $0xf4] sm:$0xf] %v330_v61  ;;  %v458_v61 = vld [vmem:[%s5138_s5 + $0x3e8] sm:$0xf] }
  0x52   : > { %333 = vst [vmem:[%s5142_s6 + $0xf8] sm:$0xf] %v332_v62  ;;  %v460_v62 = vld [vmem:[%s5138_s5 + $0x3f0] sm:$0xf] }
  0x53   : > { %335 = vst [vmem:[%s5142_s6 + $0xfc] sm:$0xf] %v334_v63  ;;  %v462_v63 = vld [vmem:[%s5138_s5 + $0x3f8] sm:$0xf] }
  0x54   : > { %337 = vst [vmem:[%s5142_s6 + $0x100] sm:$0xf] %v336_v0  ;;  %v464_v0 = vld [vmem:[%s5138_s5 + $0x400] sm:$0xf] }
  0x55   : > { %339 = vst [vmem:[%s5142_s6 + $0x104] sm:$0xf] %v338_v1  ;;  %v466_v1 = vld [vmem:[%s5138_s5 + $0x408] sm:$0xf] }
  0x56   : > { %341 = vst [vmem:[%s5142_s6 + $0x108] sm:$0xf] %v340_v2  ;;  %v468_v2 = vld [vmem:[%s5138_s5 + $0x410] sm:$0xf] }
  0x57   : > { %343 = vst [vmem:[%s5142_s6 + $0x10c] sm:$0xf] %v342_v3  ;;  %v470_v3 = vld [vmem:[%s5138_s5 + $0x418] sm:$0xf] }
  0x58   : > { %345 = vst [vmem:[%s5142_s6 + $0x110] sm:$0xf] %v344_v4  ;;  %v472_v4 = vld [vmem:[%s5138_s5 + $0x420] sm:$0xf] }
  0x59   : > { %347 = vst [vmem:[%s5142_s6 + $0x114] sm:$0xf] %v346_v5  ;;  %v474_v5 = vld [vmem:[%s5138_s5 + $0x428] sm:$0xf] }
  0x5a   : > { %349 = vst [vmem:[%s5142_s6 + $0x118] sm:$0xf] %v348_v6  ;;  %v476_v6 = vld [vmem:[%s5138_s5 + $0x430] sm:$0xf] }
  0x5b   : > { %351 = vst [vmem:[%s5142_s6 + $0x11c] sm:$0xf] %v350_v7  ;;  %v478_v7 = vld [vmem:[%s5138_s5 + $0x438] sm:$0xf] }
  0x5c   : > { %353 = vst [vmem:[%s5142_s6 + $0x120] sm:$0xf] %v352_v8  ;;  %v480_v8 = vld [vmem:[%s5138_s5 + $0x440] sm:$0xf] }
  0x5d   : > { %355 = vst [vmem:[%s5142_s6 + $0x124] sm:$0xf] %v354_v9  ;;  %v482_v9 = vld [vmem:[%s5138_s5 + $0x448] sm:$0xf] }
  0x5e   : > { %357 = vst [vmem:[%s5142_s6 + $0x128] sm:$0xf] %v356_v10  ;;  %v484_v10 = vld [vmem:[%s5138_s5 + $0x450] sm:$0xf] }
  0x5f   : > { %359 = vst [vmem:[%s5142_s6 + $0x12c] sm:$0xf] %v358_v11  ;;  %v486_v11 = vld [vmem:[%s5138_s5 + $0x458] sm:$0xf] }
  0x60   : > { %361 = vst [vmem:[%s5142_s6 + $0x130] sm:$0xf] %v360_v12  ;;  %v488_v12 = vld [vmem:[%s5138_s5 + $0x460] sm:$0xf] }
  0x61   : > { %363 = vst [vmem:[%s5142_s6 + $0x134] sm:$0xf] %v362_v13  ;;  %v490_v13 = vld [vmem:[%s5138_s5 + $0x468] sm:$0xf] }
  0x62   : > { %365 = vst [vmem:[%s5142_s6 + $0x138] sm:$0xf] %v364_v14  ;;  %v492_v14 = vld [vmem:[%s5138_s5 + $0x470] sm:$0xf] }
  0x63   : > { %367 = vst [vmem:[%s5142_s6 + $0x13c] sm:$0xf] %v366_v15  ;;  %v494_v15 = vld [vmem:[%s5138_s5 + $0x478] sm:$0xf] }
  0x64   : > { %369 = vst [vmem:[%s5142_s6 + $0x140] sm:$0xf] %v368_v16  ;;  %v496_v16 = vld [vmem:[%s5138_s5 + $0x480] sm:$0xf] }
  0x65   : > { %371 = vst [vmem:[%s5142_s6 + $0x144] sm:$0xf] %v370_v17  ;;  %v498_v17 = vld [vmem:[%s5138_s5 + $0x488] sm:$0xf] }
  0x66   : > { %373 = vst [vmem:[%s5142_s6 + $0x148] sm:$0xf] %v372_v18  ;;  %v500_v18 = vld [vmem:[%s5138_s5 + $0x490] sm:$0xf] }
  0x67   : > { %375 = vst [vmem:[%s5142_s6 + $0x14c] sm:$0xf] %v374_v19  ;;  %v502_v19 = vld [vmem:[%s5138_s5 + $0x498] sm:$0xf] }
  0x68   : > { %377 = vst [vmem:[%s5142_s6 + $0x150] sm:$0xf] %v376_v20  ;;  %v504_v20 = vld [vmem:[%s5138_s5 + $0x4a0] sm:$0xf] }
  0x69   : > { %379 = vst [vmem:[%s5142_s6 + $0x154] sm:$0xf] %v378_v21  ;;  %v506_v21 = vld [vmem:[%s5138_s5 + $0x4a8] sm:$0xf] }
  0x6a   : > { %381 = vst [vmem:[%s5142_s6 + $0x158] sm:$0xf] %v380_v22  ;;  %v508_v22 = vld [vmem:[%s5138_s5 + $0x4b0] sm:$0xf] }
  0x6b   : > { %383 = vst [vmem:[%s5142_s6 + $0x15c] sm:$0xf] %v382_v23  ;;  %v510_v23 = vld [vmem:[%s5138_s5 + $0x4b8] sm:$0xf] }
  0x6c   : > { %385 = vst [vmem:[%s5142_s6 + $0x160] sm:$0xf] %v384_v24  ;;  %v512_v24 = vld [vmem:[%s5138_s5 + $0x4c0] sm:$0xf] }
  0x6d   : > { %387 = vst [vmem:[%s5142_s6 + $0x164] sm:$0xf] %v386_v25  ;;  %v514_v25 = vld [vmem:[%s5138_s5 + $0x4c8] sm:$0xf] }
  0x6e   : > { %389 = vst [vmem:[%s5142_s6 + $0x168] sm:$0xf] %v388_v26  ;;  %v516_v26 = vld [vmem:[%s5138_s5 + $0x4d0] sm:$0xf] }
  0x6f   : > { %391 = vst [vmem:[%s5142_s6 + $0x16c] sm:$0xf] %v390_v27  ;;  %v518_v27 = vld [vmem:[%s5138_s5 + $0x4d8] sm:$0xf] }
  0x70   : > { %393 = vst [vmem:[%s5142_s6 + $0x170] sm:$0xf] %v392_v28  ;;  %v520_v28 = vld [vmem:[%s5138_s5 + $0x4e0] sm:$0xf] }
  0x71   : > { %395 = vst [vmem:[%s5142_s6 + $0x174] sm:$0xf] %v394_v29  ;;  %v522_v29 = vld [vmem:[%s5138_s5 + $0x4e8] sm:$0xf] }
  0x72   : > { %397 = vst [vmem:[%s5142_s6 + $0x178] sm:$0xf] %v396_v30  ;;  %v524_v30 = vld [vmem:[%s5138_s5 + $0x4f0] sm:$0xf] }
  0x73   : > { %399 = vst [vmem:[%s5142_s6 + $0x17c] sm:$0xf] %v398_v31  ;;  %v526_v31 = vld [vmem:[%s5138_s5 + $0x4f8] sm:$0xf] }
  0x74   : > { %401 = vst [vmem:[%s5142_s6 + $0x180] sm:$0xf] %v400_v32  ;;  %v528_v32 = vld [vmem:[%s5138_s5 + $0x500] sm:$0xf] }
  0x75   : > { %403 = vst [vmem:[%s5142_s6 + $0x184] sm:$0xf] %v402_v33  ;;  %v530_v33 = vld [vmem:[%s5138_s5 + $0x508] sm:$0xf] }
  0x76   : > { %405 = vst [vmem:[%s5142_s6 + $0x188] sm:$0xf] %v404_v34  ;;  %v532_v34 = vld [vmem:[%s5138_s5 + $0x510] sm:$0xf] }
  0x77   : > { %407 = vst [vmem:[%s5142_s6 + $0x18c] sm:$0xf] %v406_v35  ;;  %v534_v35 = vld [vmem:[%s5138_s5 + $0x518] sm:$0xf] }
  0x78   : > { %409 = vst [vmem:[%s5142_s6 + $0x190] sm:$0xf] %v408_v36  ;;  %v536_v36 = vld [vmem:[%s5138_s5 + $0x520] sm:$0xf] }
  0x79   : > { %411 = vst [vmem:[%s5142_s6 + $0x194] sm:$0xf] %v410_v37  ;;  %v538_v37 = vld [vmem:[%s5138_s5 + $0x528] sm:$0xf] }
  0x7a   : > { %413 = vst [vmem:[%s5142_s6 + $0x198] sm:$0xf] %v412_v38  ;;  %v540_v38 = vld [vmem:[%s5138_s5 + $0x530] sm:$0xf] }
  0x7b   : > { %415 = vst [vmem:[%s5142_s6 + $0x19c] sm:$0xf] %v414_v39  ;;  %v542_v39 = vld [vmem:[%s5138_s5 + $0x538] sm:$0xf] }
  0x7c   : > { %417 = vst [vmem:[%s5142_s6 + $0x1a0] sm:$0xf] %v416_v40  ;;  %v544_v40 = vld [vmem:[%s5138_s5 + $0x540] sm:$0xf] }
  0x7d   : > { %419 = vst [vmem:[%s5142_s6 + $0x1a4] sm:$0xf] %v418_v41  ;;  %v546_v41 = vld [vmem:[%s5138_s5 + $0x548] sm:$0xf] }
  0x7e   : > { %421 = vst [vmem:[%s5142_s6 + $0x1a8] sm:$0xf] %v420_v42  ;;  %v548_v42 = vld [vmem:[%s5138_s5 + $0x550] sm:$0xf] }
  0x7f   : > { %423 = vst [vmem:[%s5142_s6 + $0x1ac] sm:$0xf] %v422_v43  ;;  %v550_v43 = vld [vmem:[%s5138_s5 + $0x558] sm:$0xf] }
  0x80   : > { %425 = vst [vmem:[%s5142_s6 + $0x1b0] sm:$0xf] %v424_v44  ;;  %v552_v44 = vld [vmem:[%s5138_s5 + $0x560] sm:$0xf] }
  0x81   : > { %427 = vst [vmem:[%s5142_s6 + $0x1b4] sm:$0xf] %v426_v45  ;;  %v554_v45 = vld [vmem:[%s5138_s5 + $0x568] sm:$0xf] }
  0x82   : > { %429 = vst [vmem:[%s5142_s6 + $0x1b8] sm:$0xf] %v428_v46  ;;  %v556_v46 = vld [vmem:[%s5138_s5 + $0x570] sm:$0xf] }
  0x83   : > { %431 = vst [vmem:[%s5142_s6 + $0x1bc] sm:$0xf] %v430_v47  ;;  %v558_v47 = vld [vmem:[%s5138_s5 + $0x578] sm:$0xf] }
  0x84   : > { %433 = vst [vmem:[%s5142_s6 + $0x1c0] sm:$0xf] %v432_v48  ;;  %v560_v48 = vld [vmem:[%s5138_s5 + $0x580] sm:$0xf] }
  0x85   : > { %435 = vst [vmem:[%s5142_s6 + $0x1c4] sm:$0xf] %v434_v49  ;;  %v562_v49 = vld [vmem:[%s5138_s5 + $0x588] sm:$0xf] }
  0x86   : > { %437 = vst [vmem:[%s5142_s6 + $0x1c8] sm:$0xf] %v436_v50  ;;  %v564_v50 = vld [vmem:[%s5138_s5 + $0x590] sm:$0xf] }
  0x87   : > { %439 = vst [vmem:[%s5142_s6 + $0x1cc] sm:$0xf] %v438_v51  ;;  %v566_v51 = vld [vmem:[%s5138_s5 + $0x598] sm:$0xf] }
  0x88   : > { %441 = vst [vmem:[%s5142_s6 + $0x1d0] sm:$0xf] %v440_v52  ;;  %v568_v52 = vld [vmem:[%s5138_s5 + $0x5a0] sm:$0xf] }
  0x89   : > { %443 = vst [vmem:[%s5142_s6 + $0x1d4] sm:$0xf] %v442_v53  ;;  %v570_v53 = vld [vmem:[%s5138_s5 + $0x5a8] sm:$0xf] }
  0x8a   : > { %445 = vst [vmem:[%s5142_s6 + $0x1d8] sm:$0xf] %v444_v54  ;;  %v572_v54 = vld [vmem:[%s5138_s5 + $0x5b0] sm:$0xf] }
  0x8b   : > { %447 = vst [vmem:[%s5142_s6 + $0x1dc] sm:$0xf] %v446_v55  ;;  %v574_v55 = vld [vmem:[%s5138_s5 + $0x5b8] sm:$0xf] }
  0x8c   : > { %449 = vst [vmem:[%s5142_s6 + $0x1e0] sm:$0xf] %v448_v56  ;;  %v576_v56 = vld [vmem:[%s5138_s5 + $0x5c0] sm:$0xf] }
  0x8d   : > { %451 = vst [vmem:[%s5142_s6 + $0x1e4] sm:$0xf] %v450_v57  ;;  %v578_v57 = vld [vmem:[%s5138_s5 + $0x5c8] sm:$0xf] }
  0x8e   : > { %453 = vst [vmem:[%s5142_s6 + $0x1e8] sm:$0xf] %v452_v58  ;;  %v580_v58 = vld [vmem:[%s5138_s5 + $0x5d0] sm:$0xf] }
  0x8f   : > { %455 = vst [vmem:[%s5142_s6 + $0x1ec] sm:$0xf] %v454_v59  ;;  %v582_v59 = vld [vmem:[%s5138_s5 + $0x5d8] sm:$0xf] }
  0x90   : > { %457 = vst [vmem:[%s5142_s6 + $0x1f0] sm:$0xf] %v456_v60  ;;  %v584_v60 = vld [vmem:[%s5138_s5 + $0x5e0] sm:$0xf] }
  0x91   : > { %459 = vst [vmem:[%s5142_s6 + $0x1f4] sm:$0xf] %v458_v61  ;;  %v586_v61 = vld [vmem:[%s5138_s5 + $0x5e8] sm:$0xf] }
  0x92   : > { %461 = vst [vmem:[%s5142_s6 + $0x1f8] sm:$0xf] %v460_v62  ;;  %v588_v62 = vld [vmem:[%s5138_s5 + $0x5f0] sm:$0xf] }
  0x93   : > { %463 = vst [vmem:[%s5142_s6 + $0x1fc] sm:$0xf] %v462_v63  ;;  %v590_v63 = vld [vmem:[%s5138_s5 + $0x5f8] sm:$0xf] }
  0x94   : > { %465 = vst [vmem:[%s5142_s6 + $0x200] sm:$0xf] %v464_v0  ;;  %v592_v0 = vld [vmem:[%s5138_s5 + $0x600] sm:$0xf] }
  0x95   : > { %467 = vst [vmem:[%s5142_s6 + $0x204] sm:$0xf] %v466_v1  ;;  %v594_v1 = vld [vmem:[%s5138_s5 + $0x608] sm:$0xf] }
  0x96   : > { %469 = vst [vmem:[%s5142_s6 + $0x208] sm:$0xf] %v468_v2  ;;  %v596_v2 = vld [vmem:[%s5138_s5 + $0x610] sm:$0xf] }
  0x97   : > { %471 = vst [vmem:[%s5142_s6 + $0x20c] sm:$0xf] %v470_v3  ;;  %v598_v3 = vld [vmem:[%s5138_s5 + $0x618] sm:$0xf] }
  0x98   : > { %473 = vst [vmem:[%s5142_s6 + $0x210] sm:$0xf] %v472_v4  ;;  %v600_v4 = vld [vmem:[%s5138_s5 + $0x620] sm:$0xf] }
  0x99   : > { %475 = vst [vmem:[%s5142_s6 + $0x214] sm:$0xf] %v474_v5  ;;  %v602_v5 = vld [vmem:[%s5138_s5 + $0x628] sm:$0xf] }
  0x9a   : > { %477 = vst [vmem:[%s5142_s6 + $0x218] sm:$0xf] %v476_v6  ;;  %v604_v6 = vld [vmem:[%s5138_s5 + $0x630] sm:$0xf] }
  0x9b   : > { %479 = vst [vmem:[%s5142_s6 + $0x21c] sm:$0xf] %v478_v7  ;;  %v606_v7 = vld [vmem:[%s5138_s5 + $0x638] sm:$0xf] }
  0x9c   : > { %481 = vst [vmem:[%s5142_s6 + $0x220] sm:$0xf] %v480_v8  ;;  %v608_v8 = vld [vmem:[%s5138_s5 + $0x640] sm:$0xf] }
  0x9d   : > { %483 = vst [vmem:[%s5142_s6 + $0x224] sm:$0xf] %v482_v9  ;;  %v610_v9 = vld [vmem:[%s5138_s5 + $0x648] sm:$0xf] }
  0x9e   : > { %485 = vst [vmem:[%s5142_s6 + $0x228] sm:$0xf] %v484_v10  ;;  %v612_v10 = vld [vmem:[%s5138_s5 + $0x650] sm:$0xf] }
  0x9f   : > { %487 = vst [vmem:[%s5142_s6 + $0x22c] sm:$0xf] %v486_v11  ;;  %v614_v11 = vld [vmem:[%s5138_s5 + $0x658] sm:$0xf] }
  0xa0   : > { %489 = vst [vmem:[%s5142_s6 + $0x230] sm:$0xf] %v488_v12  ;;  %v616_v12 = vld [vmem:[%s5138_s5 + $0x660] sm:$0xf] }
  0xa1   : > { %491 = vst [vmem:[%s5142_s6 + $0x234] sm:$0xf] %v490_v13  ;;  %v618_v13 = vld [vmem:[%s5138_s5 + $0x668] sm:$0xf] }
  0xa2   : > { %493 = vst [vmem:[%s5142_s6 + $0x238] sm:$0xf] %v492_v14  ;;  %v620_v14 = vld [vmem:[%s5138_s5 + $0x670] sm:$0xf] }
  0xa3   : > { %495 = vst [vmem:[%s5142_s6 + $0x23c] sm:$0xf] %v494_v15  ;;  %v622_v15 = vld [vmem:[%s5138_s5 + $0x678] sm:$0xf] }
  0xa4   : > { %497 = vst [vmem:[%s5142_s6 + $0x240] sm:$0xf] %v496_v16  ;;  %v624_v16 = vld [vmem:[%s5138_s5 + $0x680] sm:$0xf] }
  0xa5   : > { %499 = vst [vmem:[%s5142_s6 + $0x244] sm:$0xf] %v498_v17  ;;  %v626_v17 = vld [vmem:[%s5138_s5 + $0x688] sm:$0xf] }
  0xa6   : > { %501 = vst [vmem:[%s5142_s6 + $0x248] sm:$0xf] %v500_v18  ;;  %v628_v18 = vld [vmem:[%s5138_s5 + $0x690] sm:$0xf] }
  0xa7   : > { %503 = vst [vmem:[%s5142_s6 + $0x24c] sm:$0xf] %v502_v19  ;;  %v630_v19 = vld [vmem:[%s5138_s5 + $0x698] sm:$0xf] }
  0xa8   : > { %505 = vst [vmem:[%s5142_s6 + $0x250] sm:$0xf] %v504_v20  ;;  %v632_v20 = vld [vmem:[%s5138_s5 + $0x6a0] sm:$0xf] }
  0xa9   : > { %507 = vst [vmem:[%s5142_s6 + $0x254] sm:$0xf] %v506_v21  ;;  %v634_v21 = vld [vmem:[%s5138_s5 + $0x6a8] sm:$0xf] }
  0xaa   : > { %509 = vst [vmem:[%s5142_s6 + $0x258] sm:$0xf] %v508_v22  ;;  %v636_v22 = vld [vmem:[%s5138_s5 + $0x6b0] sm:$0xf] }
  0xab   : > { %511 = vst [vmem:[%s5142_s6 + $0x25c] sm:$0xf] %v510_v23  ;;  %v638_v23 = vld [vmem:[%s5138_s5 + $0x6b8] sm:$0xf] }
  0xac   : > { %513 = vst [vmem:[%s5142_s6 + $0x260] sm:$0xf] %v512_v24  ;;  %v640_v24 = vld [vmem:[%s5138_s5 + $0x6c0] sm:$0xf] }
  0xad   : > { %515 = vst [vmem:[%s5142_s6 + $0x264] sm:$0xf] %v514_v25  ;;  %v642_v25 = vld [vmem:[%s5138_s5 + $0x6c8] sm:$0xf] }
  0xae   : > { %517 = vst [vmem:[%s5142_s6 + $0x268] sm:$0xf] %v516_v26  ;;  %v644_v26 = vld [vmem:[%s5138_s5 + $0x6d0] sm:$0xf] }
  0xaf   : > { %519 = vst [vmem:[%s5142_s6 + $0x26c] sm:$0xf] %v518_v27  ;;  %v646_v27 = vld [vmem:[%s5138_s5 + $0x6d8] sm:$0xf] }
  0xb0   : > { %521 = vst [vmem:[%s5142_s6 + $0x270] sm:$0xf] %v520_v28  ;;  %v648_v28 = vld [vmem:[%s5138_s5 + $0x6e0] sm:$0xf] }
  0xb1   : > { %523 = vst [vmem:[%s5142_s6 + $0x274] sm:$0xf] %v522_v29  ;;  %v650_v29 = vld [vmem:[%s5138_s5 + $0x6e8] sm:$0xf] }
  0xb2   : > { %525 = vst [vmem:[%s5142_s6 + $0x278] sm:$0xf] %v524_v30  ;;  %v652_v30 = vld [vmem:[%s5138_s5 + $0x6f0] sm:$0xf] }
  0xb3   : > { %527 = vst [vmem:[%s5142_s6 + $0x27c] sm:$0xf] %v526_v31  ;;  %v654_v31 = vld [vmem:[%s5138_s5 + $0x6f8] sm:$0xf] }
  0xb4   : > { %529 = vst [vmem:[%s5142_s6 + $0x280] sm:$0xf] %v528_v32  ;;  %v656_v32 = vld [vmem:[%s5138_s5 + $0x700] sm:$0xf] }
  0xb5   : > { %531 = vst [vmem:[%s5142_s6 + $0x284] sm:$0xf] %v530_v33  ;;  %v658_v33 = vld [vmem:[%s5138_s5 + $0x708] sm:$0xf] }
  0xb6   : > { %533 = vst [vmem:[%s5142_s6 + $0x288] sm:$0xf] %v532_v34  ;;  %v660_v34 = vld [vmem:[%s5138_s5 + $0x710] sm:$0xf] }
  0xb7   : > { %535 = vst [vmem:[%s5142_s6 + $0x28c] sm:$0xf] %v534_v35  ;;  %v662_v35 = vld [vmem:[%s5138_s5 + $0x718] sm:$0xf] }
  0xb8   : > { %537 = vst [vmem:[%s5142_s6 + $0x290] sm:$0xf] %v536_v36  ;;  %v664_v36 = vld [vmem:[%s5138_s5 + $0x720] sm:$0xf] }
  0xb9   : > { %539 = vst [vmem:[%s5142_s6 + $0x294] sm:$0xf] %v538_v37  ;;  %v666_v37 = vld [vmem:[%s5138_s5 + $0x728] sm:$0xf] }
  0xba   : > { %541 = vst [vmem:[%s5142_s6 + $0x298] sm:$0xf] %v540_v38  ;;  %v668_v38 = vld [vmem:[%s5138_s5 + $0x730] sm:$0xf] }
  0xbb   : > { %543 = vst [vmem:[%s5142_s6 + $0x29c] sm:$0xf] %v542_v39  ;;  %v670_v39 = vld [vmem:[%s5138_s5 + $0x738] sm:$0xf] }
  0xbc   : > { %545 = vst [vmem:[%s5142_s6 + $0x2a0] sm:$0xf] %v544_v40  ;;  %v672_v40 = vld [vmem:[%s5138_s5 + $0x740] sm:$0xf] }
  0xbd   : > { %547 = vst [vmem:[%s5142_s6 + $0x2a4] sm:$0xf] %v546_v41  ;;  %v674_v41 = vld [vmem:[%s5138_s5 + $0x748] sm:$0xf] }
  0xbe   : > { %549 = vst [vmem:[%s5142_s6 + $0x2a8] sm:$0xf] %v548_v42  ;;  %v676_v42 = vld [vmem:[%s5138_s5 + $0x750] sm:$0xf] }
  0xbf   : > { %551 = vst [vmem:[%s5142_s6 + $0x2ac] sm:$0xf] %v550_v43  ;;  %v678_v43 = vld [vmem:[%s5138_s5 + $0x758] sm:$0xf] }
  0xc0   : > { %553 = vst [vmem:[%s5142_s6 + $0x2b0] sm:$0xf] %v552_v44  ;;  %v680_v44 = vld [vmem:[%s5138_s5 + $0x760] sm:$0xf] }
  0xc1   : > { %555 = vst [vmem:[%s5142_s6 + $0x2b4] sm:$0xf] %v554_v45  ;;  %v682_v45 = vld [vmem:[%s5138_s5 + $0x768] sm:$0xf] }
  0xc2   : > { %557 = vst [vmem:[%s5142_s6 + $0x2b8] sm:$0xf] %v556_v46  ;;  %v684_v46 = vld [vmem:[%s5138_s5 + $0x770] sm:$0xf] }
  0xc3   : > { %559 = vst [vmem:[%s5142_s6 + $0x2bc] sm:$0xf] %v558_v47  ;;  %v686_v47 = vld [vmem:[%s5138_s5 + $0x778] sm:$0xf] }
  0xc4   : > { %561 = vst [vmem:[%s5142_s6 + $0x2c0] sm:$0xf] %v560_v48  ;;  %v688_v48 = vld [vmem:[%s5138_s5 + $0x780] sm:$0xf] }
  0xc5   : > { %563 = vst [vmem:[%s5142_s6 + $0x2c4] sm:$0xf] %v562_v49  ;;  %v690_v49 = vld [vmem:[%s5138_s5 + $0x788] sm:$0xf] }
  0xc6   : > { %565 = vst [vmem:[%s5142_s6 + $0x2c8] sm:$0xf] %v564_v50  ;;  %v692_v50 = vld [vmem:[%s5138_s5 + $0x790] sm:$0xf] }
  0xc7   : > { %567 = vst [vmem:[%s5142_s6 + $0x2cc] sm:$0xf] %v566_v51  ;;  %v694_v51 = vld [vmem:[%s5138_s5 + $0x798] sm:$0xf] }
  0xc8   : > { %569 = vst [vmem:[%s5142_s6 + $0x2d0] sm:$0xf] %v568_v52  ;;  %v696_v52 = vld [vmem:[%s5138_s5 + $0x7a0] sm:$0xf] }
  0xc9   : > { %571 = vst [vmem:[%s5142_s6 + $0x2d4] sm:$0xf] %v570_v53  ;;  %v698_v53 = vld [vmem:[%s5138_s5 + $0x7a8] sm:$0xf] }
  0xca   : > { %573 = vst [vmem:[%s5142_s6 + $0x2d8] sm:$0xf] %v572_v54  ;;  %v700_v54 = vld [vmem:[%s5138_s5 + $0x7b0] sm:$0xf] }
  0xcb   : > { %575 = vst [vmem:[%s5142_s6 + $0x2dc] sm:$0xf] %v574_v55  ;;  %v702_v55 = vld [vmem:[%s5138_s5 + $0x7b8] sm:$0xf] }
  0xcc   : > { %577 = vst [vmem:[%s5142_s6 + $0x2e0] sm:$0xf] %v576_v56  ;;  %v704_v56 = vld [vmem:[%s5138_s5 + $0x7c0] sm:$0xf] }
  0xcd   : > { %579 = vst [vmem:[%s5142_s6 + $0x2e4] sm:$0xf] %v578_v57  ;;  %v706_v57 = vld [vmem:[%s5138_s5 + $0x7c8] sm:$0xf] }
  0xce   : > { %581 = vst [vmem:[%s5142_s6 + $0x2e8] sm:$0xf] %v580_v58  ;;  %v708_v58 = vld [vmem:[%s5138_s5 + $0x7d0] sm:$0xf] }
  0xcf   : > { %583 = vst [vmem:[%s5142_s6 + $0x2ec] sm:$0xf] %v582_v59  ;;  %v710_v59 = vld [vmem:[%s5138_s5 + $0x7d8] sm:$0xf] }
  0xd0   : > { %585 = vst [vmem:[%s5142_s6 + $0x2f0] sm:$0xf] %v584_v60  ;;  %v712_v60 = vld [vmem:[%s5138_s5 + $0x7e0] sm:$0xf] }
  0xd1   : > { %587 = vst [vmem:[%s5142_s6 + $0x2f4] sm:$0xf] %v586_v61  ;;  %v714_v61 = vld [vmem:[%s5138_s5 + $0x7e8] sm:$0xf] }
  0xd2   : > { %589 = vst [vmem:[%s5142_s6 + $0x2f8] sm:$0xf] %v588_v62  ;;  %v716_v62 = vld [vmem:[%s5138_s5 + $0x7f0] sm:$0xf] }
  0xd3   : > { %591 = vst [vmem:[%s5142_s6 + $0x2fc] sm:$0xf] %v590_v63  ;;  %v718_v63 = vld [vmem:[%s5138_s5 + $0x7f8] sm:$0xf] }
  0xd4   : > { %593 = vst [vmem:[%s5142_s6 + $0x300] sm:$0xf] %v592_v0 }
  0xd5   : > { %595 = vst [vmem:[%s5142_s6 + $0x304] sm:$0xf] %v594_v1 }
  0xd6   : > { %597 = vst [vmem:[%s5142_s6 + $0x308] sm:$0xf] %v596_v2 }
  0xd7   : > { %599 = vst [vmem:[%s5142_s6 + $0x30c] sm:$0xf] %v598_v3 }
  0xd8   : > { %601 = vst [vmem:[%s5142_s6 + $0x310] sm:$0xf] %v600_v4 }
  0xd9   : > { %603 = vst [vmem:[%s5142_s6 + $0x314] sm:$0xf] %v602_v5 }
  0xda   : > { %605 = vst [vmem:[%s5142_s6 + $0x318] sm:$0xf] %v604_v6 }
  0xdb   : > { %607 = vst [vmem:[%s5142_s6 + $0x31c] sm:$0xf] %v606_v7 }
  0xdc   : > { %609 = vst [vmem:[%s5142_s6 + $0x320] sm:$0xf] %v608_v8 }
  0xdd   : > { %611 = vst [vmem:[%s5142_s6 + $0x324] sm:$0xf] %v610_v9 }
  0xde   : > { %613 = vst [vmem:[%s5142_s6 + $0x328] sm:$0xf] %v612_v10 }
  0xdf   : > { %615 = vst [vmem:[%s5142_s6 + $0x32c] sm:$0xf] %v614_v11 }
  0xe0   : > { %617 = vst [vmem:[%s5142_s6 + $0x330] sm:$0xf] %v616_v12 }
  0xe1   : > { %619 = vst [vmem:[%s5142_s6 + $0x334] sm:$0xf] %v618_v13 }
  0xe2   : > { %621 = vst [vmem:[%s5142_s6 + $0x338] sm:$0xf] %v620_v14 }
  0xe3   : > { %623 = vst [vmem:[%s5142_s6 + $0x33c] sm:$0xf] %v622_v15 }
  0xe4   : > { %625 = vst [vmem:[%s5142_s6 + $0x340] sm:$0xf] %v624_v16 }
  0xe5   : > { %627 = vst [vmem:[%s5142_s6 + $0x344] sm:$0xf] %v626_v17 }
  0xe6   : > { %629 = vst [vmem:[%s5142_s6 + $0x348] sm:$0xf] %v628_v18 }
  0xe7   : > { %631 = vst [vmem:[%s5142_s6 + $0x34c] sm:$0xf] %v630_v19 }
  0xe8   : > { %633 = vst [vmem:[%s5142_s6 + $0x350] sm:$0xf] %v632_v20 }
  0xe9   : > { %635 = vst [vmem:[%s5142_s6 + $0x354] sm:$0xf] %v634_v21 }
  0xea   : > { %637 = vst [vmem:[%s5142_s6 + $0x358] sm:$0xf] %v636_v22 }
  0xeb   : > { %639 = vst [vmem:[%s5142_s6 + $0x35c] sm:$0xf] %v638_v23 }
  0xec   : > { %641 = vst [vmem:[%s5142_s6 + $0x360] sm:$0xf] %v640_v24 }
  0xed   : > { %643 = vst [vmem:[%s5142_s6 + $0x364] sm:$0xf] %v642_v25 }
  0xee   : > { %645 = vst [vmem:[%s5142_s6 + $0x368] sm:$0xf] %v644_v26 }
  0xef   : > { %647 = vst [vmem:[%s5142_s6 + $0x36c] sm:$0xf] %v646_v27 }
  0xf0   : > { %649 = vst [vmem:[%s5142_s6 + $0x370] sm:$0xf] %v648_v28 }
  0xf1   : > { %651 = vst [vmem:[%s5142_s6 + $0x374] sm:$0xf] %v650_v29 }
  0xf2   : > { %653 = vst [vmem:[%s5142_s6 + $0x378] sm:$0xf] %v652_v30 }
  0xf3   : > { %655 = vst [vmem:[%s5142_s6 + $0x37c] sm:$0xf] %v654_v31 }
  0xf4   : > { %657 = vst [vmem:[%s5142_s6 + $0x380] sm:$0xf] %v656_v32 }
  0xf5   : > { %659 = vst [vmem:[%s5142_s6 + $0x384] sm:$0xf] %v658_v33 }
  0xf6   : > { %661 = vst [vmem:[%s5142_s6 + $0x388] sm:$0xf] %v660_v34 }
  0xf7   : > { %663 = vst [vmem:[%s5142_s6 + $0x38c] sm:$0xf] %v662_v35 }
  0xf8   : > { %665 = vst [vmem:[%s5142_s6 + $0x390] sm:$0xf] %v664_v36 }
  0xf9   : > { %667 = vst [vmem:[%s5142_s6 + $0x394] sm:$0xf] %v666_v37 }
  0xfa   : > { %669 = vst [vmem:[%s5142_s6 + $0x398] sm:$0xf] %v668_v38 }
  0xfb   : > { %671 = vst [vmem:[%s5142_s6 + $0x39c] sm:$0xf] %v670_v39 }
  0xfc   : > { %673 = vst [vmem:[%s5142_s6 + $0x3a0] sm:$0xf] %v672_v40 }
  0xfd   : > { %675 = vst [vmem:[%s5142_s6 + $0x3a4] sm:$0xf] %v674_v41 }
  0xfe   : > { %677 = vst [vmem:[%s5142_s6 + $0x3a8] sm:$0xf] %v676_v42 }
  0xff   : > { %679 = vst [vmem:[%s5142_s6 + $0x3ac] sm:$0xf] %v678_v43 }
 0x100   : > { %681 = vst [vmem:[%s5142_s6 + $0x3b0] sm:$0xf] %v680_v44 }
 0x101   : > { %683 = vst [vmem:[%s5142_s6 + $0x3b4] sm:$0xf] %v682_v45 }
 0x102   : > { %685 = vst [vmem:[%s5142_s6 + $0x3b8] sm:$0xf] %v684_v46 }
 0x103   : > { %687 = vst [vmem:[%s5142_s6 + $0x3bc] sm:$0xf] %v686_v47 }
 0x104   : > { %689 = vst [vmem:[%s5142_s6 + $0x3c0] sm:$0xf] %v688_v48 }
 0x105   : > { %691 = vst [vmem:[%s5142_s6 + $0x3c4] sm:$0xf] %v690_v49 }
 0x106   : > { %693 = vst [vmem:[%s5142_s6 + $0x3c8] sm:$0xf] %v692_v50 }
 0x107   : > { %695 = vst [vmem:[%s5142_s6 + $0x3cc] sm:$0xf] %v694_v51 }
 0x108   : > { %697 = vst [vmem:[%s5142_s6 + $0x3d0] sm:$0xf] %v696_v52 }
 0x109   : > { %699 = vst [vmem:[%s5142_s6 + $0x3d4] sm:$0xf] %v698_v53 }
 0x10a   : > { %701 = vst [vmem:[%s5142_s6 + $0x3d8] sm:$0xf] %v700_v54 }
 0x10b   : > { %703 = vst [vmem:[%s5142_s6 + $0x3dc] sm:$0xf] %v702_v55 }
 0x10c   : > { %705 = vst [vmem:[%s5142_s6 + $0x3e0] sm:$0xf] %v704_v56 }
 0x10d   : > { %707 = vst [vmem:[%s5142_s6 + $0x3e4] sm:$0xf] %v706_v57 }
 0x10e   : > { %709 = vst [vmem:[%s5142_s6 + $0x3e8] sm:$0xf] %v708_v58 }
 0x10f   : > { %711 = vst [vmem:[%s5142_s6 + $0x3ec] sm:$0xf] %v710_v59 }
 0x110   : > { %713 = vst [vmem:[%s5142_s6 + $0x3f0] sm:$0xf] %v712_v60 }
 0x111   : > { %715 = vst [vmem:[%s5142_s6 + $0x3f4] sm:$0xf] %v714_v61 }
 0x112   : > { %717 = vst [vmem:[%s5142_s6 + $0x3f8] sm:$0xf] %v716_v62 }
 0x113   : > { %719 = vst [vmem:[%s5142_s6 + $0x3fc] sm:$0xf] %v718_v63 }
 0x114 PF: > { %p4159_p8 = scmp.ge.s32.totalorder %s5062_s19, 1  ;;  %p2316_p9 = scmp.lt.s32.totalorder %s5062_s19, 3 }
 0x116   : > { %p2317_p10 = pnand %p4159_p8, %p2316_p9 }
 0x117   : > { %s2323_s7 = sand.u32 (!%p2317_p10), 1, %s5046_s15   ;;  %p2366_p11 = scmp.lt.s32.totalorder (!%p2317_p10), %s5054_s17, 1 }
 0x118   : > { %2320 = sbr.rel (%p2317_p10) target bundleno = 659 (0x293), region = 84  ;;  %s4160_s8 = sshll.u32 (!%p2317_p10), %s2323_s7, 10 }
 0x119   : > { %s5659_s9 = scalar_lea.vmem (!%p2317_p10), [#allocation2], %s4160_s8 }
 0x11d   : > { %v4845_v0 = vld [vmem:[%s5659_s9 + $0x38] sm:$0xff]  ;;  %v4844_v4 = vld [vmem:[%s5659_s9 + $0x30] sm:$0xff]  ;;  %v4843_v8 = vld [vmem:[%s5659_s9 + $0x28] sm:$0xff]  ;;  %s5983_s6 = scalar_select %p2366_p11, %s5054_s17, 1 }
 0x11e   : > { %v4853_v1 = vld [vmem:[%s5659_s9 + $0x78] sm:$0xff]  ;;  %3589 = vmatpush.bf16.msra.mxu0 %v4845_v0  ;;  %v4852_v5 = vld [vmem:[%s5659_s9 + $0x70] sm:$0xff]  ;;  %v4851_v9 = vld [vmem:[%s5659_s9 + $0x68] sm:$0xff]  ;;  %s4803_s15 = sshll.u32 (%p5125_p6), %s5054_s17, 2 }
 0x11f   : > { %v4861_v2 = vld [vmem:[%s5659_s9 + $0xb8] sm:$0xff]  ;;  %3608 = vmatpush.bf16.msra.mxu1 %v4853_v1  ;;  %v4860_v6 = vld [vmem:[%s5659_s9 + $0xb0] sm:$0xff]  ;;  %v4859_v10 = vld [vmem:[%s5659_s9 + $0xa8] sm:$0xff]  ;;  %s2368_s11 = scalar_lea.vmem %s6028_s2, %s5983_s6  ;;  %s2371_s14 = scalar_lea.vmem %s6029_s3, %s5983_s6 }
 0x120   : > { %v4869_v3 = vld [vmem:[%s5659_s9 + $0xf8] sm:$0xff]  ;;  %3627 = vmatpush.bf16.msra.mxu2 %v4861_v2  ;;  %v4868_v7 = vld [vmem:[%s5659_s9 + $0xf0] sm:$0xff]  ;;  %v4867_v11 = vld [vmem:[%s5659_s9 + $0xe8] sm:$0xff]  ;;  %s3990_s29 = scalar_lea.vmem (%p5125_p6), %s6030_s4, %s4803_s15 }
 0x121   : > { %3646 = vmatpush.bf16.msra.mxu3 %v4869_v3  ;;  %v4842_v12 = vld [vmem:[%s5659_s9 + $0x20] sm:$0xff]  ;;  %v4841_v16 = vld [vmem:[%s5659_s9 + $0x18] sm:$0xff]  ;;  %v4840_v20 = vld [vmem:[%s5659_s9 + $0x10] sm:$0xff] }
 0x122   : > { %3590 = vmatpush.bf16.msra.mxu0 %v4844_v4  ;;  %v4850_v13 = vld [vmem:[%s5659_s9 + $0x60] sm:$0xff]  ;;  %v4849_v17 = vld [vmem:[%s5659_s9 + $0x58] sm:$0xff]  ;;  %v4848_v21 = vld [vmem:[%s5659_s9 + $0x50] sm:$0xff] }
 0x123   : > { %3609 = vmatpush.bf16.msra.mxu1 %v4852_v5  ;;  %v4858_v14 = vld [vmem:[%s5659_s9 + $0xa0] sm:$0xff]  ;;  %v4857_v18 = vld [vmem:[%s5659_s9 + $0x98] sm:$0xff]  ;;  %v4856_v22 = vld [vmem:[%s5659_s9 + $0x90] sm:$0xff] }
 0x124   : > { %3628 = vmatpush.bf16.msra.mxu2 %v4860_v6  ;;  %v4866_v15 = vld [vmem:[%s5659_s9 + $0xe0] sm:$0xff]  ;;  %v4865_v19 = vld [vmem:[%s5659_s9 + $0xd8] sm:$0xff]  ;;  %v4864_v23 = vld [vmem:[%s5659_s9 + $0xd0] sm:$0xff] }
 0x125   : > { %3647 = vmatpush.bf16.msra.mxu3 %v4868_v7  ;;  %v4839_v24 = vld [vmem:[%s5659_s9 + $0x8] sm:$0xff]  ;;  %v4838_v28 = vld [vmem:[%s5659_s9] sm:$0xff]  ;;  %v4893_v40 = vld [vmem:[%s5659_s9 + $0x1b8] sm:$0xff] }
 0x126   : > { %3591 = vmatpush.bf16.msra.mxu0 %v4843_v8  ;;  %v4847_v25 = vld [vmem:[%s5659_s9 + $0x48] sm:$0xff]  ;;  %v4164_v29 = vld [vmem:[%s6026_s0] sm:$0xf]  ;;  %v4806_v34 = vld [vmem:[%s6026_s0 + $0x4] sm:$0xf] }
 0x127   : > { %3610 = vmatpush.bf16.msra.mxu1 %v4851_v9  ;;  %v4855_v26 = vld [vmem:[%s5659_s9 + $0x88] sm:$0xff]  ;;  %v4814_v30 = vld [vmem:[%s6026_s0 + $0x3c] sm:$0xf0]  ;;  %v4166_v35 = vld [vmem:[%s6026_s0 + $0x40] sm:$0xf0] }
 0x128   : > { %3629 = vmatpush.bf16.msra.mxu2 %v4859_v10  ;;  %v4863_v27 = vld [vmem:[%s5659_s9 + $0xc8] sm:$0xff]  ;;  %v4846_v31 = vld [vmem:[%s5659_s9 + $0x40] sm:$0xff]  ;;  %v4877_v41 = vld [vmem:[%s5659_s9 + $0x138] sm:$0xff]  ;;  %v4165_v42 = vor.u32 %v4814_v30, %v4164_v29  ;;  %v4169_v43 = vor.u32 %v4806_v34, %v4166_v35 }
 0x129   : > { %3648 = vmatpush.bf16.msra.mxu3 %v4867_v11  ;;  %v4854_v32 = vld [vmem:[%s5659_s9 + $0x80] sm:$0xff]  ;;  %v4172_v36 = vld [vmem:[%s6026_s0 + $0x8] sm:$0xf]  ;;  %v4807_v38 = vld [vmem:[%s6026_s0 + $0xc] sm:$0xf] }
 0x12a   : > { %3592 = vmatpush.bf16.msra.mxu0 %v4842_v12  ;;  %v4862_v33 = vld [vmem:[%s5659_s9 + $0xc0] sm:$0xff]  ;;  %v4815_v37 = vld [vmem:[%s6026_s0 + $0x44] sm:$0xf0]  ;;  %v4174_v39 = vld [vmem:[%s6026_s0 + $0x48] sm:$0xf0] }
 0x12b   : > { %3611 = vmatpush.bf16.msra.mxu1 %v4850_v13  ;;  %v4173_v44 = vor.u32 %v4815_v37, %v4172_v36  ;;  %v4177_v45 = vor.u32 %v4807_v38, %v4174_v39  ;;  %v4885_v46 = vld [vmem:[%s5659_s9 + $0x178] sm:$0xff]  ;;  %v4892_v48 = vld [vmem:[%s5659_s9 + $0x1b0] sm:$0xff]  ;;  %v4891_v52 = vld [vmem:[%s5659_s9 + $0x1a8] sm:$0xff] }
 0x12c   : > { %3630 = vmatpush.bf16.msra.mxu2 %v4858_v14  ;;  %v4901_v47 = vld [vmem:[%s5659_s9 + $0x1f8] sm:$0xff]  ;;  %v4876_v49 = vld [vmem:[%s5659_s9 + $0x130] sm:$0xff]  ;;  %v4875_v53 = vld [vmem:[%s5659_s9 + $0x128] sm:$0xff] }
 0x12d   : > { %3649 = vmatpush.bf16.msra.mxu3 %v4866_v15  ;;  %v4884_v50 = vld [vmem:[%s5659_s9 + $0x170] sm:$0xff]  ;;  %v4883_v54 = vld [vmem:[%s5659_s9 + $0x168] sm:$0xff]  ;;  %v4890_v56 = vld [vmem:[%s5659_s9 + $0x1a0] sm:$0xff] }
 0x12e   : > { %3593 = vmatpush.bf16.msra.mxu0 %v4841_v16  ;;  %v4900_v51 = vld [vmem:[%s5659_s9 + $0x1f0] sm:$0xff]  ;;  %v4899_v55 = vld [vmem:[%s5659_s9 + $0x1e8] sm:$0xff]  ;;  %v4874_v57 = vld [vmem:[%s5659_s9 + $0x120] sm:$0xff] }
 0x12f   : > { %3612 = vmatpush.bf16.msra.mxu1 %v4849_v17  ;;  %v4882_v58 = vld [vmem:[%s5659_s9 + $0x160] sm:$0xff]  ;;  %v4236_v0 = vld [vmem:[%s6026_s0 + $0x88] sm:$0xf]  ;;  %v4823_v2 = vld [vmem:[%s6026_s0 + $0x8c] sm:$0xf] }
 0x130   : > { %3631 = vmatpush.bf16.msra.mxu2 %v4857_v18  ;;  %v4898_v59 = vld [vmem:[%s5659_s9 + $0x1e0] sm:$0xff]  ;;  %v4831_v1 = vld [vmem:[%s6026_s0 + $0xc4] sm:$0xf0]  ;;  %v4238_v3 = vld [vmem:[%s6026_s0 + $0xc8] sm:$0xf0] }
 0x131   : > { %3650 = vmatpush.bf16.msra.mxu3 %v4865_v19  ;;  %v4228_v60 = vld [vmem:[%s6026_s0 + $0x80] sm:$0xf]  ;;  %v4822_v62 = vld [vmem:[%s6026_s0 + $0x84] sm:$0xf]  ;;  %v4889_v4 = vld [vmem:[%s5659_s9 + $0x198] sm:$0xff]  ;;  %v4237_v8 = vor.u32 %v4831_v1, %v4236_v0  ;;  %v4241_v9 = vor.u32 %v4823_v2, %v4238_v3 }
 0x132   : > { %3594 = vmatpush.bf16.msra.mxu0 %v4840_v20  ;;  %v4830_v61 = vld [vmem:[%s6026_s0 + $0xbc] sm:$0xf0]  ;;  %v4230_v63 = vld [vmem:[%s6026_s0 + $0xc0] sm:$0xf0]  ;;  %v4873_v5 = vld [vmem:[%s5659_s9 + $0x118] sm:$0xff] }
 0x133   : > { %3613 = vmatpush.bf16.msra.mxu1 %v4848_v21  ;;  %v4229_v6 = vor.u32 %v4830_v61, %v4228_v60  ;;  %v4233_v7 = vor.u32 %v4822_v62, %v4230_v63  ;;  %v4881_v10 = vld [vmem:[%s5659_s9 + $0x158] sm:$0xff]  ;;  %v4888_v12 = vld [vmem:[%s5659_s9 + $0x190] sm:$0xff]  ;;  %v4887_v16 = vld [vmem:[%s5659_s9 + $0x188] sm:$0xff] }
 0x134   : > { %3632 = vmatpush.bf16.msra.mxu2 %v4856_v22  ;;  %v4897_v11 = vld [vmem:[%s5659_s9 + $0x1d8] sm:$0xff]  ;;  %v4872_v13 = vld [vmem:[%s5659_s9 + $0x110] sm:$0xff]  ;;  %v4871_v17 = vld [vmem:[%s5659_s9 + $0x108] sm:$0xff] }
 0x135   : > { %3651 = vmatpush.bf16.msra.mxu3 %v4864_v23  ;;  %v4880_v14 = vld [vmem:[%s5659_s9 + $0x150] sm:$0xff]  ;;  %v4879_v18 = vld [vmem:[%s5659_s9 + $0x148] sm:$0xff]  ;;  %v4886_v20 = vld [vmem:[%s5659_s9 + $0x180] sm:$0xff] }
 0x136   : > { %3595 = vmatpush.bf16.msra.mxu0 %v4839_v24  ;;  %v4896_v15 = vld [vmem:[%s5659_s9 + $0x1d0] sm:$0xff]  ;;  %v4895_v19 = vld [vmem:[%s5659_s9 + $0x1c8] sm:$0xff]  ;;  %v4870_v21 = vld [vmem:[%s5659_s9 + $0x100] sm:$0xff] }
 0x137   : > { %3614 = vmatpush.bf16.msra.mxu1 %v4847_v25  ;;  %v4878_v22 = vld [vmem:[%s5659_s9 + $0x140] sm:$0xff]  ;;  %v4180_v24 = vld [vmem:[%s6026_s0 + $0x10] sm:$0xf]  ;;  %v4925_v25 = vld [vmem:[%s5659_s9 + $0x2b8] sm:$0xff] }
 0x138   : > { %3633 = vmatpush.bf16.msra.mxu2 %v4855_v26  ;;  %v4894_v23 = vld [vmem:[%s5659_s9 + $0x1c0] sm:$0xff]  ;;  %v4909_v26 = vld [vmem:[%s5659_s9 + $0x238] sm:$0xff]  ;;  %v4182_v29 = vld [vmem:[%s6026_s0 + $0x50] sm:$0xf0] }
 0x139   : > { %3652 = vmatpush.bf16.msra.mxu3 %v4863_v27  ;;  %v4816_v27 = vld [vmem:[%s6026_s0 + $0x4c] sm:$0xf0]  ;;  %v4188_v30 = vld [vmem:[%s6026_s0 + $0x18] sm:$0xf]  ;;  %v4254_v61 = vld [vmem:[%s6026_s0 + $0xd8] sm:$0xf0] }
 0x13a   : > { %3596 = vmatpush.bf16.msra.mxu0 %v4838_v28  ;;  %v4808_v28 = vld [vmem:[%s6026_s0 + $0x14] sm:$0xf]  ;;  %v4917_v34 = vld [vmem:[%s5659_s9 + $0x278] sm:$0xff]  ;;  %v4181_v36 = vor.u32 %v4816_v27, %v4180_v24  ;;  %v4198_v24 = vld [vmem:[%s6026_s0 + $0x60] sm:$0xf0] }
 0x13b   : > { %3615 = vmatpush.bf16.msra.mxu1 %v4846_v31  ;;  %v4817_v31 = vld [vmem:[%s6026_s0 + $0x54] sm:$0xf0]  ;;  %v4924_v37 = vld [vmem:[%s5659_s9 + $0x2b0] sm:$0xff]  ;;  %v4185_v38 = vor.u32 %v4808_v28, %v4182_v29  ;;  %v4811_v27 = vld [vmem:[%s6026_s0 + $0x2c] sm:$0xf] }
 0x13c   : > { %3634 = vmatpush.bf16.msra.mxu2 %v4854_v32  ;;  %v4809_v32 = vld [vmem:[%s6026_s0 + $0x1c] sm:$0xf]  ;;  %v4189_v39 = vor.u32 %v4817_v31, %v4188_v30  ;;  %v4920_v1 = vld [vmem:[%s5659_s9 + $0x290] sm:$0xff]  ;;  %v4206_v28 = vld [vmem:[%s6026_s0 + $0x68] sm:$0xf0] }
 0x13d   : > { %3653 = vmatpush.bf16.msra.mxu3 %v4862_v33  ;;  %3597 = vmatmul.bf16.vlgmr.msra.gmra.mxu0 %v4165_v42  ;;  %v4190_v33 = vld [vmem:[%s6026_s0 + $0x58] sm:$0xf0]  ;;  %v4916_v42 = vld [vmem:[%s5659_s9 + $0x270] sm:$0xff] }
 0x13e   : > { %3665 = vmatpush.bf16.msrb.mxu0 %v4877_v41  ;;  %3616 = vmatmul.bf16.vlgmr.msra.gmra.mxu1 %v4169_v43  ;;  %v4933_v35 = vld [vmem:[%s5659_s9 + $0x2f8] sm:$0xff]  ;;  %v4908_v41 = vld [vmem:[%s5659_s9 + $0x230] sm:$0xff] }
 0x13f   : > { %3635 = vmatmul.bf16.vlgmr.msra.gmra.mxu2 %v4173_v44  ;;  %3684 = vmatpush.bf16.msrb.mxu1 %v4885_v46  ;;  %v4932_v43 = vld [vmem:[%s5659_s9 + $0x2f0] sm:$0xff]  ;;  %v4923_v44 = vld [vmem:[%s5659_s9 + $0x2a8] sm:$0xff]  ;;  %v4905_v60 = vld [vmem:[%s5659_s9 + $0x218] sm:$0xff] }
 0x140   : > { %3703 = vmatpush.bf16.msrb.mxu2 %v4893_v40  ;;  %3654 = vmatmul.bf16.vlgmr.msra.gmra.mxu3 %v4177_v45  ;;  %v4193_v40 = vor.u32 %v4809_v32, %v4190_v33  ;;  %v4907_v45 = vld [vmem:[%s5659_s9 + $0x228] sm:$0xff]  ;;  %v4913_v62 = vld [vmem:[%s5659_s9 + $0x258] sm:$0xff]  ;;  %v4948_v30 = vld [vmem:[%s5659_s9 + $0x370] sm:$0xff]  ;;  %v4209_v33 = vor.u32 %v4811_v27, %v4206_v28 }
 0x141   : > { %3722 = vmatpush.bf16.msrb.mxu3 %v4901_v47  ;;  %v4915_v46 = vld [vmem:[%s5659_s9 + $0x268] sm:$0xff]  ;;  %v4929_v63 = vld [vmem:[%s5659_s9 + $0x2d8] sm:$0xff] }
 0x142   : > { %3666 = vmatpush.bf16.msrb.mxu0 %v4876_v49  ;;  %v4931_v47 = vld [vmem:[%s5659_s9 + $0x2e8] sm:$0xff]  ;;  %v4906_v49 = vld [vmem:[%s5659_s9 + $0x220] sm:$0xff]  ;;  %v4286_v27 = vld [vmem:[%s6026_s0 + $0xf8] sm:$0xf0] }
 0x143   : > { %3685 = vmatpush.bf16.msrb.mxu1 %v4884_v50  ;;  %v4914_v50 = vld [vmem:[%s5659_s9 + $0x260] sm:$0xff] }
 0x144   : > { %3704 = vmatpush.bf16.msrb.mxu2 %v4892_v48  ;;  %v4922_v48 = vld [vmem:[%s5659_s9 + $0x2a0] sm:$0xff] }
 0x145   : > { %3723 = vmatpush.bf16.msrb.mxu3 %v4900_v51  ;;  %v4930_v51 = vld [vmem:[%s5659_s9 + $0x2e0] sm:$0xff] }
 0x146   : > { %3667 = vmatpush.bf16.msrb.mxu0 %v4875_v53  ;;  %v4832_v53 = vld [vmem:[%s6026_s0 + $0xcc] sm:$0xf0] }
 0x147   : > { %3686 = vmatpush.bf16.msrb.mxu1 %v4883_v54  ;;  %v4921_v54 = vld [vmem:[%s5659_s9 + $0x298] sm:$0xff] }
 0x148   : > { %3705 = vmatpush.bf16.msrb.mxu2 %v4891_v52  ;;  %v4244_v52 = vld [vmem:[%s6026_s0 + $0x90] sm:$0xf] }
 0x149   : > { %3724 = vmatpush.bf16.msrb.mxu3 %v4899_v55  ;;  %v4824_v55 = vld [vmem:[%s6026_s0 + $0x94] sm:$0xf]  ;;  %v4245_v0 = vor.u32 %v4832_v53, %v4244_v52  ;;  %v4827_v52 = vld [vmem:[%s6026_s0 + $0xac] sm:$0xf]  ;;  %v4937_v53 = vld [vmem:[%s5659_s9 + $0x318] sm:$0xff] }
 0x14a   : > { %3668 = vmatpush.bf16.msrb.mxu0 %v4874_v57  ;;  %v4252_v57 = vld [vmem:[%s6026_s0 + $0x98] sm:$0xf] }
 0x14b   : > { %3687 = vmatpush.bf16.msrb.mxu1 %v4882_v58  ;;  %v4833_v58 = vld [vmem:[%s6026_s0 + $0xd4] sm:$0xf0] }
 0x14c   : > { %3706 = vmatpush.bf16.msrb.mxu2 %v4890_v56  ;;  %v4246_v56 = vld [vmem:[%s6026_s0 + $0xd0] sm:$0xf0]  ;;  %v4253_v3 = vor.u32 %v4833_v58, %v4252_v57 }
 0x14d   : > { %3725 = vmatpush.bf16.msrb.mxu3 %v4898_v59  ;;  %3602 = vmatmul.bf16.gmra.mxu0 %v4229_v6  ;;  %v4825_v59 = vld [vmem:[%s6026_s0 + $0x9c] sm:$0xf]  ;;  %v4249_v2 = vor.u32 %v4824_v55, %v4246_v56  ;;  %v4912_v6 = vld [vmem:[%s5659_s9 + $0x250] sm:$0xff] }
 0x14e   : > { %3669 = vmatpush.bf16.msrb.mxu0 %v4873_v5  ;;  %3621 = vmatmul.bf16.gmra.mxu1 %v4233_v7  ;;  %v4904_v5 = vld [vmem:[%s5659_s9 + $0x210] sm:$0xff]  ;;  %v4961_v55 = vld [vmem:[%s5659_s9 + $0x3d8] sm:$0xff] }
 0x14f   : > { %3640 = vmatmul.bf16.gmra.mxu2 %v4237_v8  ;;  %3688 = vmatpush.bf16.msrb.mxu1 %v4881_v10  ;;  %v4928_v7 = vld [vmem:[%s5659_s9 + $0x2d0] sm:$0xff]  ;;  %v4919_v8 = vld [vmem:[%s5659_s9 + $0x288] sm:$0xff] }
 0x150   : > { %3707 = vmatpush.bf16.msrb.mxu2 %v4889_v4  ;;  %3659 = vmatmul.bf16.gmra.mxu3 %v4241_v9  ;;  %v4257_v4 = vor.u32 %v4825_v59, %v4254_v61  ;;  %v4903_v9 = vld [vmem:[%s5659_s9 + $0x208] sm:$0xff]  ;;  %v4952_v56 = vld [vmem:[%s5659_s9 + $0x390] sm:$0xff] }
 0x151   : > { %3726 = vmatpush.bf16.msrb.mxu3 %v4897_v11  ;;  %v4911_v10 = vld [vmem:[%s5659_s9 + $0x248] sm:$0xff]  ;;  %v4944_v58 = vld [vmem:[%s5659_s9 + $0x350] sm:$0xff] }
 0x152   : > { %3670 = vmatpush.bf16.msrb.mxu0 %v4872_v13  ;;  %v4927_v11 = vld [vmem:[%s5659_s9 + $0x2c8] sm:$0xff]  ;;  %v4957_v13 = vld [vmem:[%s5659_s9 + $0x3b8] sm:$0xff] }
 0x153   : > { %3689 = vmatpush.bf16.msrb.mxu1 %v4880_v14  ;;  %v4902_v14 = vld [vmem:[%s5659_s9 + $0x200] sm:$0xff] }
 0x154   : > { %3708 = vmatpush.bf16.msrb.mxu2 %v4888_v12  ;;  %v4918_v12 = vld [vmem:[%s5659_s9 + $0x280] sm:$0xff] }
 0x155   : > { %3727 = vmatpush.bf16.msrb.mxu3 %v4896_v15  ;;  %v4910_v15 = vld [vmem:[%s5659_s9 + $0x240] sm:$0xff] }
 0x156   : > { %3671 = vmatpush.bf16.msrb.mxu0 %v4871_v17  ;;  %v4196_v17 = vld [vmem:[%s6026_s0 + $0x20] sm:$0xf] }
 0x157   : > { %3690 = vmatpush.bf16.msrb.mxu1 %v4879_v18  ;;  %v4818_v18 = vld [vmem:[%s6026_s0 + $0x5c] sm:$0xf0] }
 0x158   : > { %3709 = vmatpush.bf16.msrb.mxu2 %v4887_v16  ;;  %v4926_v16 = vld [vmem:[%s5659_s9 + $0x2c0] sm:$0xff]  ;;  %v4197_v29 = vor.u32 %v4818_v18, %v4196_v17 }
 0x159   : > { %3728 = vmatpush.bf16.msrb.mxu3 %v4895_v19  ;;  %v4941_v19 = vld [vmem:[%s5659_s9 + $0x338] sm:$0xff] }
 0x15a   : > { %3672 = vmatpush.bf16.msrb.mxu0 %v4870_v21  ;;  %v4810_v21 = vld [vmem:[%s6026_s0 + $0x24] sm:$0xf] }
 0x15b   : > { %3691 = vmatpush.bf16.msrb.mxu1 %v4878_v22  ;;  %v4965_v22 = vld [vmem:[%s5659_s9 + $0x3f8] sm:$0xff]  ;;  %v4201_v31 = vor.u32 %v4810_v21, %v4198_v24  ;;  %v4836_v21 = vld [vmem:[%s6026_s0 + $0xec] sm:$0xf0] }
 0x15c   : > { %3710 = vmatpush.bf16.msrb.mxu2 %v4886_v20  ;;  %v4949_v20 = vld [vmem:[%s5659_s9 + $0x378] sm:$0xff] }
 0x15d   : > { %3729 = vmatpush.bf16.msrb.mxu3 %v4894_v23  ;;  %3673 = vmatmul.bf16.vlgmr.msrb.gmra.mxu0 %v4181_v36  ;;  %v4956_v23 = vld [vmem:[%s5659_s9 + $0x3b0] sm:$0xff]  ;;  %v4955_v36 = vld [vmem:[%s5659_s9 + $0x3a8] sm:$0xff]  ;;  %v4284_v24 = vld [vmem:[%s6026_s0 + $0xb8] sm:$0xf] }
 0x15e   : > { %3741 = vmatpush.bf16.msra.mxu0 %v4909_v26  ;;  %3692 = vmatmul.bf16.vlgmr.msrb.gmra.mxu1 %v4185_v38  ;;  %v4819_v26 = vld [vmem:[%s6026_s0 + $0x64] sm:$0xf0] }
 0x15f   : > { %3760 = vmatpush.bf16.msra.mxu1 %v4917_v34  ;;  %3711 = vmatmul.bf16.vlgmr.msrb.gmra.mxu2 %v4189_v39  ;;  %v4940_v34 = vld [vmem:[%s5659_s9 + $0x330] sm:$0xff]  ;;  %v4939_v38 = vld [vmem:[%s5659_s9 + $0x328] sm:$0xff] }
 0x160   : > { %3779 = vmatpush.bf16.msra.mxu2 %v4925_v25  ;;  %3730 = vmatmul.bf16.vlgmr.msrb.gmra.mxu3 %v4193_v40  ;;  %v4204_v25 = vld [vmem:[%s6026_s0 + $0x28] sm:$0xf]  ;;  %v4954_v40 = vld [vmem:[%s5659_s9 + $0x3a0] sm:$0xff] }
 0x161   : > { %3798 = vmatpush.bf16.msra.mxu3 %v4933_v35  ;;  %v4205_v32 = vor.u32 %v4819_v26, %v4204_v25  ;;  %v4964_v35 = vld [vmem:[%s5659_s9 + $0x3f0] sm:$0xff]  ;;  %v4963_v39 = vld [vmem:[%s5659_s9 + $0x3e8] sm:$0xff]  ;;  %v4837_v25 = vld [vmem:[%s6026_s0 + $0xf4] sm:$0xf0] }
 0x162   : > { %3742 = vmatpush.bf16.msra.mxu0 %v4908_v41  ;;  %v4946_v41 = vld [vmem:[%s5659_s9 + $0x360] sm:$0xff]  ;;  %v4829_v26 = vld [vmem:[%s6026_s0 + $0xbc] sm:$0xf] }
 0x163   : > { %3761 = vmatpush.bf16.msra.mxu1 %v4916_v42  ;;  %v4938_v42 = vld [vmem:[%s5659_s9 + $0x320] sm:$0xff] }
 0x164   : > { %3780 = vmatpush.bf16.msra.mxu2 %v4924_v37  ;;  %v4947_v37 = vld [vmem:[%s5659_s9 + $0x368] sm:$0xff] }
 0x165   : > { %3799 = vmatpush.bf16.msra.mxu3 %v4932_v43  ;;  %v4962_v43 = vld [vmem:[%s5659_s9 + $0x3e0] sm:$0xff] }
 0x166   : > { %3743 = vmatpush.bf16.msra.mxu0 %v4907_v45  ;;  %v4260_v45 = vld [vmem:[%s6026_s0 + $0xa0] sm:$0xf] }
 0x167   : > { %3762 = vmatpush.bf16.msra.mxu1 %v4915_v46  ;;  %v4834_v46 = vld [vmem:[%s6026_s0 + $0xdc] sm:$0xf0] }
 0x168   : > { %3781 = vmatpush.bf16.msra.mxu2 %v4923_v44  ;;  %v4953_v44 = vld [vmem:[%s5659_s9 + $0x398] sm:$0xff]  ;;  %v4261_v57 = vor.u32 %v4834_v46, %v4260_v45 }
 0x169   : > { %3800 = vmatpush.bf16.msra.mxu3 %v4931_v47  ;;  %v4945_v47 = vld [vmem:[%s5659_s9 + $0x358] sm:$0xff] }
 0x16a   : > { %3744 = vmatpush.bf16.msra.mxu0 %v4906_v49  ;;  %v4262_v49 = vld [vmem:[%s6026_s0 + $0xe0] sm:$0xf0] }
 0x16b   : > { %3763 = vmatpush.bf16.msra.mxu1 %v4914_v50  ;;  %v4268_v50 = vld [vmem:[%s6026_s0 + $0xa8] sm:$0xf] }
 0x16c   : > { %3782 = vmatpush.bf16.msra.mxu2 %v4922_v48  ;;  %v4826_v48 = vld [vmem:[%s6026_s0 + $0xa4] sm:$0xf] }
 0x16d   : > { %3801 = vmatpush.bf16.msra.mxu3 %v4930_v51  ;;  %3678 = vmatmul.bf16.gmra.mxu0 %v4245_v0  ;;  %v4835_v51 = vld [vmem:[%s6026_s0 + $0xe4] sm:$0xf0]  ;;  %v4265_v59 = vor.u32 %v4826_v48, %v4262_v49 }
 0x16e   : > { %3745 = vmatpush.bf16.msra.mxu0 %v4905_v60  ;;  %3697 = vmatmul.bf16.gmra.mxu1 %v4249_v2  ;;  %v4269_v60 = vor.u32 %v4835_v51, %v4268_v50  ;;  %v4951_v0 = vld [vmem:[%s5659_s9 + $0x388] sm:$0xff] }
 0x16f   : > { %3764 = vmatpush.bf16.msra.mxu1 %v4913_v62  ;;  %3716 = vmatmul.bf16.gmra.mxu2 %v4253_v3  ;;  %v4936_v62 = vld [vmem:[%s5659_s9 + $0x310] sm:$0xff]  ;;  %v4935_v2 = vld [vmem:[%s5659_s9 + $0x308] sm:$0xff] }
 0x170   : > { %3783 = vmatpush.bf16.msra.mxu2 %v4921_v54  ;;  %3735 = vmatmul.bf16.gmra.mxu3 %v4257_v4  ;;  %v4270_v54 = vld [vmem:[%s6026_s0 + $0xe8] sm:$0xf0]  ;;  %v4950_v4 = vld [vmem:[%s5659_s9 + $0x380] sm:$0xff] }
 0x171   : > { %3802 = vmatpush.bf16.msra.mxu3 %v4929_v63  ;;  %v4273_v61 = vor.u32 %v4827_v52, %v4270_v54  ;;  %v4960_v63 = vld [vmem:[%s5659_s9 + $0x3d0] sm:$0xff]  ;;  %v4959_v3 = vld [vmem:[%s5659_s9 + $0x3c8] sm:$0xff] }
 0x172   : > { %3746 = vmatpush.bf16.msra.mxu0 %v4904_v5  ;;  %v4942_v5 = vld [vmem:[%s5659_s9 + $0x340] sm:$0xff] }
 0x173   : > { %3765 = vmatpush.bf16.msra.mxu1 %v4912_v6  ;;  %v4934_v6 = vld [vmem:[%s5659_s9 + $0x300] sm:$0xff] }
 0x174   : > { %3784 = vmatpush.bf16.msra.mxu2 %v4920_v1  ;;  %v4943_v1 = vld [vmem:[%s5659_s9 + $0x348] sm:$0xff] }
 0x175   : > { %3803 = vmatpush.bf16.msra.mxu3 %v4928_v7  ;;  %v4958_v7 = vld [vmem:[%s5659_s9 + $0x3c0] sm:$0xff]  ;;  %s4161_s9 = sshll.u32 %s2323_s7, 4 }
 0x176   : > { %3747 = vmatpush.bf16.msra.mxu0 %v4903_v9  ;;  %v4820_v9 = vld [vmem:[%s6026_s0 + $0x6c] sm:$0xf0]  ;;  %s2358_s27 = scalar_lea.vmem [#allocation3], %s4161_s9 }
 0x177   : > { %3766 = vmatpush.bf16.msra.mxu1 %v4911_v10  ;;  %v4812_v10 = vld [vmem:[%s6026_s0 + $0x34] sm:$0xf] }
 0x178   : > { %3785 = vmatpush.bf16.msra.mxu2 %v4919_v8  ;;  %v4212_v8 = vld [vmem:[%s6026_s0 + $0x30] sm:$0xf] }
 0x179   : > { %3804 = vmatpush.bf16.msra.mxu3 %v4927_v11  ;;  %v4214_v11 = vld [vmem:[%s6026_s0 + $0x70] sm:$0xf0] }
 0x17a   : > { %3748 = vmatpush.bf16.msra.mxu0 %v4902_v14  ;;  %v4813_v14 = vld [vmem:[%s6026_s0 + $0x3c] sm:$0xf]  ;;  %v4217_v17 = vor.u32 %v4812_v10, %v4214_v11 }
 0x17b   : > { %3767 = vmatpush.bf16.msra.mxu1 %v4910_v15  ;;  %v4222_v15 = vld [vmem:[%s6026_s0 + $0x78] sm:$0xf0] }
 0x17c   : > { %3786 = vmatpush.bf16.msra.mxu2 %v4918_v12  ;;  %v4220_v12 = vld [vmem:[%s6026_s0 + $0x38] sm:$0xf] }
 0x17d   : > { %3805 = vmatpush.bf16.msra.mxu3 %v4926_v16  ;;  %3749 = vmatmul.bf16.vlgmr.msra.gmra.mxu0 %v4197_v29  ;;  %v4213_v16 = vor.u32 %v4820_v9, %v4212_v8 }
 0x17e   : > { %3817 = vmatpush.bf16.msrb.mxu0 %v4941_v19  ;;  %3768 = vmatmul.bf16.vlgmr.msra.gmra.mxu1 %v4201_v31  ;;  %v4225_v19 = vor.u32 %v4813_v14, %v4222_v15  ;;  %v4289_v31 = vor.u32 %v4829_v26, %v4286_v27 }
 0x17f   : > { %3836 = vmatpush.bf16.msrb.mxu1 %v4949_v20  ;;  %3787 = vmatmul.bf16.vlgmr.msra.gmra.mxu2 %v4205_v32  ;;  %v4276_v20 = vld [vmem:[%s6026_s0 + $0xb0] sm:$0xf] }
 0x180   : > { %3855 = vmatpush.bf16.msrb.mxu2 %v4957_v13  ;;  %3806 = vmatmul.bf16.vlgmr.msra.gmra.mxu3 %v4209_v33  ;;  %v4821_v13 = vld [vmem:[%s6026_s0 + $0x74] sm:$0xf0]  ;;  %v4277_v28 = vor.u32 %v4836_v21, %v4276_v20 }
 0x181   : > { %3874 = vmatpush.bf16.msrb.mxu3 %v4965_v22  ;;  %v4221_v18 = vor.u32 %v4821_v13, %v4220_v12  ;;  %v4828_v22 = vld [vmem:[%s6026_s0 + $0xb4] sm:$0xf] }
 0x182   : > { %3818 = vmatpush.bf16.msrb.mxu0 %v4940_v34 }
 0x183   : > { %3837 = vmatpush.bf16.msrb.mxu1 %v4948_v30  ;;  %v4285_v30 = vor.u32 %v4837_v25, %v4284_v24 }
 0x184   : > { %3856 = vmatpush.bf16.msrb.mxu2 %v4956_v23  ;;  %v4278_v23 = vld [vmem:[%s6026_s0 + $0xf0] sm:$0xf0] }
 0x185   : > { %3875 = vmatpush.bf16.msrb.mxu3 %v4964_v35  ;;  %v4281_v29 = vor.u32 %v4828_v22, %v4278_v23 }
 0x186   : > { %3819 = vmatpush.bf16.msrb.mxu0 %v4939_v38 }
 0x187   : > { %3838 = vmatpush.bf16.msrb.mxu1 %v4947_v37 }
 0x188   : > { %3857 = vmatpush.bf16.msrb.mxu2 %v4955_v36 }
 0x189   : > { %3876 = vmatpush.bf16.msrb.mxu3 %v4963_v39 }
 0x18a   : > { %3820 = vmatpush.bf16.msrb.mxu0 %v4938_v42 }
 0x18b   : > { %3839 = vmatpush.bf16.msrb.mxu1 %v4946_v41 }
 0x18c   : > { %3858 = vmatpush.bf16.msrb.mxu2 %v4954_v40 }
 0x18d   : > { %3877 = vmatpush.bf16.msrb.mxu3 %v4962_v43  ;;  %3754 = vmatmul.bf16.gmra.mxu0 %v4261_v57 }
 0x18e   : > { %3821 = vmatpush.bf16.msrb.mxu0 %v4937_v53  ;;  %3773 = vmatmul.bf16.gmra.mxu1 %v4265_v59 }
 0x18f   : > { %3840 = vmatpush.bf16.msrb.mxu1 %v4945_v47  ;;  %3792 = vmatmul.bf16.gmra.mxu2 %v4269_v60 }
 0x190   : > { %3859 = vmatpush.bf16.msrb.mxu2 %v4953_v44  ;;  %3811 = vmatmul.bf16.gmra.mxu3 %v4273_v61 }
 0x191   : > { %3878 = vmatpush.bf16.msrb.mxu3 %v4961_v55 }
 0x192   : > { %3822 = vmatpush.bf16.msrb.mxu0 %v4936_v62 }
 0x193   : > { %3841 = vmatpush.bf16.msrb.mxu1 %v4944_v58 }
 0x194   : > { %3860 = vmatpush.bf16.msrb.mxu2 %v4952_v56 }
 0x195   : > { %3879 = vmatpush.bf16.msrb.mxu3 %v4960_v63 }
 0x196   : > { %3823 = vmatpush.bf16.msrb.mxu0 %v4935_v2 }
 0x197   : > { %3842 = vmatpush.bf16.msrb.mxu1 %v4943_v1 }
 0x198   : > { %3861 = vmatpush.bf16.msrb.mxu2 %v4951_v0 }
 0x199   : > { %3880 = vmatpush.bf16.msrb.mxu3 %v4959_v3 }
 0x19a   : > { %3824 = vmatpush.bf16.msrb.mxu0 %v4934_v6 }
 0x19b   : > { %3843 = vmatpush.bf16.msrb.mxu1 %v4942_v5 }
 0x19c   : > { %3862 = vmatpush.bf16.msrb.mxu2 %v4950_v4 }
 0x19d   : > { %3881 = vmatpush.bf16.msrb.mxu3 %v4958_v7  ;;  %3825 = vmatmul.bf16.vlgmr.msrb.gmra.mxu0 %v4213_v16 }
 0x19e   : > { %3844 = vmatmul.bf16.vlgmr.msrb.gmra.mxu1 %v4217_v17 }
 0x19f   : > { %3863 = vmatmul.bf16.vlgmr.msrb.gmra.mxu2 %v4221_v18 }
 0x1a0   : > { %3882 = vmatmul.bf16.vlgmr.msrb.gmra.mxu3 %v4225_v19 }
 0x1ad   : > { %3830 = vmatmul.bf16.gmra.mxu0 %v4277_v28 }
 0x1ae   : > { %3849 = vmatmul.bf16.gmra.mxu1 %v4281_v29 }
 0x1af   : > { %3868 = vmatmul.bf16.gmra.mxu2 %v4285_v30 }
 0x1b0   : > { %3887 = vmatmul.bf16.gmra.mxu3 %v4289_v31 }
 0x1ba   : > { %v3598_v32 = vpop.f32.mrf.mxu0 }
 0x1bb   : > { %v3617_v33 = vpop.f32.mrf.mxu1 }
 0x1bc   : > { %v3618_v34 = vadd.f32 %v3617_v33, %v3598_v32 }
 0x1c2   : > { %v3636_v35 = vpop.f32.mrf.mxu2  ;;  %v3600_v38 = vpop.f32.mrf.mxu0 }
 0x1c3   : > { %v3655_v36 = vpop.f32.mrf.mxu3  ;;  %v3637_v37 = vadd.f32 %v3636_v35, %v3618_v34  ;;  %v3619_v39 = vpop.f32.mrf.mxu1 }
 0x1c4   : > { %v3620_v40 = vadd.f32 %v3619_v39, %v3600_v38 }
 0x1c5   : > { %v3656_v41 = vadd.f32 %v3655_v36, %v3637_v37 }
 0x1ca   : > { %v3638_v42 = vpop.f32.mrf.mxu2  ;;  %v3603_v45 = vpop.f32.mrf.mxu0 }
 0x1cb   : > { %v3657_v43 = vpop.f32.mrf.mxu3  ;;  %v3639_v44 = vadd.f32 %v3638_v42, %v3620_v40  ;;  %v3622_v46 = vpop.f32.mrf.mxu1 }
 0x1cc   : > { %v3623_v47 = vadd.f32 %v3622_v46, %v3603_v45 }
 0x1cd   : > { %v3658_v48 = vadd.f32 %v3657_v43, %v3639_v44 }
 0x1d2   : > { %v3641_v49 = vpop.f32.mrf.mxu2  ;;  %v3605_v52 = vpop.f32.mrf.mxu0 }
 0x1d3   : > { %v3660_v50 = vpop.f32.mrf.mxu3  ;;  %v3642_v51 = vadd.f32 %v3641_v49, %v3623_v47  ;;  %v3624_v53 = vpop.f32.mrf.mxu1 }
 0x1d4   : > { %v3625_v54 = vadd.f32 %v3624_v53, %v3605_v52 }
 0x1d5   : > { %v3661_v55 = vadd.f32 %v3660_v50, %v3642_v51 }
 0x1da   : > { %v3643_v56 = vpop.f32.mrf.mxu2  ;;  %v3674_v59 = vpop.f32.mrf.mxu0 }
 0x1db   : > { %v3662_v57 = vpop.f32.mrf.mxu3  ;;  %v3644_v58 = vadd.f32 %v3643_v56, %v3625_v54  ;;  %v3675_v60 = vadd.f32 %v3674_v59, %v3656_v41  ;;  %v3693_v61 = vpop.f32.mrf.mxu1 }
 0x1dd   : > { %v3663_v62 = vadd.f32 %v3662_v57, %v3644_v58  ;;  %v3694_v63 = vadd.f32 %v3693_v61, %v3675_v60 }
 0x1e2   : > { %v3712_v0 = vpop.f32.mrf.mxu2  ;;  %v3676_v3 = vpop.f32.mrf.mxu0 }
 0x1e3   : > { %v3713_v1 = vadd.f32 %v3712_v0, %v3694_v63  ;;  %v3731_v2 = vpop.f32.mrf.mxu3  ;;  %v3695_v4 = vpop.f32.mrf.mxu1  ;;  %v3677_v26 = vadd.f32 %v3676_v3, %v3658_v48 }
 0x1e5   : > { %v3732_v5 = vadd.f32 %v3731_v2, %v3713_v1  ;;  %v3696_v27 = vadd.f32 %v3695_v4, %v3677_v26 }
 0x1ea   : > { %v3714_v6 = vpop.f32.mrf.mxu2  ;;  %v3679_v8 = vpop.f32.mrf.mxu0 }
 0x1eb   : > { %v3733_v7 = vpop.f32.mrf.mxu3  ;;  %v3698_v9 = vpop.f32.mrf.mxu1  ;;  %v3715_v29 = vadd.f32 %v3714_v6, %v3696_v27  ;;  %v3680_v33 = vadd.f32 %v3679_v8, %v3661_v55 }
 0x1ed   : > { %v3734_v34 = vadd.f32 %v3733_v7, %v3715_v29  ;;  %v3699_v36 = vadd.f32 %v3698_v9, %v3680_v33 }
 0x1f2   : > { %v3717_v10 = vpop.f32.mrf.mxu2  ;;  %v3681_v12 = vpop.f32.mrf.mxu0 }
 0x1f3   : > { %v3736_v11 = vpop.f32.mrf.mxu3  ;;  %v3700_v13 = vpop.f32.mrf.mxu1  ;;  %v3718_v39 = vadd.f32 %v3717_v10, %v3699_v36  ;;  %v3682_v44 = vadd.f32 %v3681_v12, %v3663_v62 }
 0x1f5   : > { %v3737_v47 = vadd.f32 %v3736_v11, %v3718_v39  ;;  %v3701_v49 = vadd.f32 %v3700_v13, %v3682_v44 }
 0x1fa   : > { %v3719_v14 = vpop.f32.mrf.mxu2  ;;  %v3750_v16 = vpop.f32.mrf.mxu0 }
 0x1fb   : > { %v3738_v15 = vpop.f32.mrf.mxu3  ;;  %v3769_v17 = vpop.f32.mrf.mxu1  ;;  %v3751_v35 = vadd.f32 %v3750_v16, %v3732_v5  ;;  %v3720_v53 = vadd.f32 %v3719_v14, %v3701_v49 }
 0x1fd   : > { %v3770_v40 = vadd.f32 %v3769_v17, %v3751_v35  ;;  %v3739_v61 = vadd.f32 %v3738_v15, %v3720_v53  ;;  %v5064_v17 = vmov 32.0  }
 0x1fe   : > { %5020 = vrcp.f32 %v5064_v17 }
 0x202   : > { %v3788_v18 = vpop.f32.mrf.mxu2  ;;  %v3752_v20 = vpop.f32.mrf.mxu0 }
 0x203   : > { %v3807_v19 = vpop.f32.mrf.mxu3  ;;  %v3771_v21 = vpop.f32.mrf.mxu1  ;;  %v3753_v37 = vadd.f32 %v3752_v20, %v3734_v34  ;;  %v3789_v45 = vadd.f32 %v3788_v18, %v3770_v40 }
 0x205   : > { %v3772_v46 = vadd.f32 %v3771_v21, %v3753_v37  ;;  %v3808_v50 = vadd.f32 %v3807_v19, %v3789_v45 }
 0x20a   : > { %v3790_v22 = vpop.f32.mrf.mxu2  ;;  %v3755_v24 = vpop.f32.mrf.mxu0 }
 0x20b   : > { %v3809_v23 = vpop.f32.mrf.mxu3  ;;  %v3774_v25 = vpop.f32.mrf.mxu1  ;;  %v3791_v48 = vadd.f32 %v3790_v22, %v3772_v46  ;;  %v3756_v51 = vadd.f32 %v3755_v24, %v3737_v47 }
 0x20c   : > { %v5021_v24 = vpop.eup %5020 }
 0x20d   : > { %v3810_v54 = vadd.f32 %v3809_v23, %v3791_v48  ;;  %v3775_v59 = vadd.f32 %v3774_v25, %v3756_v51  ;;  %v3903_v29 = vmul.f32 32.0, %v5021_v24  ;;  %vm3907_vm0 = vweird.f32 %v5021_v24 }
 0x20f   : > { %v3904_v33 = vsub.f32 1.0, %v3903_v29 }
 0x211   : > { %v3905_v36 = vmul.f32 %v5021_v24, %v3904_v33 }
 0x212   : > { %v3793_v28 = vpop.f32.mrf.mxu2  ;;  %v3757_v31 = vpop.f32.mrf.mxu0 }
 0x213   : > { %v3812_v30 = vpop.f32.mrf.mxu3  ;;  %v3776_v32 = vpop.f32.mrf.mxu1  ;;  %v3794_v63 = vadd.f32 %v3793_v28, %v3775_v59  ;;  %v3758_v62 = vadd.f32 %v3757_v31, %v3739_v61  ;;  %v3906_v39 = vadd.f32 %v5021_v24, %v3905_v36 }
 0x215   : > { %v3813_v4 = vadd.f32 %v3812_v30, %v3794_v63  ;;  %v3777_v8 = vadd.f32 %v3776_v32, %v3758_v62 }
 0x21a   : > { %v3795_v38 = vpop.f32.mrf.mxu2  ;;  %v3826_v42 = vpop.f32.mrf.mxu0 }
 0x21b   : > { %v3814_v41 = vpop.f32.mrf.mxu3  ;;  %v3845_v43 = vpop.f32.mrf.mxu1  ;;  %v3827_v55 = vadd.f32 %v3826_v42, %v3808_v50  ;;  %v3796_v13 = vadd.f32 %v3795_v38, %v3777_v8  ;;  %v3908_v42 = vsel %vm3907_vm0, %v5021_v24, %v3906_v39 }
 0x21d   : > { %v3846_v0 = vadd.f32 %v3845_v43, %v3827_v55  ;;  %v3815_v18 = vadd.f32 %v3814_v41, %v3796_v13 }
 0x222   : > { %v3864_v52 = vpop.f32.mrf.mxu2  ;;  %v3828_v57 = vpop.f32.mrf.mxu0 }
 0x223   : > { %v3883_v56 = vpop.f32.mrf.mxu3  ;;  %v3847_v58 = vpop.f32.mrf.mxu1  ;;  %v3829_v60 = vadd.f32 %v3828_v57, %v3810_v54  ;;  %v3865_v1 = vadd.f32 %v3864_v52, %v3846_v0 }
 0x225   : > { %v3848_v2 = vadd.f32 %v3847_v58, %v3829_v60  ;;  %v3884_v9 = vadd.f32 %v3883_v56, %v3865_v1 }
 0x22a   : > { %v3866_v3 = vpop.f32.mrf.mxu2  ;;  %v3831_v7 = vpop.f32.mrf.mxu0 }
 0x22b   : > { %v3867_v5 = vadd.f32 %v3866_v3, %v3848_v2  ;;  %v3885_v6 = vpop.f32.mrf.mxu3  ;;  %v3832_v11 = vadd.f32 %v3831_v7, %v3813_v4  ;;  %v3850_v12 = vpop.f32.mrf.mxu1 }
 0x22d   : > { %v3886_v10 = vadd.f32 %v3885_v6, %v3867_v5  ;;  %v3851_v16 = vadd.f32 %v3850_v12, %v3832_v11  ;;  %v5018_v6 = vld [vmem:[%s2368_s11] ss:$0 sm:$0xff] }
 0x22e   : > { %v5019_v12 = vld [vmem:[%s2371_s14] ss:$0 sm:$0xff] }
 0x22f   : > { %v3893_v14 = vadd.f32 %v3886_v10, %v3884_v9 }
 0x232   : > { %v3869_v15 = vpop.f32.mrf.mxu2  ;;  %v3833_v21 = vpop.f32.mrf.mxu0 }
 0x233   : > { %v3870_v19 = vadd.f32 %v3869_v15, %v3851_v16  ;;  %v3888_v20 = vpop.f32.mrf.mxu3  ;;  %v3834_v23 = vadd.f32 %v3833_v21, %v3815_v18  ;;  %v3852_v26 = vpop.f32.mrf.mxu1 }
 0x235   : > { %v3889_v22 = vadd.f32 %v3888_v20, %v3870_v19  ;;  %v3853_v27 = vadd.f32 %v3852_v26, %v3834_v23 }
 0x237   : > { %v3894_v25 = vadd.f32 %v3893_v14, %v3889_v22 }
 0x23a   : > { %v3871_v28 = vpop.f32.mrf.mxu2 }
 0x23b   : > { %v3872_v30 = vadd.f32 %v3871_v28, %v3853_v27  ;;  %v3890_v31 = vpop.f32.mrf.mxu3 }
 0x23d   : > { %v3891_v32 = vadd.f32 %v3890_v31, %v3872_v30 }
 0x23f   : > { %v3895_v34 = vadd.f32 %v3894_v25, %v3891_v32 }
 0x241   : > { %v3896_v35 = vrot.slane %v3895_v34, 4 }
 0x243   : > { %v3897_v37 = vadd.f32 %v3896_v35, %v3895_v34 }
 0x245   : > { %v3898_v38 = vrot.slane %v3897_v37, 2 }
 0x247   : > { %v3899_v40 = vadd.f32 %v3898_v38, %v3897_v37 }
 0x249   : > { %v3900_v41 = vrot.slane %v3899_v40, 1 }
 0x24b   : > { %v3901_v43 = vadd.f32 %v3900_v41, %v3899_v40 }
 0x24d   : > { %v3909_v44 = vmul.f32 %v3908_v42, %v3901_v43 }
 0x24f   : > { %v3910_v45 = vsub.f32 %v3884_v9, %v3909_v44  ;;  %v3911_v46 = vsub.f32 %v3886_v10, %v3909_v44  ;;  %v3912_v47 = vsub.f32 %v3889_v22, %v3909_v44  ;;  %v3913_v48 = vsub.f32 %v3891_v32, %v3909_v44 }
 0x251   : > { %v3914_v49 = vmul.f32 %v3910_v45, %v3910_v45  ;;  %v3915_v50 = vmul.f32 %v3911_v46, %v3911_v46  ;;  %v3916_v51 = vmul.f32 %v3912_v47, %v3912_v47  ;;  %v3917_v53 = vmul.f32 %v3913_v48, %v3913_v48 }
 0x253   : > { %v3918_v52 = vadd.f32 %v3915_v50, %v3914_v49 }
 0x255   : > { %v3919_v54 = vadd.f32 %v3918_v52, %v3916_v51 }
 0x257   : > { %v3920_v55 = vadd.f32 %v3919_v54, %v3917_v53 }
 0x259   : > { %v3921_v56 = vrot.slane %v3920_v55, 4 }
 0x25b   : > { %v3922_v57 = vadd.f32 %v3921_v56, %v3920_v55 }
 0x25d   : > { %v3923_v58 = vrot.slane %v3922_v57, 2 }
 0x25f   : > { %v3924_v59 = vadd.f32 %v3923_v58, %v3922_v57 }
 0x261   : > { %v3925_v60 = vrot.slane %v3924_v59, 1 }
 0x263   : > { %v3926_v61 = vadd.f32 %v3925_v60, %v3924_v59 }
 0x265   : > { %v3927_v63 = vmul.f32 %v3926_v61, %v3908_v42 }
 0x267   : > { %v3928_v0 = vadd.f32 1e-05, %v3927_v63 }
 0x269   : > { %5022 = vrsqrt.f32 %v3928_v0  ;;  %vm3935_vm2 = vweird.f32 %v3928_v0 }
 0x26f   : > { %v5023_v62 = vpop.eup %5022 }
 0x270   : > { %v3930_v1 = vmul.f32 %v5023_v62, %v3928_v0  ;;  %vm3936_vm1 = vweird.f32 %v5023_v62 }
 0x271   : > { %vm3937_vm3 = vmor %vm3935_vm2, %vm3936_vm1 }
 0x272   : > { %v3931_v2 = vmul.f32 %v5023_v62, %v3930_v1 }
 0x274   : > { %v3932_v3 = vmul.f32 0.5, %v3931_v2 }
 0x276   : > { %v3933_v4 = vsub.f32 1.5, %v3932_v3 }
 0x278   : > { %v3934_v5 = vmul.f32 %v5023_v62, %v3933_v4 }
 0x27a   : > { %v3938_v7 = vsel %vm3937_vm3, %v5023_v62, %v3934_v5 }
 0x27b   : > { %v3939_v8 = vmul.f32 %v3938_v7, %v3910_v45  ;;  %v3940_v9 = vmul.f32 %v3938_v7, %v3911_v46  ;;  %v3941_v10 = vmul.f32 %v3938_v7, %v3912_v47  ;;  %v3942_v11 = vmul.f32 %v3938_v7, %v3913_v48 }
 0x27d   : > { %v3947_v13 = vmul.f32 %v5018_v6, %v3939_v8  ;;  %v3948_v14 = vmul.f32 %v5018_v6, %v3940_v9  ;;  %v3949_v16 = vmul.f32 %v5018_v6, %v3941_v10  ;;  %v3950_v17 = vmul.f32 %v5018_v6, %v3942_v11 }
 0x27f   : > { %v3955_v15 = vadd.f32 %v5019_v12, %v3947_v13  ;;  %v3956_v18 = vadd.f32 %v5019_v12, %v3948_v14  ;;  %v3957_v19 = vadd.f32 %v5019_v12, %v3949_v16  ;;  %v3958_v20 = vadd.f32 %v5019_v12, %v3950_v17 }
 0x281   : > { %vm3959_vm4 = vcmp.gt.f32.partialorder %v3955_v15, 0.0  ;;  %vm3960_vm5 = vcmp.gt.f32.partialorder %v3956_v18, 0.0  ;;  %vm3961_vm6 = vcmp.gt.f32.partialorder %v3957_v19, 0.0  ;;  %vm3962_vm7 = vcmp.gt.f32.partialorder %v3958_v20, 0.0 }
 0x282   : > { %v3963_v21 = vmul.f32 0.2, %v3955_v15  ;;  %v3964_v22 = vmul.f32 0.2, %v3956_v18  ;;  %v3965_v23 = vmul.f32 0.2, %v3957_v19 }
 0x283   : > { %v3966_v24 = vmul.f32 0.2, %v3958_v20 }
 0x284   : > { %v3967_v25 = vsel %vm3959_vm4, %v3955_v15, %v3963_v21  ;;  %v3968_v26 = vsel %vm3960_vm5, %v3956_v18, %v3964_v22  ;;  %v3969_v27 = vsel %vm3961_vm6, %v3957_v19, %v3965_v23  ;;  %3985 = sbr.rel (!%p5125_p6) target bundleno = 659 (0x293), region = 92 }
 0x285   : > { %v3970_v28 = vsel %vm3962_vm7, %v3958_v20, %v3966_v24  ;;  %v4969_v29 = vpack.c.bf16 %v3968_v26, %v3967_v25 }
 0x286   : > { %v4974_v30 = vpack.c.bf16 %v3970_v28, %v3969_v27 }
 0x287   : > { %4970 = vst [vmem:[%s2358_s27] sm:$0xff] %v4969_v29  }
 0x288   : > { %4976 = vst [vmem:[%s2358_s27 + $0x8] sm:$0xff] %v4974_v30  }
 0x28e   : > { %v4007_v31 = vld [vmem:[%s2358_s27] sm:$0xf]  ;;  %v4009_v32 = vld [vmem:[%s2358_s27 + $0x4] sm:$0xf] }
 0x28f   : > { %v4011_v33 = vld [vmem:[%s2358_s27 + $0x8] sm:$0xf]  ;;  %4008 = vst [vmem:[%s3990_s29] sm:$0xf] %v4007_v31  ;;  %v4013_v34 = vld [vmem:[%s2358_s27 + $0xc] sm:$0xf] }
 0x290   : > { %4010 = vst [vmem:[%s3990_s29 + $0x8] sm:$0xf] %v4009_v32 }
 0x291   : > { %4012 = vst [vmem:[%s3990_s29 + $0x10] sm:$0xf] %v4011_v33 }
 0x292   : > { %4014 = vst [vmem:[%s3990_s29 + $0x18] sm:$0xf] %v4013_v34 }
 0x293 PF: > { %s14_s19 = sadd.s32 1, %s5062_s19   ;;  %s6032_s15 = smov %s5050_s16 }
 0x294   : > { %p11_p12 = scmp.ge.s32.totalorder %s14_s19, 4   ;;  %s6033_s16 = smov %s5130_s25 }
 0x295   : > { %s6034_s17 = smov %s5058_s18  ;;  %s6035_s18 = smov %s6037_s20 }
 0x296   :  { %13 = sbr.rel (!%p11_p12) target bundleno = 3 (0x3), region = 177 }

// kernel: _lambda_.8
= control target key start
LH: loop header
LB: loop body
LE: loop exit
PB: predicated region body
PF: predicated region fallthrough
CT: control target
= control target key end

     0   :  { %s9464_s15 = smov 0   ;;  %s9466_s16 = smov 0   ;;  %s11261_s0 = inlined_call_operand.vmem [shape: bf16[32,4096], index: 0, kind: input, shape index: {}]   ;;  %s11262_s1 = inlined_call_operand.vmem [shape: bf16[4096,512], index: 1, kind: input, shape index: {}]   ;;  %s11263_s2 = inlined_call_operand.vmem [shape: f32[1,512], index: 2, kind: input, shape index: {}]   ;;  %s11264_s3 = inlined_call_operand.vmem [shape: f32[1,512], index: 3, kind: input, shape index: {}]   ;;  %s11265_s4 = inlined_call_operand.vmem [shape: bf16[32,512], index: 4, kind: output, shape index: {}]  }
   0x1   :  { %s9468_s17 = smov 0   ;;  %s9470_s18 = smov 0  }
   0x2   :  { %s9472_s19 = smov 0  }
   0x3 LB: > { %s23_s20 = sadd.s32 1, %s9433_s18  ;;  %s7730_s21 = sadd.s32 4294967295, %s9437_s19   ;;  %s9437_s19 = sphi %s9472_s19, %s14_s19   ;;  %s9433_s18 = sphi %s9470_s18, %s11270_s18   ;;  %s9429_s17 = sphi %s9468_s17, %s11269_s17   ;;  %s9425_s16 = sphi %s9466_s16, %s11268_s16   ;;  %s9421_s15 = sphi %s9464_s15, %s11267_s15  }
   0x4   : > { %p24_p0 = scmp.ge.s32.totalorder %s23_s20, 4  ;;  %p66_p1 = scmp.ne.s32.totalorder %s9425_s16, %s9421_s15 }
   0x5   : > { %p67_p2 = scmp.eq.s32.totalorder %s9437_s19, 0  ;;  %p150_p4 = scmp.eq.s32.totalorder %s7730_s21, 3 }
   0x6   : > { %s11272_s20 = smov (%p24_p0, %s23_s20), 0  ;;  %s59_s23 = sadd.s32 1, %s9425_s16 }
   0x7   : > { %p68_p3 = por %p67_p2, %p66_p1  ;;  %s56_s22 = ssub.s32 %s9433_s18, %s11272_s20 }
   0x8   : > { %p57_p5 = scmp.eq.s32.totalorder %s56_s22, 0  ;;  %p9499_p6 = por %p150_p4, %p66_p1 }
   0x9   : > { %p7734_p7 = scmp.ge.s32.totalorder %s9437_s19, 4 }
   0xa   : > { %s9504_s25 = scalar_select %p57_p5, %s9425_s16, %s59_s23  }
   0xb   : > { %182 = sbr.rel (%p7734_p7) target bundleno = 532 (0x214), region = 20 }
  0x10   : > { %185 = sbr.rel (!%p68_p3) target bundleno = 532 (0x214), region = 24  ;;  %s187_s26 = sand.u32 (%p68_p3), 1, %s9425_s16  }
  0x11   : > { %s7736_s27 = sshll.u32 (%p68_p3), %s9433_s18, 2  ;;  %s7735_s28 = sshll.u32 (%p68_p3), %s187_s26, 11 }
  0x12   : > { %s9512_s5 = scalar_lea.vmem (%p68_p3), %s11262_s1, %s7736_s27  ;;  %s9516_s6 = scalar_lea.vmem (%p68_p3), [#allocation2], %s7735_s28 }
  0x13   : > { %v208_v0 = vld [vmem:[%s9512_s5] sm:$0xf] (%p68_p3)  ;;  %v210_v1 = vld [vmem:[%s9512_s5 + $0x10] sm:$0xf] (%p68_p3) }
  0x14   : > { %209 = vst [vmem:[%s9516_s6] sm:$0xf] (%p68_p3), %v208_v0  ;;  %v212_v2 = vld [vmem:[%s9512_s5 + $0x20] sm:$0xf] (%p68_p3)  ;;  %v214_v3 = vld [vmem:[%s9512_s5 + $0x30] sm:$0xf] (%p68_p3) }
  0x15   : > { %211 = vst [vmem:[%s9516_s6 + $0x4] sm:$0xf] %v210_v1  ;;  %v216_v4 = vld [vmem:[%s9512_s5 + $0x40] sm:$0xf]  ;;  %v218_v5 = vld [vmem:[%s9512_s5 + $0x50] sm:$0xf] }
  0x16   : > { %213 = vst [vmem:[%s9516_s6 + $0x8] sm:$0xf] %v212_v2  ;;  %v220_v6 = vld [vmem:[%s9512_s5 + $0x60] sm:$0xf]  ;;  %v222_v7 = vld [vmem:[%s9512_s5 + $0x70] sm:$0xf] }
  0x17   : > { %215 = vst [vmem:[%s9516_s6 + $0xc] sm:$0xf] %v214_v3  ;;  %v224_v8 = vld [vmem:[%s9512_s5 + $0x80] sm:$0xf]  ;;  %v226_v9 = vld [vmem:[%s9512_s5 + $0x90] sm:$0xf] }
  0x18   : > { %217 = vst [vmem:[%s9516_s6 + $0x10] sm:$0xf] %v216_v4  ;;  %v228_v10 = vld [vmem:[%s9512_s5 + $0xa0] sm:$0xf]  ;;  %v230_v11 = vld [vmem:[%s9512_s5 + $0xb0] sm:$0xf] }
  0x19   : > { %219 = vst [vmem:[%s9516_s6 + $0x14] sm:$0xf] %v218_v5  ;;  %v232_v12 = vld [vmem:[%s9512_s5 + $0xc0] sm:$0xf]  ;;  %v234_v13 = vld [vmem:[%s9512_s5 + $0xd0] sm:$0xf] }
  0x1a   : > { %221 = vst [vmem:[%s9516_s6 + $0x18] sm:$0xf] %v220_v6  ;;  %v236_v14 = vld [vmem:[%s9512_s5 + $0xe0] sm:$0xf]  ;;  %v238_v15 = vld [vmem:[%s9512_s5 + $0xf0] sm:$0xf] }
  0x1b   : > { %223 = vst [vmem:[%s9516_s6 + $0x1c] sm:$0xf] %v222_v7  ;;  %v240_v16 = vld [vmem:[%s9512_s5 + $0x100] sm:$0xf]  ;;  %v242_v17 = vld [vmem:[%s9512_s5 + $0x110] sm:$0xf] }
  0x1c   : > { %225 = vst [vmem:[%s9516_s6 + $0x20] sm:$0xf] %v224_v8  ;;  %v244_v18 = vld [vmem:[%s9512_s5 + $0x120] sm:$0xf]  ;;  %v246_v19 = vld [vmem:[%s9512_s5 + $0x130] sm:$0xf] }
  0x1d   : > { %227 = vst [vmem:[%s9516_s6 + $0x24] sm:$0xf] %v226_v9  ;;  %v248_v20 = vld [vmem:[%s9512_s5 + $0x140] sm:$0xf]  ;;  %v250_v21 = vld [vmem:[%s9512_s5 + $0x150] sm:$0xf] }
  0x1e   : > { %229 = vst [vmem:[%s9516_s6 + $0x28] sm:$0xf] %v228_v10  ;;  %v252_v22 = vld [vmem:[%s9512_s5 + $0x160] sm:$0xf]  ;;  %v254_v23 = vld [vmem:[%s9512_s5 + $0x170] sm:$0xf] }
  0x1f   : > { %231 = vst [vmem:[%s9516_s6 + $0x2c] sm:$0xf] %v230_v11  ;;  %v256_v24 = vld [vmem:[%s9512_s5 + $0x180] sm:$0xf]  ;;  %v258_v25 = vld [vmem:[%s9512_s5 + $0x190] sm:$0xf] }
  0x20   : > { %233 = vst [vmem:[%s9516_s6 + $0x30] sm:$0xf] %v232_v12  ;;  %v260_v26 = vld [vmem:[%s9512_s5 + $0x1a0] sm:$0xf]  ;;  %v262_v27 = vld [vmem:[%s9512_s5 + $0x1b0] sm:$0xf] }
  0x21   : > { %235 = vst [vmem:[%s9516_s6 + $0x34] sm:$0xf] %v234_v13  ;;  %v264_v28 = vld [vmem:[%s9512_s5 + $0x1c0] sm:$0xf]  ;;  %v266_v29 = vld [vmem:[%s9512_s5 + $0x1d0] sm:$0xf] }
  0x22   : > { %237 = vst [vmem:[%s9516_s6 + $0x38] sm:$0xf] %v236_v14  ;;  %v268_v30 = vld [vmem:[%s9512_s5 + $0x1e0] sm:$0xf]  ;;  %v270_v31 = vld [vmem:[%s9512_s5 + $0x1f0] sm:$0xf] }
  0x23   : > { %239 = vst [vmem:[%s9516_s6 + $0x3c] sm:$0xf] %v238_v15  ;;  %v272_v32 = vld [vmem:[%s9512_s5 + $0x200] sm:$0xf]  ;;  %v274_v33 = vld [vmem:[%s9512_s5 + $0x210] sm:$0xf] }
  0x24   : > { %241 = vst [vmem:[%s9516_s6 + $0x40] sm:$0xf] %v240_v16  ;;  %v276_v34 = vld [vmem:[%s9512_s5 + $0x220] sm:$0xf]  ;;  %v278_v35 = vld [vmem:[%s9512_s5 + $0x230] sm:$0xf] }
  0x25   : > { %243 = vst [vmem:[%s9516_s6 + $0x44] sm:$0xf] %v242_v17  ;;  %v280_v36 = vld [vmem:[%s9512_s5 + $0x240] sm:$0xf]  ;;  %v282_v37 = vld [vmem:[%s9512_s5 + $0x250] sm:$0xf] }
  0x26   : > { %245 = vst [vmem:[%s9516_s6 + $0x48] sm:$0xf] %v244_v18  ;;  %v284_v38 = vld [vmem:[%s9512_s5 + $0x260] sm:$0xf]  ;;  %v286_v39 = vld [vmem:[%s9512_s5 + $0x270] sm:$0xf] }
  0x27   : > { %247 = vst [vmem:[%s9516_s6 + $0x4c] sm:$0xf] %v246_v19  ;;  %v288_v40 = vld [vmem:[%s9512_s5 + $0x280] sm:$0xf]  ;;  %v290_v41 = vld [vmem:[%s9512_s5 + $0x290] sm:$0xf] }
  0x28   : > { %249 = vst [vmem:[%s9516_s6 + $0x50] sm:$0xf] %v248_v20  ;;  %v292_v42 = vld [vmem:[%s9512_s5 + $0x2a0] sm:$0xf]  ;;  %v294_v43 = vld [vmem:[%s9512_s5 + $0x2b0] sm:$0xf] }
  0x29   : > { %251 = vst [vmem:[%s9516_s6 + $0x54] sm:$0xf] %v250_v21  ;;  %v296_v44 = vld [vmem:[%s9512_s5 + $0x2c0] sm:$0xf]  ;;  %v298_v45 = vld [vmem:[%s9512_s5 + $0x2d0] sm:$0xf] }
  0x2a   : > { %253 = vst [vmem:[%s9516_s6 + $0x58] sm:$0xf] %v252_v22  ;;  %v300_v46 = vld [vmem:[%s9512_s5 + $0x2e0] sm:$0xf]  ;;  %v302_v47 = vld [vmem:[%s9512_s5 + $0x2f0] sm:$0xf] }
  0x2b   : > { %255 = vst [vmem:[%s9516_s6 + $0x5c] sm:$0xf] %v254_v23  ;;  %v304_v48 = vld [vmem:[%s9512_s5 + $0x300] sm:$0xf]  ;;  %v306_v49 = vld [vmem:[%s9512_s5 + $0x310] sm:$0xf] }
  0x2c   : > { %257 = vst [vmem:[%s9516_s6 + $0x60] sm:$0xf] %v256_v24  ;;  %v308_v50 = vld [vmem:[%s9512_s5 + $0x320] sm:$0xf]  ;;  %v310_v51 = vld [vmem:[%s9512_s5 + $0x330] sm:$0xf] }
  0x2d   : > { %259 = vst [vmem:[%s9516_s6 + $0x64] sm:$0xf] %v258_v25  ;;  %v312_v52 = vld [vmem:[%s9512_s5 + $0x340] sm:$0xf]  ;;  %v314_v53 = vld [vmem:[%s9512_s5 + $0x350] sm:$0xf] }
  0x2e   : > { %261 = vst [vmem:[%s9516_s6 + $0x68] sm:$0xf] %v260_v26  ;;  %v316_v54 = vld [vmem:[%s9512_s5 + $0x360] sm:$0xf]  ;;  %v318_v55 = vld [vmem:[%s9512_s5 + $0x370] sm:$0xf] }
  0x2f   : > { %263 = vst [vmem:[%s9516_s6 + $0x6c] sm:$0xf] %v262_v27  ;;  %v320_v56 = vld [vmem:[%s9512_s5 + $0x380] sm:$0xf]  ;;  %v322_v57 = vld [vmem:[%s9512_s5 + $0x390] sm:$0xf] }
  0x30   : > { %265 = vst [vmem:[%s9516_s6 + $0x70] sm:$0xf] %v264_v28  ;;  %v324_v58 = vld [vmem:[%s9512_s5 + $0x3a0] sm:$0xf]  ;;  %v326_v59 = vld [vmem:[%s9512_s5 + $0x3b0] sm:$0xf] }
  0x31   : > { %267 = vst [vmem:[%s9516_s6 + $0x74] sm:$0xf] %v266_v29  ;;  %v328_v60 = vld [vmem:[%s9512_s5 + $0x3c0] sm:$0xf]  ;;  %v330_v61 = vld [vmem:[%s9512_s5 + $0x3d0] sm:$0xf] }
  0x32   : > { %269 = vst [vmem:[%s9516_s6 + $0x78] sm:$0xf] %v268_v30  ;;  %v332_v62 = vld [vmem:[%s9512_s5 + $0x3e0] sm:$0xf]  ;;  %v334_v63 = vld [vmem:[%s9512_s5 + $0x3f0] sm:$0xf] }
  0x33   : > { %271 = vst [vmem:[%s9516_s6 + $0x7c] sm:$0xf] %v270_v31  ;;  %v336_v0 = vld [vmem:[%s9512_s5 + $0x400] sm:$0xf]  ;;  %v338_v1 = vld [vmem:[%s9512_s5 + $0x410] sm:$0xf] }
  0x34   : > { %273 = vst [vmem:[%s9516_s6 + $0x80] sm:$0xf] %v272_v32  ;;  %v340_v2 = vld [vmem:[%s9512_s5 + $0x420] sm:$0xf]  ;;  %v342_v3 = vld [vmem:[%s9512_s5 + $0x430] sm:$0xf] }
  0x35   : > { %275 = vst [vmem:[%s9516_s6 + $0x84] sm:$0xf] %v274_v33  ;;  %v344_v4 = vld [vmem:[%s9512_s5 + $0x440] sm:$0xf]  ;;  %v346_v5 = vld [vmem:[%s9512_s5 + $0x450] sm:$0xf] }
  0x36   : > { %277 = vst [vmem:[%s9516_s6 + $0x88] sm:$0xf] %v276_v34  ;;  %v348_v6 = vld [vmem:[%s9512_s5 + $0x460] sm:$0xf]  ;;  %v350_v7 = vld [vmem:[%s9512_s5 + $0x470] sm:$0xf] }
  0x37   : > { %279 = vst [vmem:[%s9516_s6 + $0x8c] sm:$0xf] %v278_v35  ;;  %v352_v8 = vld [vmem:[%s9512_s5 + $0x480] sm:$0xf]  ;;  %v354_v9 = vld [vmem:[%s9512_s5 + $0x490] sm:$0xf] }
  0x38   : > { %281 = vst [vmem:[%s9516_s6 + $0x90] sm:$0xf] %v280_v36  ;;  %v356_v10 = vld [vmem:[%s9512_s5 + $0x4a0] sm:$0xf]  ;;  %v358_v11 = vld [vmem:[%s9512_s5 + $0x4b0] sm:$0xf] }
  0x39   : > { %283 = vst [vmem:[%s9516_s6 + $0x94] sm:$0xf] %v282_v37  ;;  %v360_v12 = vld [vmem:[%s9512_s5 + $0x4c0] sm:$0xf]  ;;  %v362_v13 = vld [vmem:[%s9512_s5 + $0x4d0] sm:$0xf] }
  0x3a   : > { %285 = vst [vmem:[%s9516_s6 + $0x98] sm:$0xf] %v284_v38  ;;  %v364_v14 = vld [vmem:[%s9512_s5 + $0x4e0] sm:$0xf]  ;;  %v366_v15 = vld [vmem:[%s9512_s5 + $0x4f0] sm:$0xf] }
  0x3b   : > { %287 = vst [vmem:[%s9516_s6 + $0x9c] sm:$0xf] %v286_v39  ;;  %v368_v16 = vld [vmem:[%s9512_s5 + $0x500] sm:$0xf]  ;;  %v370_v17 = vld [vmem:[%s9512_s5 + $0x510] sm:$0xf] }
  0x3c   : > { %289 = vst [vmem:[%s9516_s6 + $0xa0] sm:$0xf] %v288_v40  ;;  %v372_v18 = vld [vmem:[%s9512_s5 + $0x520] sm:$0xf]  ;;  %v374_v19 = vld [vmem:[%s9512_s5 + $0x530] sm:$0xf] }
  0x3d   : > { %291 = vst [vmem:[%s9516_s6 + $0xa4] sm:$0xf] %v290_v41  ;;  %v376_v20 = vld [vmem:[%s9512_s5 + $0x540] sm:$0xf]  ;;  %v378_v21 = vld [vmem:[%s9512_s5 + $0x550] sm:$0xf] }
  0x3e   : > { %293 = vst [vmem:[%s9516_s6 + $0xa8] sm:$0xf] %v292_v42  ;;  %v380_v22 = vld [vmem:[%s9512_s5 + $0x560] sm:$0xf]  ;;  %v382_v23 = vld [vmem:[%s9512_s5 + $0x570] sm:$0xf] }
  0x3f   : > { %295 = vst [vmem:[%s9516_s6 + $0xac] sm:$0xf] %v294_v43  ;;  %v384_v24 = vld [vmem:[%s9512_s5 + $0x580] sm:$0xf]  ;;  %v386_v25 = vld [vmem:[%s9512_s5 + $0x590] sm:$0xf] }
  0x40   : > { %297 = vst [vmem:[%s9516_s6 + $0xb0] sm:$0xf] %v296_v44  ;;  %v388_v26 = vld [vmem:[%s9512_s5 + $0x5a0] sm:$0xf]  ;;  %v390_v27 = vld [vmem:[%s9512_s5 + $0x5b0] sm:$0xf] }
  0x41   : > { %299 = vst [vmem:[%s9516_s6 + $0xb4] sm:$0xf] %v298_v45  ;;  %v392_v28 = vld [vmem:[%s9512_s5 + $0x5c0] sm:$0xf]  ;;  %v394_v29 = vld [vmem:[%s9512_s5 + $0x5d0] sm:$0xf] }
  0x42   : > { %301 = vst [vmem:[%s9516_s6 + $0xb8] sm:$0xf] %v300_v46  ;;  %v396_v30 = vld [vmem:[%s9512_s5 + $0x5e0] sm:$0xf]  ;;  %v398_v31 = vld [vmem:[%s9512_s5 + $0x5f0] sm:$0xf] }
  0x43   : > { %303 = vst [vmem:[%s9516_s6 + $0xbc] sm:$0xf] %v302_v47  ;;  %v400_v32 = vld [vmem:[%s9512_s5 + $0x600] sm:$0xf]  ;;  %v402_v33 = vld [vmem:[%s9512_s5 + $0x610] sm:$0xf] }
  0x44   : > { %305 = vst [vmem:[%s9516_s6 + $0xc0] sm:$0xf] %v304_v48  ;;  %v404_v34 = vld [vmem:[%s9512_s5 + $0x620] sm:$0xf]  ;;  %v406_v35 = vld [vmem:[%s9512_s5 + $0x630] sm:$0xf] }
  0x45   : > { %307 = vst [vmem:[%s9516_s6 + $0xc4] sm:$0xf] %v306_v49  ;;  %v408_v36 = vld [vmem:[%s9512_s5 + $0x640] sm:$0xf]  ;;  %v410_v37 = vld [vmem:[%s9512_s5 + $0x650] sm:$0xf] }
  0x46   : > { %309 = vst [vmem:[%s9516_s6 + $0xc8] sm:$0xf] %v308_v50  ;;  %v412_v38 = vld [vmem:[%s9512_s5 + $0x660] sm:$0xf]  ;;  %v414_v39 = vld [vmem:[%s9512_s5 + $0x670] sm:$0xf] }
  0x47   : > { %311 = vst [vmem:[%s9516_s6 + $0xcc] sm:$0xf] %v310_v51  ;;  %v416_v40 = vld [vmem:[%s9512_s5 + $0x680] sm:$0xf]  ;;  %v418_v41 = vld [vmem:[%s9512_s5 + $0x690] sm:$0xf] }
  0x48   : > { %313 = vst [vmem:[%s9516_s6 + $0xd0] sm:$0xf] %v312_v52  ;;  %v420_v42 = vld [vmem:[%s9512_s5 + $0x6a0] sm:$0xf]  ;;  %v422_v43 = vld [vmem:[%s9512_s5 + $0x6b0] sm:$0xf] }
  0x49   : > { %315 = vst [vmem:[%s9516_s6 + $0xd4] sm:$0xf] %v314_v53  ;;  %v424_v44 = vld [vmem:[%s9512_s5 + $0x6c0] sm:$0xf]  ;;  %v426_v45 = vld [vmem:[%s9512_s5 + $0x6d0] sm:$0xf] }
  0x4a   : > { %317 = vst [vmem:[%s9516_s6 + $0xd8] sm:$0xf] %v316_v54  ;;  %v428_v46 = vld [vmem:[%s9512_s5 + $0x6e0] sm:$0xf]  ;;  %v430_v47 = vld [vmem:[%s9512_s5 + $0x6f0] sm:$0xf] }
  0x4b   : > { %319 = vst [vmem:[%s9516_s6 + $0xdc] sm:$0xf] %v318_v55  ;;  %v432_v48 = vld [vmem:[%s9512_s5 + $0x700] sm:$0xf]  ;;  %v434_v49 = vld [vmem:[%s9512_s5 + $0x710] sm:$0xf] }
  0x4c   : > { %321 = vst [vmem:[%s9516_s6 + $0xe0] sm:$0xf] %v320_v56  ;;  %v436_v50 = vld [vmem:[%s9512_s5 + $0x720] sm:$0xf]  ;;  %v438_v51 = vld [vmem:[%s9512_s5 + $0x730] sm:$0xf] }
  0x4d   : > { %323 = vst [vmem:[%s9516_s6 + $0xe4] sm:$0xf] %v322_v57  ;;  %v440_v52 = vld [vmem:[%s9512_s5 + $0x740] sm:$0xf]  ;;  %v442_v53 = vld [vmem:[%s9512_s5 + $0x750] sm:$0xf] }
  0x4e   : > { %325 = vst [vmem:[%s9516_s6 + $0xe8] sm:$0xf] %v324_v58  ;;  %v444_v54 = vld [vmem:[%s9512_s5 + $0x760] sm:$0xf]  ;;  %v446_v55 = vld [vmem:[%s9512_s5 + $0x770] sm:$0xf] }
  0x4f   : > { %327 = vst [vmem:[%s9516_s6 + $0xec] sm:$0xf] %v326_v59  ;;  %v448_v56 = vld [vmem:[%s9512_s5 + $0x780] sm:$0xf]  ;;  %v450_v57 = vld [vmem:[%s9512_s5 + $0x790] sm:$0xf] }
  0x50   : > { %329 = vst [vmem:[%s9516_s6 + $0xf0] sm:$0xf] %v328_v60  ;;  %v452_v58 = vld [vmem:[%s9512_s5 + $0x7a0] sm:$0xf]  ;;  %v454_v59 = vld [vmem:[%s9512_s5 + $0x7b0] sm:$0xf] }
  0x51   : > { %331 = vst [vmem:[%s9516_s6 + $0xf4] sm:$0xf] %v330_v61  ;;  %v456_v60 = vld [vmem:[%s9512_s5 + $0x7c0] sm:$0xf]  ;;  %v458_v61 = vld [vmem:[%s9512_s5 + $0x7d0] sm:$0xf] }
  0x52   : > { %333 = vst [vmem:[%s9516_s6 + $0xf8] sm:$0xf] %v332_v62  ;;  %v460_v62 = vld [vmem:[%s9512_s5 + $0x7e0] sm:$0xf] }
  0x53   : > { %335 = vst [vmem:[%s9516_s6 + $0xfc] sm:$0xf] %v334_v63  ;;  %v462_v63 = vld [vmem:[%s9512_s5 + $0x7f0] sm:$0xf] }
  0x54   : > { %337 = vst [vmem:[%s9516_s6 + $0x100] sm:$0xf] %v336_v0  ;;  %v464_v0 = vld [vmem:[%s9512_s5 + $0x800] sm:$0xf] }
  0x55   : > { %339 = vst [vmem:[%s9516_s6 + $0x104] sm:$0xf] %v338_v1  ;;  %v466_v1 = vld [vmem:[%s9512_s5 + $0x810] sm:$0xf] }
  0x56   : > { %341 = vst [vmem:[%s9516_s6 + $0x108] sm:$0xf] %v340_v2  ;;  %v468_v2 = vld [vmem:[%s9512_s5 + $0x820] sm:$0xf] }
  0x57   : > { %343 = vst [vmem:[%s9516_s6 + $0x10c] sm:$0xf] %v342_v3  ;;  %v470_v3 = vld [vmem:[%s9512_s5 + $0x830] sm:$0xf] }
  0x58   : > { %345 = vst [vmem:[%s9516_s6 + $0x110] sm:$0xf] %v344_v4  ;;  %v472_v4 = vld [vmem:[%s9512_s5 + $0x840] sm:$0xf] }
  0x59   : > { %347 = vst [vmem:[%s9516_s6 + $0x114] sm:$0xf] %v346_v5  ;;  %v474_v5 = vld [vmem:[%s9512_s5 + $0x850] sm:$0xf] }
  0x5a   : > { %349 = vst [vmem:[%s9516_s6 + $0x118] sm:$0xf] %v348_v6  ;;  %v476_v6 = vld [vmem:[%s9512_s5 + $0x860] sm:$0xf] }
  0x5b   : > { %351 = vst [vmem:[%s9516_s6 + $0x11c] sm:$0xf] %v350_v7  ;;  %v478_v7 = vld [vmem:[%s9512_s5 + $0x870] sm:$0xf] }
  0x5c   : > { %353 = vst [vmem:[%s9516_s6 + $0x120] sm:$0xf] %v352_v8  ;;  %v480_v8 = vld [vmem:[%s9512_s5 + $0x880] sm:$0xf] }
  0x5d   : > { %355 = vst [vmem:[%s9516_s6 + $0x124] sm:$0xf] %v354_v9  ;;  %v482_v9 = vld [vmem:[%s9512_s5 + $0x890] sm:$0xf] }
  0x5e   : > { %357 = vst [vmem:[%s9516_s6 + $0x128] sm:$0xf] %v356_v10  ;;  %v484_v10 = vld [vmem:[%s9512_s5 + $0x8a0] sm:$0xf] }
  0x5f   : > { %359 = vst [vmem:[%s9516_s6 + $0x12c] sm:$0xf] %v358_v11  ;;  %v486_v11 = vld [vmem:[%s9512_s5 + $0x8b0] sm:$0xf] }
  0x60   : > { %361 = vst [vmem:[%s9516_s6 + $0x130] sm:$0xf] %v360_v12  ;;  %v488_v12 = vld [vmem:[%s9512_s5 + $0x8c0] sm:$0xf] }
  0x61   : > { %363 = vst [vmem:[%s9516_s6 + $0x134] sm:$0xf] %v362_v13  ;;  %v490_v13 = vld [vmem:[%s9512_s5 + $0x8d0] sm:$0xf] }
  0x62   : > { %365 = vst [vmem:[%s9516_s6 + $0x138] sm:$0xf] %v364_v14  ;;  %v492_v14 = vld [vmem:[%s9512_s5 + $0x8e0] sm:$0xf] }
  0x63   : > { %367 = vst [vmem:[%s9516_s6 + $0x13c] sm:$0xf] %v366_v15  ;;  %v494_v15 = vld [vmem:[%s9512_s5 + $0x8f0] sm:$0xf] }
  0x64   : > { %369 = vst [vmem:[%s9516_s6 + $0x140] sm:$0xf] %v368_v16  ;;  %v496_v16 = vld [vmem:[%s9512_s5 + $0x900] sm:$0xf] }
  0x65   : > { %371 = vst [vmem:[%s9516_s6 + $0x144] sm:$0xf] %v370_v17  ;;  %v498_v17 = vld [vmem:[%s9512_s5 + $0x910] sm:$0xf] }
  0x66   : > { %373 = vst [vmem:[%s9516_s6 + $0x148] sm:$0xf] %v372_v18  ;;  %v500_v18 = vld [vmem:[%s9512_s5 + $0x920] sm:$0xf] }
  0x67   : > { %375 = vst [vmem:[%s9516_s6 + $0x14c] sm:$0xf] %v374_v19  ;;  %v502_v19 = vld [vmem:[%s9512_s5 + $0x930] sm:$0xf] }
  0x68   : > { %377 = vst [vmem:[%s9516_s6 + $0x150] sm:$0xf] %v376_v20  ;;  %v504_v20 = vld [vmem:[%s9512_s5 + $0x940] sm:$0xf] }
  0x69   : > { %379 = vst [vmem:[%s9516_s6 + $0x154] sm:$0xf] %v378_v21  ;;  %v506_v21 = vld [vmem:[%s9512_s5 + $0x950] sm:$0xf] }
  0x6a   : > { %381 = vst [vmem:[%s9516_s6 + $0x158] sm:$0xf] %v380_v22  ;;  %v508_v22 = vld [vmem:[%s9512_s5 + $0x960] sm:$0xf] }
  0x6b   : > { %383 = vst [vmem:[%s9516_s6 + $0x15c] sm:$0xf] %v382_v23  ;;  %v510_v23 = vld [vmem:[%s9512_s5 + $0x970] sm:$0xf] }
  0x6c   : > { %385 = vst [vmem:[%s9516_s6 + $0x160] sm:$0xf] %v384_v24  ;;  %v512_v24 = vld [vmem:[%s9512_s5 + $0x980] sm:$0xf] }
  0x6d   : > { %387 = vst [vmem:[%s9516_s6 + $0x164] sm:$0xf] %v386_v25  ;;  %v514_v25 = vld [vmem:[%s9512_s5 + $0x990] sm:$0xf] }
  0x6e   : > { %389 = vst [vmem:[%s9516_s6 + $0x168] sm:$0xf] %v388_v26  ;;  %v516_v26 = vld [vmem:[%s9512_s5 + $0x9a0] sm:$0xf] }
  0x6f   : > { %391 = vst [vmem:[%s9516_s6 + $0x16c] sm:$0xf] %v390_v27  ;;  %v518_v27 = vld [vmem:[%s9512_s5 + $0x9b0] sm:$0xf] }
  0x70   : > { %393 = vst [vmem:[%s9516_s6 + $0x170] sm:$0xf] %v392_v28  ;;  %v520_v28 = vld [vmem:[%s9512_s5 + $0x9c0] sm:$0xf] }
  0x71   : > { %395 = vst [vmem:[%s9516_s6 + $0x174] sm:$0xf] %v394_v29  ;;  %v522_v29 = vld [vmem:[%s9512_s5 + $0x9d0] sm:$0xf] }
  0x72   : > { %397 = vst [vmem:[%s9516_s6 + $0x178] sm:$0xf] %v396_v30  ;;  %v524_v30 = vld [vmem:[%s9512_s5 + $0x9e0] sm:$0xf] }
  0x73   : > { %399 = vst [vmem:[%s9516_s6 + $0x17c] sm:$0xf] %v398_v31  ;;  %v526_v31 = vld [vmem:[%s9512_s5 + $0x9f0] sm:$0xf] }
  0x74   : > { %401 = vst [vmem:[%s9516_s6 + $0x180] sm:$0xf] %v400_v32  ;;  %v528_v32 = vld [vmem:[%s9512_s5 + $0xa00] sm:$0xf] }
  0x75   : > { %403 = vst [vmem:[%s9516_s6 + $0x184] sm:$0xf] %v402_v33  ;;  %v530_v33 = vld [vmem:[%s9512_s5 + $0xa10] sm:$0xf] }
  0x76   : > { %405 = vst [vmem:[%s9516_s6 + $0x188] sm:$0xf] %v404_v34  ;;  %v532_v34 = vld [vmem:[%s9512_s5 + $0xa20] sm:$0xf] }
  0x77   : > { %407 = vst [vmem:[%s9516_s6 + $0x18c] sm:$0xf] %v406_v35  ;;  %v534_v35 = vld [vmem:[%s9512_s5 + $0xa30] sm:$0xf] }
  0x78   : > { %409 = vst [vmem:[%s9516_s6 + $0x190] sm:$0xf] %v408_v36  ;;  %v536_v36 = vld [vmem:[%s9512_s5 + $0xa40] sm:$0xf] }
  0x79   : > { %411 = vst [vmem:[%s9516_s6 + $0x194] sm:$0xf] %v410_v37  ;;  %v538_v37 = vld [vmem:[%s9512_s5 + $0xa50] sm:$0xf] }
  0x7a   : > { %413 = vst [vmem:[%s9516_s6 + $0x198] sm:$0xf] %v412_v38  ;;  %v540_v38 = vld [vmem:[%s9512_s5 + $0xa60] sm:$0xf] }
  0x7b   : > { %415 = vst [vmem:[%s9516_s6 + $0x19c] sm:$0xf] %v414_v39  ;;  %v542_v39 = vld [vmem:[%s9512_s5 + $0xa70] sm:$0xf] }
  0x7c   : > { %417 = vst [vmem:[%s9516_s6 + $0x1a0] sm:$0xf] %v416_v40  ;;  %v544_v40 = vld [vmem:[%s9512_s5 + $0xa80] sm:$0xf] }
  0x7d   : > { %419 = vst [vmem:[%s9516_s6 + $0x1a4] sm:$0xf] %v418_v41  ;;  %v546_v41 = vld [vmem:[%s9512_s5 + $0xa90] sm:$0xf] }
  0x7e   : > { %421 = vst [vmem:[%s9516_s6 + $0x1a8] sm:$0xf] %v420_v42  ;;  %v548_v42 = vld [vmem:[%s9512_s5 + $0xaa0] sm:$0xf] }
  0x7f   : > { %423 = vst [vmem:[%s9516_s6 + $0x1ac] sm:$0xf] %v422_v43  ;;  %v550_v43 = vld [vmem:[%s9512_s5 + $0xab0] sm:$0xf] }
  0x80   : > { %425 = vst [vmem:[%s9516_s6 + $0x1b0] sm:$0xf] %v424_v44  ;;  %v552_v44 = vld [vmem:[%s9512_s5 + $0xac0] sm:$0xf] }
  0x81   : > { %427 = vst [vmem:[%s9516_s6 + $0x1b4] sm:$0xf] %v426_v45  ;;  %v554_v45 = vld [vmem:[%s9512_s5 + $0xad0] sm:$0xf] }
  0x82   : > { %429 = vst [vmem:[%s9516_s6 + $0x1b8] sm:$0xf] %v428_v46  ;;  %v556_v46 = vld [vmem:[%s9512_s5 + $0xae0] sm:$0xf] }
  0x83   : > { %431 = vst [vmem:[%s9516_s6 + $0x1bc] sm:$0xf] %v430_v47  ;;  %v558_v47 = vld [vmem:[%s9512_s5 + $0xaf0] sm:$0xf] }
  0x84   : > { %433 = vst [vmem:[%s9516_s6 + $0x1c0] sm:$0xf] %v432_v48  ;;  %v560_v48 = vld [vmem:[%s9512_s5 + $0xb00] sm:$0xf] }
  0x85   : > { %435 = vst [vmem:[%s9516_s6 + $0x1c4] sm:$0xf] %v434_v49  ;;  %v562_v49 = vld [vmem:[%s9512_s5 + $0xb10] sm:$0xf] }
  0x86   : > { %437 = vst [vmem:[%s9516_s6 + $0x1c8] sm:$0xf] %v436_v50  ;;  %v564_v50 = vld [vmem:[%s9512_s5 + $0xb20] sm:$0xf] }
  0x87   : > { %439 = vst [vmem:[%s9516_s6 + $0x1cc] sm:$0xf] %v438_v51  ;;  %v566_v51 = vld [vmem:[%s9512_s5 + $0xb30] sm:$0xf] }
  0x88   : > { %441 = vst [vmem:[%s9516_s6 + $0x1d0] sm:$0xf] %v440_v52  ;;  %v568_v52 = vld [vmem:[%s9512_s5 + $0xb40] sm:$0xf] }
  0x89   : > { %443 = vst [vmem:[%s9516_s6 + $0x1d4] sm:$0xf] %v442_v53  ;;  %v570_v53 = vld [vmem:[%s9512_s5 + $0xb50] sm:$0xf] }
  0x8a   : > { %445 = vst [vmem:[%s9516_s6 + $0x1d8] sm:$0xf] %v444_v54  ;;  %v572_v54 = vld [vmem:[%s9512_s5 + $0xb60] sm:$0xf] }
  0x8b   : > { %447 = vst [vmem:[%s9516_s6 + $0x1dc] sm:$0xf] %v446_v55  ;;  %v574_v55 = vld [vmem:[%s9512_s5 + $0xb70] sm:$0xf] }
  0x8c   : > { %449 = vst [vmem:[%s9516_s6 + $0x1e0] sm:$0xf] %v448_v56  ;;  %v576_v56 = vld [vmem:[%s9512_s5 + $0xb80] sm:$0xf] }
  0x8d   : > { %451 = vst [vmem:[%s9516_s6 + $0x1e4] sm:$0xf] %v450_v57  ;;  %v578_v57 = vld [vmem:[%s9512_s5 + $0xb90] sm:$0xf] }
  0x8e   : > { %453 = vst [vmem:[%s9516_s6 + $0x1e8] sm:$0xf] %v452_v58  ;;  %v580_v58 = vld [vmem:[%s9512_s5 + $0xba0] sm:$0xf] }
  0x8f   : > { %455 = vst [vmem:[%s9516_s6 + $0x1ec] sm:$0xf] %v454_v59  ;;  %v582_v59 = vld [vmem:[%s9512_s5 + $0xbb0] sm:$0xf] }
  0x90   : > { %457 = vst [vmem:[%s9516_s6 + $0x1f0] sm:$0xf] %v456_v60  ;;  %v584_v60 = vld [vmem:[%s9512_s5 + $0xbc0] sm:$0xf] }
  0x91   : > { %459 = vst [vmem:[%s9516_s6 + $0x1f4] sm:$0xf] %v458_v61  ;;  %v586_v61 = vld [vmem:[%s9512_s5 + $0xbd0] sm:$0xf] }
  0x92   : > { %461 = vst [vmem:[%s9516_s6 + $0x1f8] sm:$0xf] %v460_v62  ;;  %v588_v62 = vld [vmem:[%s9512_s5 + $0xbe0] sm:$0xf] }
  0x93   : > { %463 = vst [vmem:[%s9516_s6 + $0x1fc] sm:$0xf] %v462_v63  ;;  %v590_v63 = vld [vmem:[%s9512_s5 + $0xbf0] sm:$0xf] }
  0x94   : > { %465 = vst [vmem:[%s9516_s6 + $0x200] sm:$0xf] %v464_v0  ;;  %v592_v0 = vld [vmem:[%s9512_s5 + $0xc00] sm:$0xf] }
  0x95   : > { %467 = vst [vmem:[%s9516_s6 + $0x204] sm:$0xf] %v466_v1  ;;  %v594_v1 = vld [vmem:[%s9512_s5 + $0xc10] sm:$0xf] }
  0x96   : > { %469 = vst [vmem:[%s9516_s6 + $0x208] sm:$0xf] %v468_v2  ;;  %v596_v2 = vld [vmem:[%s9512_s5 + $0xc20] sm:$0xf] }
  0x97   : > { %471 = vst [vmem:[%s9516_s6 + $0x20c] sm:$0xf] %v470_v3  ;;  %v598_v3 = vld [vmem:[%s9512_s5 + $0xc30] sm:$0xf] }
  0x98   : > { %473 = vst [vmem:[%s9516_s6 + $0x210] sm:$0xf] %v472_v4  ;;  %v600_v4 = vld [vmem:[%s9512_s5 + $0xc40] sm:$0xf] }
  0x99   : > { %475 = vst [vmem:[%s9516_s6 + $0x214] sm:$0xf] %v474_v5  ;;  %v602_v5 = vld [vmem:[%s9512_s5 + $0xc50] sm:$0xf] }
  0x9a   : > { %477 = vst [vmem:[%s9516_s6 + $0x218] sm:$0xf] %v476_v6  ;;  %v604_v6 = vld [vmem:[%s9512_s5 + $0xc60] sm:$0xf] }
  0x9b   : > { %479 = vst [vmem:[%s9516_s6 + $0x21c] sm:$0xf] %v478_v7  ;;  %v606_v7 = vld [vmem:[%s9512_s5 + $0xc70] sm:$0xf] }
  0x9c   : > { %481 = vst [vmem:[%s9516_s6 + $0x220] sm:$0xf] %v480_v8  ;;  %v608_v8 = vld [vmem:[%s9512_s5 + $0xc80] sm:$0xf] }
  0x9d   : > { %483 = vst [vmem:[%s9516_s6 + $0x224] sm:$0xf] %v482_v9  ;;  %v610_v9 = vld [vmem:[%s9512_s5 + $0xc90] sm:$0xf] }
  0x9e   : > { %485 = vst [vmem:[%s9516_s6 + $0x228] sm:$0xf] %v484_v10  ;;  %v612_v10 = vld [vmem:[%s9512_s5 + $0xca0] sm:$0xf] }
  0x9f   : > { %487 = vst [vmem:[%s9516_s6 + $0x22c] sm:$0xf] %v486_v11  ;;  %v614_v11 = vld [vmem:[%s9512_s5 + $0xcb0] sm:$0xf] }
  0xa0   : > { %489 = vst [vmem:[%s9516_s6 + $0x230] sm:$0xf] %v488_v12  ;;  %v616_v12 = vld [vmem:[%s9512_s5 + $0xcc0] sm:$0xf] }
  0xa1   : > { %491 = vst [vmem:[%s9516_s6 + $0x234] sm:$0xf] %v490_v13  ;;  %v618_v13 = vld [vmem:[%s9512_s5 + $0xcd0] sm:$0xf] }
  0xa2   : > { %493 = vst [vmem:[%s9516_s6 + $0x238] sm:$0xf] %v492_v14  ;;  %v620_v14 = vld [vmem:[%s9512_s5 + $0xce0] sm:$0xf] }
  0xa3   : > { %495 = vst [vmem:[%s9516_s6 + $0x23c] sm:$0xf] %v494_v15  ;;  %v622_v15 = vld [vmem:[%s9512_s5 + $0xcf0] sm:$0xf] }
  0xa4   : > { %497 = vst [vmem:[%s9516_s6 + $0x240] sm:$0xf] %v496_v16  ;;  %v624_v16 = vld [vmem:[%s9512_s5 + $0xd00] sm:$0xf] }
  0xa5   : > { %499 = vst [vmem:[%s9516_s6 + $0x244] sm:$0xf] %v498_v17  ;;  %v626_v17 = vld [vmem:[%s9512_s5 + $0xd10] sm:$0xf] }
  0xa6   : > { %501 = vst [vmem:[%s9516_s6 + $0x248] sm:$0xf] %v500_v18  ;;  %v628_v18 = vld [vmem:[%s9512_s5 + $0xd20] sm:$0xf] }
  0xa7   : > { %503 = vst [vmem:[%s9516_s6 + $0x24c] sm:$0xf] %v502_v19  ;;  %v630_v19 = vld [vmem:[%s9512_s5 + $0xd30] sm:$0xf] }
  0xa8   : > { %505 = vst [vmem:[%s9516_s6 + $0x250] sm:$0xf] %v504_v20  ;;  %v632_v20 = vld [vmem:[%s9512_s5 + $0xd40] sm:$0xf] }
  0xa9   : > { %507 = vst [vmem:[%s9516_s6 + $0x254] sm:$0xf] %v506_v21  ;;  %v634_v21 = vld [vmem:[%s9512_s5 + $0xd50] sm:$0xf] }
  0xaa   : > { %509 = vst [vmem:[%s9516_s6 + $0x258] sm:$0xf] %v508_v22  ;;  %v636_v22 = vld [vmem:[%s9512_s5 + $0xd60] sm:$0xf] }
  0xab   : > { %511 = vst [vmem:[%s9516_s6 + $0x25c] sm:$0xf] %v510_v23  ;;  %v638_v23 = vld [vmem:[%s9512_s5 + $0xd70] sm:$0xf] }
  0xac   : > { %513 = vst [vmem:[%s9516_s6 + $0x260] sm:$0xf] %v512_v24  ;;  %v640_v24 = vld [vmem:[%s9512_s5 + $0xd80] sm:$0xf] }
  0xad   : > { %515 = vst [vmem:[%s9516_s6 + $0x264] sm:$0xf] %v514_v25  ;;  %v642_v25 = vld [vmem:[%s9512_s5 + $0xd90] sm:$0xf] }
  0xae   : > { %517 = vst [vmem:[%s9516_s6 + $0x268] sm:$0xf] %v516_v26  ;;  %v644_v26 = vld [vmem:[%s9512_s5 + $0xda0] sm:$0xf] }
  0xaf   : > { %519 = vst [vmem:[%s9516_s6 + $0x26c] sm:$0xf] %v518_v27  ;;  %v646_v27 = vld [vmem:[%s9512_s5 + $0xdb0] sm:$0xf] }
  0xb0   : > { %521 = vst [vmem:[%s9516_s6 + $0x270] sm:$0xf] %v520_v28  ;;  %v648_v28 = vld [vmem:[%s9512_s5 + $0xdc0] sm:$0xf] }
  0xb1   : > { %523 = vst [vmem:[%s9516_s6 + $0x274] sm:$0xf] %v522_v29  ;;  %v650_v29 = vld [vmem:[%s9512_s5 + $0xdd0] sm:$0xf] }
  0xb2   : > { %525 = vst [vmem:[%s9516_s6 + $0x278] sm:$0xf] %v524_v30  ;;  %v652_v30 = vld [vmem:[%s9512_s5 + $0xde0] sm:$0xf] }
  0xb3   : > { %527 = vst [vmem:[%s9516_s6 + $0x27c] sm:$0xf] %v526_v31  ;;  %v654_v31 = vld [vmem:[%s9512_s5 + $0xdf0] sm:$0xf] }
  0xb4   : > { %529 = vst [vmem:[%s9516_s6 + $0x280] sm:$0xf] %v528_v32  ;;  %v656_v32 = vld [vmem:[%s9512_s5 + $0xe00] sm:$0xf] }
  0xb5   : > { %531 = vst [vmem:[%s9516_s6 + $0x284] sm:$0xf] %v530_v33  ;;  %v658_v33 = vld [vmem:[%s9512_s5 + $0xe10] sm:$0xf] }
  0xb6   : > { %533 = vst [vmem:[%s9516_s6 + $0x288] sm:$0xf] %v532_v34  ;;  %v660_v34 = vld [vmem:[%s9512_s5 + $0xe20] sm:$0xf] }
  0xb7   : > { %535 = vst [vmem:[%s9516_s6 + $0x28c] sm:$0xf] %v534_v35  ;;  %v662_v35 = vld [vmem:[%s9512_s5 + $0xe30] sm:$0xf] }
  0xb8   : > { %537 = vst [vmem:[%s9516_s6 + $0x290] sm:$0xf] %v536_v36  ;;  %v664_v36 = vld [vmem:[%s9512_s5 + $0xe40] sm:$0xf] }
  0xb9   : > { %539 = vst [vmem:[%s9516_s6 + $0x294] sm:$0xf] %v538_v37  ;;  %v666_v37 = vld [vmem:[%s9512_s5 + $0xe50] sm:$0xf] }
  0xba   : > { %541 = vst [vmem:[%s9516_s6 + $0x298] sm:$0xf] %v540_v38  ;;  %v668_v38 = vld [vmem:[%s9512_s5 + $0xe60] sm:$0xf] }
  0xbb   : > { %543 = vst [vmem:[%s9516_s6 + $0x29c] sm:$0xf] %v542_v39  ;;  %v670_v39 = vld [vmem:[%s9512_s5 + $0xe70] sm:$0xf] }
  0xbc   : > { %545 = vst [vmem:[%s9516_s6 + $0x2a0] sm:$0xf] %v544_v40  ;;  %v672_v40 = vld [vmem:[%s9512_s5 + $0xe80] sm:$0xf] }
  0xbd   : > { %547 = vst [vmem:[%s9516_s6 + $0x2a4] sm:$0xf] %v546_v41  ;;  %v674_v41 = vld [vmem:[%s9512_s5 + $0xe90] sm:$0xf] }
  0xbe   : > { %549 = vst [vmem:[%s9516_s6 + $0x2a8] sm:$0xf] %v548_v42  ;;  %v676_v42 = vld [vmem:[%s9512_s5 + $0xea0] sm:$0xf] }
  0xbf   : > { %551 = vst [vmem:[%s9516_s6 + $0x2ac] sm:$0xf] %v550_v43  ;;  %v678_v43 = vld [vmem:[%s9512_s5 + $0xeb0] sm:$0xf] }
  0xc0   : > { %553 = vst [vmem:[%s9516_s6 + $0x2b0] sm:$0xf] %v552_v44  ;;  %v680_v44 = vld [vmem:[%s9512_s5 + $0xec0] sm:$0xf] }
  0xc1   : > { %555 = vst [vmem:[%s9516_s6 + $0x2b4] sm:$0xf] %v554_v45  ;;  %v682_v45 = vld [vmem:[%s9512_s5 + $0xed0] sm:$0xf] }
  0xc2   : > { %557 = vst [vmem:[%s9516_s6 + $0x2b8] sm:$0xf] %v556_v46  ;;  %v684_v46 = vld [vmem:[%s9512_s5 + $0xee0] sm:$0xf] }
  0xc3   : > { %559 = vst [vmem:[%s9516_s6 + $0x2bc] sm:$0xf] %v558_v47  ;;  %v686_v47 = vld [vmem:[%s9512_s5 + $0xef0] sm:$0xf] }
  0xc4   : > { %561 = vst [vmem:[%s9516_s6 + $0x2c0] sm:$0xf] %v560_v48  ;;  %v688_v48 = vld [vmem:[%s9512_s5 + $0xf00] sm:$0xf] }
  0xc5   : > { %563 = vst [vmem:[%s9516_s6 + $0x2c4] sm:$0xf] %v562_v49  ;;  %v690_v49 = vld [vmem:[%s9512_s5 + $0xf10] sm:$0xf] }
  0xc6   : > { %565 = vst [vmem:[%s9516_s6 + $0x2c8] sm:$0xf] %v564_v50  ;;  %v692_v50 = vld [vmem:[%s9512_s5 + $0xf20] sm:$0xf] }
  0xc7   : > { %567 = vst [vmem:[%s9516_s6 + $0x2cc] sm:$0xf] %v566_v51  ;;  %v694_v51 = vld [vmem:[%s9512_s5 + $0xf30] sm:$0xf] }
  0xc8   : > { %569 = vst [vmem:[%s9516_s6 + $0x2d0] sm:$0xf] %v568_v52  ;;  %v696_v52 = vld [vmem:[%s9512_s5 + $0xf40] sm:$0xf] }
  0xc9   : > { %571 = vst [vmem:[%s9516_s6 + $0x2d4] sm:$0xf] %v570_v53  ;;  %v698_v53 = vld [vmem:[%s9512_s5 + $0xf50] sm:$0xf] }
  0xca   : > { %573 = vst [vmem:[%s9516_s6 + $0x2d8] sm:$0xf] %v572_v54  ;;  %v700_v54 = vld [vmem:[%s9512_s5 + $0xf60] sm:$0xf] }
  0xcb   : > { %575 = vst [vmem:[%s9516_s6 + $0x2dc] sm:$0xf] %v574_v55  ;;  %v702_v55 = vld [vmem:[%s9512_s5 + $0xf70] sm:$0xf] }
  0xcc   : > { %577 = vst [vmem:[%s9516_s6 + $0x2e0] sm:$0xf] %v576_v56  ;;  %v704_v56 = vld [vmem:[%s9512_s5 + $0xf80] sm:$0xf] }
  0xcd   : > { %579 = vst [vmem:[%s9516_s6 + $0x2e4] sm:$0xf] %v578_v57  ;;  %v706_v57 = vld [vmem:[%s9512_s5 + $0xf90] sm:$0xf] }
  0xce   : > { %581 = vst [vmem:[%s9516_s6 + $0x2e8] sm:$0xf] %v580_v58  ;;  %v708_v58 = vld [vmem:[%s9512_s5 + $0xfa0] sm:$0xf] }
  0xcf   : > { %583 = vst [vmem:[%s9516_s6 + $0x2ec] sm:$0xf] %v582_v59  ;;  %v710_v59 = vld [vmem:[%s9512_s5 + $0xfb0] sm:$0xf] }
  0xd0   : > { %585 = vst [vmem:[%s9516_s6 + $0x2f0] sm:$0xf] %v584_v60  ;;  %v712_v60 = vld [vmem:[%s9512_s5 + $0xfc0] sm:$0xf] }
  0xd1   : > { %587 = vst [vmem:[%s9516_s6 + $0x2f4] sm:$0xf] %v586_v61  ;;  %v714_v61 = vld [vmem:[%s9512_s5 + $0xfd0] sm:$0xf] }
  0xd2   : > { %589 = vst [vmem:[%s9516_s6 + $0x2f8] sm:$0xf] %v588_v62  ;;  %v716_v62 = vld [vmem:[%s9512_s5 + $0xfe0] sm:$0xf] }
  0xd3   : > { %591 = vst [vmem:[%s9516_s6 + $0x2fc] sm:$0xf] %v590_v63  ;;  %v718_v63 = vld [vmem:[%s9512_s5 + $0xff0] sm:$0xf] }
  0xd4   : > { %593 = vst [vmem:[%s9516_s6 + $0x300] sm:$0xf] %v592_v0  ;;  %v720_v0 = vld [vmem:[%s9512_s5 + $0x1000] sm:$0xf] }
  0xd5   : > { %595 = vst [vmem:[%s9516_s6 + $0x304] sm:$0xf] %v594_v1  ;;  %v722_v1 = vld [vmem:[%s9512_s5 + $0x1010] sm:$0xf] }
  0xd6   : > { %597 = vst [vmem:[%s9516_s6 + $0x308] sm:$0xf] %v596_v2  ;;  %v724_v2 = vld [vmem:[%s9512_s5 + $0x1020] sm:$0xf] }
  0xd7   : > { %599 = vst [vmem:[%s9516_s6 + $0x30c] sm:$0xf] %v598_v3  ;;  %v726_v3 = vld [vmem:[%s9512_s5 + $0x1030] sm:$0xf] }
  0xd8   : > { %601 = vst [vmem:[%s9516_s6 + $0x310] sm:$0xf] %v600_v4  ;;  %v728_v4 = vld [vmem:[%s9512_s5 + $0x1040] sm:$0xf] }
  0xd9   : > { %603 = vst [vmem:[%s9516_s6 + $0x314] sm:$0xf] %v602_v5  ;;  %v730_v5 = vld [vmem:[%s9512_s5 + $0x1050] sm:$0xf] }
  0xda   : > { %605 = vst [vmem:[%s9516_s6 + $0x318] sm:$0xf] %v604_v6  ;;  %v732_v6 = vld [vmem:[%s9512_s5 + $0x1060] sm:$0xf] }
  0xdb   : > { %607 = vst [vmem:[%s9516_s6 + $0x31c] sm:$0xf] %v606_v7  ;;  %v734_v7 = vld [vmem:[%s9512_s5 + $0x1070] sm:$0xf] }
  0xdc   : > { %609 = vst [vmem:[%s9516_s6 + $0x320] sm:$0xf] %v608_v8  ;;  %v736_v8 = vld [vmem:[%s9512_s5 + $0x1080] sm:$0xf] }
  0xdd   : > { %611 = vst [vmem:[%s9516_s6 + $0x324] sm:$0xf] %v610_v9  ;;  %v738_v9 = vld [vmem:[%s9512_s5 + $0x1090] sm:$0xf] }
  0xde   : > { %613 = vst [vmem:[%s9516_s6 + $0x328] sm:$0xf] %v612_v10  ;;  %v740_v10 = vld [vmem:[%s9512_s5 + $0x10a0] sm:$0xf] }
  0xdf   : > { %615 = vst [vmem:[%s9516_s6 + $0x32c] sm:$0xf] %v614_v11  ;;  %v742_v11 = vld [vmem:[%s9512_s5 + $0x10b0] sm:$0xf] }
  0xe0   : > { %617 = vst [vmem:[%s9516_s6 + $0x330] sm:$0xf] %v616_v12  ;;  %v744_v12 = vld [vmem:[%s9512_s5 + $0x10c0] sm:$0xf] }
  0xe1   : > { %619 = vst [vmem:[%s9516_s6 + $0x334] sm:$0xf] %v618_v13  ;;  %v746_v13 = vld [vmem:[%s9512_s5 + $0x10d0] sm:$0xf] }
  0xe2   : > { %621 = vst [vmem:[%s9516_s6 + $0x338] sm:$0xf] %v620_v14  ;;  %v748_v14 = vld [vmem:[%s9512_s5 + $0x10e0] sm:$0xf] }
  0xe3   : > { %623 = vst [vmem:[%s9516_s6 + $0x33c] sm:$0xf] %v622_v15  ;;  %v750_v15 = vld [vmem:[%s9512_s5 + $0x10f0] sm:$0xf] }
  0xe4   : > { %625 = vst [vmem:[%s9516_s6 + $0x340] sm:$0xf] %v624_v16  ;;  %v752_v16 = vld [vmem:[%s9512_s5 + $0x1100] sm:$0xf] }
  0xe5   : > { %627 = vst [vmem:[%s9516_s6 + $0x344] sm:$0xf] %v626_v17  ;;  %v754_v17 = vld [vmem:[%s9512_s5 + $0x1110] sm:$0xf] }
  0xe6   : > { %629 = vst [vmem:[%s9516_s6 + $0x348] sm:$0xf] %v628_v18  ;;  %v756_v18 = vld [vmem:[%s9512_s5 + $0x1120] sm:$0xf] }
  0xe7   : > { %631 = vst [vmem:[%s9516_s6 + $0x34c] sm:$0xf] %v630_v19  ;;  %v758_v19 = vld [vmem:[%s9512_s5 + $0x1130] sm:$0xf] }
  0xe8   : > { %633 = vst [vmem:[%s9516_s6 + $0x350] sm:$0xf] %v632_v20  ;;  %v760_v20 = vld [vmem:[%s9512_s5 + $0x1140] sm:$0xf] }
  0xe9   : > { %635 = vst [vmem:[%s9516_s6 + $0x354] sm:$0xf] %v634_v21  ;;  %v762_v21 = vld [vmem:[%s9512_s5 + $0x1150] sm:$0xf] }
  0xea   : > { %637 = vst [vmem:[%s9516_s6 + $0x358] sm:$0xf] %v636_v22  ;;  %v764_v22 = vld [vmem:[%s9512_s5 + $0x1160] sm:$0xf] }
  0xeb   : > { %639 = vst [vmem:[%s9516_s6 + $0x35c] sm:$0xf] %v638_v23  ;;  %v766_v23 = vld [vmem:[%s9512_s5 + $0x1170] sm:$0xf] }
  0xec   : > { %641 = vst [vmem:[%s9516_s6 + $0x360] sm:$0xf] %v640_v24  ;;  %v768_v24 = vld [vmem:[%s9512_s5 + $0x1180] sm:$0xf] }
  0xed   : > { %643 = vst [vmem:[%s9516_s6 + $0x364] sm:$0xf] %v642_v25  ;;  %v770_v25 = vld [vmem:[%s9512_s5 + $0x1190] sm:$0xf] }
  0xee   : > { %645 = vst [vmem:[%s9516_s6 + $0x368] sm:$0xf] %v644_v26  ;;  %v772_v26 = vld [vmem:[%s9512_s5 + $0x11a0] sm:$0xf] }
  0xef   : > { %647 = vst [vmem:[%s9516_s6 + $0x36c] sm:$0xf] %v646_v27  ;;  %v774_v27 = vld [vmem:[%s9512_s5 + $0x11b0] sm:$0xf] }
  0xf0   : > { %649 = vst [vmem:[%s9516_s6 + $0x370] sm:$0xf] %v648_v28  ;;  %v776_v28 = vld [vmem:[%s9512_s5 + $0x11c0] sm:$0xf] }
  0xf1   : > { %651 = vst [vmem:[%s9516_s6 + $0x374] sm:$0xf] %v650_v29  ;;  %v778_v29 = vld [vmem:[%s9512_s5 + $0x11d0] sm:$0xf] }
  0xf2   : > { %653 = vst [vmem:[%s9516_s6 + $0x378] sm:$0xf] %v652_v30  ;;  %v780_v30 = vld [vmem:[%s9512_s5 + $0x11e0] sm:$0xf] }
  0xf3   : > { %655 = vst [vmem:[%s9516_s6 + $0x37c] sm:$0xf] %v654_v31  ;;  %v782_v31 = vld [vmem:[%s9512_s5 + $0x11f0] sm:$0xf] }
  0xf4   : > { %657 = vst [vmem:[%s9516_s6 + $0x380] sm:$0xf] %v656_v32  ;;  %v784_v32 = vld [vmem:[%s9512_s5 + $0x1200] sm:$0xf] }
  0xf5   : > { %659 = vst [vmem:[%s9516_s6 + $0x384] sm:$0xf] %v658_v33  ;;  %v786_v33 = vld [vmem:[%s9512_s5 + $0x1210] sm:$0xf] }
  0xf6   : > { %661 = vst [vmem:[%s9516_s6 + $0x388] sm:$0xf] %v660_v34  ;;  %v788_v34 = vld [vmem:[%s9512_s5 + $0x1220] sm:$0xf] }
  0xf7   : > { %663 = vst [vmem:[%s9516_s6 + $0x38c] sm:$0xf] %v662_v35  ;;  %v790_v35 = vld [vmem:[%s9512_s5 + $0x1230] sm:$0xf] }
  0xf8   : > { %665 = vst [vmem:[%s9516_s6 + $0x390] sm:$0xf] %v664_v36  ;;  %v792_v36 = vld [vmem:[%s9512_s5 + $0x1240] sm:$0xf] }
  0xf9   : > { %667 = vst [vmem:[%s9516_s6 + $0x394] sm:$0xf] %v666_v37  ;;  %v794_v37 = vld [vmem:[%s9512_s5 + $0x1250] sm:$0xf] }
  0xfa   : > { %669 = vst [vmem:[%s9516_s6 + $0x398] sm:$0xf] %v668_v38  ;;  %v796_v38 = vld [vmem:[%s9512_s5 + $0x1260] sm:$0xf] }
  0xfb   : > { %671 = vst [vmem:[%s9516_s6 + $0x39c] sm:$0xf] %v670_v39  ;;  %v798_v39 = vld [vmem:[%s9512_s5 + $0x1270] sm:$0xf] }
  0xfc   : > { %673 = vst [vmem:[%s9516_s6 + $0x3a0] sm:$0xf] %v672_v40  ;;  %v800_v40 = vld [vmem:[%s9512_s5 + $0x1280] sm:$0xf] }
  0xfd   : > { %675 = vst [vmem:[%s9516_s6 + $0x3a4] sm:$0xf] %v674_v41  ;;  %v802_v41 = vld [vmem:[%s9512_s5 + $0x1290] sm:$0xf] }
  0xfe   : > { %677 = vst [vmem:[%s9516_s6 + $0x3a8] sm:$0xf] %v676_v42  ;;  %v804_v42 = vld [vmem:[%s9512_s5 + $0x12a0] sm:$0xf] }
  0xff   : > { %679 = vst [vmem:[%s9516_s6 + $0x3ac] sm:$0xf] %v678_v43  ;;  %v806_v43 = vld [vmem:[%s9512_s5 + $0x12b0] sm:$0xf] }
 0x100   : > { %681 = vst [vmem:[%s9516_s6 + $0x3b0] sm:$0xf] %v680_v44  ;;  %v808_v44 = vld [vmem:[%s9512_s5 + $0x12c0] sm:$0xf] }
 0x101   : > { %683 = vst [vmem:[%s9516_s6 + $0x3b4] sm:$0xf] %v682_v45  ;;  %v810_v45 = vld [vmem:[%s9512_s5 + $0x12d0] sm:$0xf] }
 0x102   : > { %685 = vst [vmem:[%s9516_s6 + $0x3b8] sm:$0xf] %v684_v46  ;;  %v812_v46 = vld [vmem:[%s9512_s5 + $0x12e0] sm:$0xf] }
 0x103   : > { %687 = vst [vmem:[%s9516_s6 + $0x3bc] sm:$0xf] %v686_v47  ;;  %v814_v47 = vld [vmem:[%s9512_s5 + $0x12f0] sm:$0xf] }
 0x104   : > { %689 = vst [vmem:[%s9516_s6 + $0x3c0] sm:$0xf] %v688_v48  ;;  %v816_v48 = vld [vmem:[%s9512_s5 + $0x1300] sm:$0xf] }
 0x105   : > { %691 = vst [vmem:[%s9516_s6 + $0x3c4] sm:$0xf] %v690_v49  ;;  %v818_v49 = vld [vmem:[%s9512_s5 + $0x1310] sm:$0xf] }
 0x106   : > { %693 = vst [vmem:[%s9516_s6 + $0x3c8] sm:$0xf] %v692_v50  ;;  %v820_v50 = vld [vmem:[%s9512_s5 + $0x1320] sm:$0xf] }
 0x107   : > { %695 = vst [vmem:[%s9516_s6 + $0x3cc] sm:$0xf] %v694_v51  ;;  %v822_v51 = vld [vmem:[%s9512_s5 + $0x1330] sm:$0xf] }
 0x108   : > { %697 = vst [vmem:[%s9516_s6 + $0x3d0] sm:$0xf] %v696_v52  ;;  %v824_v52 = vld [vmem:[%s9512_s5 + $0x1340] sm:$0xf] }
 0x109   : > { %699 = vst [vmem:[%s9516_s6 + $0x3d4] sm:$0xf] %v698_v53  ;;  %v826_v53 = vld [vmem:[%s9512_s5 + $0x1350] sm:$0xf] }
 0x10a   : > { %701 = vst [vmem:[%s9516_s6 + $0x3d8] sm:$0xf] %v700_v54  ;;  %v828_v54 = vld [vmem:[%s9512_s5 + $0x1360] sm:$0xf] }
 0x10b   : > { %703 = vst [vmem:[%s9516_s6 + $0x3dc] sm:$0xf] %v702_v55  ;;  %v830_v55 = vld [vmem:[%s9512_s5 + $0x1370] sm:$0xf] }
 0x10c   : > { %705 = vst [vmem:[%s9516_s6 + $0x3e0] sm:$0xf] %v704_v56  ;;  %v832_v56 = vld [vmem:[%s9512_s5 + $0x1380] sm:$0xf] }
 0x10d   : > { %707 = vst [vmem:[%s9516_s6 + $0x3e4] sm:$0xf] %v706_v57  ;;  %v834_v57 = vld [vmem:[%s9512_s5 + $0x1390] sm:$0xf] }
 0x10e   : > { %709 = vst [vmem:[%s9516_s6 + $0x3e8] sm:$0xf] %v708_v58  ;;  %v836_v58 = vld [vmem:[%s9512_s5 + $0x13a0] sm:$0xf] }
 0x10f   : > { %711 = vst [vmem:[%s9516_s6 + $0x3ec] sm:$0xf] %v710_v59  ;;  %v838_v59 = vld [vmem:[%s9512_s5 + $0x13b0] sm:$0xf] }
 0x110   : > { %713 = vst [vmem:[%s9516_s6 + $0x3f0] sm:$0xf] %v712_v60  ;;  %v840_v60 = vld [vmem:[%s9512_s5 + $0x13c0] sm:$0xf] }
 0x111   : > { %715 = vst [vmem:[%s9516_s6 + $0x3f4] sm:$0xf] %v714_v61  ;;  %v842_v61 = vld [vmem:[%s9512_s5 + $0x13d0] sm:$0xf] }
 0x112   : > { %717 = vst [vmem:[%s9516_s6 + $0x3f8] sm:$0xf] %v716_v62  ;;  %v844_v62 = vld [vmem:[%s9512_s5 + $0x13e0] sm:$0xf] }
 0x113   : > { %719 = vst [vmem:[%s9516_s6 + $0x3fc] sm:$0xf] %v718_v63  ;;  %v846_v63 = vld [vmem:[%s9512_s5 + $0x13f0] sm:$0xf] }
 0x114   : > { %721 = vst [vmem:[%s9516_s6 + $0x400] sm:$0xf] %v720_v0  ;;  %v848_v0 = vld [vmem:[%s9512_s5 + $0x1400] sm:$0xf] }
 0x115   : > { %723 = vst [vmem:[%s9516_s6 + $0x404] sm:$0xf] %v722_v1  ;;  %v850_v1 = vld [vmem:[%s9512_s5 + $0x1410] sm:$0xf] }
 0x116   : > { %725 = vst [vmem:[%s9516_s6 + $0x408] sm:$0xf] %v724_v2  ;;  %v852_v2 = vld [vmem:[%s9512_s5 + $0x1420] sm:$0xf] }
 0x117   : > { %727 = vst [vmem:[%s9516_s6 + $0x40c] sm:$0xf] %v726_v3  ;;  %v854_v3 = vld [vmem:[%s9512_s5 + $0x1430] sm:$0xf] }
 0x118   : > { %729 = vst [vmem:[%s9516_s6 + $0x410] sm:$0xf] %v728_v4  ;;  %v856_v4 = vld [vmem:[%s9512_s5 + $0x1440] sm:$0xf] }
 0x119   : > { %731 = vst [vmem:[%s9516_s6 + $0x414] sm:$0xf] %v730_v5  ;;  %v858_v5 = vld [vmem:[%s9512_s5 + $0x1450] sm:$0xf] }
 0x11a   : > { %733 = vst [vmem:[%s9516_s6 + $0x418] sm:$0xf] %v732_v6  ;;  %v860_v6 = vld [vmem:[%s9512_s5 + $0x1460] sm:$0xf] }
 0x11b   : > { %735 = vst [vmem:[%s9516_s6 + $0x41c] sm:$0xf] %v734_v7  ;;  %v862_v7 = vld [vmem:[%s9512_s5 + $0x1470] sm:$0xf] }
 0x11c   : > { %737 = vst [vmem:[%s9516_s6 + $0x420] sm:$0xf] %v736_v8  ;;  %v864_v8 = vld [vmem:[%s9512_s5 + $0x1480] sm:$0xf] }
 0x11d   : > { %739 = vst [vmem:[%s9516_s6 + $0x424] sm:$0xf] %v738_v9  ;;  %v866_v9 = vld [vmem:[%s9512_s5 + $0x1490] sm:$0xf] }
 0x11e   : > { %741 = vst [vmem:[%s9516_s6 + $0x428] sm:$0xf] %v740_v10  ;;  %v868_v10 = vld [vmem:[%s9512_s5 + $0x14a0] sm:$0xf] }
 0x11f   : > { %743 = vst [vmem:[%s9516_s6 + $0x42c] sm:$0xf] %v742_v11  ;;  %v870_v11 = vld [vmem:[%s9512_s5 + $0x14b0] sm:$0xf] }
 0x120   : > { %745 = vst [vmem:[%s9516_s6 + $0x430] sm:$0xf] %v744_v12  ;;  %v872_v12 = vld [vmem:[%s9512_s5 + $0x14c0] sm:$0xf] }
 0x121   : > { %747 = vst [vmem:[%s9516_s6 + $0x434] sm:$0xf] %v746_v13  ;;  %v874_v13 = vld [vmem:[%s9512_s5 + $0x14d0] sm:$0xf] }
 0x122   : > { %749 = vst [vmem:[%s9516_s6 + $0x438] sm:$0xf] %v748_v14  ;;  %v876_v14 = vld [vmem:[%s9512_s5 + $0x14e0] sm:$0xf] }
 0x123   : > { %751 = vst [vmem:[%s9516_s6 + $0x43c] sm:$0xf] %v750_v15  ;;  %v878_v15 = vld [vmem:[%s9512_s5 + $0x14f0] sm:$0xf] }
 0x124   : > { %753 = vst [vmem:[%s9516_s6 + $0x440] sm:$0xf] %v752_v16  ;;  %v880_v16 = vld [vmem:[%s9512_s5 + $0x1500] sm:$0xf] }
 0x125   : > { %755 = vst [vmem:[%s9516_s6 + $0x444] sm:$0xf] %v754_v17  ;;  %v882_v17 = vld [vmem:[%s9512_s5 + $0x1510] sm:$0xf] }
 0x126   : > { %757 = vst [vmem:[%s9516_s6 + $0x448] sm:$0xf] %v756_v18  ;;  %v884_v18 = vld [vmem:[%s9512_s5 + $0x1520] sm:$0xf] }
 0x127   : > { %759 = vst [vmem:[%s9516_s6 + $0x44c] sm:$0xf] %v758_v19  ;;  %v886_v19 = vld [vmem:[%s9512_s5 + $0x1530] sm:$0xf] }
 0x128   : > { %761 = vst [vmem:[%s9516_s6 + $0x450] sm:$0xf] %v760_v20  ;;  %v888_v20 = vld [vmem:[%s9512_s5 + $0x1540] sm:$0xf] }
 0x129   : > { %763 = vst [vmem:[%s9516_s6 + $0x454] sm:$0xf] %v762_v21  ;;  %v890_v21 = vld [vmem:[%s9512_s5 + $0x1550] sm:$0xf] }
 0x12a   : > { %765 = vst [vmem:[%s9516_s6 + $0x458] sm:$0xf] %v764_v22  ;;  %v892_v22 = vld [vmem:[%s9512_s5 + $0x1560] sm:$0xf] }
 0x12b   : > { %767 = vst [vmem:[%s9516_s6 + $0x45c] sm:$0xf] %v766_v23  ;;  %v894_v23 = vld [vmem:[%s9512_s5 + $0x1570] sm:$0xf] }
 0x12c   : > { %769 = vst [vmem:[%s9516_s6 + $0x460] sm:$0xf] %v768_v24  ;;  %v896_v24 = vld [vmem:[%s9512_s5 + $0x1580] sm:$0xf] }
 0x12d   : > { %771 = vst [vmem:[%s9516_s6 + $0x464] sm:$0xf] %v770_v25  ;;  %v898_v25 = vld [vmem:[%s9512_s5 + $0x1590] sm:$0xf] }
 0x12e   : > { %773 = vst [vmem:[%s9516_s6 + $0x468] sm:$0xf] %v772_v26  ;;  %v900_v26 = vld [vmem:[%s9512_s5 + $0x15a0] sm:$0xf] }
 0x12f   : > { %775 = vst [vmem:[%s9516_s6 + $0x46c] sm:$0xf] %v774_v27  ;;  %v902_v27 = vld [vmem:[%s9512_s5 + $0x15b0] sm:$0xf] }
 0x130   : > { %777 = vst [vmem:[%s9516_s6 + $0x470] sm:$0xf] %v776_v28  ;;  %v904_v28 = vld [vmem:[%s9512_s5 + $0x15c0] sm:$0xf] }
 0x131   : > { %779 = vst [vmem:[%s9516_s6 + $0x474] sm:$0xf] %v778_v29  ;;  %v906_v29 = vld [vmem:[%s9512_s5 + $0x15d0] sm:$0xf] }
 0x132   : > { %781 = vst [vmem:[%s9516_s6 + $0x478] sm:$0xf] %v780_v30  ;;  %v908_v30 = vld [vmem:[%s9512_s5 + $0x15e0] sm:$0xf] }
 0x133   : > { %783 = vst [vmem:[%s9516_s6 + $0x47c] sm:$0xf] %v782_v31  ;;  %v910_v31 = vld [vmem:[%s9512_s5 + $0x15f0] sm:$0xf] }
 0x134   : > { %785 = vst [vmem:[%s9516_s6 + $0x480] sm:$0xf] %v784_v32  ;;  %v912_v32 = vld [vmem:[%s9512_s5 + $0x1600] sm:$0xf] }
 0x135   : > { %787 = vst [vmem:[%s9516_s6 + $0x484] sm:$0xf] %v786_v33  ;;  %v914_v33 = vld [vmem:[%s9512_s5 + $0x1610] sm:$0xf] }
 0x136   : > { %789 = vst [vmem:[%s9516_s6 + $0x488] sm:$0xf] %v788_v34  ;;  %v916_v34 = vld [vmem:[%s9512_s5 + $0x1620] sm:$0xf] }
 0x137   : > { %791 = vst [vmem:[%s9516_s6 + $0x48c] sm:$0xf] %v790_v35  ;;  %v918_v35 = vld [vmem:[%s9512_s5 + $0x1630] sm:$0xf] }
 0x138   : > { %793 = vst [vmem:[%s9516_s6 + $0x490] sm:$0xf] %v792_v36  ;;  %v920_v36 = vld [vmem:[%s9512_s5 + $0x1640] sm:$0xf] }
 0x139   : > { %795 = vst [vmem:[%s9516_s6 + $0x494] sm:$0xf] %v794_v37  ;;  %v922_v37 = vld [vmem:[%s9512_s5 + $0x1650] sm:$0xf] }
 0x13a   : > { %797 = vst [vmem:[%s9516_s6 + $0x498] sm:$0xf] %v796_v38  ;;  %v924_v38 = vld [vmem:[%s9512_s5 + $0x1660] sm:$0xf] }
 0x13b   : > { %799 = vst [vmem:[%s9516_s6 + $0x49c] sm:$0xf] %v798_v39  ;;  %v926_v39 = vld [vmem:[%s9512_s5 + $0x1670] sm:$0xf] }
 0x13c   : > { %801 = vst [vmem:[%s9516_s6 + $0x4a0] sm:$0xf] %v800_v40  ;;  %v928_v40 = vld [vmem:[%s9512_s5 + $0x1680] sm:$0xf] }
 0x13d   : > { %803 = vst [vmem:[%s9516_s6 + $0x4a4] sm:$0xf] %v802_v41  ;;  %v930_v41 = vld [vmem:[%s9512_s5 + $0x1690] sm:$0xf] }
 0x13e   : > { %805 = vst [vmem:[%s9516_s6 + $0x4a8] sm:$0xf] %v804_v42  ;;  %v932_v42 = vld [vmem:[%s9512_s5 + $0x16a0] sm:$0xf] }
 0x13f   : > { %807 = vst [vmem:[%s9516_s6 + $0x4ac] sm:$0xf] %v806_v43  ;;  %v934_v43 = vld [vmem:[%s9512_s5 + $0x16b0] sm:$0xf] }
 0x140   : > { %809 = vst [vmem:[%s9516_s6 + $0x4b0] sm:$0xf] %v808_v44  ;;  %v936_v44 = vld [vmem:[%s9512_s5 + $0x16c0] sm:$0xf] }
 0x141   : > { %811 = vst [vmem:[%s9516_s6 + $0x4b4] sm:$0xf] %v810_v45  ;;  %v938_v45 = vld [vmem:[%s9512_s5 + $0x16d0] sm:$0xf] }
 0x142   : > { %813 = vst [vmem:[%s9516_s6 + $0x4b8] sm:$0xf] %v812_v46  ;;  %v940_v46 = vld [vmem:[%s9512_s5 + $0x16e0] sm:$0xf] }
 0x143   : > { %815 = vst [vmem:[%s9516_s6 + $0x4bc] sm:$0xf] %v814_v47  ;;  %v942_v47 = vld [vmem:[%s9512_s5 + $0x16f0] sm:$0xf] }
 0x144   : > { %817 = vst [vmem:[%s9516_s6 + $0x4c0] sm:$0xf] %v816_v48  ;;  %v944_v48 = vld [vmem:[%s9512_s5 + $0x1700] sm:$0xf] }
 0x145   : > { %819 = vst [vmem:[%s9516_s6 + $0x4c4] sm:$0xf] %v818_v49  ;;  %v946_v49 = vld [vmem:[%s9512_s5 + $0x1710] sm:$0xf] }
 0x146   : > { %821 = vst [vmem:[%s9516_s6 + $0x4c8] sm:$0xf] %v820_v50  ;;  %v948_v50 = vld [vmem:[%s9512_s5 + $0x1720] sm:$0xf] }
 0x147   : > { %823 = vst [vmem:[%s9516_s6 + $0x4cc] sm:$0xf] %v822_v51  ;;  %v950_v51 = vld [vmem:[%s9512_s5 + $0x1730] sm:$0xf] }
 0x148   : > { %825 = vst [vmem:[%s9516_s6 + $0x4d0] sm:$0xf] %v824_v52  ;;  %v952_v52 = vld [vmem:[%s9512_s5 + $0x1740] sm:$0xf] }
 0x149   : > { %827 = vst [vmem:[%s9516_s6 + $0x4d4] sm:$0xf] %v826_v53  ;;  %v954_v53 = vld [vmem:[%s9512_s5 + $0x1750] sm:$0xf] }
 0x14a   : > { %829 = vst [vmem:[%s9516_s6 + $0x4d8] sm:$0xf] %v828_v54  ;;  %v956_v54 = vld [vmem:[%s9512_s5 + $0x1760] sm:$0xf] }
 0x14b   : > { %831 = vst [vmem:[%s9516_s6 + $0x4dc] sm:$0xf] %v830_v55  ;;  %v958_v55 = vld [vmem:[%s9512_s5 + $0x1770] sm:$0xf] }
 0x14c   : > { %833 = vst [vmem:[%s9516_s6 + $0x4e0] sm:$0xf] %v832_v56  ;;  %v960_v56 = vld [vmem:[%s9512_s5 + $0x1780] sm:$0xf] }
 0x14d   : > { %835 = vst [vmem:[%s9516_s6 + $0x4e4] sm:$0xf] %v834_v57  ;;  %v962_v57 = vld [vmem:[%s9512_s5 + $0x1790] sm:$0xf] }
 0x14e   : > { %837 = vst [vmem:[%s9516_s6 + $0x4e8] sm:$0xf] %v836_v58  ;;  %v964_v58 = vld [vmem:[%s9512_s5 + $0x17a0] sm:$0xf] }
 0x14f   : > { %839 = vst [vmem:[%s9516_s6 + $0x4ec] sm:$0xf] %v838_v59  ;;  %v966_v59 = vld [vmem:[%s9512_s5 + $0x17b0] sm:$0xf] }
 0x150   : > { %841 = vst [vmem:[%s9516_s6 + $0x4f0] sm:$0xf] %v840_v60  ;;  %v968_v60 = vld [vmem:[%s9512_s5 + $0x17c0] sm:$0xf] }
 0x151   : > { %843 = vst [vmem:[%s9516_s6 + $0x4f4] sm:$0xf] %v842_v61  ;;  %v970_v61 = vld [vmem:[%s9512_s5 + $0x17d0] sm:$0xf] }
 0x152   : > { %845 = vst [vmem:[%s9516_s6 + $0x4f8] sm:$0xf] %v844_v62  ;;  %v972_v62 = vld [vmem:[%s9512_s5 + $0x17e0] sm:$0xf] }
 0x153   : > { %847 = vst [vmem:[%s9516_s6 + $0x4fc] sm:$0xf] %v846_v63  ;;  %v974_v63 = vld [vmem:[%s9512_s5 + $0x17f0] sm:$0xf] }
 0x154   : > { %849 = vst [vmem:[%s9516_s6 + $0x500] sm:$0xf] %v848_v0  ;;  %v976_v0 = vld [vmem:[%s9512_s5 + $0x1800] sm:$0xf] }
 0x155   : > { %851 = vst [vmem:[%s9516_s6 + $0x504] sm:$0xf] %v850_v1  ;;  %v978_v1 = vld [vmem:[%s9512_s5 + $0x1810] sm:$0xf] }
 0x156   : > { %853 = vst [vmem:[%s9516_s6 + $0x508] sm:$0xf] %v852_v2  ;;  %v980_v2 = vld [vmem:[%s9512_s5 + $0x1820] sm:$0xf] }
 0x157   : > { %855 = vst [vmem:[%s9516_s6 + $0x50c] sm:$0xf] %v854_v3  ;;  %v982_v3 = vld [vmem:[%s9512_s5 + $0x1830] sm:$0xf] }
 0x158   : > { %857 = vst [vmem:[%s9516_s6 + $0x510] sm:$0xf] %v856_v4  ;;  %v984_v4 = vld [vmem:[%s9512_s5 + $0x1840] sm:$0xf] }
 0x159   : > { %859 = vst [vmem:[%s9516_s6 + $0x514] sm:$0xf] %v858_v5  ;;  %v986_v5 = vld [vmem:[%s9512_s5 + $0x1850] sm:$0xf] }
 0x15a   : > { %861 = vst [vmem:[%s9516_s6 + $0x518] sm:$0xf] %v860_v6  ;;  %v988_v6 = vld [vmem:[%s9512_s5 + $0x1860] sm:$0xf] }
 0x15b   : > { %863 = vst [vmem:[%s9516_s6 + $0x51c] sm:$0xf] %v862_v7  ;;  %v990_v7 = vld [vmem:[%s9512_s5 + $0x1870] sm:$0xf] }
 0x15c   : > { %865 = vst [vmem:[%s9516_s6 + $0x520] sm:$0xf] %v864_v8  ;;  %v992_v8 = vld [vmem:[%s9512_s5 + $0x1880] sm:$0xf] }
 0x15d   : > { %867 = vst [vmem:[%s9516_s6 + $0x524] sm:$0xf] %v866_v9  ;;  %v994_v9 = vld [vmem:[%s9512_s5 + $0x1890] sm:$0xf] }
 0x15e   : > { %869 = vst [vmem:[%s9516_s6 + $0x528] sm:$0xf] %v868_v10  ;;  %v996_v10 = vld [vmem:[%s9512_s5 + $0x18a0] sm:$0xf] }
 0x15f   : > { %871 = vst [vmem:[%s9516_s6 + $0x52c] sm:$0xf] %v870_v11  ;;  %v998_v11 = vld [vmem:[%s9512_s5 + $0x18b0] sm:$0xf] }
 0x160   : > { %873 = vst [vmem:[%s9516_s6 + $0x530] sm:$0xf] %v872_v12  ;;  %v1000_v12 = vld [vmem:[%s9512_s5 + $0x18c0] sm:$0xf] }
 0x161   : > { %875 = vst [vmem:[%s9516_s6 + $0x534] sm:$0xf] %v874_v13  ;;  %v1002_v13 = vld [vmem:[%s9512_s5 + $0x18d0] sm:$0xf] }
 0x162   : > { %877 = vst [vmem:[%s9516_s6 + $0x538] sm:$0xf] %v876_v14  ;;  %v1004_v14 = vld [vmem:[%s9512_s5 + $0x18e0] sm:$0xf] }
 0x163   : > { %879 = vst [vmem:[%s9516_s6 + $0x53c] sm:$0xf] %v878_v15  ;;  %v1006_v15 = vld [vmem:[%s9512_s5 + $0x18f0] sm:$0xf] }
 0x164   : > { %881 = vst [vmem:[%s9516_s6 + $0x540] sm:$0xf] %v880_v16  ;;  %v1008_v16 = vld [vmem:[%s9512_s5 + $0x1900] sm:$0xf] }
 0x165   : > { %883 = vst [vmem:[%s9516_s6 + $0x544] sm:$0xf] %v882_v17  ;;  %v1010_v17 = vld [vmem:[%s9512_s5 + $0x1910] sm:$0xf] }
 0x166   : > { %885 = vst [vmem:[%s9516_s6 + $0x548] sm:$0xf] %v884_v18  ;;  %v1012_v18 = vld [vmem:[%s9512_s5 + $0x1920] sm:$0xf] }
 0x167   : > { %887 = vst [vmem:[%s9516_s6 + $0x54c] sm:$0xf] %v886_v19  ;;  %v1014_v19 = vld [vmem:[%s9512_s5 + $0x1930] sm:$0xf] }
 0x168   : > { %889 = vst [vmem:[%s9516_s6 + $0x550] sm:$0xf] %v888_v20  ;;  %v1016_v20 = vld [vmem:[%s9512_s5 + $0x1940] sm:$0xf] }
 0x169   : > { %891 = vst [vmem:[%s9516_s6 + $0x554] sm:$0xf] %v890_v21  ;;  %v1018_v21 = vld [vmem:[%s9512_s5 + $0x1950] sm:$0xf] }
 0x16a   : > { %893 = vst [vmem:[%s9516_s6 + $0x558] sm:$0xf] %v892_v22  ;;  %v1020_v22 = vld [vmem:[%s9512_s5 + $0x1960] sm:$0xf] }
 0x16b   : > { %895 = vst [vmem:[%s9516_s6 + $0x55c] sm:$0xf] %v894_v23  ;;  %v1022_v23 = vld [vmem:[%s9512_s5 + $0x1970] sm:$0xf] }
 0x16c   : > { %897 = vst [vmem:[%s9516_s6 + $0x560] sm:$0xf] %v896_v24  ;;  %v1024_v24 = vld [vmem:[%s9512_s5 + $0x1980] sm:$0xf] }
 0x16d   : > { %899 = vst [vmem:[%s9516_s6 + $0x564] sm:$0xf] %v898_v25  ;;  %v1026_v25 = vld [vmem:[%s9512_s5 + $0x1990] sm:$0xf] }
 0x16e   : > { %901 = vst [vmem:[%s9516_s6 + $0x568] sm:$0xf] %v900_v26  ;;  %v1028_v26 = vld [vmem:[%s9512_s5 + $0x19a0] sm:$0xf] }
 0x16f   : > { %903 = vst [vmem:[%s9516_s6 + $0x56c] sm:$0xf] %v902_v27  ;;  %v1030_v27 = vld [vmem:[%s9512_s5 + $0x19b0] sm:$0xf] }
 0x170   : > { %905 = vst [vmem:[%s9516_s6 + $0x570] sm:$0xf] %v904_v28  ;;  %v1032_v28 = vld [vmem:[%s9512_s5 + $0x19c0] sm:$0xf] }
 0x171   : > { %907 = vst [vmem:[%s9516_s6 + $0x574] sm:$0xf] %v906_v29  ;;  %v1034_v29 = vld [vmem:[%s9512_s5 + $0x19d0] sm:$0xf] }
 0x172   : > { %909 = vst [vmem:[%s9516_s6 + $0x578] sm:$0xf] %v908_v30  ;;  %v1036_v30 = vld [vmem:[%s9512_s5 + $0x19e0] sm:$0xf] }
 0x173   : > { %911 = vst [vmem:[%s9516_s6 + $0x57c] sm:$0xf] %v910_v31  ;;  %v1038_v31 = vld [vmem:[%s9512_s5 + $0x19f0] sm:$0xf] }
 0x174   : > { %913 = vst [vmem:[%s9516_s6 + $0x580] sm:$0xf] %v912_v32  ;;  %v1040_v32 = vld [vmem:[%s9512_s5 + $0x1a00] sm:$0xf] }
 0x175   : > { %915 = vst [vmem:[%s9516_s6 + $0x584] sm:$0xf] %v914_v33  ;;  %v1042_v33 = vld [vmem:[%s9512_s5 + $0x1a10] sm:$0xf] }
 0x176   : > { %917 = vst [vmem:[%s9516_s6 + $0x588] sm:$0xf] %v916_v34  ;;  %v1044_v34 = vld [vmem:[%s9512_s5 + $0x1a20] sm:$0xf] }
 0x177   : > { %919 = vst [vmem:[%s9516_s6 + $0x58c] sm:$0xf] %v918_v35  ;;  %v1046_v35 = vld [vmem:[%s9512_s5 + $0x1a30] sm:$0xf] }
 0x178   : > { %921 = vst [vmem:[%s9516_s6 + $0x590] sm:$0xf] %v920_v36  ;;  %v1048_v36 = vld [vmem:[%s9512_s5 + $0x1a40] sm:$0xf] }
 0x179   : > { %923 = vst [vmem:[%s9516_s6 + $0x594] sm:$0xf] %v922_v37  ;;  %v1050_v37 = vld [vmem:[%s9512_s5 + $0x1a50] sm:$0xf] }
 0x17a   : > { %925 = vst [vmem:[%s9516_s6 + $0x598] sm:$0xf] %v924_v38  ;;  %v1052_v38 = vld [vmem:[%s9512_s5 + $0x1a60] sm:$0xf] }
 0x17b   : > { %927 = vst [vmem:[%s9516_s6 + $0x59c] sm:$0xf] %v926_v39  ;;  %v1054_v39 = vld [vmem:[%s9512_s5 + $0x1a70] sm:$0xf] }
 0x17c   : > { %929 = vst [vmem:[%s9516_s6 + $0x5a0] sm:$0xf] %v928_v40  ;;  %v1056_v40 = vld [vmem:[%s9512_s5 + $0x1a80] sm:$0xf] }
 0x17d   : > { %931 = vst [vmem:[%s9516_s6 + $0x5a4] sm:$0xf] %v930_v41  ;;  %v1058_v41 = vld [vmem:[%s9512_s5 + $0x1a90] sm:$0xf] }
 0x17e   : > { %933 = vst [vmem:[%s9516_s6 + $0x5a8] sm:$0xf] %v932_v42  ;;  %v1060_v42 = vld [vmem:[%s9512_s5 + $0x1aa0] sm:$0xf] }
 0x17f   : > { %935 = vst [vmem:[%s9516_s6 + $0x5ac] sm:$0xf] %v934_v43  ;;  %v1062_v43 = vld [vmem:[%s9512_s5 + $0x1ab0] sm:$0xf] }
 0x180   : > { %937 = vst [vmem:[%s9516_s6 + $0x5b0] sm:$0xf] %v936_v44  ;;  %v1064_v44 = vld [vmem:[%s9512_s5 + $0x1ac0] sm:$0xf] }
 0x181   : > { %939 = vst [vmem:[%s9516_s6 + $0x5b4] sm:$0xf] %v938_v45  ;;  %v1066_v45 = vld [vmem:[%s9512_s5 + $0x1ad0] sm:$0xf] }
 0x182   : > { %941 = vst [vmem:[%s9516_s6 + $0x5b8] sm:$0xf] %v940_v46  ;;  %v1068_v46 = vld [vmem:[%s9512_s5 + $0x1ae0] sm:$0xf] }
 0x183   : > { %943 = vst [vmem:[%s9516_s6 + $0x5bc] sm:$0xf] %v942_v47  ;;  %v1070_v47 = vld [vmem:[%s9512_s5 + $0x1af0] sm:$0xf] }
 0x184   : > { %945 = vst [vmem:[%s9516_s6 + $0x5c0] sm:$0xf] %v944_v48  ;;  %v1072_v48 = vld [vmem:[%s9512_s5 + $0x1b00] sm:$0xf] }
 0x185   : > { %947 = vst [vmem:[%s9516_s6 + $0x5c4] sm:$0xf] %v946_v49  ;;  %v1074_v49 = vld [vmem:[%s9512_s5 + $0x1b10] sm:$0xf] }
 0x186   : > { %949 = vst [vmem:[%s9516_s6 + $0x5c8] sm:$0xf] %v948_v50  ;;  %v1076_v50 = vld [vmem:[%s9512_s5 + $0x1b20] sm:$0xf] }
 0x187   : > { %951 = vst [vmem:[%s9516_s6 + $0x5cc] sm:$0xf] %v950_v51  ;;  %v1078_v51 = vld [vmem:[%s9512_s5 + $0x1b30] sm:$0xf] }
 0x188   : > { %953 = vst [vmem:[%s9516_s6 + $0x5d0] sm:$0xf] %v952_v52  ;;  %v1080_v52 = vld [vmem:[%s9512_s5 + $0x1b40] sm:$0xf] }
 0x189   : > { %955 = vst [vmem:[%s9516_s6 + $0x5d4] sm:$0xf] %v954_v53  ;;  %v1082_v53 = vld [vmem:[%s9512_s5 + $0x1b50] sm:$0xf] }
 0x18a   : > { %957 = vst [vmem:[%s9516_s6 + $0x5d8] sm:$0xf] %v956_v54  ;;  %v1084_v54 = vld [vmem:[%s9512_s5 + $0x1b60] sm:$0xf] }
 0x18b   : > { %959 = vst [vmem:[%s9516_s6 + $0x5dc] sm:$0xf] %v958_v55  ;;  %v1086_v55 = vld [vmem:[%s9512_s5 + $0x1b70] sm:$0xf] }
 0x18c   : > { %961 = vst [vmem:[%s9516_s6 + $0x5e0] sm:$0xf] %v960_v56  ;;  %v1088_v56 = vld [vmem:[%s9512_s5 + $0x1b80] sm:$0xf] }
 0x18d   : > { %963 = vst [vmem:[%s9516_s6 + $0x5e4] sm:$0xf] %v962_v57  ;;  %v1090_v57 = vld [vmem:[%s9512_s5 + $0x1b90] sm:$0xf] }
 0x18e   : > { %965 = vst [vmem:[%s9516_s6 + $0x5e8] sm:$0xf] %v964_v58  ;;  %v1092_v58 = vld [vmem:[%s9512_s5 + $0x1ba0] sm:$0xf] }
 0x18f   : > { %967 = vst [vmem:[%s9516_s6 + $0x5ec] sm:$0xf] %v966_v59  ;;  %v1094_v59 = vld [vmem:[%s9512_s5 + $0x1bb0] sm:$0xf] }
 0x190   : > { %969 = vst [vmem:[%s9516_s6 + $0x5f0] sm:$0xf] %v968_v60  ;;  %v1096_v60 = vld [vmem:[%s9512_s5 + $0x1bc0] sm:$0xf] }
 0x191   : > { %971 = vst [vmem:[%s9516_s6 + $0x5f4] sm:$0xf] %v970_v61  ;;  %v1098_v61 = vld [vmem:[%s9512_s5 + $0x1bd0] sm:$0xf] }
 0x192   : > { %973 = vst [vmem:[%s9516_s6 + $0x5f8] sm:$0xf] %v972_v62  ;;  %v1100_v62 = vld [vmem:[%s9512_s5 + $0x1be0] sm:$0xf] }
 0x193   : > { %975 = vst [vmem:[%s9516_s6 + $0x5fc] sm:$0xf] %v974_v63  ;;  %v1102_v63 = vld [vmem:[%s9512_s5 + $0x1bf0] sm:$0xf] }
 0x194   : > { %977 = vst [vmem:[%s9516_s6 + $0x600] sm:$0xf] %v976_v0  ;;  %v1104_v0 = vld [vmem:[%s9512_s5 + $0x1c00] sm:$0xf] }
 0x195   : > { %979 = vst [vmem:[%s9516_s6 + $0x604] sm:$0xf] %v978_v1  ;;  %v1106_v1 = vld [vmem:[%s9512_s5 + $0x1c10] sm:$0xf] }
 0x196   : > { %981 = vst [vmem:[%s9516_s6 + $0x608] sm:$0xf] %v980_v2  ;;  %v1108_v2 = vld [vmem:[%s9512_s5 + $0x1c20] sm:$0xf] }
 0x197   : > { %983 = vst [vmem:[%s9516_s6 + $0x60c] sm:$0xf] %v982_v3  ;;  %v1110_v3 = vld [vmem:[%s9512_s5 + $0x1c30] sm:$0xf] }
 0x198   : > { %985 = vst [vmem:[%s9516_s6 + $0x610] sm:$0xf] %v984_v4  ;;  %v1112_v4 = vld [vmem:[%s9512_s5 + $0x1c40] sm:$0xf] }
 0x199   : > { %987 = vst [vmem:[%s9516_s6 + $0x614] sm:$0xf] %v986_v5  ;;  %v1114_v5 = vld [vmem:[%s9512_s5 + $0x1c50] sm:$0xf] }
 0x19a   : > { %989 = vst [vmem:[%s9516_s6 + $0x618] sm:$0xf] %v988_v6  ;;  %v1116_v6 = vld [vmem:[%s9512_s5 + $0x1c60] sm:$0xf] }
 0x19b   : > { %991 = vst [vmem:[%s9516_s6 + $0x61c] sm:$0xf] %v990_v7  ;;  %v1118_v7 = vld [vmem:[%s9512_s5 + $0x1c70] sm:$0xf] }
 0x19c   : > { %993 = vst [vmem:[%s9516_s6 + $0x620] sm:$0xf] %v992_v8  ;;  %v1120_v8 = vld [vmem:[%s9512_s5 + $0x1c80] sm:$0xf] }
 0x19d   : > { %995 = vst [vmem:[%s9516_s6 + $0x624] sm:$0xf] %v994_v9  ;;  %v1122_v9 = vld [vmem:[%s9512_s5 + $0x1c90] sm:$0xf] }
 0x19e   : > { %997 = vst [vmem:[%s9516_s6 + $0x628] sm:$0xf] %v996_v10  ;;  %v1124_v10 = vld [vmem:[%s9512_s5 + $0x1ca0] sm:$0xf] }
 0x19f   : > { %999 = vst [vmem:[%s9516_s6 + $0x62c] sm:$0xf] %v998_v11  ;;  %v1126_v11 = vld [vmem:[%s9512_s5 + $0x1cb0] sm:$0xf] }
 0x1a0   : > { %1001 = vst [vmem:[%s9516_s6 + $0x630] sm:$0xf] %v1000_v12  ;;  %v1128_v12 = vld [vmem:[%s9512_s5 + $0x1cc0] sm:$0xf] }
 0x1a1   : > { %1003 = vst [vmem:[%s9516_s6 + $0x634] sm:$0xf] %v1002_v13  ;;  %v1130_v13 = vld [vmem:[%s9512_s5 + $0x1cd0] sm:$0xf] }
 0x1a2   : > { %1005 = vst [vmem:[%s9516_s6 + $0x638] sm:$0xf] %v1004_v14  ;;  %v1132_v14 = vld [vmem:[%s9512_s5 + $0x1ce0] sm:$0xf] }
 0x1a3   : > { %1007 = vst [vmem:[%s9516_s6 + $0x63c] sm:$0xf] %v1006_v15  ;;  %v1134_v15 = vld [vmem:[%s9512_s5 + $0x1cf0] sm:$0xf] }
 0x1a4   : > { %1009 = vst [vmem:[%s9516_s6 + $0x640] sm:$0xf] %v1008_v16  ;;  %v1136_v16 = vld [vmem:[%s9512_s5 + $0x1d00] sm:$0xf] }
 0x1a5   : > { %1011 = vst [vmem:[%s9516_s6 + $0x644] sm:$0xf] %v1010_v17  ;;  %v1138_v17 = vld [vmem:[%s9512_s5 + $0x1d10] sm:$0xf] }
 0x1a6   : > { %1013 = vst [vmem:[%s9516_s6 + $0x648] sm:$0xf] %v1012_v18  ;;  %v1140_v18 = vld [vmem:[%s9512_s5 + $0x1d20] sm:$0xf] }
 0x1a7   : > { %1015 = vst [vmem:[%s9516_s6 + $0x64c] sm:$0xf] %v1014_v19  ;;  %v1142_v19 = vld [vmem:[%s9512_s5 + $0x1d30] sm:$0xf] }
 0x1a8   : > { %1017 = vst [vmem:[%s9516_s6 + $0x650] sm:$0xf] %v1016_v20  ;;  %v1144_v20 = vld [vmem:[%s9512_s5 + $0x1d40] sm:$0xf] }
 0x1a9   : > { %1019 = vst [vmem:[%s9516_s6 + $0x654] sm:$0xf] %v1018_v21  ;;  %v1146_v21 = vld [vmem:[%s9512_s5 + $0x1d50] sm:$0xf] }
 0x1aa   : > { %1021 = vst [vmem:[%s9516_s6 + $0x658] sm:$0xf] %v1020_v22  ;;  %v1148_v22 = vld [vmem:[%s9512_s5 + $0x1d60] sm:$0xf] }
 0x1ab   : > { %1023 = vst [vmem:[%s9516_s6 + $0x65c] sm:$0xf] %v1022_v23  ;;  %v1150_v23 = vld [vmem:[%s9512_s5 + $0x1d70] sm:$0xf] }
 0x1ac   : > { %1025 = vst [vmem:[%s9516_s6 + $0x660] sm:$0xf] %v1024_v24  ;;  %v1152_v24 = vld [vmem:[%s9512_s5 + $0x1d80] sm:$0xf] }
 0x1ad   : > { %1027 = vst [vmem:[%s9516_s6 + $0x664] sm:$0xf] %v1026_v25  ;;  %v1154_v25 = vld [vmem:[%s9512_s5 + $0x1d90] sm:$0xf] }
 0x1ae   : > { %1029 = vst [vmem:[%s9516_s6 + $0x668] sm:$0xf] %v1028_v26  ;;  %v1156_v26 = vld [vmem:[%s9512_s5 + $0x1da0] sm:$0xf] }
 0x1af   : > { %1031 = vst [vmem:[%s9516_s6 + $0x66c] sm:$0xf] %v1030_v27  ;;  %v1158_v27 = vld [vmem:[%s9512_s5 + $0x1db0] sm:$0xf] }
 0x1b0   : > { %1033 = vst [vmem:[%s9516_s6 + $0x670] sm:$0xf] %v1032_v28  ;;  %v1160_v28 = vld [vmem:[%s9512_s5 + $0x1dc0] sm:$0xf] }
 0x1b1   : > { %1035 = vst [vmem:[%s9516_s6 + $0x674] sm:$0xf] %v1034_v29  ;;  %v1162_v29 = vld [vmem:[%s9512_s5 + $0x1dd0] sm:$0xf] }
 0x1b2   : > { %1037 = vst [vmem:[%s9516_s6 + $0x678] sm:$0xf] %v1036_v30  ;;  %v1164_v30 = vld [vmem:[%s9512_s5 + $0x1de0] sm:$0xf] }
 0x1b3   : > { %1039 = vst [vmem:[%s9516_s6 + $0x67c] sm:$0xf] %v1038_v31  ;;  %v1166_v31 = vld [vmem:[%s9512_s5 + $0x1df0] sm:$0xf] }
 0x1b4   : > { %1041 = vst [vmem:[%s9516_s6 + $0x680] sm:$0xf] %v1040_v32  ;;  %v1168_v32 = vld [vmem:[%s9512_s5 + $0x1e00] sm:$0xf] }
 0x1b5   : > { %1043 = vst [vmem:[%s9516_s6 + $0x684] sm:$0xf] %v1042_v33  ;;  %v1170_v33 = vld [vmem:[%s9512_s5 + $0x1e10] sm:$0xf] }
 0x1b6   : > { %1045 = vst [vmem:[%s9516_s6 + $0x688] sm:$0xf] %v1044_v34  ;;  %v1172_v34 = vld [vmem:[%s9512_s5 + $0x1e20] sm:$0xf] }
 0x1b7   : > { %1047 = vst [vmem:[%s9516_s6 + $0x68c] sm:$0xf] %v1046_v35  ;;  %v1174_v35 = vld [vmem:[%s9512_s5 + $0x1e30] sm:$0xf] }
 0x1b8   : > { %1049 = vst [vmem:[%s9516_s6 + $0x690] sm:$0xf] %v1048_v36  ;;  %v1176_v36 = vld [vmem:[%s9512_s5 + $0x1e40] sm:$0xf] }
 0x1b9   : > { %1051 = vst [vmem:[%s9516_s6 + $0x694] sm:$0xf] %v1050_v37  ;;  %v1178_v37 = vld [vmem:[%s9512_s5 + $0x1e50] sm:$0xf] }
 0x1ba   : > { %1053 = vst [vmem:[%s9516_s6 + $0x698] sm:$0xf] %v1052_v38  ;;  %v1180_v38 = vld [vmem:[%s9512_s5 + $0x1e60] sm:$0xf] }
 0x1bb   : > { %1055 = vst [vmem:[%s9516_s6 + $0x69c] sm:$0xf] %v1054_v39  ;;  %v1182_v39 = vld [vmem:[%s9512_s5 + $0x1e70] sm:$0xf] }
 0x1bc   : > { %1057 = vst [vmem:[%s9516_s6 + $0x6a0] sm:$0xf] %v1056_v40  ;;  %v1184_v40 = vld [vmem:[%s9512_s5 + $0x1e80] sm:$0xf] }
 0x1bd   : > { %1059 = vst [vmem:[%s9516_s6 + $0x6a4] sm:$0xf] %v1058_v41  ;;  %v1186_v41 = vld [vmem:[%s9512_s5 + $0x1e90] sm:$0xf] }
 0x1be   : > { %1061 = vst [vmem:[%s9516_s6 + $0x6a8] sm:$0xf] %v1060_v42  ;;  %v1188_v42 = vld [vmem:[%s9512_s5 + $0x1ea0] sm:$0xf] }
 0x1bf   : > { %1063 = vst [vmem:[%s9516_s6 + $0x6ac] sm:$0xf] %v1062_v43  ;;  %v1190_v43 = vld [vmem:[%s9512_s5 + $0x1eb0] sm:$0xf] }
 0x1c0   : > { %1065 = vst [vmem:[%s9516_s6 + $0x6b0] sm:$0xf] %v1064_v44  ;;  %v1192_v44 = vld [vmem:[%s9512_s5 + $0x1ec0] sm:$0xf] }
 0x1c1   : > { %1067 = vst [vmem:[%s9516_s6 + $0x6b4] sm:$0xf] %v1066_v45  ;;  %v1194_v45 = vld [vmem:[%s9512_s5 + $0x1ed0] sm:$0xf] }
 0x1c2   : > { %1069 = vst [vmem:[%s9516_s6 + $0x6b8] sm:$0xf] %v1068_v46  ;;  %v1196_v46 = vld [vmem:[%s9512_s5 + $0x1ee0] sm:$0xf] }
 0x1c3   : > { %1071 = vst [vmem:[%s9516_s6 + $0x6bc] sm:$0xf] %v1070_v47  ;;  %v1198_v47 = vld [vmem:[%s9512_s5 + $0x1ef0] sm:$0xf] }
 0x1c4   : > { %1073 = vst [vmem:[%s9516_s6 + $0x6c0] sm:$0xf] %v1072_v48  ;;  %v1200_v48 = vld [vmem:[%s9512_s5 + $0x1f00] sm:$0xf] }
 0x1c5   : > { %1075 = vst [vmem:[%s9516_s6 + $0x6c4] sm:$0xf] %v1074_v49  ;;  %v1202_v49 = vld [vmem:[%s9512_s5 + $0x1f10] sm:$0xf] }
 0x1c6   : > { %1077 = vst [vmem:[%s9516_s6 + $0x6c8] sm:$0xf] %v1076_v50  ;;  %v1204_v50 = vld [vmem:[%s9512_s5 + $0x1f20] sm:$0xf] }
 0x1c7   : > { %1079 = vst [vmem:[%s9516_s6 + $0x6cc] sm:$0xf] %v1078_v51  ;;  %v1206_v51 = vld [vmem:[%s9512_s5 + $0x1f30] sm:$0xf] }
 0x1c8   : > { %1081 = vst [vmem:[%s9516_s6 + $0x6d0] sm:$0xf] %v1080_v52  ;;  %v1208_v52 = vld [vmem:[%s9512_s5 + $0x1f40] sm:$0xf] }
 0x1c9   : > { %1083 = vst [vmem:[%s9516_s6 + $0x6d4] sm:$0xf] %v1082_v53  ;;  %v1210_v53 = vld [vmem:[%s9512_s5 + $0x1f50] sm:$0xf] }
 0x1ca   : > { %1085 = vst [vmem:[%s9516_s6 + $0x6d8] sm:$0xf] %v1084_v54  ;;  %v1212_v54 = vld [vmem:[%s9512_s5 + $0x1f60] sm:$0xf] }
 0x1cb   : > { %1087 = vst [vmem:[%s9516_s6 + $0x6dc] sm:$0xf] %v1086_v55  ;;  %v1214_v55 = vld [vmem:[%s9512_s5 + $0x1f70] sm:$0xf] }
 0x1cc   : > { %1089 = vst [vmem:[%s9516_s6 + $0x6e0] sm:$0xf] %v1088_v56  ;;  %v1216_v56 = vld [vmem:[%s9512_s5 + $0x1f80] sm:$0xf] }
 0x1cd   : > { %1091 = vst [vmem:[%s9516_s6 + $0x6e4] sm:$0xf] %v1090_v57  ;;  %v1218_v57 = vld [vmem:[%s9512_s5 + $0x1f90] sm:$0xf] }
 0x1ce   : > { %1093 = vst [vmem:[%s9516_s6 + $0x6e8] sm:$0xf] %v1092_v58  ;;  %v1220_v58 = vld [vmem:[%s9512_s5 + $0x1fa0] sm:$0xf] }
 0x1cf   : > { %1095 = vst [vmem:[%s9516_s6 + $0x6ec] sm:$0xf] %v1094_v59  ;;  %v1222_v59 = vld [vmem:[%s9512_s5 + $0x1fb0] sm:$0xf] }
 0x1d0   : > { %1097 = vst [vmem:[%s9516_s6 + $0x6f0] sm:$0xf] %v1096_v60  ;;  %v1224_v60 = vld [vmem:[%s9512_s5 + $0x1fc0] sm:$0xf] }
 0x1d1   : > { %1099 = vst [vmem:[%s9516_s6 + $0x6f4] sm:$0xf] %v1098_v61  ;;  %v1226_v61 = vld [vmem:[%s9512_s5 + $0x1fd0] sm:$0xf] }
 0x1d2   : > { %1101 = vst [vmem:[%s9516_s6 + $0x6f8] sm:$0xf] %v1100_v62  ;;  %v1228_v62 = vld [vmem:[%s9512_s5 + $0x1fe0] sm:$0xf] }
 0x1d3   : > { %1103 = vst [vmem:[%s9516_s6 + $0x6fc] sm:$0xf] %v1102_v63  ;;  %v1230_v63 = vld [vmem:[%s9512_s5 + $0x1ff0] sm:$0xf] }
 0x1d4   : > { %1105 = vst [vmem:[%s9516_s6 + $0x700] sm:$0xf] %v1104_v0 }
 0x1d5   : > { %1107 = vst [vmem:[%s9516_s6 + $0x704] sm:$0xf] %v1106_v1 }
 0x1d6   : > { %1109 = vst [vmem:[%s9516_s6 + $0x708] sm:$0xf] %v1108_v2 }
 0x1d7   : > { %1111 = vst [vmem:[%s9516_s6 + $0x70c] sm:$0xf] %v1110_v3 }
 0x1d8   : > { %1113 = vst [vmem:[%s9516_s6 + $0x710] sm:$0xf] %v1112_v4 }
 0x1d9   : > { %1115 = vst [vmem:[%s9516_s6 + $0x714] sm:$0xf] %v1114_v5 }
 0x1da   : > { %1117 = vst [vmem:[%s9516_s6 + $0x718] sm:$0xf] %v1116_v6 }
 0x1db   : > { %1119 = vst [vmem:[%s9516_s6 + $0x71c] sm:$0xf] %v1118_v7 }
 0x1dc   : > { %1121 = vst [vmem:[%s9516_s6 + $0x720] sm:$0xf] %v1120_v8 }
 0x1dd   : > { %1123 = vst [vmem:[%s9516_s6 + $0x724] sm:$0xf] %v1122_v9 }
 0x1de   : > { %1125 = vst [vmem:[%s9516_s6 + $0x728] sm:$0xf] %v1124_v10 }
 0x1df   : > { %1127 = vst [vmem:[%s9516_s6 + $0x72c] sm:$0xf] %v1126_v11 }
 0x1e0   : > { %1129 = vst [vmem:[%s9516_s6 + $0x730] sm:$0xf] %v1128_v12 }
 0x1e1   : > { %1131 = vst [vmem:[%s9516_s6 + $0x734] sm:$0xf] %v1130_v13 }
 0x1e2   : > { %1133 = vst [vmem:[%s9516_s6 + $0x738] sm:$0xf] %v1132_v14 }
 0x1e3   : > { %1135 = vst [vmem:[%s9516_s6 + $0x73c] sm:$0xf] %v1134_v15 }
 0x1e4   : > { %1137 = vst [vmem:[%s9516_s6 + $0x740] sm:$0xf] %v1136_v16 }
 0x1e5   : > { %1139 = vst [vmem:[%s9516_s6 + $0x744] sm:$0xf] %v1138_v17 }
 0x1e6   : > { %1141 = vst [vmem:[%s9516_s6 + $0x748] sm:$0xf] %v1140_v18 }
 0x1e7   : > { %1143 = vst [vmem:[%s9516_s6 + $0x74c] sm:$0xf] %v1142_v19 }
 0x1e8   : > { %1145 = vst [vmem:[%s9516_s6 + $0x750] sm:$0xf] %v1144_v20 }
 0x1e9   : > { %1147 = vst [vmem:[%s9516_s6 + $0x754] sm:$0xf] %v1146_v21 }
 0x1ea   : > { %1149 = vst [vmem:[%s9516_s6 + $0x758] sm:$0xf] %v1148_v22 }
 0x1eb   : > { %1151 = vst [vmem:[%s9516_s6 + $0x75c] sm:$0xf] %v1150_v23 }
 0x1ec   : > { %1153 = vst [vmem:[%s9516_s6 + $0x760] sm:$0xf] %v1152_v24 }
 0x1ed   : > { %1155 = vst [vmem:[%s9516_s6 + $0x764] sm:$0xf] %v1154_v25 }
 0x1ee   : > { %1157 = vst [vmem:[%s9516_s6 + $0x768] sm:$0xf] %v1156_v26 }
 0x1ef   : > { %1159 = vst [vmem:[%s9516_s6 + $0x76c] sm:$0xf] %v1158_v27 }
 0x1f0   : > { %1161 = vst [vmem:[%s9516_s6 + $0x770] sm:$0xf] %v1160_v28 }
 0x1f1   : > { %1163 = vst [vmem:[%s9516_s6 + $0x774] sm:$0xf] %v1162_v29 }
 0x1f2   : > { %1165 = vst [vmem:[%s9516_s6 + $0x778] sm:$0xf] %v1164_v30 }
 0x1f3   : > { %1167 = vst [vmem:[%s9516_s6 + $0x77c] sm:$0xf] %v1166_v31 }
 0x1f4   : > { %1169 = vst [vmem:[%s9516_s6 + $0x780] sm:$0xf] %v1168_v32 }
 0x1f5   : > { %1171 = vst [vmem:[%s9516_s6 + $0x784] sm:$0xf] %v1170_v33 }
 0x1f6   : > { %1173 = vst [vmem:[%s9516_s6 + $0x788] sm:$0xf] %v1172_v34 }
 0x1f7   : > { %1175 = vst [vmem:[%s9516_s6 + $0x78c] sm:$0xf] %v1174_v35 }
 0x1f8   : > { %1177 = vst [vmem:[%s9516_s6 + $0x790] sm:$0xf] %v1176_v36 }
 0x1f9   : > { %1179 = vst [vmem:[%s9516_s6 + $0x794] sm:$0xf] %v1178_v37 }
 0x1fa   : > { %1181 = vst [vmem:[%s9516_s6 + $0x798] sm:$0xf] %v1180_v38 }
 0x1fb   : > { %1183 = vst [vmem:[%s9516_s6 + $0x79c] sm:$0xf] %v1182_v39 }
 0x1fc   : > { %1185 = vst [vmem:[%s9516_s6 + $0x7a0] sm:$0xf] %v1184_v40 }
 0x1fd   : > { %1187 = vst [vmem:[%s9516_s6 + $0x7a4] sm:$0xf] %v1186_v41 }
 0x1fe   : > { %1189 = vst [vmem:[%s9516_s6 + $0x7a8] sm:$0xf] %v1188_v42 }
 0x1ff   : > { %1191 = vst [vmem:[%s9516_s6 + $0x7ac] sm:$0xf] %v1190_v43 }
 0x200   : > { %1193 = vst [vmem:[%s9516_s6 + $0x7b0] sm:$0xf] %v1192_v44 }
 0x201   : > { %1195 = vst [vmem:[%s9516_s6 + $0x7b4] sm:$0xf] %v1194_v45 }
 0x202   : > { %1197 = vst [vmem:[%s9516_s6 + $0x7b8] sm:$0xf] %v1196_v46 }
 0x203   : > { %1199 = vst [vmem:[%s9516_s6 + $0x7bc] sm:$0xf] %v1198_v47 }
 0x204   : > { %1201 = vst [vmem:[%s9516_s6 + $0x7c0] sm:$0xf] %v1200_v48 }
 0x205   : > { %1203 = vst [vmem:[%s9516_s6 + $0x7c4] sm:$0xf] %v1202_v49 }
 0x206   : > { %1205 = vst [vmem:[%s9516_s6 + $0x7c8] sm:$0xf] %v1204_v50 }
 0x207   : > { %1207 = vst [vmem:[%s9516_s6 + $0x7cc] sm:$0xf] %v1206_v51 }
 0x208   : > { %1209 = vst [vmem:[%s9516_s6 + $0x7d0] sm:$0xf] %v1208_v52 }
 0x209   : > { %1211 = vst [vmem:[%s9516_s6 + $0x7d4] sm:$0xf] %v1210_v53 }
 0x20a   : > { %1213 = vst [vmem:[%s9516_s6 + $0x7d8] sm:$0xf] %v1212_v54 }
 0x20b   : > { %1215 = vst [vmem:[%s9516_s6 + $0x7dc] sm:$0xf] %v1214_v55 }
 0x20c   : > { %1217 = vst [vmem:[%s9516_s6 + $0x7e0] sm:$0xf] %v1216_v56 }
 0x20d   : > { %1219 = vst [vmem:[%s9516_s6 + $0x7e4] sm:$0xf] %v1218_v57 }
 0x20e   : > { %1221 = vst [vmem:[%s9516_s6 + $0x7e8] sm:$0xf] %v1220_v58 }
 0x20f   : > { %1223 = vst [vmem:[%s9516_s6 + $0x7ec] sm:$0xf] %v1222_v59 }
 0x210   : > { %1225 = vst [vmem:[%s9516_s6 + $0x7f0] sm:$0xf] %v1224_v60 }
 0x211   : > { %1227 = vst [vmem:[%s9516_s6 + $0x7f4] sm:$0xf] %v1226_v61 }
 0x212   : > { %1229 = vst [vmem:[%s9516_s6 + $0x7f8] sm:$0xf] %v1228_v62 }
 0x213   : > { %1231 = vst [vmem:[%s9516_s6 + $0x7fc] sm:$0xf] %v1230_v63 }
 0x214 PF: > { %p7737_p8 = scmp.ge.s32.totalorder %s9437_s19, 1  ;;  %p4364_p9 = scmp.lt.s32.totalorder %s9437_s19, 5 }
 0x216   : > { %p4365_p10 = pnand %p7737_p8, %p4364_p9 }
 0x217   : > { %s4371_s7 = sand.u32 (!%p4365_p10), 1, %s9421_s15   ;;  %p4414_p11 = scmp.lt.s32.totalorder (!%p4365_p10), %s9429_s17, 3 }
 0x218   : > { %4368 = sbr.rel (%p4365_p10) target bundleno = 1034 (0x40a), region = 84  ;;  %s7738_s8 = sshll.u32 (!%p4365_p10), %s4371_s7, 11 }
 0x219   : > { %s10545_s9 = scalar_lea.vmem (!%p4365_p10), [#allocation2], %s7738_s8  ;;  %s7739_s26 = sshll.u32 (!%p4365_p10), %s4371_s7, 4 }
 0x21a   : > { %s4406_s27 = scalar_lea.vmem (!%p4365_p10), [#allocation3], %s7739_s26 }
 0x21d   : > { %v9095_v0 = vld [vmem:[%s10545_s9 + $0x38] sm:$0xff]  ;;  %v9094_v4 = vld [vmem:[%s10545_s9 + $0x30] sm:$0xff]  ;;  %v9093_v8 = vld [vmem:[%s10545_s9 + $0x28] sm:$0xff]  ;;  %s11216_s6 = scalar_select %p4414_p11, %s9429_s17, 3 }
 0x21e   : > { %v9103_v1 = vld [vmem:[%s10545_s9 + $0x78] sm:$0xff]  ;;  %6853 = vmatpush.bf16.msra.mxu0 %v9095_v0  ;;  %v9102_v5 = vld [vmem:[%s10545_s9 + $0x70] sm:$0xff]  ;;  %v9101_v9 = vld [vmem:[%s10545_s9 + $0x68] sm:$0xff]  ;;  %s9021_s28 = sshll.u32 (%p9499_p6), %s9429_s17, 2 }
 0x21f   : > { %v9111_v2 = vld [vmem:[%s10545_s9 + $0xb8] sm:$0xff]  ;;  %6872 = vmatpush.bf16.msra.mxu1 %v9103_v1  ;;  %v9110_v6 = vld [vmem:[%s10545_s9 + $0xb0] sm:$0xff]  ;;  %v9109_v10 = vld [vmem:[%s10545_s9 + $0xa8] sm:$0xff]  ;;  %s4416_s11 = scalar_lea.vmem %s11263_s2, %s11216_s6  ;;  %s4419_s13 = scalar_lea.vmem %s11264_s3, %s11216_s6 }
 0x220   : > { %v9119_v3 = vld [vmem:[%s10545_s9 + $0xf8] sm:$0xff]  ;;  %6891 = vmatpush.bf16.msra.mxu2 %v9111_v2  ;;  %v9118_v7 = vld [vmem:[%s10545_s9 + $0xf0] sm:$0xff]  ;;  %v9117_v11 = vld [vmem:[%s10545_s9 + $0xe8] sm:$0xff]  ;;  %s7568_s29 = scalar_lea.vmem (%p9499_p6), %s11265_s4, %s9021_s28 }
 0x221   : > { %6910 = vmatpush.bf16.msra.mxu3 %v9119_v3  ;;  %v9092_v12 = vld [vmem:[%s10545_s9 + $0x20] sm:$0xff]  ;;  %v9091_v16 = vld [vmem:[%s10545_s9 + $0x18] sm:$0xff]  ;;  %v9090_v20 = vld [vmem:[%s10545_s9 + $0x10] sm:$0xff] }
 0x222   : > { %6854 = vmatpush.bf16.msra.mxu0 %v9094_v4  ;;  %v9100_v13 = vld [vmem:[%s10545_s9 + $0x60] sm:$0xff]  ;;  %v9099_v17 = vld [vmem:[%s10545_s9 + $0x58] sm:$0xff]  ;;  %v9098_v21 = vld [vmem:[%s10545_s9 + $0x50] sm:$0xff] }
 0x223   : > { %6873 = vmatpush.bf16.msra.mxu1 %v9102_v5  ;;  %v9108_v14 = vld [vmem:[%s10545_s9 + $0xa0] sm:$0xff]  ;;  %v9107_v18 = vld [vmem:[%s10545_s9 + $0x98] sm:$0xff]  ;;  %v9106_v22 = vld [vmem:[%s10545_s9 + $0x90] sm:$0xff] }
 0x224   : > { %6892 = vmatpush.bf16.msra.mxu2 %v9110_v6  ;;  %v9116_v15 = vld [vmem:[%s10545_s9 + $0xe0] sm:$0xff]  ;;  %v9115_v19 = vld [vmem:[%s10545_s9 + $0xd8] sm:$0xff]  ;;  %v9114_v23 = vld [vmem:[%s10545_s9 + $0xd0] sm:$0xff] }
 0x225   : > { %6911 = vmatpush.bf16.msra.mxu3 %v9118_v7  ;;  %v9089_v24 = vld [vmem:[%s10545_s9 + $0x8] sm:$0xff]  ;;  %v9088_v28 = vld [vmem:[%s10545_s9] sm:$0xff]  ;;  %v9143_v40 = vld [vmem:[%s10545_s9 + $0x1b8] sm:$0xff] }
 0x226   : > { %6855 = vmatpush.bf16.msra.mxu0 %v9093_v8  ;;  %v9097_v25 = vld [vmem:[%s10545_s9 + $0x48] sm:$0xff]  ;;  %v7742_v29 = vld [vmem:[%s11261_s0] sm:$0xf]  ;;  %v9024_v34 = vld [vmem:[%s11261_s0 + $0x4] sm:$0xf] }
 0x227   : > { %6874 = vmatpush.bf16.msra.mxu1 %v9101_v9  ;;  %v9105_v26 = vld [vmem:[%s10545_s9 + $0x88] sm:$0xff]  ;;  %v9040_v30 = vld [vmem:[%s11261_s0 + $0x7c] sm:$0xf0]  ;;  %v7744_v35 = vld [vmem:[%s11261_s0 + $0x80] sm:$0xf0] }
 0x228   : > { %6893 = vmatpush.bf16.msra.mxu2 %v9109_v10  ;;  %v9113_v27 = vld [vmem:[%s10545_s9 + $0xc8] sm:$0xff]  ;;  %v9096_v31 = vld [vmem:[%s10545_s9 + $0x40] sm:$0xff]  ;;  %v9127_v41 = vld [vmem:[%s10545_s9 + $0x138] sm:$0xff]  ;;  %v7743_v42 = vor.u32 %v9040_v30, %v7742_v29  ;;  %v7747_v43 = vor.u32 %v9024_v34, %v7744_v35 }
 0x229   : > { %6912 = vmatpush.bf16.msra.mxu3 %v9117_v11  ;;  %v9104_v32 = vld [vmem:[%s10545_s9 + $0x80] sm:$0xff]  ;;  %v7750_v36 = vld [vmem:[%s11261_s0 + $0x8] sm:$0xf]  ;;  %v9025_v38 = vld [vmem:[%s11261_s0 + $0xc] sm:$0xf] }
 0x22a   : > { %6856 = vmatpush.bf16.msra.mxu0 %v9092_v12  ;;  %v9112_v33 = vld [vmem:[%s10545_s9 + $0xc0] sm:$0xff]  ;;  %v9041_v37 = vld [vmem:[%s11261_s0 + $0x84] sm:$0xf0]  ;;  %v7752_v39 = vld [vmem:[%s11261_s0 + $0x88] sm:$0xf0] }
 0x22b   : > { %6875 = vmatpush.bf16.msra.mxu1 %v9100_v13  ;;  %v7751_v44 = vor.u32 %v9041_v37, %v7750_v36  ;;  %v7755_v45 = vor.u32 %v9025_v38, %v7752_v39  ;;  %v9135_v46 = vld [vmem:[%s10545_s9 + $0x178] sm:$0xff]  ;;  %v9142_v48 = vld [vmem:[%s10545_s9 + $0x1b0] sm:$0xff]  ;;  %v9141_v52 = vld [vmem:[%s10545_s9 + $0x1a8] sm:$0xff] }
 0x22c   : > { %6894 = vmatpush.bf16.msra.mxu2 %v9108_v14  ;;  %v9151_v47 = vld [vmem:[%s10545_s9 + $0x1f8] sm:$0xff]  ;;  %v9126_v49 = vld [vmem:[%s10545_s9 + $0x130] sm:$0xff]  ;;  %v9125_v53 = vld [vmem:[%s10545_s9 + $0x128] sm:$0xff] }
 0x22d   : > { %6913 = vmatpush.bf16.msra.mxu3 %v9116_v15  ;;  %v9134_v50 = vld [vmem:[%s10545_s9 + $0x170] sm:$0xff]  ;;  %v9133_v54 = vld [vmem:[%s10545_s9 + $0x168] sm:$0xff]  ;;  %v9140_v56 = vld [vmem:[%s10545_s9 + $0x1a0] sm:$0xff] }
 0x22e   : > { %6857 = vmatpush.bf16.msra.mxu0 %v9091_v16  ;;  %v9150_v51 = vld [vmem:[%s10545_s9 + $0x1f0] sm:$0xff]  ;;  %v9149_v55 = vld [vmem:[%s10545_s9 + $0x1e8] sm:$0xff]  ;;  %v9124_v57 = vld [vmem:[%s10545_s9 + $0x120] sm:$0xff] }
 0x22f   : > { %6876 = vmatpush.bf16.msra.mxu1 %v9099_v17  ;;  %v9132_v58 = vld [vmem:[%s10545_s9 + $0x160] sm:$0xff]  ;;  %v7878_v0 = vld [vmem:[%s11261_s0 + $0x108] sm:$0xf]  ;;  %v9057_v2 = vld [vmem:[%s11261_s0 + $0x10c] sm:$0xf] }
 0x230   : > { %6895 = vmatpush.bf16.msra.mxu2 %v9107_v18  ;;  %v9148_v59 = vld [vmem:[%s10545_s9 + $0x1e0] sm:$0xff]  ;;  %v9073_v1 = vld [vmem:[%s11261_s0 + $0x184] sm:$0xf0]  ;;  %v7880_v3 = vld [vmem:[%s11261_s0 + $0x188] sm:$0xf0] }
 0x231   : > { %6914 = vmatpush.bf16.msra.mxu3 %v9115_v19  ;;  %v7870_v60 = vld [vmem:[%s11261_s0 + $0x100] sm:$0xf]  ;;  %v9056_v62 = vld [vmem:[%s11261_s0 + $0x104] sm:$0xf]  ;;  %v9139_v4 = vld [vmem:[%s10545_s9 + $0x198] sm:$0xff]  ;;  %v7879_v8 = vor.u32 %v9073_v1, %v7878_v0  ;;  %v7883_v9 = vor.u32 %v9057_v2, %v7880_v3 }
 0x232   : > { %6858 = vmatpush.bf16.msra.mxu0 %v9090_v20  ;;  %v9072_v61 = vld [vmem:[%s11261_s0 + $0x17c] sm:$0xf0]  ;;  %v7872_v63 = vld [vmem:[%s11261_s0 + $0x180] sm:$0xf0]  ;;  %v9123_v5 = vld [vmem:[%s10545_s9 + $0x118] sm:$0xff] }
 0x233   : > { %6877 = vmatpush.bf16.msra.mxu1 %v9098_v21  ;;  %v7871_v6 = vor.u32 %v9072_v61, %v7870_v60  ;;  %v7875_v7 = vor.u32 %v9056_v62, %v7872_v63  ;;  %v9131_v10 = vld [vmem:[%s10545_s9 + $0x158] sm:$0xff]  ;;  %v9138_v12 = vld [vmem:[%s10545_s9 + $0x190] sm:$0xff]  ;;  %v9137_v16 = vld [vmem:[%s10545_s9 + $0x188] sm:$0xff] }
 0x234   : > { %6896 = vmatpush.bf16.msra.mxu2 %v9106_v22  ;;  %v9147_v11 = vld [vmem:[%s10545_s9 + $0x1d8] sm:$0xff]  ;;  %v9122_v13 = vld [vmem:[%s10545_s9 + $0x110] sm:$0xff]  ;;  %v9121_v17 = vld [vmem:[%s10545_s9 + $0x108] sm:$0xff] }
 0x235   : > { %6915 = vmatpush.bf16.msra.mxu3 %v9114_v23  ;;  %v9130_v14 = vld [vmem:[%s10545_s9 + $0x150] sm:$0xff]  ;;  %v9129_v18 = vld [vmem:[%s10545_s9 + $0x148] sm:$0xff]  ;;  %v9136_v20 = vld [vmem:[%s10545_s9 + $0x180] sm:$0xff] }
 0x236   : > { %6859 = vmatpush.bf16.msra.mxu0 %v9089_v24  ;;  %v9146_v15 = vld [vmem:[%s10545_s9 + $0x1d0] sm:$0xff]  ;;  %v9145_v19 = vld [vmem:[%s10545_s9 + $0x1c8] sm:$0xff]  ;;  %v9120_v21 = vld [vmem:[%s10545_s9 + $0x100] sm:$0xff] }
 0x237   : > { %6878 = vmatpush.bf16.msra.mxu1 %v9097_v25  ;;  %v9128_v22 = vld [vmem:[%s10545_s9 + $0x140] sm:$0xff]  ;;  %v7758_v24 = vld [vmem:[%s11261_s0 + $0x10] sm:$0xf]  ;;  %v9175_v25 = vld [vmem:[%s10545_s9 + $0x2b8] sm:$0xff] }
 0x238   : > { %6897 = vmatpush.bf16.msra.mxu2 %v9105_v26  ;;  %v9144_v23 = vld [vmem:[%s10545_s9 + $0x1c0] sm:$0xff]  ;;  %v9159_v26 = vld [vmem:[%s10545_s9 + $0x238] sm:$0xff]  ;;  %v7760_v29 = vld [vmem:[%s11261_s0 + $0x90] sm:$0xf0] }
 0x239   : > { %6916 = vmatpush.bf16.msra.mxu3 %v9113_v27  ;;  %v9042_v27 = vld [vmem:[%s11261_s0 + $0x8c] sm:$0xf0]  ;;  %v7766_v30 = vld [vmem:[%s11261_s0 + $0x18] sm:$0xf]  ;;  %v7896_v61 = vld [vmem:[%s11261_s0 + $0x198] sm:$0xf0] }
 0x23a   : > { %6860 = vmatpush.bf16.msra.mxu0 %v9088_v28  ;;  %v9026_v28 = vld [vmem:[%s11261_s0 + $0x14] sm:$0xf]  ;;  %v9167_v34 = vld [vmem:[%s10545_s9 + $0x278] sm:$0xff]  ;;  %v7759_v36 = vor.u32 %v9042_v27, %v7758_v24  ;;  %v7776_v24 = vld [vmem:[%s11261_s0 + $0xa0] sm:$0xf0] }
 0x23b   : > { %6879 = vmatpush.bf16.msra.mxu1 %v9096_v31  ;;  %v9043_v31 = vld [vmem:[%s11261_s0 + $0x94] sm:$0xf0]  ;;  %v9174_v37 = vld [vmem:[%s10545_s9 + $0x2b0] sm:$0xff]  ;;  %v7763_v38 = vor.u32 %v9026_v28, %v7760_v29  ;;  %v9029_v27 = vld [vmem:[%s11261_s0 + $0x2c] sm:$0xf] }
 0x23c   : > { %6898 = vmatpush.bf16.msra.mxu2 %v9104_v32  ;;  %v9027_v32 = vld [vmem:[%s11261_s0 + $0x1c] sm:$0xf]  ;;  %v7767_v39 = vor.u32 %v9043_v31, %v7766_v30  ;;  %v9170_v1 = vld [vmem:[%s10545_s9 + $0x290] sm:$0xff]  ;;  %v7784_v28 = vld [vmem:[%s11261_s0 + $0xa8] sm:$0xf0] }
 0x23d   : > { %6917 = vmatpush.bf16.msra.mxu3 %v9112_v33  ;;  %6861 = vmatmul.bf16.vlgmr.msra.gmra.mxu0 %v7743_v42  ;;  %v7768_v33 = vld [vmem:[%s11261_s0 + $0x98] sm:$0xf0]  ;;  %v9166_v42 = vld [vmem:[%s10545_s9 + $0x270] sm:$0xff] }
 0x23e   : > { %6929 = vmatpush.bf16.msrb.mxu0 %v9127_v41  ;;  %6880 = vmatmul.bf16.vlgmr.msra.gmra.mxu1 %v7747_v43  ;;  %v9183_v35 = vld [vmem:[%s10545_s9 + $0x2f8] sm:$0xff]  ;;  %v9158_v41 = vld [vmem:[%s10545_s9 + $0x230] sm:$0xff] }
 0x23f   : > { %6899 = vmatmul.bf16.vlgmr.msra.gmra.mxu2 %v7751_v44  ;;  %6948 = vmatpush.bf16.msrb.mxu1 %v9135_v46  ;;  %v9182_v43 = vld [vmem:[%s10545_s9 + $0x2f0] sm:$0xff]  ;;  %v9173_v44 = vld [vmem:[%s10545_s9 + $0x2a8] sm:$0xff]  ;;  %v9155_v60 = vld [vmem:[%s10545_s9 + $0x218] sm:$0xff] }
 0x240   : > { %6967 = vmatpush.bf16.msrb.mxu2 %v9143_v40  ;;  %6918 = vmatmul.bf16.vlgmr.msra.gmra.mxu3 %v7755_v45  ;;  %v7771_v40 = vor.u32 %v9027_v32, %v7768_v33  ;;  %v9157_v45 = vld [vmem:[%s10545_s9 + $0x228] sm:$0xff]  ;;  %v9163_v62 = vld [vmem:[%s10545_s9 + $0x258] sm:$0xff]  ;;  %v9198_v30 = vld [vmem:[%s10545_s9 + $0x370] sm:$0xff]  ;;  %v7787_v33 = vor.u32 %v9029_v27, %v7784_v28 }
 0x241   : > { %6986 = vmatpush.bf16.msrb.mxu3 %v9151_v47  ;;  %v9165_v46 = vld [vmem:[%s10545_s9 + $0x268] sm:$0xff]  ;;  %v9179_v63 = vld [vmem:[%s10545_s9 + $0x2d8] sm:$0xff] }
 0x242   : > { %6930 = vmatpush.bf16.msrb.mxu0 %v9126_v49  ;;  %v9181_v47 = vld [vmem:[%s10545_s9 + $0x2e8] sm:$0xff]  ;;  %v9156_v49 = vld [vmem:[%s10545_s9 + $0x220] sm:$0xff] }
 0x243   : > { %6949 = vmatpush.bf16.msrb.mxu1 %v9134_v50  ;;  %v9164_v50 = vld [vmem:[%s10545_s9 + $0x260] sm:$0xff]  ;;  %v9237_v28 = vld [vmem:[%s10545_s9 + $0x4a8] sm:$0xff] }
 0x244   : > { %6968 = vmatpush.bf16.msrb.mxu2 %v9142_v48  ;;  %v9172_v48 = vld [vmem:[%s10545_s9 + $0x2a0] sm:$0xff] }
 0x245   : > { %6987 = vmatpush.bf16.msrb.mxu3 %v9150_v51  ;;  %v9180_v51 = vld [vmem:[%s10545_s9 + $0x2e0] sm:$0xff] }
 0x246   : > { %6931 = vmatpush.bf16.msrb.mxu0 %v9125_v53  ;;  %v9074_v53 = vld [vmem:[%s11261_s0 + $0x18c] sm:$0xf0] }
 0x247   : > { %6950 = vmatpush.bf16.msrb.mxu1 %v9133_v54  ;;  %v9171_v54 = vld [vmem:[%s10545_s9 + $0x298] sm:$0xff] }
 0x248   : > { %6969 = vmatpush.bf16.msrb.mxu2 %v9141_v52  ;;  %v7886_v52 = vld [vmem:[%s11261_s0 + $0x110] sm:$0xf] }
 0x249   : > { %6988 = vmatpush.bf16.msrb.mxu3 %v9149_v55  ;;  %v9058_v55 = vld [vmem:[%s11261_s0 + $0x114] sm:$0xf]  ;;  %v7887_v0 = vor.u32 %v9074_v53, %v7886_v52  ;;  %v9061_v52 = vld [vmem:[%s11261_s0 + $0x12c] sm:$0xf]  ;;  %v9187_v53 = vld [vmem:[%s10545_s9 + $0x318] sm:$0xff] }
 0x24a   : > { %6932 = vmatpush.bf16.msrb.mxu0 %v9124_v57  ;;  %v7894_v57 = vld [vmem:[%s11261_s0 + $0x118] sm:$0xf] }
 0x24b   : > { %6951 = vmatpush.bf16.msrb.mxu1 %v9132_v58  ;;  %v9075_v58 = vld [vmem:[%s11261_s0 + $0x194] sm:$0xf0] }
 0x24c   : > { %6970 = vmatpush.bf16.msrb.mxu2 %v9140_v56  ;;  %v7888_v56 = vld [vmem:[%s11261_s0 + $0x190] sm:$0xf0]  ;;  %v7895_v3 = vor.u32 %v9075_v58, %v7894_v57 }
 0x24d   : > { %6989 = vmatpush.bf16.msrb.mxu3 %v9148_v59  ;;  %6866 = vmatmul.bf16.gmra.mxu0 %v7871_v6  ;;  %v9059_v59 = vld [vmem:[%s11261_s0 + $0x11c] sm:$0xf]  ;;  %v7891_v2 = vor.u32 %v9058_v55, %v7888_v56  ;;  %v9162_v6 = vld [vmem:[%s10545_s9 + $0x250] sm:$0xff] }
 0x24e   : > { %6933 = vmatpush.bf16.msrb.mxu0 %v9123_v5  ;;  %6885 = vmatmul.bf16.gmra.mxu1 %v7875_v7  ;;  %v9154_v5 = vld [vmem:[%s10545_s9 + $0x210] sm:$0xff]  ;;  %v9211_v55 = vld [vmem:[%s10545_s9 + $0x3d8] sm:$0xff] }
 0x24f   : > { %6904 = vmatmul.bf16.gmra.mxu2 %v7879_v8  ;;  %6952 = vmatpush.bf16.msrb.mxu1 %v9131_v10  ;;  %v9178_v7 = vld [vmem:[%s10545_s9 + $0x2d0] sm:$0xff]  ;;  %v9169_v8 = vld [vmem:[%s10545_s9 + $0x288] sm:$0xff] }
 0x250   : > { %6971 = vmatpush.bf16.msrb.mxu2 %v9139_v4  ;;  %6923 = vmatmul.bf16.gmra.mxu3 %v7883_v9  ;;  %v7899_v4 = vor.u32 %v9059_v59, %v7896_v61  ;;  %v9153_v9 = vld [vmem:[%s10545_s9 + $0x208] sm:$0xff]  ;;  %v9202_v56 = vld [vmem:[%s10545_s9 + $0x390] sm:$0xff] }
 0x251   : > { %6990 = vmatpush.bf16.msrb.mxu3 %v9147_v11  ;;  %v9161_v10 = vld [vmem:[%s10545_s9 + $0x248] sm:$0xff]  ;;  %v9194_v58 = vld [vmem:[%s10545_s9 + $0x350] sm:$0xff] }
 0x252   : > { %6934 = vmatpush.bf16.msrb.mxu0 %v9122_v13  ;;  %v9177_v11 = vld [vmem:[%s10545_s9 + $0x2c8] sm:$0xff]  ;;  %v9207_v13 = vld [vmem:[%s10545_s9 + $0x3b8] sm:$0xff] }
 0x253   : > { %6953 = vmatpush.bf16.msrb.mxu1 %v9130_v14  ;;  %v9152_v14 = vld [vmem:[%s10545_s9 + $0x200] sm:$0xff] }
 0x254   : > { %6972 = vmatpush.bf16.msrb.mxu2 %v9138_v12  ;;  %v9168_v12 = vld [vmem:[%s10545_s9 + $0x280] sm:$0xff] }
 0x255   : > { %6991 = vmatpush.bf16.msrb.mxu3 %v9146_v15  ;;  %v9160_v15 = vld [vmem:[%s10545_s9 + $0x240] sm:$0xff] }
 0x256   : > { %6935 = vmatpush.bf16.msrb.mxu0 %v9121_v17  ;;  %v7774_v17 = vld [vmem:[%s11261_s0 + $0x20] sm:$0xf] }
 0x257   : > { %6954 = vmatpush.bf16.msrb.mxu1 %v9129_v18  ;;  %v9044_v18 = vld [vmem:[%s11261_s0 + $0x9c] sm:$0xf0] }
 0x258   : > { %6973 = vmatpush.bf16.msrb.mxu2 %v9137_v16  ;;  %v9176_v16 = vld [vmem:[%s10545_s9 + $0x2c0] sm:$0xff]  ;;  %v7775_v29 = vor.u32 %v9044_v18, %v7774_v17  ;;  %v7792_v17 = vld [vmem:[%s11261_s0 + $0xb0] sm:$0xf0]  ;;  %v7798_v18 = vld [vmem:[%s11261_s0 + $0x38] sm:$0xf] }
 0x259   : > { %6992 = vmatpush.bf16.msrb.mxu3 %v9145_v19  ;;  %v9191_v19 = vld [vmem:[%s10545_s9 + $0x338] sm:$0xff] }
 0x25a   : > { %6936 = vmatpush.bf16.msrb.mxu0 %v9120_v21  ;;  %v9028_v21 = vld [vmem:[%s11261_s0 + $0x24] sm:$0xf] }
 0x25b   : > { %6955 = vmatpush.bf16.msrb.mxu1 %v9128_v22  ;;  %v9215_v22 = vld [vmem:[%s10545_s9 + $0x3f8] sm:$0xff]  ;;  %v7779_v31 = vor.u32 %v9028_v21, %v7776_v24  ;;  %v9246_v24 = vld [vmem:[%s10545_s9 + $0x4f0] sm:$0xff] }
 0x25c   : > { %6974 = vmatpush.bf16.msrb.mxu2 %v9136_v20  ;;  %v9199_v20 = vld [vmem:[%s10545_s9 + $0x378] sm:$0xff] }
 0x25d   : > { %6993 = vmatpush.bf16.msrb.mxu3 %v9144_v23  ;;  %6937 = vmatmul.bf16.vlgmr.msrb.gmra.mxu0 %v7759_v36  ;;  %v9206_v23 = vld [vmem:[%s10545_s9 + $0x3b0] sm:$0xff]  ;;  %v9205_v36 = vld [vmem:[%s10545_s9 + $0x3a8] sm:$0xff]  ;;  %v7800_v21 = vld [vmem:[%s11261_s0 + $0xb8] sm:$0xf0] }
 0x25e   : > { %7005 = vmatpush.bf16.msra.mxu0 %v9159_v26  ;;  %6956 = vmatmul.bf16.vlgmr.msrb.gmra.mxu1 %v7763_v38  ;;  %v9045_v26 = vld [vmem:[%s11261_s0 + $0xa4] sm:$0xf0] }
 0x25f   : > { %7024 = vmatpush.bf16.msra.mxu1 %v9167_v34  ;;  %6975 = vmatmul.bf16.vlgmr.msrb.gmra.mxu2 %v7767_v39  ;;  %v9190_v34 = vld [vmem:[%s10545_s9 + $0x330] sm:$0xff]  ;;  %v9189_v38 = vld [vmem:[%s10545_s9 + $0x328] sm:$0xff] }
 0x260   : > { %7043 = vmatpush.bf16.msra.mxu2 %v9175_v25  ;;  %6994 = vmatmul.bf16.vlgmr.msrb.gmra.mxu3 %v7771_v40  ;;  %v7782_v25 = vld [vmem:[%s11261_s0 + $0x28] sm:$0xf]  ;;  %v9204_v40 = vld [vmem:[%s10545_s9 + $0x3a0] sm:$0xff] }
 0x261   : > { %7062 = vmatpush.bf16.msra.mxu3 %v9183_v35  ;;  %v7783_v32 = vor.u32 %v9045_v26, %v7782_v25  ;;  %v9214_v35 = vld [vmem:[%s10545_s9 + $0x3f0] sm:$0xff]  ;;  %v9213_v39 = vld [vmem:[%s10545_s9 + $0x3e8] sm:$0xff] }
 0x262   : > { %7006 = vmatpush.bf16.msra.mxu0 %v9158_v41  ;;  %v9196_v41 = vld [vmem:[%s10545_s9 + $0x360] sm:$0xff] }
 0x263   : > { %7025 = vmatpush.bf16.msra.mxu1 %v9166_v42  ;;  %v9188_v42 = vld [vmem:[%s10545_s9 + $0x320] sm:$0xff] }
 0x264   : > { %7044 = vmatpush.bf16.msra.mxu2 %v9174_v37  ;;  %v9197_v37 = vld [vmem:[%s10545_s9 + $0x368] sm:$0xff] }
 0x265   : > { %7063 = vmatpush.bf16.msra.mxu3 %v9182_v43  ;;  %v9212_v43 = vld [vmem:[%s10545_s9 + $0x3e0] sm:$0xff] }
 0x266   : > { %7007 = vmatpush.bf16.msra.mxu0 %v9157_v45  ;;  %v7902_v45 = vld [vmem:[%s11261_s0 + $0x120] sm:$0xf] }
 0x267   : > { %7026 = vmatpush.bf16.msra.mxu1 %v9165_v46  ;;  %v9076_v46 = vld [vmem:[%s11261_s0 + $0x19c] sm:$0xf0] }
 0x268   : > { %7045 = vmatpush.bf16.msra.mxu2 %v9173_v44  ;;  %v9203_v44 = vld [vmem:[%s10545_s9 + $0x398] sm:$0xff]  ;;  %v7903_v57 = vor.u32 %v9076_v46, %v7902_v45 }
 0x269   : > { %7064 = vmatpush.bf16.msra.mxu3 %v9181_v47  ;;  %v9195_v47 = vld [vmem:[%s10545_s9 + $0x358] sm:$0xff] }
 0x26a   : > { %7008 = vmatpush.bf16.msra.mxu0 %v9156_v49  ;;  %v7904_v49 = vld [vmem:[%s11261_s0 + $0x1a0] sm:$0xf0]  ;;  %v9079_v45 = vld [vmem:[%s11261_s0 + $0x1b4] sm:$0xf0]  ;;  %v9063_v46 = vld [vmem:[%s11261_s0 + $0x13c] sm:$0xf] }
 0x26b   : > { %7027 = vmatpush.bf16.msra.mxu1 %v9164_v50  ;;  %v7910_v50 = vld [vmem:[%s11261_s0 + $0x128] sm:$0xf] }
 0x26c   : > { %7046 = vmatpush.bf16.msra.mxu2 %v9172_v48  ;;  %v9060_v48 = vld [vmem:[%s11261_s0 + $0x124] sm:$0xf] }
 0x26d   : > { %7065 = vmatpush.bf16.msra.mxu3 %v9180_v51  ;;  %6942 = vmatmul.bf16.gmra.mxu0 %v7887_v0  ;;  %v9077_v51 = vld [vmem:[%s11261_s0 + $0x1a4] sm:$0xf0]  ;;  %v7907_v59 = vor.u32 %v9060_v48, %v7904_v49  ;;  %v7928_v48 = vld [vmem:[%s11261_s0 + $0x1b8] sm:$0xf0]  ;;  %v9218_v49 = vld [vmem:[%s10545_s9 + $0x410] sm:$0xff] }
 0x26e   : > { %7009 = vmatpush.bf16.msra.mxu0 %v9155_v60  ;;  %6961 = vmatmul.bf16.gmra.mxu1 %v7891_v2  ;;  %v7911_v60 = vor.u32 %v9077_v51, %v7910_v50  ;;  %v9201_v0 = vld [vmem:[%s10545_s9 + $0x388] sm:$0xff]  ;;  %v9226_v50 = vld [vmem:[%s10545_s9 + $0x450] sm:$0xff] }
 0x26f   : > { %7028 = vmatpush.bf16.msra.mxu1 %v9163_v62  ;;  %6980 = vmatmul.bf16.gmra.mxu2 %v7895_v3  ;;  %v9186_v62 = vld [vmem:[%s10545_s9 + $0x310] sm:$0xff]  ;;  %v9185_v2 = vld [vmem:[%s10545_s9 + $0x308] sm:$0xff] }
 0x270   : > { %7047 = vmatpush.bf16.msra.mxu2 %v9171_v54  ;;  %6999 = vmatmul.bf16.gmra.mxu3 %v7899_v4  ;;  %v7912_v54 = vld [vmem:[%s11261_s0 + $0x1a8] sm:$0xf0]  ;;  %v9200_v4 = vld [vmem:[%s10545_s9 + $0x380] sm:$0xff] }
 0x271   : > { %7066 = vmatpush.bf16.msra.mxu3 %v9179_v63  ;;  %v7915_v61 = vor.u32 %v9061_v52, %v7912_v54  ;;  %v9210_v63 = vld [vmem:[%s10545_s9 + $0x3d0] sm:$0xff]  ;;  %v9209_v3 = vld [vmem:[%s10545_s9 + $0x3c8] sm:$0xff] }
 0x272   : > { %7010 = vmatpush.bf16.msra.mxu0 %v9154_v5  ;;  %v9192_v5 = vld [vmem:[%s10545_s9 + $0x340] sm:$0xff]  ;;  %v9242_v52 = vld [vmem:[%s10545_s9 + $0x4d0] sm:$0xff] }
 0x273   : > { %7029 = vmatpush.bf16.msra.mxu1 %v9162_v6  ;;  %v9239_v6 = vld [vmem:[%s10545_s9 + $0x4b8] sm:$0xff] }
 0x274   : > { %7048 = vmatpush.bf16.msra.mxu2 %v9170_v1  ;;  %v9193_v1 = vld [vmem:[%s10545_s9 + $0x348] sm:$0xff] }
 0x275   : > { %7067 = vmatpush.bf16.msra.mxu3 %v9178_v7  ;;  %v9231_v7 = vld [vmem:[%s10545_s9 + $0x478] sm:$0xff] }
 0x276   : > { %7011 = vmatpush.bf16.msra.mxu0 %v9153_v9  ;;  %v9208_v9 = vld [vmem:[%s10545_s9 + $0x3c0] sm:$0xff] }
 0x277   : > { %7030 = vmatpush.bf16.msra.mxu1 %v9161_v10  ;;  %v9223_v10 = vld [vmem:[%s10545_s9 + $0x438] sm:$0xff] }
 0x278   : > { %7049 = vmatpush.bf16.msra.mxu2 %v9169_v8  ;;  %v9184_v8 = vld [vmem:[%s10545_s9 + $0x300] sm:$0xff] }
 0x279   : > { %7068 = vmatpush.bf16.msra.mxu3 %v9177_v11  ;;  %v7790_v11 = vld [vmem:[%s11261_s0 + $0x30] sm:$0xf] }
 0x27a   : > { %7012 = vmatpush.bf16.msra.mxu0 %v9152_v14  ;;  %v9046_v14 = vld [vmem:[%s11261_s0 + $0xac] sm:$0xf0] }
 0x27b   : > { %7031 = vmatpush.bf16.msra.mxu1 %v9160_v15  ;;  %v9030_v15 = vld [vmem:[%s11261_s0 + $0x34] sm:$0xf] }
 0x27c   : > { %7050 = vmatpush.bf16.msra.mxu2 %v9168_v12  ;;  %v9247_v12 = vld [vmem:[%s10545_s9 + $0x4f8] sm:$0xff]  ;;  %v7795_v25 = vor.u32 %v9030_v15, %v7792_v17  ;;  %v7816_v15 = vld [vmem:[%s11261_s0 + $0xc8] sm:$0xf0] }
 0x27d   : > { %7069 = vmatpush.bf16.msra.mxu3 %v9176_v16  ;;  %7013 = vmatmul.bf16.vlgmr.msra.gmra.mxu0 %v7775_v29  ;;  %v9230_v16 = vld [vmem:[%s10545_s9 + $0x470] sm:$0xff]  ;;  %v9221_v29 = vld [vmem:[%s10545_s9 + $0x428] sm:$0xff] }
 0x27e   : > { %7081 = vmatpush.bf16.msrb.mxu0 %v9191_v19  ;;  %7032 = vmatmul.bf16.vlgmr.msra.gmra.mxu1 %v7779_v31  ;;  %v9047_v19 = vld [vmem:[%s11261_s0 + $0xb4] sm:$0xf0]  ;;  %v9245_v31 = vld [vmem:[%s10545_s9 + $0x4e8] sm:$0xff] }
 0x27f   : > { %7100 = vmatpush.bf16.msrb.mxu1 %v9199_v20  ;;  %7051 = vmatmul.bf16.vlgmr.msra.gmra.mxu2 %v7783_v32  ;;  %v9031_v20 = vld [vmem:[%s11261_s0 + $0x3c] sm:$0xf]  ;;  %v7799_v26 = vor.u32 %v9047_v19, %v7798_v18  ;;  %v9236_v32 = vld [vmem:[%s10545_s9 + $0x4a0] sm:$0xff]  ;;  %v9269_v17 = vld [vmem:[%s10545_s9 + $0x5a8] sm:$0xff] }
 0x280   : > { %7119 = vmatpush.bf16.msrb.mxu2 %v9207_v13  ;;  %7070 = vmatmul.bf16.vlgmr.msra.gmra.mxu3 %v7787_v33  ;;  %v9238_v13 = vld [vmem:[%s10545_s9 + $0x4b0] sm:$0xff]  ;;  %v7803_v27 = vor.u32 %v9031_v20, %v7800_v21  ;;  %v9220_v33 = vld [vmem:[%s10545_s9 + $0x420] sm:$0xff] }
 0x281   : > { %7138 = vmatpush.bf16.msrb.mxu3 %v9215_v22  ;;  %v9222_v22 = vld [vmem:[%s10545_s9 + $0x430] sm:$0xff] }
 0x282   : > { %7082 = vmatpush.bf16.msrb.mxu0 %v9190_v34  ;;  %v9228_v34 = vld [vmem:[%s10545_s9 + $0x460] sm:$0xff] }
 0x283   : > { %7101 = vmatpush.bf16.msrb.mxu1 %v9198_v30  ;;  %v9229_v30 = vld [vmem:[%s10545_s9 + $0x468] sm:$0xff] }
 0x284   : > { %7120 = vmatpush.bf16.msrb.mxu2 %v9206_v23  ;;  %v7791_v23 = vor.u32 %v9046_v14, %v7790_v11  ;;  %v7814_v11 = vld [vmem:[%s11261_s0 + $0x48] sm:$0xf]  ;;  %v9033_v14 = vld [vmem:[%s11261_s0 + $0x4c] sm:$0xf] }
 0x285   : > { %7139 = vmatpush.bf16.msrb.mxu3 %v9214_v35  ;;  %v9244_v35 = vld [vmem:[%s10545_s9 + $0x4e0] sm:$0xff] }
 0x286   : > { %7083 = vmatpush.bf16.msrb.mxu0 %v9189_v38  ;;  %v9227_v38 = vld [vmem:[%s10545_s9 + $0x458] sm:$0xff] }
 0x287   : > { %7102 = vmatpush.bf16.msrb.mxu1 %v9197_v37  ;;  %v9219_v37 = vld [vmem:[%s10545_s9 + $0x418] sm:$0xff] }
 0x288   : > { %7121 = vmatpush.bf16.msrb.mxu2 %v9205_v36  ;;  %v9235_v36 = vld [vmem:[%s10545_s9 + $0x498] sm:$0xff] }
 0x289   : > { %7140 = vmatpush.bf16.msrb.mxu3 %v9213_v39  ;;  %v7918_v39 = vld [vmem:[%s11261_s0 + $0x130] sm:$0xf] }
 0x28a   : > { %7084 = vmatpush.bf16.msrb.mxu0 %v9188_v42  ;;  %v9062_v42 = vld [vmem:[%s11261_s0 + $0x134] sm:$0xf] }
 0x28b   : > { %7103 = vmatpush.bf16.msrb.mxu1 %v9196_v41  ;;  %v9243_v41 = vld [vmem:[%s10545_s9 + $0x4d8] sm:$0xff] }
 0x28c   : > { %7122 = vmatpush.bf16.msrb.mxu2 %v9204_v40  ;;  %v9078_v40 = vld [vmem:[%s11261_s0 + $0x1ac] sm:$0xf0] }
 0x28d   : > { %7141 = vmatpush.bf16.msrb.mxu3 %v9212_v43  ;;  %7018 = vmatmul.bf16.gmra.mxu0 %v7903_v57  ;;  %v7920_v43 = vld [vmem:[%s11261_s0 + $0x1b0] sm:$0xf0]  ;;  %v7919_v51 = vor.u32 %v9078_v40, %v7918_v39  ;;  %v9217_v57 = vld [vmem:[%s10545_s9 + $0x408] sm:$0xff]  ;;  %v9259_v40 = vld [vmem:[%s10545_s9 + $0x558] sm:$0xff] }
 0x28e   : > { %7085 = vmatpush.bf16.msrb.mxu0 %v9187_v53  ;;  %7037 = vmatmul.bf16.gmra.mxu1 %v7907_v59  ;;  %v7923_v53 = vor.u32 %v9062_v42, %v7920_v43  ;;  %v9241_v59 = vld [vmem:[%s10545_s9 + $0x4c8] sm:$0xff]  ;;  %v7934_v42 = vld [vmem:[%s11261_s0 + $0x140] sm:$0xf] }
 0x28f   : > { %7104 = vmatpush.bf16.msrb.mxu1 %v9195_v47  ;;  %7056 = vmatmul.bf16.gmra.mxu2 %v7911_v60  ;;  %v9234_v47 = vld [vmem:[%s10545_s9 + $0x490] sm:$0xff]  ;;  %v9232_v60 = vld [vmem:[%s10545_s9 + $0x480] sm:$0xff] }
 0x290   : > { %7123 = vmatpush.bf16.msrb.mxu2 %v9203_v44  ;;  %7075 = vmatmul.bf16.gmra.mxu3 %v7915_v61  ;;  %v7926_v44 = vld [vmem:[%s11261_s0 + $0x138] sm:$0xf]  ;;  %v9216_v61 = vld [vmem:[%s10545_s9 + $0x400] sm:$0xff] }
 0x291   : > { %7142 = vmatpush.bf16.msrb.mxu3 %v9211_v55  ;;  %v7927_v54 = vor.u32 %v9079_v45, %v7926_v44  ;;  %v7931_v55 = vor.u32 %v9063_v46, %v7928_v48  ;;  %v9080_v43 = vld [vmem:[%s11261_s0 + $0x1bc] sm:$0xf0]  ;;  %v9266_v44 = vld [vmem:[%s10545_s9 + $0x590] sm:$0xff]  ;;  %v9064_v45 = vld [vmem:[%s11261_s0 + $0x144] sm:$0xf] }
 0x292   : > { %7086 = vmatpush.bf16.msrb.mxu0 %v9186_v62  ;;  %v9224_v62 = vld [vmem:[%s10545_s9 + $0x440] sm:$0xff]  ;;  %v9081_v48 = vld [vmem:[%s11261_s0 + $0x1c4] sm:$0xf0] }
 0x293   : > { %7105 = vmatpush.bf16.msrb.mxu1 %v9194_v58  ;;  %v9225_v58 = vld [vmem:[%s10545_s9 + $0x448] sm:$0xff]  ;;  %v7936_v46 = vld [vmem:[%s11261_s0 + $0x1c0] sm:$0xf0] }
 0x294   : > { %7124 = vmatpush.bf16.msrb.mxu2 %v9202_v56  ;;  %v9233_v56 = vld [vmem:[%s10545_s9 + $0x488] sm:$0xff] }
 0x295   : > { %7143 = vmatpush.bf16.msrb.mxu3 %v9210_v63  ;;  %v9240_v63 = vld [vmem:[%s10545_s9 + $0x4c0] sm:$0xff] }
 0x296   : > { %7087 = vmatpush.bf16.msrb.mxu0 %v9185_v2  ;;  %v9263_v2 = vld [vmem:[%s10545_s9 + $0x578] sm:$0xff] }
 0x297   : > { %7106 = vmatpush.bf16.msrb.mxu1 %v9193_v1  ;;  %v9255_v1 = vld [vmem:[%s10545_s9 + $0x538] sm:$0xff] }
 0x298   : > { %7125 = vmatpush.bf16.msrb.mxu2 %v9201_v0  ;;  %v9271_v0 = vld [vmem:[%s10545_s9 + $0x5b8] sm:$0xff] }
 0x299   : > { %7144 = vmatpush.bf16.msrb.mxu3 %v9209_v3  ;;  %v9279_v3 = vld [vmem:[%s10545_s9 + $0x5f8] sm:$0xff] }
 0x29a   : > { %7088 = vmatpush.bf16.msrb.mxu0 %v9184_v8  ;;  %v7808_v8 = vld [vmem:[%s11261_s0 + $0xc0] sm:$0xf0] }
 0x29b   : > { %7107 = vmatpush.bf16.msrb.mxu1 %v9192_v5  ;;  %v9048_v5 = vld [vmem:[%s11261_s0 + $0xbc] sm:$0xf0] }
 0x29c   : > { %7126 = vmatpush.bf16.msrb.mxu2 %v9200_v4  ;;  %v7806_v4 = vld [vmem:[%s11261_s0 + $0x40] sm:$0xf] }
 0x29d   : > { %7145 = vmatpush.bf16.msrb.mxu3 %v9208_v9  ;;  %7089 = vmatmul.bf16.vlgmr.msrb.gmra.mxu0 %v7791_v23  ;;  %v9254_v9 = vld [vmem:[%s10545_s9 + $0x530] sm:$0xff]  ;;  %v7819_v23 = vor.u32 %v9033_v14, %v7816_v15 }
 0x29e   : > { %7157 = vmatpush.bf16.msra.mxu0 %v9223_v10  ;;  %7108 = vmatmul.bf16.vlgmr.msrb.gmra.mxu1 %v7795_v25  ;;  %v9262_v10 = vld [vmem:[%s10545_s9 + $0x570] sm:$0xff]  ;;  %v9261_v25 = vld [vmem:[%s10545_s9 + $0x568] sm:$0xff] }
 0x29f   : > { %7176 = vmatpush.bf16.msra.mxu1 %v9231_v7  ;;  %7127 = vmatmul.bf16.vlgmr.msrb.gmra.mxu2 %v7799_v26  ;;  %v9270_v7 = vld [vmem:[%s10545_s9 + $0x5b0] sm:$0xff]  ;;  %v9277_v26 = vld [vmem:[%s10545_s9 + $0x5e8] sm:$0xff] }
 0x2a0   : > { %7195 = vmatpush.bf16.msra.mxu2 %v9239_v6  ;;  %7146 = vmatmul.bf16.vlgmr.msrb.gmra.mxu3 %v7803_v27  ;;  %v9032_v6 = vld [vmem:[%s11261_s0 + $0x44] sm:$0xf] }
 0x2a1   : > { %7214 = vmatpush.bf16.msra.mxu3 %v9247_v12  ;;  %v9049_v12 = vld [vmem:[%s11261_s0 + $0xc4] sm:$0xf0]  ;;  %v7811_v20 = vor.u32 %v9032_v6, %v7808_v8  ;;  %v9268_v27 = vld [vmem:[%s10545_s9 + $0x5a0] sm:$0xff]  ;;  %v9303_v6 = vld [vmem:[%s10545_s9 + $0x6b8] sm:$0xff] }
 0x2a2   : > { %7158 = vmatpush.bf16.msra.mxu0 %v9222_v22  ;;  %v7815_v21 = vor.u32 %v9049_v12, %v7814_v11  ;;  %v9256_v8 = vld [vmem:[%s10545_s9 + $0x540] sm:$0xff]  ;;  %v9287_v12 = vld [vmem:[%s10545_s9 + $0x638] sm:$0xff] }
 0x2a3   : > { %7177 = vmatpush.bf16.msra.mxu1 %v9230_v16  ;;  %v7807_v16 = vor.u32 %v9048_v5, %v7806_v4  ;;  %v9273_v4 = vld [vmem:[%s10545_s9 + $0x5c8] sm:$0xff]  ;;  %v9264_v5 = vld [vmem:[%s10545_s9 + $0x580] sm:$0xff] }
 0x2a4   : > { %7196 = vmatpush.bf16.msra.mxu2 %v9238_v13  ;;  %v9278_v13 = vld [vmem:[%s10545_s9 + $0x5f0] sm:$0xff] }
 0x2a5   : > { %7215 = vmatpush.bf16.msra.mxu3 %v9246_v24  ;;  %v9253_v24 = vld [vmem:[%s10545_s9 + $0x528] sm:$0xff] }
 0x2a6   : > { %7159 = vmatpush.bf16.msra.mxu0 %v9221_v29  ;;  %v9260_v29 = vld [vmem:[%s10545_s9 + $0x560] sm:$0xff] }
 0x2a7   : > { %7178 = vmatpush.bf16.msra.mxu1 %v9229_v30  ;;  %v9276_v30 = vld [vmem:[%s10545_s9 + $0x5e0] sm:$0xff] }
 0x2a8   : > { %7197 = vmatpush.bf16.msra.mxu2 %v9237_v28  ;;  %v9252_v28 = vld [vmem:[%s10545_s9 + $0x520] sm:$0xff] }
 0x2a9   : > { %7216 = vmatpush.bf16.msra.mxu3 %v9245_v31 }
 0x2aa   : > { %7160 = vmatpush.bf16.msra.mxu0 %v9220_v33  ;;  %v9267_v33 = vld [vmem:[%s10545_s9 + $0x598] sm:$0xff] }
 0x2ab   : > { %7179 = vmatpush.bf16.msra.mxu1 %v9228_v34 }
 0x2ac   : > { %7198 = vmatpush.bf16.msra.mxu2 %v9236_v32 }
 0x2ad   : > { %7217 = vmatpush.bf16.msra.mxu3 %v9244_v35  ;;  %7094 = vmatmul.bf16.gmra.mxu0 %v7919_v51  ;;  %v7944_v51 = vld [vmem:[%s11261_s0 + $0x1c8] sm:$0xf0] }
 0x2ae   : > { %7161 = vmatpush.bf16.msra.mxu0 %v9219_v37  ;;  %7113 = vmatmul.bf16.gmra.mxu1 %v7923_v53  ;;  %v9274_v53 = vld [vmem:[%s10545_s9 + $0x5d0] sm:$0xff] }
 0x2af   : > { %7180 = vmatpush.bf16.msra.mxu1 %v9227_v38  ;;  %7132 = vmatmul.bf16.gmra.mxu2 %v7927_v54  ;;  %v9251_v38 = vld [vmem:[%s10545_s9 + $0x518] sm:$0xff] }
 0x2b0   : > { %7199 = vmatpush.bf16.msra.mxu2 %v9235_v36  ;;  %7151 = vmatmul.bf16.gmra.mxu3 %v7931_v55 }
 0x2b1   : > { %7218 = vmatpush.bf16.msra.mxu3 %v9243_v41  ;;  %v9275_v41 = vld [vmem:[%s10545_s9 + $0x5d8] sm:$0xff] }
 0x2b2   : > { %7162 = vmatpush.bf16.msra.mxu0 %v9218_v49  ;;  %v9065_v49 = vld [vmem:[%s11261_s0 + $0x14c] sm:$0xf] }
 0x2b3   : > { %7181 = vmatpush.bf16.msra.mxu1 %v9226_v50  ;;  %v9250_v50 = vld [vmem:[%s10545_s9 + $0x510] sm:$0xff] }
 0x2b4   : > { %7200 = vmatpush.bf16.msra.mxu2 %v9234_v47  ;;  %v7942_v47 = vld [vmem:[%s11261_s0 + $0x148] sm:$0xf] }
 0x2b5   : > { %7219 = vmatpush.bf16.msra.mxu3 %v9242_v52  ;;  %v9258_v52 = vld [vmem:[%s10545_s9 + $0x550] sm:$0xff] }
 0x2b6   : > { %7163 = vmatpush.bf16.msra.mxu0 %v9217_v57  ;;  %v9265_v57 = vld [vmem:[%s10545_s9 + $0x588] sm:$0xff] }
 0x2b7   : > { %7182 = vmatpush.bf16.msra.mxu1 %v9225_v58 }
 0x2b8   : > { %7201 = vmatpush.bf16.msra.mxu2 %v9233_v56  ;;  %v7935_v56 = vor.u32 %v9080_v43, %v7934_v42 }
 0x2b9   : > { %7220 = vmatpush.bf16.msra.mxu3 %v9241_v59 }
 0x2ba   : > { %7164 = vmatpush.bf16.msra.mxu0 %v9216_v61  ;;  %v6862_v18 = vpop.f32.mrf.mxu0  ;;  %v7939_v61 = vor.u32 %v9064_v45, %v7936_v46  ;;  %v9285_v45 = vld [vmem:[%s10545_s9 + $0x628] sm:$0xff] }
 0x2bb   : > { %7183 = vmatpush.bf16.msra.mxu1 %v9224_v62  ;;  %v6881_v19 = vpop.f32.mrf.mxu1  ;;  %v7943_v62 = vor.u32 %v9081_v48, %v7942_v47  ;;  %v9309_v47 = vld [vmem:[%s10545_s9 + $0x6e8] sm:$0xff]  ;;  %v9300_v48 = vld [vmem:[%s10545_s9 + $0x6a0] sm:$0xff] }
 0x2bc   : > { %7202 = vmatpush.bf16.msra.mxu2 %v9232_v60  ;;  %v6882_v22 = vadd.f32 %v6881_v19, %v6862_v18  ;;  %v9302_v18 = vld [vmem:[%s10545_s9 + $0x6b0] sm:$0xff] }
 0x2bd   : > { %7221 = vmatpush.bf16.msra.mxu3 %v9240_v63  ;;  %7165 = vmatmul.bf16.vlgmr.msra.gmra.mxu0 %v7807_v16 }
 0x2be   : > { %7233 = vmatpush.bf16.msrb.mxu0 %v9255_v1  ;;  %7184 = vmatmul.bf16.vlgmr.msra.gmra.mxu1 %v7811_v20  ;;  %v9249_v1 = vld [vmem:[%s10545_s9 + $0x508] sm:$0xff] }
 0x2bf   : > { %7252 = vmatpush.bf16.msrb.mxu1 %v9263_v2  ;;  %7203 = vmatmul.bf16.vlgmr.msra.gmra.mxu2 %v7815_v21  ;;  %v7822_v21 = vld [vmem:[%s11261_s0 + $0x50] sm:$0xf] }
 0x2c0   : > { %7271 = vmatpush.bf16.msrb.mxu2 %v9271_v0  ;;  %7222 = vmatmul.bf16.vlgmr.msra.gmra.mxu3 %v7819_v23  ;;  %v7947_v0 = vor.u32 %v9065_v49, %v7944_v51  ;;  %v9286_v23 = vld [vmem:[%s10545_s9 + $0x630] sm:$0xff]  ;;  %v9308_v51 = vld [vmem:[%s10545_s9 + $0x6e0] sm:$0xff] }
 0x2c1   : > { %7290 = vmatpush.bf16.msrb.mxu3 %v9279_v3  ;;  %v9257_v3 = vld [vmem:[%s10545_s9 + $0x548] sm:$0xff] }
 0x2c2   : > { %7234 = vmatpush.bf16.msrb.mxu0 %v9254_v9  ;;  %v6900_v31 = vpop.f32.mrf.mxu2  ;;  %v6864_v35 = vpop.f32.mrf.mxu0  ;;  %v9272_v9 = vld [vmem:[%s10545_s9 + $0x5c0] sm:$0xff] }
 0x2c3   : > { %7253 = vmatpush.bf16.msrb.mxu1 %v9262_v10  ;;  %v6919_v32 = vpop.f32.mrf.mxu3  ;;  %v6901_v34 = vadd.f32 %v6900_v31, %v6882_v22  ;;  %v6883_v36 = vpop.f32.mrf.mxu1  ;;  %v9050_v22 = vld [vmem:[%s11261_s0 + $0xcc] sm:$0xf0]  ;;  %v9035_v31 = vld [vmem:[%s11261_s0 + $0x5c] sm:$0xf] }
 0x2c4   : > { %7272 = vmatpush.bf16.msrb.mxu2 %v9270_v7  ;;  %v6884_v37 = vadd.f32 %v6883_v36, %v6864_v35  ;;  %v9248_v7 = vld [vmem:[%s10545_s9 + $0x500] sm:$0xff]  ;;  %v7823_v35 = vor.u32 %v9050_v22, %v7822_v21  ;;  %v9293_v36 = vld [vmem:[%s10545_s9 + $0x668] sm:$0xff] }
 0x2c5   : > { %7291 = vmatpush.bf16.msrb.mxu3 %v9278_v13  ;;  %v10941_v39 = vadd.f32 %v6919_v32, %v6901_v34  ;;  %v9295_v13 = vld [vmem:[%s10545_s9 + $0x678] sm:$0xff] }
 0x2c6   : > { %7235 = vmatpush.bf16.msrb.mxu0 %v9253_v24  ;;  %v9294_v24 = vld [vmem:[%s10545_s9 + $0x670] sm:$0xff]  ;;  %v7832_v32 = vld [vmem:[%s11261_s0 + $0xd8] sm:$0xf0] }
 0x2c7   : > { %7254 = vmatpush.bf16.msrb.mxu1 %v9261_v25  ;;  %v9034_v25 = vld [vmem:[%s11261_s0 + $0x54] sm:$0xf] }
 0x2c8   : > { %7273 = vmatpush.bf16.msrb.mxu2 %v9269_v17  ;;  %v9311_v17 = vld [vmem:[%s10545_s9 + $0x6f8] sm:$0xff] }
 0x2c9   : > { %7292 = vmatpush.bf16.msrb.mxu3 %v9277_v26  ;;  %v9310_v26 = vld [vmem:[%s10545_s9 + $0x6f0] sm:$0xff] }
 0x2ca   : > { %7236 = vmatpush.bf16.msrb.mxu0 %v9252_v28  ;;  %v6902_v54 = vpop.f32.mrf.mxu2  ;;  %v6867_v59 = vpop.f32.mrf.mxu0  ;;  %v7824_v28 = vld [vmem:[%s11261_s0 + $0xd0] sm:$0xf0] }
 0x2cb   : > { %7255 = vmatpush.bf16.msrb.mxu1 %v9260_v29  ;;  %v6921_v55 = vpop.f32.mrf.mxu3  ;;  %v6903_v58 = vadd.f32 %v6902_v54, %v6884_v37  ;;  %v6886_v60 = vpop.f32.mrf.mxu1  ;;  %v7830_v29 = vld [vmem:[%s11261_s0 + $0x58] sm:$0xf] }
 0x2cc   : > { %7274 = vmatpush.bf16.msrb.mxu2 %v9268_v27  ;;  %v6887_v63 = vadd.f32 %v6886_v60, %v6867_v59  ;;  %v9301_v27 = vld [vmem:[%s10545_s9 + $0x6a8] sm:$0xff]  ;;  %v9291_v54 = vld [vmem:[%s10545_s9 + $0x658] sm:$0xff] }
 0x2cd   : > { %7293 = vmatpush.bf16.msrb.mxu3 %v9276_v30  ;;  %v10975_v2 = vadd.f32 %v6921_v55, %v6903_v58  ;;  %7170 = vmatmul.bf16.gmra.mxu0 %v7935_v56  ;;  %v9051_v30 = vld [vmem:[%s11261_s0 + $0xd4] sm:$0xf0] }
 0x2ce   : > { %7237 = vmatpush.bf16.msrb.mxu0 %v9251_v38  ;;  %7189 = vmatmul.bf16.gmra.mxu1 %v7939_v61  ;;  %v9283_v60 = vld [vmem:[%s10545_s9 + $0x618] sm:$0xff] }
 0x2cf   : > { %7256 = vmatpush.bf16.msrb.mxu1 %v9259_v40  ;;  %7208 = vmatmul.bf16.gmra.mxu2 %v7943_v62  ;;  %v7827_v40 = vor.u32 %v9034_v25, %v7824_v28  ;;  %v9307_v62 = vld [vmem:[%s10545_s9 + $0x6d8] sm:$0xff]  ;;  %v9281_v25 = vld [vmem:[%s10545_s9 + $0x608] sm:$0xff]  ;;  %v9296_v28 = vld [vmem:[%s10545_s9 + $0x680] sm:$0xff] }
 0x2d0   : > { %7275 = vmatpush.bf16.msrb.mxu2 %v9267_v33  ;;  %7227 = vmatmul.bf16.gmra.mxu3 %v7947_v0 }
 0x2d1   : > { %7294 = vmatpush.bf16.msrb.mxu3 %v9275_v41  ;;  %v7831_v41 = vor.u32 %v9051_v30, %v7830_v29  ;;  %v9288_v30 = vld [vmem:[%s10545_s9 + $0x640] sm:$0xff] }
 0x2d2   : > { %7238 = vmatpush.bf16.msrb.mxu0 %v9250_v50  ;;  %v6905_v10 = vpop.f32.mrf.mxu2  ;;  %v6869_v15 = vpop.f32.mrf.mxu0  ;;  %v9292_v50 = vld [vmem:[%s10545_s9 + $0x660] sm:$0xff] }
 0x2d3   : > { %7257 = vmatpush.bf16.msrb.mxu1 %v9258_v52  ;;  %v6924_v11 = vpop.f32.mrf.mxu3  ;;  %v6906_v14 = vadd.f32 %v6905_v10, %v6887_v63  ;;  %v6888_v16 = vpop.f32.mrf.mxu1  ;;  %v9299_v52 = vld [vmem:[%s10545_s9 + $0x698] sm:$0xff]  ;;  %v9298_v63 = vld [vmem:[%s10545_s9 + $0x690] sm:$0xff] }
 0x2d4   : > { %7276 = vmatpush.bf16.msrb.mxu2 %v9266_v44  ;;  %v6889_v19 = vadd.f32 %v6888_v16, %v6869_v15  ;;  %v7835_v44 = vor.u32 %v9035_v31, %v7832_v32  ;;  %v7960_v10 = vld [vmem:[%s11261_s0 + $0x1d8] sm:$0xf0]  ;;  %v9289_v15 = vld [vmem:[%s10545_s9 + $0x648] sm:$0xff]  ;;  %v9280_v32 = vld [vmem:[%s10545_s9 + $0x600] sm:$0xff] }
 0x2d5   : > { %7295 = vmatpush.bf16.msrb.mxu3 %v9274_v53  ;;  %v10988_v20 = vadd.f32 %v6924_v11, %v6906_v14  ;;  %v9306_v11 = vld [vmem:[%s10545_s9 + $0x6d0] sm:$0xff]  ;;  %v9327_v31 = vld [vmem:[%s10545_s9 + $0x778] sm:$0xff] }
 0x2d6   : > { %7239 = vmatpush.bf16.msrb.mxu0 %v9249_v1  ;;  %v7950_v1 = vld [vmem:[%s11261_s0 + $0x150] sm:$0xf] }
 0x2d7   : > { %7258 = vmatpush.bf16.msrb.mxu1 %v9257_v3  ;;  %v9290_v3 = vld [vmem:[%s10545_s9 + $0x650] sm:$0xff] }
 0x2d8   : > { %7277 = vmatpush.bf16.msrb.mxu2 %v9265_v57 }
 0x2d9   : > { %7296 = vmatpush.bf16.msrb.mxu3 %v9273_v4  ;;  %v9066_v4 = vld [vmem:[%s11261_s0 + $0x154] sm:$0xf] }
 0x2da   : > { %7240 = vmatpush.bf16.msrb.mxu0 %v9248_v7  ;;  %v6907_v33 = vpop.f32.mrf.mxu2  ;;  %v6938_v38 = vpop.f32.mrf.mxu0  ;;  %v9083_v7 = vld [vmem:[%s11261_s0 + $0x1d4] sm:$0xf0] }
 0x2db   : > { %7259 = vmatpush.bf16.msrb.mxu1 %v9256_v8  ;;  %v6926_v34 = vpop.f32.mrf.mxu3  ;;  %v6908_v37 = vadd.f32 %v6907_v33, %v6889_v19  ;;  %v6939_v42 = vadd.f32 %v6938_v38, %v10941_v39  ;;  %v6957_v43 = vpop.f32.mrf.mxu1  ;;  %v9284_v39 = vld [vmem:[%s10545_s9 + $0x620] sm:$0xff]  ;;  %v9067_v8 = vld [vmem:[%s11261_s0 + $0x15c] sm:$0xf] }
 0x2dc   : > { %7278 = vmatpush.bf16.msrb.mxu2 %v9264_v5  ;;  %v7952_v5 = vld [vmem:[%s11261_s0 + $0x1d0] sm:$0xf0]  ;;  %v9304_v33 = vld [vmem:[%s10545_s9 + $0x6c0] sm:$0xff] }
 0x2dd   : > { %7297 = vmatpush.bf16.msrb.mxu3 %v9272_v9  ;;  %v11021_v46 = vadd.f32 %v6926_v34, %v6908_v37  ;;  %v6958_v49 = vadd.f32 %v6957_v43, %v6939_v42  ;;  %7241 = vmatmul.bf16.vlgmr.msrb.gmra.mxu0 %v7823_v35  ;;  %v9282_v9 = vld [vmem:[%s10545_s9 + $0x610] sm:$0xff]  ;;  %v7955_v19 = vor.u32 %v9066_v4, %v7952_v5  ;;  %v9319_v34 = vld [vmem:[%s10545_s9 + $0x738] sm:$0xff] }
 0x2de   : > { %7309 = vmatpush.bf16.msra.mxu0 %v9287_v12  ;;  %7260 = vmatmul.bf16.vlgmr.msrb.gmra.mxu1 %v7827_v40  ;;  %v9297_v12 = vld [vmem:[%s10545_s9 + $0x688] sm:$0xff]  ;;  %v9334_v37 = vld [vmem:[%s10545_s9 + $0x7b0] sm:$0xff] }
 0x2df   : > { %7328 = vmatpush.bf16.msra.mxu1 %v9295_v13  ;;  %7279 = vmatmul.bf16.vlgmr.msrb.gmra.mxu2 %v7831_v41  ;;  %v9326_v42 = vld [vmem:[%s10545_s9 + $0x770] sm:$0xff] }
 0x2e0   : > { %7347 = vmatpush.bf16.msra.mxu2 %v9303_v6  ;;  %7298 = vmatmul.bf16.vlgmr.msrb.gmra.mxu3 %v7835_v44  ;;  %v7958_v6 = vld [vmem:[%s11261_s0 + $0x158] sm:$0xf] }
 0x2e1   : > { %7366 = vmatpush.bf16.msra.mxu3 %v9311_v17  ;;  %v7959_v21 = vor.u32 %v9083_v7, %v7958_v6  ;;  %v9332_v7 = vld [vmem:[%s10545_s9 + $0x7a0] sm:$0xff] }
 0x2e2   : > { %7310 = vmatpush.bf16.msra.mxu0 %v9286_v23  ;;  %v6976_v53 = vpop.f32.mrf.mxu2  ;;  %v6940_v57 = vpop.f32.mrf.mxu0 }
 0x2e3   : > { %7329 = vmatpush.bf16.msra.mxu1 %v9294_v24  ;;  %v6977_v55 = vadd.f32 %v6976_v53, %v6958_v49  ;;  %v6995_v56 = vpop.f32.mrf.mxu3  ;;  %v6941_v58 = vadd.f32 %v6940_v57, %v10975_v2  ;;  %v6959_v59 = vpop.f32.mrf.mxu1  ;;  %v9082_v2 = vld [vmem:[%s11261_s0 + $0x1cc] sm:$0xf0]  ;;  %v7963_v24 = vor.u32 %v9067_v8, %v7960_v10  ;;  %v7838_v49 = vld [vmem:[%s11261_s0 + $0x60] sm:$0xf]  ;;  %v7840_v53 = vld [vmem:[%s11261_s0 + $0xe0] sm:$0xf0] }
 0x2e4   : > { %7348 = vmatpush.bf16.msra.mxu2 %v9302_v18  ;;  %v7951_v14 = vor.u32 %v9082_v2, %v7950_v1  ;;  %v7848_v57 = vld [vmem:[%s11261_s0 + $0xe8] sm:$0xf0]  ;;  %v9324_v10 = vld [vmem:[%s10545_s9 + $0x760] sm:$0xff] }
 0x2e5   : > { %7367 = vmatpush.bf16.msra.mxu3 %v9310_v26  ;;  %v11032_v61 = vadd.f32 %v6995_v56, %v6977_v55  ;;  %v6960_v0 = vadd.f32 %v6959_v59, %v6941_v58  ;;  %v9053_v55 = vld [vmem:[%s11261_s0 + $0xe4] sm:$0xf0]  ;;  %v9037_v56 = vld [vmem:[%s11261_s0 + $0x6c] sm:$0xf] }
 0x2e6   : > { %7311 = vmatpush.bf16.msra.mxu0 %v9285_v45  ;;  %v9317_v58 = vld [vmem:[%s10545_s9 + $0x728] sm:$0xff]  ;;  %v7851_v6 = vor.u32 %v9037_v56, %v7848_v57  ;;  %v9336_v56 = vld [vmem:[%s10545_s9 + $0x7c0] sm:$0xff] }
 0x2e7   : > { %7330 = vmatpush.bf16.msra.mxu1 %v9293_v36  ;;  %v9343_v36 = vld [vmem:[%s10545_s9 + $0x7f8] sm:$0xff] }
 0x2e8   : > { %7349 = vmatpush.bf16.msra.mxu2 %v9301_v27  ;;  %v9305_v27 = vld [vmem:[%s10545_s9 + $0x6c8] sm:$0xff] }
 0x2e9   : > { %7368 = vmatpush.bf16.msra.mxu3 %v9309_v47  ;;  %v9318_v47 = vld [vmem:[%s10545_s9 + $0x730] sm:$0xff] }
 0x2ea   : > { %7312 = vmatpush.bf16.msra.mxu0 %v9284_v39  ;;  %v6978_v13 = vpop.f32.mrf.mxu2  ;;  %v6943_v18 = vpop.f32.mrf.mxu0  ;;  %v9333_v39 = vld [vmem:[%s10545_s9 + $0x7a8] sm:$0xff] }
 0x2eb   : > { %7331 = vmatpush.bf16.msra.mxu1 %v9292_v50  ;;  %v6979_v16 = vadd.f32 %v6978_v13, %v6960_v0  ;;  %v6997_v17 = vpop.f32.mrf.mxu3  ;;  %v6944_v22 = vadd.f32 %v6943_v18, %v10988_v20  ;;  %v6962_v23 = vpop.f32.mrf.mxu1  ;;  %v9335_v20 = vld [vmem:[%s10545_s9 + $0x7b8] sm:$0xff]  ;;  %v9342_v50 = vld [vmem:[%s10545_s9 + $0x7f0] sm:$0xff] }
 0x2ec   : > { %7350 = vmatpush.bf16.msra.mxu2 %v9300_v48  ;;  %v9315_v13 = vld [vmem:[%s10545_s9 + $0x718] sm:$0xff] }
 0x2ed   : > { %7369 = vmatpush.bf16.msra.mxu3 %v9308_v51  ;;  %v11067_v26 = vadd.f32 %v6997_v17, %v6979_v16  ;;  %v6963_v29 = vadd.f32 %v6962_v23, %v6944_v22  ;;  %7246 = vmatmul.bf16.gmra.mxu0 %v7951_v14  ;;  %v9036_v51 = vld [vmem:[%s11261_s0 + $0x64] sm:$0xf]  ;;  %v9323_v14 = vld [vmem:[%s10545_s9 + $0x758] sm:$0xff]  ;;  %v9330_v23 = vld [vmem:[%s10545_s9 + $0x790] sm:$0xff] }
 0x2ee   : > { %7313 = vmatpush.bf16.msra.mxu0 %v9283_v60  ;;  %7265 = vmatmul.bf16.gmra.mxu1 %v7955_v19  ;;  %v7843_v2 = vor.u32 %v9036_v51, %v7840_v53  ;;  %v9339_v16 = vld [vmem:[%s10545_s9 + $0x7d8] sm:$0xff]  ;;  %v9328_v51 = vld [vmem:[%s10545_s9 + $0x780] sm:$0xff] }
 0x2ef   : > { %7332 = vmatpush.bf16.msra.mxu1 %v9291_v54  ;;  %7284 = vmatmul.bf16.gmra.mxu2 %v7959_v21  ;;  %v7846_v54 = vld [vmem:[%s11261_s0 + $0x68] sm:$0xf]  ;;  %v9312_v53 = vld [vmem:[%s10545_s9 + $0x700] sm:$0xff] }
 0x2f0   : > { %7351 = vmatpush.bf16.msra.mxu2 %v9299_v52  ;;  %7303 = vmatmul.bf16.gmra.mxu3 %v7963_v24  ;;  %v9325_v52 = vld [vmem:[%s10545_s9 + $0x768] sm:$0xff] }
 0x2f1   : > { %7370 = vmatpush.bf16.msra.mxu3 %v9307_v62  ;;  %v9341_v62 = vld [vmem:[%s10545_s9 + $0x7e8] sm:$0xff] }
 0x2f2   : > { %7314 = vmatpush.bf16.msra.mxu0 %v9282_v9  ;;  %v6981_v35 = vpop.f32.mrf.mxu2  ;;  %v6945_v41 = vpop.f32.mrf.mxu0  ;;  %v9316_v9 = vld [vmem:[%s10545_s9 + $0x720] sm:$0xff] }
 0x2f3   : > { %7333 = vmatpush.bf16.msra.mxu1 %v9290_v3  ;;  %v6982_v38 = vadd.f32 %v6981_v35, %v6963_v29  ;;  %v7000_v40 = vpop.f32.mrf.mxu3  ;;  %v6946_v43 = vadd.f32 %v6945_v41, %v11021_v46  ;;  %v6964_v44 = vpop.f32.mrf.mxu1  ;;  %v9052_v46 = vld [vmem:[%s11261_s0 + $0xdc] sm:$0xf0]  ;;  %v7847_v3 = vor.u32 %v9053_v55, %v7846_v54  ;;  %v9329_v35 = vld [vmem:[%s10545_s9 + $0x788] sm:$0xff] }
 0x2f4   : > { %7352 = vmatpush.bf16.msra.mxu2 %v9298_v63  ;;  %v7839_v60 = vor.u32 %v9052_v46, %v7838_v49  ;;  %v7966_v29 = vld [vmem:[%s11261_s0 + $0x160] sm:$0xf] }
 0x2f5   : > { %7371 = vmatpush.bf16.msra.mxu3 %v9306_v11  ;;  %v11081_v45 = vadd.f32 %v7000_v40, %v6982_v38  ;;  %v6965_v48 = vadd.f32 %v6964_v44, %v6946_v43  ;;  %v9321_v38 = vld [vmem:[%s10545_s9 + $0x748] sm:$0xff]  ;;  %v9320_v54 = vld [vmem:[%s10545_s9 + $0x740] sm:$0xff] }
 0x2f6   : > { %7315 = vmatpush.bf16.msra.mxu0 %v9281_v25  ;;  %v9314_v25 = vld [vmem:[%s10545_s9 + $0x710] sm:$0xff] }
 0x2f7   : > { %7334 = vmatpush.bf16.msra.mxu1 %v9289_v15 }
 0x2f8   : > { %7353 = vmatpush.bf16.msra.mxu2 %v9297_v12  ;;  %v9340_v12 = vld [vmem:[%s10545_s9 + $0x7e0] sm:$0xff] }
 0x2f9   : > { %7372 = vmatpush.bf16.msra.mxu3 %v9305_v27  ;;  %v9322_v27 = vld [vmem:[%s10545_s9 + $0x750] sm:$0xff] }
 0x2fa   : > { %7316 = vmatpush.bf16.msra.mxu0 %v9280_v32  ;;  %v6983_v59 = vpop.f32.mrf.mxu2  ;;  %v7014_v1 = vpop.f32.mrf.mxu0  ;;  %v7974_v32 = vld [vmem:[%s11261_s0 + $0x168] sm:$0xf] }
 0x2fb   : > { %7335 = vmatpush.bf16.msra.mxu1 %v9288_v30  ;;  %v6984_v63 = vadd.f32 %v6983_v59, %v6965_v48  ;;  %v7002_v0 = vpop.f32.mrf.mxu3  ;;  %v7015_v4 = vadd.f32 %v7014_v1, %v11032_v61  ;;  %v7033_v5 = vpop.f32.mrf.mxu1  ;;  %v9331_v61 = vld [vmem:[%s10545_s9 + $0x798] sm:$0xff]  ;;  %v9338_v30 = vld [vmem:[%s10545_s9 + $0x7d0] sm:$0xff] }
 0x2fc   : > { %7354 = vmatpush.bf16.msra.mxu2 %v9296_v28  ;;  %v7854_v1 = vld [vmem:[%s11261_s0 + $0x70] sm:$0xf] }
 0x2fd   : > { %7373 = vmatpush.bf16.msra.mxu3 %v9304_v33  ;;  %v11115_v8 = vadd.f32 %v7002_v0, %v6984_v63  ;;  %v7034_v11 = vadd.f32 %v7033_v5, %v7015_v4  ;;  %7317 = vmatmul.bf16.vlgmr.msra.gmra.mxu0 %v7839_v60  ;;  %v9085_v33 = vld [vmem:[%s11261_s0 + $0x1e4] sm:$0xf0]  ;;  %v7856_v4 = vld [vmem:[%s11261_s0 + $0xf0] sm:$0xf0]  ;;  %v7862_v5 = vld [vmem:[%s11261_s0 + $0x78] sm:$0xf] }
 0x2fe   : > { %7385 = vmatpush.bf16.msrb.mxu0 %v9319_v34  ;;  %7336 = vmatmul.bf16.vlgmr.msra.gmra.mxu1 %v7843_v2  ;;  %v9069_v34 = vld [vmem:[%s11261_s0 + $0x16c] sm:$0xf]  ;;  %v7975_v49 = vor.u32 %v9085_v33, %v7974_v32  ;;  %v9054_v2 = vld [vmem:[%s11261_s0 + $0xec] sm:$0xf0]  ;;  %v7990_v32 = vld [vmem:[%s11261_s0 + $0x178] sm:$0xf] }
 0x2ff   : > { %7404 = vmatpush.bf16.msrb.mxu1 %v9327_v31  ;;  %7355 = vmatmul.bf16.vlgmr.msra.gmra.mxu2 %v7847_v3  ;;  %v7968_v31 = vld [vmem:[%s11261_s0 + $0x1e0] sm:$0xf0]  ;;  %v9038_v3 = vld [vmem:[%s11261_s0 + $0x74] sm:$0xf]  ;;  %v9087_v33 = vld [vmem:[%s11261_s0 + $0x1f4] sm:$0xf0] }
 0x300   : > { %7423 = vmatpush.bf16.msrb.mxu2 %v9335_v20  ;;  %7374 = vmatmul.bf16.vlgmr.msra.gmra.mxu3 %v7851_v6  ;;  %v9068_v20 = vld [vmem:[%s11261_s0 + $0x164] sm:$0xf]  ;;  %v9055_v6 = vld [vmem:[%s11261_s0 + $0xf4] sm:$0xf0] }
 0x301   : > { %7442 = vmatpush.bf16.msrb.mxu3 %v9343_v36  ;;  %v7976_v36 = vld [vmem:[%s11261_s0 + $0x1e8] sm:$0xf0]  ;;  %v7971_v48 = vor.u32 %v9068_v20, %v7968_v31  ;;  %v9070_v20 = vld [vmem:[%s11261_s0 + $0x174] sm:$0xf] }
 0x302   : > { %7386 = vmatpush.bf16.msrb.mxu0 %v9318_v47  ;;  %v7052_v15 = vpop.f32.mrf.mxu2  ;;  %v7016_v19 = vpop.f32.mrf.mxu0  ;;  %v7979_v46 = vor.u32 %v9069_v34, %v7976_v36  ;;  %v7984_v31 = vld [vmem:[%s11261_s0 + $0x1f0] sm:$0xf0]  ;;  %v9071_v34 = vld [vmem:[%s11261_s0 + $0x17c] sm:$0xf] }
 0x303   : > { %7405 = vmatpush.bf16.msrb.mxu1 %v9326_v42  ;;  %v7053_v17 = vadd.f32 %v7052_v15, %v7034_v11  ;;  %v7071_v18 = vpop.f32.mrf.mxu3  ;;  %v7017_v21 = vadd.f32 %v7016_v19, %v11067_v26  ;;  %v7035_v22 = vpop.f32.mrf.mxu1  ;;  %v9084_v26 = vld [vmem:[%s11261_s0 + $0x1dc] sm:$0xf0]  ;;  %v9337_v42 = vld [vmem:[%s10545_s9 + $0x7c8] sm:$0xff] }
 0x304   : > { %7424 = vmatpush.bf16.msrb.mxu2 %v9334_v37  ;;  %v9313_v37 = vld [vmem:[%s10545_s9 + $0x708] sm:$0xff]  ;;  %v7967_v41 = vor.u32 %v9084_v26, %v7966_v29 }
 0x305   : > { %7443 = vmatpush.bf16.msrb.mxu3 %v9342_v50  ;;  %v11126_v24 = vadd.f32 %v7071_v18, %v7053_v17  ;;  %v7036_v28 = vadd.f32 %v7035_v22, %v7017_v21 }
 0x306   : > { %7387 = vmatpush.bf16.msrb.mxu0 %v9317_v58 }
 0x307   : > { %7406 = vmatpush.bf16.msrb.mxu1 %v9325_v52 }
 0x308   : > { %7425 = vmatpush.bf16.msrb.mxu2 %v9333_v39 }
 0x309   : > { %7444 = vmatpush.bf16.msrb.mxu3 %v9341_v62 }
 0x30a   : > { %7388 = vmatpush.bf16.msrb.mxu0 %v9316_v9  ;;  %v7054_v40 = vpop.f32.mrf.mxu2  ;;  %v7019_v47 = vpop.f32.mrf.mxu0 }
 0x30b   : > { %7407 = vmatpush.bf16.msrb.mxu1 %v9324_v10  ;;  %v7055_v43 = vadd.f32 %v7054_v40, %v7036_v28  ;;  %v7073_v44 = vpop.f32.mrf.mxu3  ;;  %v7020_v50 = vadd.f32 %v7019_v47, %v11081_v45  ;;  %v7038_v39 = vpop.f32.mrf.mxu1  ;;  %v7855_v10 = vor.u32 %v9054_v2, %v7854_v1 }
 0x30c   : > { %7426 = vmatpush.bf16.msrb.mxu2 %v9332_v7  ;;  %v9039_v7 = vld [vmem:[%s11261_s0 + $0x7c] sm:$0xf] }
 0x30d   : > { %7445 = vmatpush.bf16.msrb.mxu3 %v9340_v12  ;;  %v7074_v52 = vadd.f32 %v7073_v44, %v7055_v43  ;;  %v7039_v55 = vadd.f32 %v7038_v39, %v7020_v50  ;;  %7322 = vmatmul.bf16.gmra.mxu0 %v7967_v41  ;;  %v7991_v43 = vor.u32 %v9087_v33, %v7990_v32 }
 0x30e   : > { %7389 = vmatpush.bf16.msrb.mxu0 %v9315_v13  ;;  %7341 = vmatmul.bf16.gmra.mxu1 %v7971_v48  ;;  %v7859_v13 = vor.u32 %v9038_v3, %v7856_v4 }
 0x30f   : > { %7408 = vmatpush.bf16.msrb.mxu1 %v9323_v14  ;;  %7360 = vmatmul.bf16.gmra.mxu2 %v7975_v49  ;;  %v7863_v14 = vor.u32 %v9055_v6, %v7862_v5 }
 0x310   : > { %7427 = vmatpush.bf16.msrb.mxu2 %v9331_v61  ;;  %7379 = vmatmul.bf16.gmra.mxu3 %v7979_v46 }
 0x311   : > { %7446 = vmatpush.bf16.msrb.mxu3 %v9339_v16 }
 0x312   : > { %7390 = vmatpush.bf16.msrb.mxu0 %v9314_v25  ;;  %v7057_v45 = vpop.f32.mrf.mxu2  ;;  %v7021_v59 = vpop.f32.mrf.mxu0 }
 0x313   : > { %7409 = vmatpush.bf16.msrb.mxu1 %v9322_v27  ;;  %v7058_v57 = vadd.f32 %v7057_v45, %v7039_v55  ;;  %v7076_v58 = vpop.f32.mrf.mxu3  ;;  %v7022_v60 = vadd.f32 %v7021_v59, %v11115_v8  ;;  %v7040_v62 = vpop.f32.mrf.mxu1  ;;  %v7864_v8 = vld [vmem:[%s11261_s0 + $0xf8] sm:$0xf0] }
 0x314   : > { %7428 = vmatpush.bf16.msrb.mxu2 %v9330_v23  ;;  %v7867_v17 = vor.u32 %v9039_v7, %v7864_v8 }
 0x315   : > { %7447 = vmatpush.bf16.msrb.mxu3 %v9338_v30  ;;  %v7077_v63 = vadd.f32 %v7076_v58, %v7058_v57  ;;  %v7041_v0 = vadd.f32 %v7040_v62, %v7022_v60  ;;  %v9086_v30 = vld [vmem:[%s11261_s0 + $0x1ec] sm:$0xf0] }
 0x316   : > { %7391 = vmatpush.bf16.msrb.mxu0 %v9313_v37 }
 0x317   : > { %7410 = vmatpush.bf16.msrb.mxu1 %v9321_v38 }
 0x318   : > { %7429 = vmatpush.bf16.msrb.mxu2 %v9329_v35  ;;  %v7992_v35 = vld [vmem:[%s11261_s0 + $0x1f8] sm:$0xf0] }
 0x319   : > { %7448 = vmatpush.bf16.msrb.mxu3 %v9337_v42  ;;  %v7987_v42 = vor.u32 %v9070_v20, %v7984_v31  ;;  %v7995_v48 = vor.u32 %v9071_v34, %v7992_v35 }
 0x31a   : > { %7392 = vmatpush.bf16.msrb.mxu0 %v9312_v53  ;;  %v7059_v9 = vpop.f32.mrf.mxu2  ;;  %v7090_v61 = vpop.f32.mrf.mxu0 }
 0x31b   : > { %7411 = vmatpush.bf16.msrb.mxu1 %v9320_v54  ;;  %v7060_v11 = vadd.f32 %v7059_v9, %v7041_v0  ;;  %v7078_v12 = vpop.f32.mrf.mxu3  ;;  %v7091_v15 = vadd.f32 %v7090_v61, %v11126_v24  ;;  %v7109_v16 = vpop.f32.mrf.mxu1  ;;  %v7982_v24 = vld [vmem:[%s11261_s0 + $0x170] sm:$0xf] }
 0x31c   : > { %7430 = vmatpush.bf16.msrb.mxu2 %v9328_v51  ;;  %v7983_v37 = vor.u32 %v9086_v30, %v7982_v24 }
 0x31d   : > { %7449 = vmatpush.bf16.msrb.mxu3 %v9336_v56  ;;  %v7079_v18 = vadd.f32 %v7078_v12, %v7060_v11  ;;  %v7110_v19 = vadd.f32 %v7109_v16, %v7091_v15  ;;  %7393 = vmatmul.bf16.vlgmr.msrb.gmra.mxu0 %v7855_v10 }
 0x31e   : > { %7412 = vmatmul.bf16.vlgmr.msrb.gmra.mxu1 %v7859_v13 }
 0x31f   : > { %7431 = vmatmul.bf16.vlgmr.msrb.gmra.mxu2 %v7863_v14 }
 0x320   : > { %7450 = vmatmul.bf16.vlgmr.msrb.gmra.mxu3 %v7867_v17 }
 0x322   : > { %v7128_v21 = vpop.f32.mrf.mxu2  ;;  %v7092_v25 = vpop.f32.mrf.mxu0 }
 0x323   : > { %v7129_v22 = vadd.f32 %v7128_v21, %v7110_v19  ;;  %v7147_v23 = vpop.f32.mrf.mxu3  ;;  %v7093_v27 = vadd.f32 %v7092_v25, %v7074_v52  ;;  %v7111_v28 = vpop.f32.mrf.mxu1 }
 0x325   : > { %v7148_v29 = vadd.f32 %v7147_v23, %v7129_v22  ;;  %v7112_v26 = vadd.f32 %v7111_v28, %v7093_v27 }
 0x32a   : > { %v7130_v36 = vpop.f32.mrf.mxu2  ;;  %v7095_v41 = vpop.f32.mrf.mxu0 }
 0x32b   : > { %v7131_v38 = vadd.f32 %v7130_v36, %v7112_v26  ;;  %v7149_v40 = vpop.f32.mrf.mxu3  ;;  %v7096_v44 = vadd.f32 %v7095_v41, %v7077_v63  ;;  %v7114_v47 = vpop.f32.mrf.mxu1 }
 0x32d   : > { %v7150_v49 = vadd.f32 %v7149_v40, %v7131_v38  ;;  %v7115_v50 = vadd.f32 %v7114_v47, %v7096_v44  ;;  %7398 = vmatmul.bf16.gmra.mxu0 %v7983_v37 }
 0x32e   : > { %7417 = vmatmul.bf16.gmra.mxu1 %v7987_v42 }
 0x32f   : > { %7436 = vmatmul.bf16.gmra.mxu2 %v7991_v43 }
 0x330   : > { %7455 = vmatmul.bf16.gmra.mxu3 %v7995_v48 }
 0x332   : > { %v7133_v39 = vpop.f32.mrf.mxu2  ;;  %v7097_v52 = vpop.f32.mrf.mxu0 }
 0x333   : > { %v7134_v46 = vadd.f32 %v7133_v39, %v7115_v50  ;;  %v7152_v51 = vpop.f32.mrf.mxu3  ;;  %v7098_v53 = vadd.f32 %v7097_v52, %v7079_v18  ;;  %v7116_v54 = vpop.f32.mrf.mxu1 }
 0x335   : > { %v7153_v55 = vadd.f32 %v7152_v51, %v7134_v46  ;;  %v7117_v56 = vadd.f32 %v7116_v54, %v7098_v53 }
 0x33a   : > { %v7135_v45 = vpop.f32.mrf.mxu2  ;;  %v7166_v59 = vpop.f32.mrf.mxu0 }
 0x33b   : > { %v7136_v57 = vadd.f32 %v7135_v45, %v7117_v56  ;;  %v7154_v58 = vpop.f32.mrf.mxu3  ;;  %v7167_v60 = vadd.f32 %v7166_v59, %v7148_v29  ;;  %v7185_v62 = vpop.f32.mrf.mxu1 }
 0x33d   : > { %v7155_v63 = vadd.f32 %v7154_v58, %v7136_v57  ;;  %v7186_v0 = vadd.f32 %v7185_v62, %v7167_v60 }
 0x342   : > { %v7204_v1 = vpop.f32.mrf.mxu2  ;;  %v7168_v4 = vpop.f32.mrf.mxu0 }
 0x343   : > { %v7205_v2 = vadd.f32 %v7204_v1, %v7186_v0  ;;  %v7223_v3 = vpop.f32.mrf.mxu3  ;;  %v7169_v5 = vadd.f32 %v7168_v4, %v7150_v49  ;;  %v7187_v6 = vpop.f32.mrf.mxu1 }
 0x345   : > { %v7224_v7 = vadd.f32 %v7223_v3, %v7205_v2  ;;  %v7188_v8 = vadd.f32 %v7187_v6, %v7169_v5 }
 0x34a   : > { %v7206_v9 = vpop.f32.mrf.mxu2  ;;  %v7171_v12 = vpop.f32.mrf.mxu0 }
 0x34b   : > { %v7207_v10 = vadd.f32 %v7206_v9, %v7188_v8  ;;  %v7225_v11 = vpop.f32.mrf.mxu3  ;;  %v7172_v61 = vadd.f32 %v7171_v12, %v7153_v55  ;;  %v7190_v13 = vpop.f32.mrf.mxu1 }
 0x34d   : > { %v7226_v14 = vadd.f32 %v7225_v11, %v7207_v10  ;;  %v7191_v15 = vadd.f32 %v7190_v13, %v7172_v61 }
 0x352   : > { %v7209_v16 = vpop.f32.mrf.mxu2  ;;  %v7173_v19 = vpop.f32.mrf.mxu0 }
 0x353   : > { %v7210_v17 = vadd.f32 %v7209_v16, %v7191_v15  ;;  %v7228_v18 = vpop.f32.mrf.mxu3  ;;  %v7174_v21 = vadd.f32 %v7173_v19, %v7155_v63  ;;  %v7192_v22 = vpop.f32.mrf.mxu1 }
 0x355   : > { %v7229_v23 = vadd.f32 %v7228_v18, %v7210_v17  ;;  %v7193_v25 = vadd.f32 %v7192_v22, %v7174_v21 }
 0x35a   : > { %v7211_v27 = vpop.f32.mrf.mxu2  ;;  %v7242_v26 = vpop.f32.mrf.mxu0 }
 0x35b   : > { %v7212_v28 = vadd.f32 %v7211_v27, %v7193_v25  ;;  %v7230_v29 = vpop.f32.mrf.mxu3  ;;  %v7261_v24 = vpop.f32.mrf.mxu1  ;;  %v7243_v56 = vadd.f32 %v7242_v26, %v7224_v7 }
 0x35d   : > { %v7231_v30 = vadd.f32 %v7230_v29, %v7212_v28  ;;  %v7262_v60 = vadd.f32 %v7261_v24, %v7243_v56 }
 0x362   : > { %v7280_v20 = vpop.f32.mrf.mxu2  ;;  %v7244_v32 = vpop.f32.mrf.mxu0 }
 0x363   : > { %v7299_v31 = vpop.f32.mrf.mxu3  ;;  %v7263_v33 = vpop.f32.mrf.mxu1  ;;  %v7245_v59 = vadd.f32 %v7244_v32, %v7226_v14  ;;  %v7281_v62 = vadd.f32 %v7280_v20, %v7262_v60 }
 0x365   : > { %v7264_v63 = vadd.f32 %v7263_v33, %v7245_v59  ;;  %v7300_v6 = vadd.f32 %v7299_v31, %v7281_v62 }
 0x36a   : > { %v7282_v34 = vpop.f32.mrf.mxu2  ;;  %v7247_v36 = vpop.f32.mrf.mxu0 }
 0x36b   : > { %v7301_v35 = vpop.f32.mrf.mxu3  ;;  %v7266_v37 = vpop.f32.mrf.mxu1  ;;  %v7283_v1 = vadd.f32 %v7282_v34, %v7264_v63  ;;  %v7248_v8 = vadd.f32 %v7247_v36, %v7229_v23  ;;  %v7461_v36 = vlaneseq }
 0x36d   : > { %v7302_v10 = vadd.f32 %v7301_v35, %v7283_v1  ;;  %v7267_v12 = vadd.f32 %v7266_v37, %v7248_v8 }
 0x372   : > { %v7285_v38 = vpop.f32.mrf.mxu2  ;;  %v7249_v41 = vpop.f32.mrf.mxu0 }
 0x373   : > { %v7304_v40 = vpop.f32.mrf.mxu3  ;;  %v7250_v42 = vadd.f32 %v7249_v41, %v7231_v30  ;;  %v7268_v43 = vpop.f32.mrf.mxu1  ;;  %v7286_v13 = vadd.f32 %v7285_v38, %v7267_v12 }
 0x375   : > { %v7269_v44 = vadd.f32 %v7268_v43, %v7250_v42  ;;  %v7305_v25 = vadd.f32 %v7304_v40, %v7286_v13 }
 0x37a   : > { %v7287_v47 = vpop.f32.mrf.mxu2  ;;  %v7318_v50 = vpop.f32.mrf.mxu0 }
 0x37b   : > { %v7288_v48 = vadd.f32 %v7287_v47, %v7269_v44  ;;  %v7306_v49 = vpop.f32.mrf.mxu3  ;;  %v7337_v39 = vpop.f32.mrf.mxu1  ;;  %v7319_v11 = vadd.f32 %v7318_v50, %v7300_v6  ;;  %v7462_v47 = vshrl.u32 %v7461_v36, 7 }
 0x37d   : > { %v7307_v46 = vadd.f32 %v7306_v49, %v7288_v48  ;;  %v7338_v15 = vadd.f32 %v7337_v39, %v7319_v11 }
 0x382   : > { %v7356_v51 = vpop.f32.mrf.mxu2  ;;  %v7320_v53 = vpop.f32.mrf.mxu0 }
 0x383   : > { %v7375_v52 = vpop.f32.mrf.mxu3  ;;  %v7339_v54 = vpop.f32.mrf.mxu1  ;;  %v7321_v7 = vadd.f32 %v7320_v53, %v7302_v10  ;;  %v7357_v19 = vadd.f32 %v7356_v51, %v7338_v15  ;;  %v7464_v51 = vadd.s32 16, %v7462_v47 }
 0x385   : > { %v7340_v21 = vadd.f32 %v7339_v54, %v7321_v7  ;;  %v7376_v28 = vadd.f32 %v7375_v52, %v7357_v19  ;;  %vm7468_vm0 = vcmp.lt.s32.totalorder %v7464_v51, 18 }
 0x38a   : > { %v7358_v55 = vpop.f32.mrf.mxu2  ;;  %v7323_v57 = vpop.f32.mrf.mxu0 }
 0x38b   : > { %v7377_v45 = vpop.f32.mrf.mxu3  ;;  %v7342_v58 = vpop.f32.mrf.mxu1  ;;  %v7359_v27 = vadd.f32 %v7358_v55, %v7340_v21  ;;  %v7324_v29 = vadd.f32 %v7323_v57, %v7305_v25 }
 0x38d   : > { %v7378_v26 = vadd.f32 %v7377_v45, %v7359_v27  ;;  %v7343_v31 = vadd.f32 %v7342_v58, %v7324_v29 }
 0x392   : > { %v7361_v0 = vpop.f32.mrf.mxu2  ;;  %v7325_v3 = vpop.f32.mrf.mxu0 }
 0x393   : > { %v7380_v2 = vpop.f32.mrf.mxu3  ;;  %v7326_v4 = vadd.f32 %v7325_v3, %v7307_v46  ;;  %v7344_v5 = vpop.f32.mrf.mxu1  ;;  %v7362_v34 = vadd.f32 %v7361_v0, %v7343_v31 }
 0x395   : > { %v7345_v9 = vadd.f32 %v7344_v5, %v7326_v4  ;;  %v7381_v42 = vadd.f32 %v7380_v2, %v7362_v34 }
 0x39a   : > { %v7363_v61 = vpop.f32.mrf.mxu2  ;;  %v7394_v17 = vpop.f32.mrf.mxu0 }
 0x39b   : > { %v7364_v14 = vadd.f32 %v7363_v61, %v7345_v9  ;;  %v7382_v16 = vpop.f32.mrf.mxu3  ;;  %v7413_v18 = vpop.f32.mrf.mxu1  ;;  %v7395_v24 = vadd.f32 %v7394_v17, %v7376_v28 }
 0x39d   : > { %v7383_v22 = vadd.f32 %v7382_v16, %v7364_v14  ;;  %v7414_v35 = vadd.f32 %v7413_v18, %v7395_v24 }
 0x3a2   : > { %v7432_v23 = vpop.f32.mrf.mxu2  ;;  %v7396_v20 = vpop.f32.mrf.mxu0 }
 0x3a3   : > { %v7451_v30 = vpop.f32.mrf.mxu3  ;;  %v7397_v32 = vadd.f32 %v7396_v20, %v7378_v26  ;;  %v7415_v33 = vpop.f32.mrf.mxu1  ;;  %v7433_v37 = vadd.f32 %v7432_v23, %v7414_v35 }
 0x3a5   : > { %v7416_v38 = vadd.f32 %v7415_v33, %v7397_v32  ;;  %v7452_v48 = vadd.f32 %v7451_v30, %v7433_v37  ;;  %v9395_v33 = vld [vmem:[%s4416_s11] ss:$0 sm:$0xff] }
 0x3aa   : > { %v7434_v41 = vpop.f32.mrf.mxu2  ;;  %v7399_v44 = vpop.f32.mrf.mxu0 }
 0x3ab   : > { %v7435_v43 = vadd.f32 %v7434_v41, %v7416_v38  ;;  %v7453_v40 = vpop.f32.mrf.mxu3  ;;  %v7400_v50 = vadd.f32 %v7399_v44, %v7381_v42  ;;  %v7418_v46 = vpop.f32.mrf.mxu1  ;;  %v9396_v38 = vld [vmem:[%s4419_s13] ss:$0 sm:$0xff] }
 0x3ad   : > { %v7454_v49 = vadd.f32 %v7453_v40, %v7435_v43  ;;  %v7419_v52 = vadd.f32 %v7418_v46, %v7400_v50 }
 0x3af   : > { %v7474_v39 = vadd.f32 %v7454_v49, %v7452_v48 }
 0x3b2   : > { %v7437_v53 = vpop.f32.mrf.mxu2  ;;  %v7401_v58 = vpop.f32.mrf.mxu0 }
 0x3b3   : > { %v7438_v54 = vadd.f32 %v7437_v53, %v7419_v52  ;;  %v7456_v55 = vpop.f32.mrf.mxu3  ;;  %v7402_v62 = vadd.f32 %v7401_v58, %v7383_v22  ;;  %v7420_v0 = vpop.f32.mrf.mxu1 }
 0x3b5   : > { %v7457_v56 = vadd.f32 %v7456_v55, %v7438_v54  ;;  %v7421_v3 = vadd.f32 %v7420_v0, %v7402_v62 }
 0x3b7   : > { %v7472_v45 = vsel %vm7468_vm0, %v7457_v56, 0.0 }
 0x3b8   : > { %v7475_v57 = vadd.f32 %v7474_v39, %v7472_v45 }
 0x3ba   : > { %v7477_v59 = vrot.slane %v7475_v57, 4  ;;  %v7439_v1 = vpop.f32.mrf.mxu2 }
 0x3bb   : > { %v7440_v5 = vadd.f32 %v7439_v1, %v7421_v3  ;;  %v7458_v8 = vpop.f32.mrf.mxu3 }
 0x3bc   : > { %v7478_v60 = vadd.f32 %v7477_v59, %v7475_v57 }
 0x3bd   : > { %v7459_v10 = vadd.f32 %v7458_v8, %v7440_v5 }
 0x3be   : > { %v7479_v63 = vrot.slane %v7478_v60, 2 }
 0x3c0   : > { %v7480_v2 = vadd.f32 %v7479_v63, %v7478_v60 }
 0x3c2   : > { %v7481_v4 = vrot.slane %v7480_v2, 1 }
 0x3c4   : > { %v7482_v6 = vadd.f32 %v7481_v4, %v7480_v2 }
 0x3c6   : > { %v7483_v9 = vmul.f32 0.055555556, %v7482_v6 }
 0x3c8   : > { %v7484_v11 = vsub.f32 %v7452_v48, %v7483_v9  ;;  %v7485_v12 = vsub.f32 %v7454_v49, %v7483_v9  ;;  %v7486_v7 = vsub.f32 %v7457_v56, %v7483_v9  ;;  %v7487_v61 = vsub.f32 %v7459_v10, %v7483_v9 }
 0x3ca   : > { %v7490_v13 = vsel %vm7468_vm0, %v7486_v7, 0.0  ;;  %v7492_v15 = vmul.f32 %v7484_v11, %v7484_v11  ;;  %v7493_v14 = vmul.f32 %v7485_v12, %v7485_v12 }
 0x3cb   : > { %v7494_v16 = vmul.f32 %v7490_v13, %v7490_v13 }
 0x3cc   : > { %v7496_v17 = vadd.f32 %v7493_v14, %v7492_v15 }
 0x3ce   : > { %v7497_v18 = vadd.f32 %v7496_v17, %v7494_v16 }
 0x3d0   : > { %v7499_v19 = vrot.slane %v7497_v18, 4 }
 0x3d2   : > { %v7500_v21 = vadd.f32 %v7499_v19, %v7497_v18 }
 0x3d4   : > { %v7501_v22 = vrot.slane %v7500_v21, 2 }
 0x3d6   : > { %v7502_v25 = vadd.f32 %v7501_v22, %v7500_v21 }
 0x3d8   : > { %v7503_v27 = vrot.slane %v7502_v25, 1 }
 0x3da   : > { %v7504_v28 = vadd.f32 %v7503_v27, %v7502_v25 }
 0x3dc   : > { %v7505_v29 = vmul.f32 0.055555556, %v7504_v28 }
 0x3de   : > { %v7506_v23 = vadd.f32 1e-05, %v7505_v29 }
 0x3e0   : > { %9397 = vrsqrt.f32 %v7506_v23  ;;  %vm7513_vm2 = vweird.f32 %v7506_v23 }
 0x3e6   : > { %v9398_v26 = vpop.eup %9397 }
 0x3e7   : > { %v7508_v24 = vmul.f32 %v9398_v26, %v7506_v23  ;;  %vm7514_vm1 = vweird.f32 %v9398_v26 }
 0x3e8   : > { %vm7515_vm3 = vmor %vm7513_vm2, %vm7514_vm1 }
 0x3e9   : > { %v7509_v30 = vmul.f32 %v9398_v26, %v7508_v24 }
 0x3eb   : > { %v7510_v20 = vmul.f32 0.5, %v7509_v30 }
 0x3ed   : > { %v7511_v31 = vsub.f32 1.5, %v7510_v20 }
 0x3ef   : > { %v7512_v32 = vmul.f32 %v9398_v26, %v7511_v31 }
 0x3f1   : > { %v7516_v34 = vsel %vm7515_vm3, %v9398_v26, %v7512_v32 }
 0x3f2   : > { %v7517_v35 = vmul.f32 %v7516_v34, %v7484_v11  ;;  %v7518_v36 = vmul.f32 %v7516_v34, %v7485_v12  ;;  %v7519_v37 = vmul.f32 %v7516_v34, %v7486_v7  ;;  %v7520_v41 = vmul.f32 %v7516_v34, %v7487_v61 }
 0x3f4   : > { %v7525_v42 = vmul.f32 %v9395_v33, %v7517_v35  ;;  %v7526_v43 = vmul.f32 %v9395_v33, %v7518_v36  ;;  %v7527_v40 = vmul.f32 %v9395_v33, %v7519_v37  ;;  %v7528_v44 = vmul.f32 %v9395_v33, %v7520_v41 }
 0x3f6   : > { %v7533_v47 = vadd.f32 %v9396_v38, %v7525_v42  ;;  %v7534_v48 = vadd.f32 %v9396_v38, %v7526_v43  ;;  %v7535_v49 = vadd.f32 %v9396_v38, %v7527_v40  ;;  %v7536_v50 = vadd.f32 %v9396_v38, %v7528_v44 }
 0x3f8   : > { %vm7537_vm4 = vcmp.gt.f32.partialorder %v7533_v47, 0.0  ;;  %vm7538_vm5 = vcmp.gt.f32.partialorder %v7534_v48, 0.0  ;;  %vm7539_vm6 = vcmp.gt.f32.partialorder %v7535_v49, 0.0  ;;  %v7541_v39 = vmul.f32 0.2, %v7533_v47 }
 0x3f9   : > { %v7542_v46 = vmul.f32 0.2, %v7534_v48  ;;  %v7543_v51 = vmul.f32 0.2, %v7535_v49  ;;  %vm7540_vm7 = vcmp.gt.f32.partialorder %v7536_v50, 0.0 }
 0x3fa   : > { %v7544_v52 = vmul.f32 0.2, %v7536_v50  ;;  %v7545_v53 = vsel %vm7537_vm4, %v7533_v47, %v7541_v39 }
 0x3fb   : > { %v7547_v54 = vsel %vm7539_vm6, %v7535_v49, %v7543_v51  ;;  %v7546_v55 = vsel %vm7538_vm5, %v7534_v48, %v7542_v46  ;;  %7563 = sbr.rel (!%p9499_p6) target bundleno = 1034 (0x40a), region = 92 }
 0x3fc   : > { %v7548_v56 = vsel %vm7540_vm7, %v7536_v50, %v7544_v52  ;;  %v9347_v45 = vpack.c.bf16 %v7546_v55, %v7545_v53 }
 0x3fd   : > { %v9352_v57 = vpack.c.bf16 %v7548_v56, %v7547_v54 }
 0x3fe   : > { %9348 = vst [vmem:[%s4406_s27] sm:$0xff] %v9347_v45  }
 0x3ff   : > { %9354 = vst [vmem:[%s4406_s27 + $0x8] sm:$0xff] %v9352_v57  }
 0x405   : > { %v7585_v58 = vld [vmem:[%s4406_s27] sm:$0xf]  ;;  %v7587_v59 = vld [vmem:[%s4406_s27 + $0x4] sm:$0xf] }
 0x406   : > { %v7589_v60 = vld [vmem:[%s4406_s27 + $0x8] sm:$0xf]  ;;  %7586 = vst [vmem:[%s7568_s29] sm:$0xf] %v7585_v58  ;;  %v7591_v62 = vld [vmem:[%s4406_s27 + $0xc] sm:$0xf] }
 0x407   : > { %7588 = vst [vmem:[%s7568_s29 + $0x10] sm:$0xf] %v7587_v59 }
 0x408   : > { %7590 = vst [vmem:[%s7568_s29 + $0x20] sm:$0xf] %v7589_v60 }
 0x409   : > { %7592 = vst [vmem:[%s7568_s29 + $0x30] sm:$0xf] %v7591_v62 }
 0x40a PF: > { %s14_s19 = sadd.s32 1, %s9437_s19   ;;  %s11267_s15 = smov %s9425_s16 }
 0x40b   : > { %p11_p12 = scmp.ge.s32.totalorder %s14_s19, 6   ;;  %s11268_s16 = smov %s9504_s25 }
 0x40c   : > { %s11269_s17 = smov %s9433_s18  ;;  %s11270_s18 = smov %s11272_s20 }
 0x40d   :  { %13 = sbr.rel (!%p11_p12) target bundleno = 3 (0x3), region = 177 }

// kernel: _lambda_.9
= control target key start
LH: loop header
LB: loop body
LE: loop exit
PB: predicated region body
PF: predicated region fallthrough
CT: control target
= control target key end

     0   :  { %s10314_s1 = inlined_call_operand.vmem [shape: bf16[8192,128], index: 1, kind: input, shape index: {}]   ;;  %s10315_s3 = inlined_call_operand.vmem [shape: f32[1,128], index: 3, kind: input, shape index: {}]   ;;  %s10316_s0 = inlined_call_operand.vmem [shape: bf16[16,8192], index: 0, kind: input, shape index: {}]   ;;  %s10317_s2 = inlined_call_operand.vmem [shape: f32[1,128], index: 2, kind: input, shape index: {}]   ;;  %s10318_s4 = inlined_call_operand.vmem [shape: f32[16,128], index: 4, kind: output, shape index: {}]  }
   0x1   :  { %v7778_v0 = vld [vmem:[%s10314_s1 + $0x38] sm:$0xff]  ;;  %v7777_v4 = vld [vmem:[%s10314_s1 + $0x30] sm:$0xff]  ;;  %v7776_v8 = vld [vmem:[%s10314_s1 + $0x28] sm:$0xff] }
   0x2   :  { %v7786_v1 = vld [vmem:[%s10314_s1 + $0x78] sm:$0xff]  ;;  %4501 = vmatpush.bf16.msra.mxu0 %v7778_v0  ;;  %v7785_v5 = vld [vmem:[%s10314_s1 + $0x70] sm:$0xff]  ;;  %v7784_v9 = vld [vmem:[%s10314_s1 + $0x68] sm:$0xff] }
   0x3   :  { %v7794_v2 = vld [vmem:[%s10314_s1 + $0xb8] sm:$0xff]  ;;  %4515 = vmatpush.bf16.msra.mxu1 %v7786_v1  ;;  %v7793_v6 = vld [vmem:[%s10314_s1 + $0xb0] sm:$0xff]  ;;  %v7792_v10 = vld [vmem:[%s10314_s1 + $0xa8] sm:$0xff] }
   0x4   :  { %v7802_v3 = vld [vmem:[%s10314_s1 + $0xf8] sm:$0xff]  ;;  %4529 = vmatpush.bf16.msra.mxu2 %v7794_v2  ;;  %v7801_v7 = vld [vmem:[%s10314_s1 + $0xf0] sm:$0xff]  ;;  %v7800_v11 = vld [vmem:[%s10314_s1 + $0xe8] sm:$0xff] }
   0x5   :  { %4543 = vmatpush.bf16.msra.mxu3 %v7802_v3  ;;  %v7775_v12 = vld [vmem:[%s10314_s1 + $0x20] sm:$0xff]  ;;  %v7774_v16 = vld [vmem:[%s10314_s1 + $0x18] sm:$0xff]  ;;  %v7773_v20 = vld [vmem:[%s10314_s1 + $0x10] sm:$0xff] }
   0x6   :  { %4502 = vmatpush.bf16.msra.mxu0 %v7777_v4  ;;  %v7783_v13 = vld [vmem:[%s10314_s1 + $0x60] sm:$0xff]  ;;  %v7782_v17 = vld [vmem:[%s10314_s1 + $0x58] sm:$0xff]  ;;  %v7781_v21 = vld [vmem:[%s10314_s1 + $0x50] sm:$0xff] }
   0x7   :  { %4516 = vmatpush.bf16.msra.mxu1 %v7785_v5  ;;  %v7791_v14 = vld [vmem:[%s10314_s1 + $0xa0] sm:$0xff]  ;;  %v7790_v18 = vld [vmem:[%s10314_s1 + $0x98] sm:$0xff]  ;;  %v7789_v22 = vld [vmem:[%s10314_s1 + $0x90] sm:$0xff] }
   0x8   :  { %4530 = vmatpush.bf16.msra.mxu2 %v7793_v6  ;;  %v7799_v15 = vld [vmem:[%s10314_s1 + $0xe0] sm:$0xff]  ;;  %v7798_v19 = vld [vmem:[%s10314_s1 + $0xd8] sm:$0xff]  ;;  %v7797_v23 = vld [vmem:[%s10314_s1 + $0xd0] sm:$0xff] }
   0x9   :  { %4544 = vmatpush.bf16.msra.mxu3 %v7801_v7  ;;  %v7772_v24 = vld [vmem:[%s10314_s1 + $0x8] sm:$0xff]  ;;  %v7771_v28 = vld [vmem:[%s10314_s1] sm:$0xff]  ;;  %v7810_v32 = vld [vmem:[%s10314_s1 + $0x138] sm:$0xff] }
   0xa   :  { %4503 = vmatpush.bf16.msra.mxu0 %v7776_v8  ;;  %v7780_v25 = vld [vmem:[%s10314_s1 + $0x48] sm:$0xff]  ;;  %v7779_v29 = vld [vmem:[%s10314_s1 + $0x40] sm:$0xff]  ;;  %v7818_v33 = vld [vmem:[%s10314_s1 + $0x178] sm:$0xff] }
   0xb   :  { %4517 = vmatpush.bf16.msra.mxu1 %v7784_v9  ;;  %v7788_v26 = vld [vmem:[%s10314_s1 + $0x88] sm:$0xff]  ;;  %v7787_v30 = vld [vmem:[%s10314_s1 + $0x80] sm:$0xff]  ;;  %v7826_v42 = vld [vmem:[%s10314_s1 + $0x1b8] sm:$0xff] }
   0xc   :  { %4531 = vmatpush.bf16.msra.mxu2 %v7792_v10  ;;  %v7796_v27 = vld [vmem:[%s10314_s1 + $0xc8] sm:$0xff]  ;;  %v7795_v31 = vld [vmem:[%s10314_s1 + $0xc0] sm:$0xff]  ;;  %v7834_v43 = vld [vmem:[%s10314_s1 + $0x1f8] sm:$0xff] }
   0xd   :  { %4545 = vmatpush.bf16.msra.mxu3 %v7800_v11  ;;  %v5405_v34 = vld [vmem:[%s10316_s0] sm:$0xf]  ;;  %v5413_v36 = vld [vmem:[%s10316_s0 + $0x8] sm:$0xf]  ;;  %v7707_v38 = vld [vmem:[%s10316_s0 + $0x4] sm:$0xf] }
   0xe   :  { %4504 = vmatpush.bf16.msra.mxu0 %v7775_v12  ;;  %v7739_v35 = vld [vmem:[%s10316_s0 + $0xfc] sm:$0xf0]  ;;  %v7740_v37 = vld [vmem:[%s10316_s0 + $0x104] sm:$0xf0]  ;;  %v5407_v39 = vld [vmem:[%s10316_s0 + $0x100] sm:$0xf0] }
   0xf   :  { %4518 = vmatpush.bf16.msra.mxu1 %v7783_v13  ;;  %v7708_v40 = vld [vmem:[%s10316_s0 + $0xc] sm:$0xf]  ;;  %v5406_v44 = vor.u32 %v7739_v35, %v5405_v34  ;;  %v5414_v45 = vor.u32 %v7740_v37, %v5413_v36  ;;  %v5410_v46 = vor.u32 %v7707_v38, %v5407_v39  ;;  %v7809_v48 = vld [vmem:[%s10314_s1 + $0x130] sm:$0xff]  ;;  %v7807_v56 = vld [vmem:[%s10314_s1 + $0x120] sm:$0xff] }
  0x10   :  { %4532 = vmatpush.bf16.msra.mxu2 %v7791_v14  ;;  %v5415_v41 = vld [vmem:[%s10316_s0 + $0x108] sm:$0xf0]  ;;  %v7817_v49 = vld [vmem:[%s10314_s1 + $0x170] sm:$0xff]  ;;  %v7815_v57 = vld [vmem:[%s10314_s1 + $0x160] sm:$0xff] }
  0x11   :  { %4546 = vmatpush.bf16.msra.mxu3 %v7799_v15  ;;  %v5418_v47 = vor.u32 %v7708_v40, %v5415_v41  ;;  %v7825_v50 = vld [vmem:[%s10314_s1 + $0x1b0] sm:$0xff]  ;;  %v7808_v52 = vld [vmem:[%s10314_s1 + $0x128] sm:$0xff]  ;;  %v7823_v58 = vld [vmem:[%s10314_s1 + $0x1a0] sm:$0xff] }
  0x12   :  { %4505 = vmatpush.bf16.msra.mxu0 %v7774_v16  ;;  %v7833_v51 = vld [vmem:[%s10314_s1 + $0x1f0] sm:$0xff]  ;;  %v7816_v53 = vld [vmem:[%s10314_s1 + $0x168] sm:$0xff]  ;;  %v7831_v59 = vld [vmem:[%s10314_s1 + $0x1e0] sm:$0xff] }
  0x13   :  { %4519 = vmatpush.bf16.msra.mxu1 %v7782_v17  ;;  %v7824_v54 = vld [vmem:[%s10314_s1 + $0x1a8] sm:$0xff]  ;;  %v7806_v60 = vld [vmem:[%s10314_s1 + $0x118] sm:$0xff]  ;;  %v7805_v0 = vld [vmem:[%s10314_s1 + $0x110] sm:$0xff] }
  0x14   :  { %4533 = vmatpush.bf16.msra.mxu2 %v7790_v18  ;;  %v7832_v55 = vld [vmem:[%s10314_s1 + $0x1e8] sm:$0xff]  ;;  %v7814_v61 = vld [vmem:[%s10314_s1 + $0x158] sm:$0xff]  ;;  %v7813_v1 = vld [vmem:[%s10314_s1 + $0x150] sm:$0xff] }
  0x15   :  { %4547 = vmatpush.bf16.msra.mxu3 %v7798_v19  ;;  %v7822_v62 = vld [vmem:[%s10314_s1 + $0x198] sm:$0xff]  ;;  %v7821_v2 = vld [vmem:[%s10314_s1 + $0x190] sm:$0xff]  ;;  %v7804_v4 = vld [vmem:[%s10314_s1 + $0x108] sm:$0xff] }
  0x16   :  { %4506 = vmatpush.bf16.msra.mxu0 %v7773_v20  ;;  %v7830_v63 = vld [vmem:[%s10314_s1 + $0x1d8] sm:$0xff]  ;;  %v7829_v3 = vld [vmem:[%s10314_s1 + $0x1d0] sm:$0xff]  ;;  %v7812_v5 = vld [vmem:[%s10314_s1 + $0x148] sm:$0xff] }
  0x17   :  { %4520 = vmatpush.bf16.msra.mxu1 %v7781_v21  ;;  %v7820_v6 = vld [vmem:[%s10314_s1 + $0x188] sm:$0xff]  ;;  %v7803_v8 = vld [vmem:[%s10314_s1 + $0x100] sm:$0xff]  ;;  %v7842_v12 = vld [vmem:[%s10314_s1 + $0x238] sm:$0xff] }
  0x18   :  { %4534 = vmatpush.bf16.msra.mxu2 %v7789_v22  ;;  %v7828_v7 = vld [vmem:[%s10314_s1 + $0x1c8] sm:$0xff]  ;;  %v7811_v9 = vld [vmem:[%s10314_s1 + $0x140] sm:$0xff]  ;;  %v7850_v13 = vld [vmem:[%s10314_s1 + $0x278] sm:$0xff] }
  0x19   :  { %4548 = vmatpush.bf16.msra.mxu3 %v7797_v23  ;;  %v7819_v10 = vld [vmem:[%s10314_s1 + $0x180] sm:$0xff]  ;;  %v5421_v14 = vld [vmem:[%s10316_s0 + $0x10] sm:$0xf]  ;;  %v5429_v16 = vld [vmem:[%s10316_s0 + $0x18] sm:$0xf] }
  0x1a   :  { %4507 = vmatpush.bf16.msra.mxu0 %v7772_v24  ;;  %v7827_v11 = vld [vmem:[%s10314_s1 + $0x1c0] sm:$0xff]  ;;  %v7741_v15 = vld [vmem:[%s10316_s0 + $0x10c] sm:$0xf0]  ;;  %v7742_v17 = vld [vmem:[%s10316_s0 + $0x114] sm:$0xf0] }
  0x1b   :  { %4521 = vmatpush.bf16.msra.mxu1 %v7780_v25  ;;  %v7709_v18 = vld [vmem:[%s10316_s0 + $0x14] sm:$0xf]  ;;  %v7710_v20 = vld [vmem:[%s10316_s0 + $0x1c] sm:$0xf]  ;;  %v5422_v24 = vor.u32 %v7741_v15, %v5421_v14  ;;  %v5430_v25 = vor.u32 %v7742_v17, %v5429_v16  ;;  %v7856_v34 = vld [vmem:[%s10314_s1 + $0x2a8] sm:$0xff] }
  0x1c   :  { %4535 = vmatpush.bf16.msra.mxu2 %v7788_v26  ;;  %v5423_v19 = vld [vmem:[%s10316_s0 + $0x110] sm:$0xf0]  ;;  %v5431_v21 = vld [vmem:[%s10316_s0 + $0x118] sm:$0xf0]  ;;  %v7864_v35 = vld [vmem:[%s10314_s1 + $0x2e8] sm:$0xff] }
  0x1d   :  { %4549 = vmatpush.bf16.msra.mxu3 %v7796_v27  ;;  %v7858_v22 = vld [vmem:[%s10314_s1 + $0x2b8] sm:$0xff]  ;;  %v5426_v26 = vor.u32 %v7709_v18, %v5423_v19  ;;  %v5434_v27 = vor.u32 %v7710_v20, %v5431_v21  ;;  %v7839_v36 = vld [vmem:[%s10314_s1 + $0x220] sm:$0xff]  ;;  %v7888_v14 = vld [vmem:[%s10314_s1 + $0x3a8] sm:$0xff] }
  0x1e   :  { %4508 = vmatpush.bf16.msra.mxu0 %v7771_v28  ;;  %v7866_v23 = vld [vmem:[%s10314_s1 + $0x2f8] sm:$0xff]  ;;  %v7841_v28 = vld [vmem:[%s10314_s1 + $0x230] sm:$0xff]  ;;  %v7847_v37 = vld [vmem:[%s10314_s1 + $0x260] sm:$0xff] }
  0x1f   :  { %4522 = vmatpush.bf16.msra.mxu1 %v7779_v29  ;;  %v7849_v29 = vld [vmem:[%s10314_s1 + $0x270] sm:$0xff]  ;;  %v7855_v38 = vld [vmem:[%s10314_s1 + $0x2a0] sm:$0xff]  ;;  %v7838_v40 = vld [vmem:[%s10314_s1 + $0x218] sm:$0xff] }
  0x20   :  { %4536 = vmatpush.bf16.msra.mxu2 %v7787_v30  ;;  %v7857_v30 = vld [vmem:[%s10314_s1 + $0x2b0] sm:$0xff]  ;;  %v7863_v39 = vld [vmem:[%s10314_s1 + $0x2e0] sm:$0xff]  ;;  %v7846_v41 = vld [vmem:[%s10314_s1 + $0x258] sm:$0xff] }
  0x21   :  { %4550 = vmatpush.bf16.msra.mxu3 %v7795_v31  ;;  %4509 = vmatmul.bf16.vlgmr.msra.gmra.mxu0 %v5406_v44  ;;  %v7865_v31 = vld [vmem:[%s10314_s1 + $0x2f0] sm:$0xff]  ;;  %v7896_v15 = vld [vmem:[%s10314_s1 + $0x3e8] sm:$0xff]  ;;  %v7871_v16 = vld [vmem:[%s10314_s1 + $0x320] sm:$0xff] }
  0x22   :  { %4557 = vmatpush.bf16.msrb.mxu0 %v7810_v32  ;;  %4523 = vmatmul.bf16.vlgmr.msra.gmra.mxu1 %v5410_v46  ;;  %v7840_v32 = vld [vmem:[%s10314_s1 + $0x228] sm:$0xff]  ;;  %v7837_v44 = vld [vmem:[%s10314_s1 + $0x210] sm:$0xff]  ;;  %v7879_v17 = vld [vmem:[%s10314_s1 + $0x360] sm:$0xff] }
  0x23   :  { %4571 = vmatpush.bf16.msrb.mxu1 %v7818_v33  ;;  %4537 = vmatmul.bf16.vlgmr.msra.gmra.mxu2 %v5414_v45  ;;  %v7848_v33 = vld [vmem:[%s10314_s1 + $0x268] sm:$0xff]  ;;  %v7845_v45 = vld [vmem:[%s10314_s1 + $0x250] sm:$0xff]  ;;  %v7887_v18 = vld [vmem:[%s10314_s1 + $0x3a0] sm:$0xff] }
  0x24   :  { %4585 = vmatpush.bf16.msrb.mxu2 %v7826_v42  ;;  %4551 = vmatmul.bf16.vlgmr.msra.gmra.mxu3 %v5418_v47  ;;  %v7854_v42 = vld [vmem:[%s10314_s1 + $0x298] sm:$0xff]  ;;  %v7853_v46 = vld [vmem:[%s10314_s1 + $0x290] sm:$0xff]  ;;  %v7895_v19 = vld [vmem:[%s10314_s1 + $0x3e0] sm:$0xff] }
  0x25   :  { %4599 = vmatpush.bf16.msrb.mxu3 %v7834_v43  ;;  %v7862_v43 = vld [vmem:[%s10314_s1 + $0x2d8] sm:$0xff]  ;;  %v7861_v47 = vld [vmem:[%s10314_s1 + $0x2d0] sm:$0xff] }
  0x26   :  { %4558 = vmatpush.bf16.msrb.mxu0 %v7809_v48  ;;  %v7836_v48 = vld [vmem:[%s10314_s1 + $0x208] sm:$0xff]  ;;  %v7870_v20 = vld [vmem:[%s10314_s1 + $0x318] sm:$0xff] }
  0x27   :  { %4572 = vmatpush.bf16.msrb.mxu1 %v7817_v49  ;;  %v7844_v49 = vld [vmem:[%s10314_s1 + $0x248] sm:$0xff]  ;;  %v7878_v21 = vld [vmem:[%s10314_s1 + $0x358] sm:$0xff] }
  0x28   :  { %4586 = vmatpush.bf16.msrb.mxu2 %v7825_v50  ;;  %v7852_v50 = vld [vmem:[%s10314_s1 + $0x288] sm:$0xff] }
  0x29   :  { %4600 = vmatpush.bf16.msrb.mxu3 %v7833_v51  ;;  %v7860_v51 = vld [vmem:[%s10314_s1 + $0x2c8] sm:$0xff] }
  0x2a   :  { %4559 = vmatpush.bf16.msrb.mxu0 %v7808_v52  ;;  %v7835_v52 = vld [vmem:[%s10314_s1 + $0x200] sm:$0xff] }
  0x2b   :  { %4573 = vmatpush.bf16.msrb.mxu1 %v7816_v53  ;;  %v7843_v53 = vld [vmem:[%s10314_s1 + $0x240] sm:$0xff] }
  0x2c   :  { %4587 = vmatpush.bf16.msrb.mxu2 %v7824_v54  ;;  %v7851_v54 = vld [vmem:[%s10314_s1 + $0x280] sm:$0xff] }
  0x2d   :  { %4601 = vmatpush.bf16.msrb.mxu3 %v7832_v55  ;;  %v7859_v55 = vld [vmem:[%s10314_s1 + $0x2c0] sm:$0xff] }
  0x2e   :  { %4560 = vmatpush.bf16.msrb.mxu0 %v7807_v56  ;;  %v7874_v56 = vld [vmem:[%s10314_s1 + $0x338] sm:$0xff] }
  0x2f   :  { %4574 = vmatpush.bf16.msrb.mxu1 %v7815_v57  ;;  %v7882_v57 = vld [vmem:[%s10314_s1 + $0x378] sm:$0xff] }
  0x30   :  { %4588 = vmatpush.bf16.msrb.mxu2 %v7823_v58  ;;  %v5437_v58 = vld [vmem:[%s10316_s0 + $0x20] sm:$0xf] }
  0x31   :  { %4602 = vmatpush.bf16.msrb.mxu3 %v7831_v59  ;;  %v7743_v59 = vld [vmem:[%s10316_s0 + $0x11c] sm:$0xf0] }
  0x32   :  { %4561 = vmatpush.bf16.msrb.mxu0 %v7806_v60  ;;  %v5445_v60 = vld [vmem:[%s10316_s0 + $0x28] sm:$0xf] }
  0x33   :  { %4575 = vmatpush.bf16.msrb.mxu1 %v7814_v61  ;;  %v7744_v61 = vld [vmem:[%s10316_s0 + $0x124] sm:$0xf0] }
  0x34   :  { %4589 = vmatpush.bf16.msrb.mxu2 %v7822_v62  ;;  %v7711_v62 = vld [vmem:[%s10316_s0 + $0x24] sm:$0xf] }
  0x35   :  { %4603 = vmatpush.bf16.msrb.mxu3 %v7830_v63  ;;  %v5439_v63 = vld [vmem:[%s10316_s0 + $0x120] sm:$0xf0] }
  0x36   :  { %4562 = vmatpush.bf16.msrb.mxu0 %v7805_v0  ;;  %v7712_v0 = vld [vmem:[%s10316_s0 + $0x2c] sm:$0xf] }
  0x37   :  { %4576 = vmatpush.bf16.msrb.mxu1 %v7813_v1  ;;  %v5447_v1 = vld [vmem:[%s10316_s0 + $0x128] sm:$0xf0] }
  0x38   :  { %4590 = vmatpush.bf16.msrb.mxu2 %v7821_v2  ;;  %v7890_v2 = vld [vmem:[%s10314_s1 + $0x3b8] sm:$0xff] }
  0x39   :  { %4604 = vmatpush.bf16.msrb.mxu3 %v7829_v3  ;;  %v7898_v3 = vld [vmem:[%s10314_s1 + $0x3f8] sm:$0xff] }
  0x3a   :  { %4563 = vmatpush.bf16.msrb.mxu0 %v7804_v4  ;;  %v5438_v4 = vor.u32 %v7743_v59, %v5437_v58  ;;  %v7920_v58 = vld [vmem:[%s10314_s1 + $0x4a8] sm:$0xff] }
  0x3b   :  { %4577 = vmatpush.bf16.msrb.mxu1 %v7812_v5  ;;  %v5446_v5 = vor.u32 %v7744_v61, %v5445_v60  ;;  %v7928_v59 = vld [vmem:[%s10314_s1 + $0x4e8] sm:$0xff]  ;;  %v7903_v60 = vld [vmem:[%s10314_s1 + $0x420] sm:$0xff] }
  0x3c   :  { %4591 = vmatpush.bf16.msrb.mxu2 %v7820_v6  ;;  %v5442_v6 = vor.u32 %v7711_v62, %v5439_v63  ;;  %v7911_v61 = vld [vmem:[%s10314_s1 + $0x460] sm:$0xff] }
  0x3d   :  { %4605 = vmatpush.bf16.msrb.mxu3 %v7828_v7  ;;  %v5450_v7 = vor.u32 %v7712_v0, %v5447_v1  ;;  %v7919_v62 = vld [vmem:[%s10314_s1 + $0x4a0] sm:$0xff]  ;;  %v7902_v0 = vld [vmem:[%s10314_s1 + $0x418] sm:$0xff] }
  0x3e   :  { %4564 = vmatpush.bf16.msrb.mxu0 %v7803_v8  ;;  %v7873_v8 = vld [vmem:[%s10314_s1 + $0x330] sm:$0xff]  ;;  %v7927_v63 = vld [vmem:[%s10314_s1 + $0x4e0] sm:$0xff]  ;;  %v7910_v1 = vld [vmem:[%s10314_s1 + $0x458] sm:$0xff] }
  0x3f   :  { %4578 = vmatpush.bf16.msrb.mxu1 %v7811_v9  ;;  %v7881_v9 = vld [vmem:[%s10314_s1 + $0x370] sm:$0xff] }
  0x40   :  { %4592 = vmatpush.bf16.msrb.mxu2 %v7819_v10  ;;  %v7889_v10 = vld [vmem:[%s10314_s1 + $0x3b0] sm:$0xff] }
  0x41   :  { %4606 = vmatpush.bf16.msrb.mxu3 %v7827_v11  ;;  %4565 = vmatmul.bf16.vlgmr.msrb.gmra.mxu0 %v5422_v24  ;;  %v7897_v11 = vld [vmem:[%s10314_s1 + $0x3f0] sm:$0xff] }
  0x42   :  { %4613 = vmatpush.bf16.msra.mxu0 %v7842_v12  ;;  %4579 = vmatmul.bf16.vlgmr.msrb.gmra.mxu1 %v5426_v26  ;;  %v7872_v12 = vld [vmem:[%s10314_s1 + $0x328] sm:$0xff]  ;;  %v7869_v24 = vld [vmem:[%s10314_s1 + $0x310] sm:$0xff] }
  0x43   :  { %4627 = vmatpush.bf16.msra.mxu1 %v7850_v13  ;;  %4593 = vmatmul.bf16.vlgmr.msrb.gmra.mxu2 %v5430_v25  ;;  %v7880_v13 = vld [vmem:[%s10314_s1 + $0x368] sm:$0xff]  ;;  %v7877_v25 = vld [vmem:[%s10314_s1 + $0x350] sm:$0xff] }
  0x44   :  { %4641 = vmatpush.bf16.msra.mxu2 %v7858_v22  ;;  %4607 = vmatmul.bf16.vlgmr.msrb.gmra.mxu3 %v5434_v27  ;;  %v7886_v22 = vld [vmem:[%s10314_s1 + $0x398] sm:$0xff]  ;;  %v7885_v26 = vld [vmem:[%s10314_s1 + $0x390] sm:$0xff] }
  0x45   :  { %4655 = vmatpush.bf16.msra.mxu3 %v7866_v23  ;;  %v7894_v23 = vld [vmem:[%s10314_s1 + $0x3d8] sm:$0xff]  ;;  %v7893_v27 = vld [vmem:[%s10314_s1 + $0x3d0] sm:$0xff] }
  0x46   :  { %4614 = vmatpush.bf16.msra.mxu0 %v7841_v28  ;;  %v7868_v28 = vld [vmem:[%s10314_s1 + $0x308] sm:$0xff] }
  0x47   :  { %4628 = vmatpush.bf16.msra.mxu1 %v7849_v29  ;;  %v7876_v29 = vld [vmem:[%s10314_s1 + $0x348] sm:$0xff] }
  0x48   :  { %4642 = vmatpush.bf16.msra.mxu2 %v7857_v30  ;;  %v7884_v30 = vld [vmem:[%s10314_s1 + $0x388] sm:$0xff] }
  0x49   :  { %4656 = vmatpush.bf16.msra.mxu3 %v7865_v31  ;;  %v7892_v31 = vld [vmem:[%s10314_s1 + $0x3c8] sm:$0xff] }
  0x4a   :  { %4615 = vmatpush.bf16.msra.mxu0 %v7840_v32  ;;  %v7867_v32 = vld [vmem:[%s10314_s1 + $0x300] sm:$0xff] }
  0x4b   :  { %4629 = vmatpush.bf16.msra.mxu1 %v7848_v33  ;;  %v7875_v33 = vld [vmem:[%s10314_s1 + $0x340] sm:$0xff] }
  0x4c   :  { %4643 = vmatpush.bf16.msra.mxu2 %v7856_v34  ;;  %v7883_v34 = vld [vmem:[%s10314_s1 + $0x380] sm:$0xff] }
  0x4d   :  { %4657 = vmatpush.bf16.msra.mxu3 %v7864_v35  ;;  %v7891_v35 = vld [vmem:[%s10314_s1 + $0x3c0] sm:$0xff] }
  0x4e   :  { %4616 = vmatpush.bf16.msra.mxu0 %v7839_v36  ;;  %v7906_v36 = vld [vmem:[%s10314_s1 + $0x438] sm:$0xff] }
  0x4f   :  { %4630 = vmatpush.bf16.msra.mxu1 %v7847_v37  ;;  %v7914_v37 = vld [vmem:[%s10314_s1 + $0x478] sm:$0xff] }
  0x50   :  { %4644 = vmatpush.bf16.msra.mxu2 %v7855_v38  ;;  %v5453_v38 = vld [vmem:[%s10316_s0 + $0x30] sm:$0xf] }
  0x51   :  { %4658 = vmatpush.bf16.msra.mxu3 %v7863_v39  ;;  %v7745_v39 = vld [vmem:[%s10316_s0 + $0x12c] sm:$0xf0] }
  0x52   :  { %4617 = vmatpush.bf16.msra.mxu0 %v7838_v40  ;;  %v5461_v40 = vld [vmem:[%s10316_s0 + $0x38] sm:$0xf] }
  0x53   :  { %4631 = vmatpush.bf16.msra.mxu1 %v7846_v41  ;;  %v7746_v41 = vld [vmem:[%s10316_s0 + $0x134] sm:$0xf0] }
  0x54   :  { %4645 = vmatpush.bf16.msra.mxu2 %v7854_v42  ;;  %v7713_v42 = vld [vmem:[%s10316_s0 + $0x34] sm:$0xf] }
  0x55   :  { %4659 = vmatpush.bf16.msra.mxu3 %v7862_v43  ;;  %v5455_v43 = vld [vmem:[%s10316_s0 + $0x130] sm:$0xf0] }
  0x56   :  { %4618 = vmatpush.bf16.msra.mxu0 %v7837_v44  ;;  %v7714_v44 = vld [vmem:[%s10316_s0 + $0x3c] sm:$0xf] }
  0x57   :  { %4632 = vmatpush.bf16.msra.mxu1 %v7845_v45  ;;  %v5463_v45 = vld [vmem:[%s10316_s0 + $0x138] sm:$0xf0] }
  0x58   :  { %4646 = vmatpush.bf16.msra.mxu2 %v7853_v46  ;;  %v7922_v46 = vld [vmem:[%s10314_s1 + $0x4b8] sm:$0xff] }
  0x59   :  { %4660 = vmatpush.bf16.msra.mxu3 %v7861_v47  ;;  %v7930_v47 = vld [vmem:[%s10314_s1 + $0x4f8] sm:$0xff] }
  0x5a   :  { %4619 = vmatpush.bf16.msra.mxu0 %v7836_v48  ;;  %v5454_v48 = vor.u32 %v7745_v39, %v5453_v38  ;;  %v8942_v38 = vld [vmem:[%s10317_s2] ss:$0 sm:$0xff]  ;;  %v7952_v39 = vld [vmem:[%s10314_s1 + $0x5a8] sm:$0xff] }
  0x5b   :  { %4633 = vmatpush.bf16.msra.mxu1 %v7844_v49  ;;  %v5462_v49 = vor.u32 %v7746_v41, %v5461_v40  ;;  %v7960_v40 = vld [vmem:[%s10314_s1 + $0x5e8] sm:$0xff] }
  0x5c   :  { %4647 = vmatpush.bf16.msra.mxu2 %v7852_v50  ;;  %v5458_v50 = vor.u32 %v7713_v42, %v5455_v43  ;;  %v7935_v42 = vld [vmem:[%s10314_s1 + $0x520] sm:$0xff] }
  0x5d   :  { %4661 = vmatpush.bf16.msra.mxu3 %v7860_v51  ;;  %v5466_v51 = vor.u32 %v7714_v44, %v5463_v45  ;;  %v7943_v43 = vld [vmem:[%s10314_s1 + $0x560] sm:$0xff] }
  0x5e   :  { %4620 = vmatpush.bf16.msra.mxu0 %v7835_v52  ;;  %v7905_v52 = vld [vmem:[%s10314_s1 + $0x430] sm:$0xff]  ;;  %v7951_v45 = vld [vmem:[%s10314_s1 + $0x5a0] sm:$0xff] }
  0x5f   :  { %4634 = vmatpush.bf16.msra.mxu1 %v7843_v53  ;;  %v7913_v53 = vld [vmem:[%s10314_s1 + $0x470] sm:$0xff] }
  0x60   :  { %4648 = vmatpush.bf16.msra.mxu2 %v7851_v54  ;;  %v7921_v54 = vld [vmem:[%s10314_s1 + $0x4b0] sm:$0xff] }
  0x61   :  { %4662 = vmatpush.bf16.msra.mxu3 %v7859_v55  ;;  %4621 = vmatmul.bf16.vlgmr.msra.gmra.mxu0 %v5438_v4  ;;  %v7929_v55 = vld [vmem:[%s10314_s1 + $0x4f0] sm:$0xff] }
  0x62   :  { %4669 = vmatpush.bf16.msrb.mxu0 %v7874_v56  ;;  %4635 = vmatmul.bf16.vlgmr.msra.gmra.mxu1 %v5442_v6  ;;  %v7904_v56 = vld [vmem:[%s10314_s1 + $0x428] sm:$0xff]  ;;  %v7901_v4 = vld [vmem:[%s10314_s1 + $0x410] sm:$0xff] }
  0x63   :  { %4683 = vmatpush.bf16.msrb.mxu1 %v7882_v57  ;;  %4649 = vmatmul.bf16.vlgmr.msra.gmra.mxu2 %v5446_v5  ;;  %v7912_v57 = vld [vmem:[%s10314_s1 + $0x468] sm:$0xff]  ;;  %v7909_v5 = vld [vmem:[%s10314_s1 + $0x450] sm:$0xff] }
  0x64   :  { %4697 = vmatpush.bf16.msrb.mxu2 %v7890_v2  ;;  %4663 = vmatmul.bf16.vlgmr.msra.gmra.mxu3 %v5450_v7  ;;  %v7918_v2 = vld [vmem:[%s10314_s1 + $0x498] sm:$0xff]  ;;  %v7917_v6 = vld [vmem:[%s10314_s1 + $0x490] sm:$0xff] }
  0x65   :  { %4711 = vmatpush.bf16.msrb.mxu3 %v7898_v3  ;;  %v7926_v3 = vld [vmem:[%s10314_s1 + $0x4d8] sm:$0xff]  ;;  %v7925_v7 = vld [vmem:[%s10314_s1 + $0x4d0] sm:$0xff] }
  0x66   :  { %4670 = vmatpush.bf16.msrb.mxu0 %v7873_v8  ;;  %v7900_v8 = vld [vmem:[%s10314_s1 + $0x408] sm:$0xff] }
  0x67   :  { %4684 = vmatpush.bf16.msrb.mxu1 %v7881_v9  ;;  %v7908_v9 = vld [vmem:[%s10314_s1 + $0x448] sm:$0xff] }
  0x68   :  { %4698 = vmatpush.bf16.msrb.mxu2 %v7889_v10  ;;  %v7916_v10 = vld [vmem:[%s10314_s1 + $0x488] sm:$0xff] }
  0x69   :  { %4712 = vmatpush.bf16.msrb.mxu3 %v7897_v11  ;;  %v7924_v11 = vld [vmem:[%s10314_s1 + $0x4c8] sm:$0xff] }
  0x6a   :  { %4671 = vmatpush.bf16.msrb.mxu0 %v7872_v12  ;;  %v7899_v12 = vld [vmem:[%s10314_s1 + $0x400] sm:$0xff] }
  0x6b   :  { %4685 = vmatpush.bf16.msrb.mxu1 %v7880_v13  ;;  %v7907_v13 = vld [vmem:[%s10314_s1 + $0x440] sm:$0xff] }
  0x6c   :  { %4699 = vmatpush.bf16.msrb.mxu2 %v7888_v14  ;;  %v7915_v14 = vld [vmem:[%s10314_s1 + $0x480] sm:$0xff] }
  0x6d   :  { %4713 = vmatpush.bf16.msrb.mxu3 %v7896_v15  ;;  %v7923_v15 = vld [vmem:[%s10314_s1 + $0x4c0] sm:$0xff] }
  0x6e   :  { %4672 = vmatpush.bf16.msrb.mxu0 %v7871_v16  ;;  %v7938_v16 = vld [vmem:[%s10314_s1 + $0x538] sm:$0xff] }
  0x6f   :  { %4686 = vmatpush.bf16.msrb.mxu1 %v7879_v17  ;;  %v7946_v17 = vld [vmem:[%s10314_s1 + $0x578] sm:$0xff] }
  0x70   :  { %4700 = vmatpush.bf16.msrb.mxu2 %v7887_v18  ;;  %v5469_v18 = vld [vmem:[%s10316_s0 + $0x40] sm:$0xf] }
  0x71   :  { %4714 = vmatpush.bf16.msrb.mxu3 %v7895_v19  ;;  %v7747_v19 = vld [vmem:[%s10316_s0 + $0x13c] sm:$0xf0] }
  0x72   :  { %4673 = vmatpush.bf16.msrb.mxu0 %v7870_v20  ;;  %v5477_v20 = vld [vmem:[%s10316_s0 + $0x48] sm:$0xf] }
  0x73   :  { %4687 = vmatpush.bf16.msrb.mxu1 %v7878_v21  ;;  %v7748_v21 = vld [vmem:[%s10316_s0 + $0x144] sm:$0xf0] }
  0x74   :  { %4701 = vmatpush.bf16.msrb.mxu2 %v7886_v22  ;;  %v7715_v22 = vld [vmem:[%s10316_s0 + $0x44] sm:$0xf] }
  0x75   :  { %4715 = vmatpush.bf16.msrb.mxu3 %v7894_v23  ;;  %v5471_v23 = vld [vmem:[%s10316_s0 + $0x140] sm:$0xf0] }
  0x76   :  { %4674 = vmatpush.bf16.msrb.mxu0 %v7869_v24  ;;  %v7716_v24 = vld [vmem:[%s10316_s0 + $0x4c] sm:$0xf] }
  0x77   :  { %4688 = vmatpush.bf16.msrb.mxu1 %v7877_v25  ;;  %v5479_v25 = vld [vmem:[%s10316_s0 + $0x148] sm:$0xf0] }
  0x78   :  { %4702 = vmatpush.bf16.msrb.mxu2 %v7885_v26  ;;  %v7954_v26 = vld [vmem:[%s10314_s1 + $0x5b8] sm:$0xff] }
  0x79   :  { %4716 = vmatpush.bf16.msrb.mxu3 %v7893_v27  ;;  %v7962_v27 = vld [vmem:[%s10314_s1 + $0x5f8] sm:$0xff] }
  0x7a   :  { %4675 = vmatpush.bf16.msrb.mxu0 %v7868_v28  ;;  %v5470_v28 = vor.u32 %v7747_v19, %v5469_v18 }
  0x7b   :  { %4689 = vmatpush.bf16.msrb.mxu1 %v7876_v29  ;;  %v5478_v29 = vor.u32 %v7748_v21, %v5477_v20 }
  0x7c   :  { %4703 = vmatpush.bf16.msrb.mxu2 %v7884_v30  ;;  %v5474_v30 = vor.u32 %v7715_v22, %v5471_v23  ;;  %v7969_v23 = vld [vmem:[%s10314_s1 + $0x630] sm:$0xff] }
  0x7d   :  { %4717 = vmatpush.bf16.msrb.mxu3 %v7892_v31  ;;  %v5482_v31 = vor.u32 %v7716_v24, %v5479_v25  ;;  %v7977_v24 = vld [vmem:[%s10314_s1 + $0x670] sm:$0xff] }
  0x7e   :  { %4676 = vmatpush.bf16.msrb.mxu0 %v7867_v32  ;;  %v7937_v32 = vld [vmem:[%s10314_s1 + $0x530] sm:$0xff] }
  0x7f   :  { %4690 = vmatpush.bf16.msrb.mxu1 %v7875_v33  ;;  %v7945_v33 = vld [vmem:[%s10314_s1 + $0x570] sm:$0xff] }
  0x80   :  { %4704 = vmatpush.bf16.msrb.mxu2 %v7883_v34  ;;  %v7953_v34 = vld [vmem:[%s10314_s1 + $0x5b0] sm:$0xff] }
  0x81   :  { %4718 = vmatpush.bf16.msrb.mxu3 %v7891_v35  ;;  %4677 = vmatmul.bf16.vlgmr.msrb.gmra.mxu0 %v5454_v48  ;;  %v7961_v35 = vld [vmem:[%s10314_s1 + $0x5f0] sm:$0xff] }
  0x82   :  { %4725 = vmatpush.bf16.msra.mxu0 %v7906_v36  ;;  %4691 = vmatmul.bf16.vlgmr.msrb.gmra.mxu1 %v5458_v50  ;;  %v7936_v36 = vld [vmem:[%s10314_s1 + $0x528] sm:$0xff]  ;;  %v7942_v50 = vld [vmem:[%s10314_s1 + $0x558] sm:$0xff]  ;;  %v7985_v25 = vld [vmem:[%s10314_s1 + $0x6b0] sm:$0xff] }
  0x83   :  { %4739 = vmatpush.bf16.msra.mxu1 %v7914_v37  ;;  %4705 = vmatmul.bf16.vlgmr.msrb.gmra.mxu2 %v5462_v49  ;;  %v7944_v37 = vld [vmem:[%s10314_s1 + $0x568] sm:$0xff]  ;;  %v7934_v49 = vld [vmem:[%s10314_s1 + $0x518] sm:$0xff] }
  0x84   :  { %4753 = vmatpush.bf16.msra.mxu2 %v7922_v46  ;;  %4719 = vmatmul.bf16.vlgmr.msrb.gmra.mxu3 %v5466_v51  ;;  %v7959_v46 = vld [vmem:[%s10314_s1 + $0x5e0] sm:$0xff]  ;;  %v7950_v51 = vld [vmem:[%s10314_s1 + $0x598] sm:$0xff] }
  0x85   :  { %4767 = vmatpush.bf16.msra.mxu3 %v7930_v47 }
  0x86   :  { %4726 = vmatpush.bf16.msra.mxu0 %v7905_v52  ;;  %v7958_v52 = vld [vmem:[%s10314_s1 + $0x5d8] sm:$0xff] }
  0x87   :  { %4740 = vmatpush.bf16.msra.mxu1 %v7913_v53 }
  0x88   :  { %4754 = vmatpush.bf16.msra.mxu2 %v7921_v54 }
  0x89   :  { %4768 = vmatpush.bf16.msra.mxu3 %v7929_v55 }
  0x8a   :  { %4727 = vmatpush.bf16.msra.mxu0 %v7904_v56  ;;  %v7933_v56 = vld [vmem:[%s10314_s1 + $0x510] sm:$0xff] }
  0x8b   :  { %4741 = vmatpush.bf16.msra.mxu1 %v7912_v57  ;;  %v7941_v57 = vld [vmem:[%s10314_s1 + $0x550] sm:$0xff] }
  0x8c   :  { %4755 = vmatpush.bf16.msra.mxu2 %v7920_v58 }
  0x8d   :  { %4769 = vmatpush.bf16.msra.mxu3 %v7928_v59  ;;  %v7949_v59 = vld [vmem:[%s10314_s1 + $0x590] sm:$0xff] }
  0x8e   :  { %4728 = vmatpush.bf16.msra.mxu0 %v7903_v60  ;;  %v7957_v60 = vld [vmem:[%s10314_s1 + $0x5d0] sm:$0xff] }
  0x8f   :  { %4742 = vmatpush.bf16.msra.mxu1 %v7911_v61  ;;  %v7932_v61 = vld [vmem:[%s10314_s1 + $0x508] sm:$0xff] }
  0x90   :  { %4756 = vmatpush.bf16.msra.mxu2 %v7919_v62  ;;  %v7940_v62 = vld [vmem:[%s10314_s1 + $0x548] sm:$0xff] }
  0x91   :  { %4770 = vmatpush.bf16.msra.mxu3 %v7927_v63  ;;  %v7948_v63 = vld [vmem:[%s10314_s1 + $0x588] sm:$0xff] }
  0x92   :  { %4729 = vmatpush.bf16.msra.mxu0 %v7902_v0  ;;  %v7956_v0 = vld [vmem:[%s10314_s1 + $0x5c8] sm:$0xff] }
  0x93   :  { %4743 = vmatpush.bf16.msra.mxu1 %v7910_v1  ;;  %v7931_v1 = vld [vmem:[%s10314_s1 + $0x500] sm:$0xff] }
  0x94   :  { %4757 = vmatpush.bf16.msra.mxu2 %v7918_v2  ;;  %v7939_v2 = vld [vmem:[%s10314_s1 + $0x540] sm:$0xff] }
  0x95   :  { %4771 = vmatpush.bf16.msra.mxu3 %v7926_v3  ;;  %v7947_v3 = vld [vmem:[%s10314_s1 + $0x580] sm:$0xff] }
  0x96   :  { %4730 = vmatpush.bf16.msra.mxu0 %v7901_v4  ;;  %v7955_v4 = vld [vmem:[%s10314_s1 + $0x5c0] sm:$0xff] }
  0x97   :  { %4744 = vmatpush.bf16.msra.mxu1 %v7909_v5  ;;  %v7970_v5 = vld [vmem:[%s10314_s1 + $0x638] sm:$0xff] }
  0x98   :  { %4758 = vmatpush.bf16.msra.mxu2 %v7917_v6  ;;  %v7978_v6 = vld [vmem:[%s10314_s1 + $0x678] sm:$0xff] }
  0x99   :  { %4772 = vmatpush.bf16.msra.mxu3 %v7925_v7  ;;  %v5485_v7 = vld [vmem:[%s10316_s0 + $0x50] sm:$0xf] }
  0x9a   :  { %4731 = vmatpush.bf16.msra.mxu0 %v7900_v8  ;;  %v7749_v8 = vld [vmem:[%s10316_s0 + $0x14c] sm:$0xf0] }
  0x9b   :  { %4745 = vmatpush.bf16.msra.mxu1 %v7908_v9  ;;  %v5493_v9 = vld [vmem:[%s10316_s0 + $0x58] sm:$0xf]  ;;  %v5486_v18 = vor.u32 %v7749_v8, %v5485_v7  ;;  %v5511_v7 = vld [vmem:[%s10316_s0 + $0x168] sm:$0xf0] }
  0x9c   :  { %4759 = vmatpush.bf16.msra.mxu2 %v7916_v10  ;;  %v7750_v10 = vld [vmem:[%s10316_s0 + $0x154] sm:$0xf0] }
  0x9d   :  { %4773 = vmatpush.bf16.msra.mxu3 %v7924_v11  ;;  %v7717_v11 = vld [vmem:[%s10316_s0 + $0x54] sm:$0xf]  ;;  %v5494_v19 = vor.u32 %v7750_v10, %v5493_v9  ;;  %v8018_v8 = vld [vmem:[%s10314_s1 + $0x7b8] sm:$0xff] }
  0x9e   :  { %4732 = vmatpush.bf16.msra.mxu0 %v7899_v12  ;;  %v4510_v41 = vpop.f32.mrf.mxu0  ;;  %v5487_v12 = vld [vmem:[%s10316_s0 + $0x150] sm:$0xf0]  ;;  %v8026_v9 = vld [vmem:[%s10314_s1 + $0x7f8] sm:$0xff] }
  0x9f   :  { %4746 = vmatpush.bf16.msra.mxu1 %v7907_v13  ;;  %v4511_v44 = vadd.f32 %v8942_v38, %v4510_v41  ;;  %v4524_v47 = vpop.f32.mrf.mxu1  ;;  %v7718_v13 = vld [vmem:[%s10316_s0 + $0x5c] sm:$0xf]  ;;  %v5490_v20 = vor.u32 %v7717_v11, %v5487_v12 }
  0xa0   :  { %4760 = vmatpush.bf16.msra.mxu2 %v7915_v14  ;;  %v5495_v14 = vld [vmem:[%s10316_s0 + $0x158] sm:$0xf0] }
  0xa1   :  { %4774 = vmatpush.bf16.msra.mxu3 %v7923_v15  ;;  %4733 = vmatmul.bf16.vlgmr.msra.gmra.mxu0 %v5470_v28  ;;  %v4525_v48 = vadd.f32 %v4524_v47, %v4511_v44  ;;  %v7986_v15 = vld [vmem:[%s10314_s1 + $0x6b8] sm:$0xff]  ;;  %v5498_v21 = vor.u32 %v7718_v13, %v5495_v14  ;;  %v7968_v28 = vld [vmem:[%s10314_s1 + $0x628] sm:$0xff] }
  0xa2   :  { %4781 = vmatpush.bf16.msrb.mxu0 %v7938_v16  ;;  %4747 = vmatmul.bf16.vlgmr.msra.gmra.mxu1 %v5474_v30  ;;  %v7994_v16 = vld [vmem:[%s10314_s1 + $0x6f8] sm:$0xff]  ;;  %v7984_v30 = vld [vmem:[%s10314_s1 + $0x6a8] sm:$0xff] }
  0xa3   :  { %4795 = vmatpush.bf16.msrb.mxu1 %v7946_v17  ;;  %4761 = vmatmul.bf16.vlgmr.msra.gmra.mxu2 %v5478_v29  ;;  %v7976_v29 = vld [vmem:[%s10314_s1 + $0x668] sm:$0xff]  ;;  %v7982_v44 = vld [vmem:[%s10314_s1 + $0x698] sm:$0xff] }
  0xa4   :  { %4809 = vmatpush.bf16.msrb.mxu2 %v7954_v26  ;;  %4775 = vmatmul.bf16.vlgmr.msra.gmra.mxu3 %v5482_v31  ;;  %v7993_v26 = vld [vmem:[%s10314_s1 + $0x6f0] sm:$0xff]  ;;  %v7992_v31 = vld [vmem:[%s10314_s1 + $0x6e8] sm:$0xff] }
  0xa5   :  { %4823 = vmatpush.bf16.msrb.mxu3 %v7962_v27 }
  0xa6   :  { %4782 = vmatpush.bf16.msrb.mxu0 %v7937_v32  ;;  %v4538_v53 = vpop.f32.mrf.mxu2  ;;  %v9049_v17 = vpop.f32.mrf.mxu0 }
  0xa7   :  { %4796 = vmatpush.bf16.msrb.mxu1 %v7945_v33  ;;  %v4539_v54 = vadd.f32 %v4538_v53, %v4525_v48  ;;  %v4552_v55 = vpop.f32.mrf.mxu3  ;;  %v9051_v22 = vpop.f32.mrf.mxu1  ;;  %v7989_v53 = vld [vmem:[%s10314_s1 + $0x6d0] sm:$0xff] }
  0xa8   :  { %4810 = vmatpush.bf16.msrb.mxu2 %v7953_v34 }
  0xa9   :  { %4824 = vmatpush.bf16.msrb.mxu3 %v7961_v35  ;;  %v8981_v58 = vadd.f32 %v4552_v55, %v4539_v54  ;;  %v7967_v35 = vld [vmem:[%s10314_s1 + $0x620] sm:$0xff]  ;;  %v7964_v54 = vld [vmem:[%s10314_s1 + $0x608] sm:$0xff] }
  0xaa   :  { %4783 = vmatpush.bf16.msrb.mxu0 %v7936_v36  ;;  %v7975_v36 = vld [vmem:[%s10314_s1 + $0x660] sm:$0xff]  ;;  %v7972_v55 = vld [vmem:[%s10314_s1 + $0x648] sm:$0xff] }
  0xab   :  { %4797 = vmatpush.bf16.msrb.mxu1 %v7944_v37  ;;  %v7983_v37 = vld [vmem:[%s10314_s1 + $0x6a0] sm:$0xff] }
  0xac   :  { %4811 = vmatpush.bf16.msrb.mxu2 %v7952_v39  ;;  %v7991_v39 = vld [vmem:[%s10314_s1 + $0x6e0] sm:$0xff] }
  0xad   :  { %4825 = vmatpush.bf16.msrb.mxu3 %v7960_v40 }
  0xae   :  { %4784 = vmatpush.bf16.msrb.mxu0 %v7935_v42  ;;  %v9065_v27 = vpop.f32.mrf.mxu2  ;;  %v7966_v42 = vld [vmem:[%s10314_s1 + $0x618] sm:$0xff] }
  0xaf   :  { %4798 = vmatpush.bf16.msrb.mxu1 %v7943_v43  ;;  %v9079_v32 = vpop.f32.mrf.mxu3  ;;  %v7974_v43 = vld [vmem:[%s10314_s1 + $0x658] sm:$0xff] }
  0xb0   :  { %4812 = vmatpush.bf16.msrb.mxu2 %v7951_v45  ;;  %v7990_v45 = vld [vmem:[%s10314_s1 + $0x6d8] sm:$0xff] }
  0xb1   :  { %4826 = vmatpush.bf16.msrb.mxu3 %v7959_v46 }
  0xb2   :  { %4785 = vmatpush.bf16.msrb.mxu0 %v7934_v49 }
  0xb3   :  { %4799 = vmatpush.bf16.msrb.mxu1 %v7942_v50  ;;  %v7965_v50 = vld [vmem:[%s10314_s1 + $0x610] sm:$0xff] }
  0xb4   :  { %4813 = vmatpush.bf16.msrb.mxu2 %v7950_v51  ;;  %v7973_v51 = vld [vmem:[%s10314_s1 + $0x650] sm:$0xff] }
  0xb5   :  { %4827 = vmatpush.bf16.msrb.mxu3 %v7958_v52  ;;  %v7981_v52 = vld [vmem:[%s10314_s1 + $0x690] sm:$0xff] }
  0xb6   :  { %4786 = vmatpush.bf16.msrb.mxu0 %v7933_v56  ;;  %v7980_v56 = vld [vmem:[%s10314_s1 + $0x688] sm:$0xff] }
  0xb7   :  { %4800 = vmatpush.bf16.msrb.mxu1 %v7941_v57  ;;  %v7988_v57 = vld [vmem:[%s10314_s1 + $0x6c8] sm:$0xff] }
  0xb8   :  { %4814 = vmatpush.bf16.msrb.mxu2 %v7949_v59  ;;  %v7971_v59 = vld [vmem:[%s10314_s1 + $0x640] sm:$0xff] }
  0xb9   :  { %4828 = vmatpush.bf16.msrb.mxu3 %v7957_v60  ;;  %v7979_v60 = vld [vmem:[%s10314_s1 + $0x680] sm:$0xff] }
  0xba   :  { %4787 = vmatpush.bf16.msrb.mxu0 %v7932_v61  ;;  %v7987_v61 = vld [vmem:[%s10314_s1 + $0x6c0] sm:$0xff] }
  0xbb   :  { %4801 = vmatpush.bf16.msrb.mxu1 %v7940_v62  ;;  %v8002_v62 = vld [vmem:[%s10314_s1 + $0x738] sm:$0xff] }
  0xbc   :  { %4815 = vmatpush.bf16.msrb.mxu2 %v7948_v63  ;;  %v8010_v63 = vld [vmem:[%s10314_s1 + $0x778] sm:$0xff] }
  0xbd   :  { %4829 = vmatpush.bf16.msrb.mxu3 %v7956_v0  ;;  %v5501_v0 = vld [vmem:[%s10316_s0 + $0x60] sm:$0xf] }
  0xbe   :  { %4788 = vmatpush.bf16.msrb.mxu0 %v7931_v1  ;;  %v4566_v33 = vpop.f32.mrf.mxu0  ;;  %v7751_v1 = vld [vmem:[%s10316_s0 + $0x15c] sm:$0xf0] }
  0xbf   :  { %4802 = vmatpush.bf16.msrb.mxu1 %v7939_v2  ;;  %v4567_v34 = vadd.f32 %v4566_v33, %v8981_v58  ;;  %v4580_v40 = vpop.f32.mrf.mxu1  ;;  %v7963_v58 = vld [vmem:[%s10314_s1 + $0x600] sm:$0xff]  ;;  %v5509_v2 = vld [vmem:[%s10316_s0 + $0x68] sm:$0xf]  ;;  %v5502_v10 = vor.u32 %v7751_v1, %v5501_v0  ;;  %v7721_v0 = vld [vmem:[%s10316_s0 + $0x74] sm:$0xf] }
  0xc0   :  { %4816 = vmatpush.bf16.msrb.mxu2 %v7947_v3  ;;  %v7752_v3 = vld [vmem:[%s10316_s0 + $0x164] sm:$0xf0]  ;;  %v8007_v33 = vld [vmem:[%s10314_s1 + $0x760] sm:$0xff]  ;;  %v5519_v1 = vld [vmem:[%s10316_s0 + $0x170] sm:$0xf0] }
  0xc1   :  { %4830 = vmatpush.bf16.msrb.mxu3 %v7955_v4  ;;  %4789 = vmatmul.bf16.vlgmr.msrb.gmra.mxu0 %v5486_v18  ;;  %v4581_v41 = vadd.f32 %v4580_v40, %v4567_v34  ;;  %v7719_v4 = vld [vmem:[%s10316_s0 + $0x64] sm:$0xf]  ;;  %v5510_v11 = vor.u32 %v7752_v3, %v5509_v2  ;;  %v8009_v18 = vld [vmem:[%s10314_s1 + $0x770] sm:$0xff]  ;;  %v8006_v40 = vld [vmem:[%s10314_s1 + $0x758] sm:$0xff] }
  0xc2   :  { %4837 = vmatpush.bf16.msra.mxu0 %v7970_v5  ;;  %4803 = vmatmul.bf16.vlgmr.msrb.gmra.mxu1 %v5490_v20  ;;  %v5503_v5 = vld [vmem:[%s10316_s0 + $0x160] sm:$0xf0]  ;;  %v8025_v20 = vld [vmem:[%s10314_s1 + $0x7f0] sm:$0xff]  ;;  %v7722_v2 = vld [vmem:[%s10316_s0 + $0x7c] sm:$0xf] }
  0xc3   :  { %4851 = vmatpush.bf16.msra.mxu1 %v7978_v6  ;;  %4817 = vmatmul.bf16.vlgmr.msrb.gmra.mxu2 %v5494_v19  ;;  %v7720_v6 = vld [vmem:[%s10316_s0 + $0x6c] sm:$0xf]  ;;  %v5506_v13 = vor.u32 %v7719_v4, %v5503_v5  ;;  %v8017_v19 = vld [vmem:[%s10314_s1 + $0x7b0] sm:$0xff]  ;;  %v5527_v3 = vld [vmem:[%s10316_s0 + $0x178] sm:$0xf0] }
  0xc4   :  { %4865 = vmatpush.bf16.msra.mxu2 %v7986_v15  ;;  %4831 = vmatmul.bf16.vlgmr.msrb.gmra.mxu3 %v5498_v21  ;;  %v5514_v14 = vor.u32 %v7720_v6, %v5511_v7  ;;  %v8000_v21 = vld [vmem:[%s10314_s1 + $0x728] sm:$0xff]  ;;  %v8050_v4 = vld [vmem:[%s10314_s1 + $0x8b8] sm:$0xff] }
  0xc5   :  { %4879 = vmatpush.bf16.msra.mxu3 %v7994_v16  ;;  %v8001_v16 = vld [vmem:[%s10314_s1 + $0x730] sm:$0xff]  ;;  %v8058_v5 = vld [vmem:[%s10314_s1 + $0x8f8] sm:$0xff] }
  0xc6   :  { %4838 = vmatpush.bf16.msra.mxu0 %v7969_v23  ;;  %v4594_v46 = vpop.f32.mrf.mxu2  ;;  %v9180_v12 = vpop.f32.mrf.mxu0  ;;  %v8008_v23 = vld [vmem:[%s10314_s1 + $0x768] sm:$0xff] }
  0xc7   :  { %4852 = vmatpush.bf16.msra.mxu1 %v7977_v24  ;;  %v4595_v47 = vadd.f32 %v4594_v46, %v4581_v41  ;;  %v4608_v48 = vpop.f32.mrf.mxu3  ;;  %v9182_v15 = vpop.f32.mrf.mxu1  ;;  %v8014_v41 = vld [vmem:[%s10314_s1 + $0x798] sm:$0xff] }
  0xc8   :  { %4866 = vmatpush.bf16.msra.mxu2 %v7985_v25  ;;  %v8016_v25 = vld [vmem:[%s10314_s1 + $0x7a8] sm:$0xff] }
  0xc9   :  { %4880 = vmatpush.bf16.msra.mxu3 %v7993_v26  ;;  %v9106_v49 = vadd.f32 %v4608_v48, %v4595_v47  ;;  %v8024_v26 = vld [vmem:[%s10314_s1 + $0x7e8] sm:$0xff]  ;;  %v7997_v47 = vld [vmem:[%s10314_s1 + $0x710] sm:$0xff] }
  0xca   :  { %4839 = vmatpush.bf16.msra.mxu0 %v7968_v28  ;;  %v8005_v48 = vld [vmem:[%s10314_s1 + $0x750] sm:$0xff] }
  0xcb   :  { %4853 = vmatpush.bf16.msra.mxu1 %v7976_v29 }
  0xcc   :  { %4867 = vmatpush.bf16.msra.mxu2 %v7984_v30 }
  0xcd   :  { %4881 = vmatpush.bf16.msra.mxu3 %v7992_v31  ;;  %v7999_v31 = vld [vmem:[%s10314_s1 + $0x720] sm:$0xff] }
  0xce   :  { %4840 = vmatpush.bf16.msra.mxu0 %v7967_v35  ;;  %v9202_v24 = vpop.f32.mrf.mxu2  ;;  %v8015_v35 = vld [vmem:[%s10314_s1 + $0x7a0] sm:$0xff] }
  0xcf   :  { %4854 = vmatpush.bf16.msra.mxu1 %v7975_v36  ;;  %v9210_v28 = vpop.f32.mrf.mxu3  ;;  %v8023_v36 = vld [vmem:[%s10314_s1 + $0x7e0] sm:$0xff] }
  0xd0   :  { %4868 = vmatpush.bf16.msra.mxu2 %v7983_v37 }
  0xd1   :  { %4882 = vmatpush.bf16.msra.mxu3 %v7991_v39  ;;  %v7998_v39 = vld [vmem:[%s10314_s1 + $0x718] sm:$0xff] }
  0xd2   :  { %4841 = vmatpush.bf16.msra.mxu0 %v7966_v42  ;;  %v8022_v42 = vld [vmem:[%s10314_s1 + $0x7d8] sm:$0xff] }
  0xd3   :  { %4855 = vmatpush.bf16.msra.mxu1 %v7974_v43 }
  0xd4   :  { %4869 = vmatpush.bf16.msra.mxu2 %v7982_v44 }
  0xd5   :  { %4883 = vmatpush.bf16.msra.mxu3 %v7990_v45 }
  0xd6   :  { %4842 = vmatpush.bf16.msra.mxu0 %v7965_v50  ;;  %v8021_v50 = vld [vmem:[%s10314_s1 + $0x7d0] sm:$0xff] }
  0xd7   :  { %4856 = vmatpush.bf16.msra.mxu1 %v7973_v51  ;;  %v7996_v51 = vld [vmem:[%s10314_s1 + $0x708] sm:$0xff] }
  0xd8   :  { %4870 = vmatpush.bf16.msra.mxu2 %v7981_v52  ;;  %v8004_v52 = vld [vmem:[%s10314_s1 + $0x748] sm:$0xff] }
  0xd9   :  { %4884 = vmatpush.bf16.msra.mxu3 %v7989_v53  ;;  %v8012_v53 = vld [vmem:[%s10314_s1 + $0x788] sm:$0xff] }
  0xda   :  { %4843 = vmatpush.bf16.msra.mxu0 %v7964_v54  ;;  %v8020_v54 = vld [vmem:[%s10314_s1 + $0x7c8] sm:$0xff] }
  0xdb   :  { %4857 = vmatpush.bf16.msra.mxu1 %v7972_v55  ;;  %v7995_v55 = vld [vmem:[%s10314_s1 + $0x700] sm:$0xff] }
  0xdc   :  { %4871 = vmatpush.bf16.msra.mxu2 %v7980_v56  ;;  %v8003_v56 = vld [vmem:[%s10314_s1 + $0x740] sm:$0xff] }
  0xdd   :  { %4885 = vmatpush.bf16.msra.mxu3 %v7988_v57  ;;  %v8011_v57 = vld [vmem:[%s10314_s1 + $0x780] sm:$0xff] }
  0xde   :  { %4844 = vmatpush.bf16.msra.mxu0 %v7963_v58  ;;  %v4622_v29 = vpop.f32.mrf.mxu0  ;;  %v8019_v58 = vld [vmem:[%s10314_s1 + $0x7c0] sm:$0xff] }
  0xdf   :  { %4858 = vmatpush.bf16.msra.mxu1 %v7971_v59  ;;  %v4623_v30 = vadd.f32 %v4622_v29, %v9106_v49  ;;  %v4636_v34 = vpop.f32.mrf.mxu1  ;;  %v8013_v49 = vld [vmem:[%s10314_s1 + $0x790] sm:$0xff]  ;;  %v4513_v59 = vadd.f32 %v8942_v38, %v9049_v17  ;;  %v5525_v38 = vld [vmem:[%s10316_s0 + $0x78] sm:$0xf] }
  0xe0   :  { %4872 = vmatpush.bf16.msra.mxu2 %v7979_v60  ;;  %v8034_v60 = vld [vmem:[%s10314_s1 + $0x838] sm:$0xff] }
  0xe1   :  { %4886 = vmatpush.bf16.msra.mxu3 %v7987_v61  ;;  %4845 = vmatmul.bf16.vlgmr.msra.gmra.mxu0 %v5502_v10  ;;  %v4637_v37 = vadd.f32 %v4636_v34, %v4623_v30  ;;  %v8042_v61 = vld [vmem:[%s10314_s1 + $0x878] sm:$0xff]  ;;  %v4527_v6 = vadd.f32 %v9051_v22, %v4513_v59  ;;  %v5522_v10 = vor.u32 %v7721_v0, %v5519_v1  ;;  %v8041_v22 = vld [vmem:[%s10314_s1 + $0x870] sm:$0xff]  ;;  %v8039_v34 = vld [vmem:[%s10314_s1 + $0x860] sm:$0xff] }
  0xe2   :  { %4893 = vmatpush.bf16.msrb.mxu0 %v8002_v62  ;;  %4859 = vmatmul.bf16.vlgmr.msra.gmra.mxu1 %v5506_v13  ;;  %v5517_v62 = vld [vmem:[%s10316_s0 + $0x70] sm:$0xf]  ;;  %v7754_v17 = vld [vmem:[%s10316_s0 + $0x174] sm:$0xf0]  ;;  %v8051_v59 = vld [vmem:[%s10314_s1 + $0x8c0] sm:$0xff] }
  0xe3   :  { %4907 = vmatpush.bf16.msrb.mxu1 %v8010_v63  ;;  %4873 = vmatmul.bf16.vlgmr.msra.gmra.mxu2 %v5510_v11  ;;  %v7753_v63 = vld [vmem:[%s10316_s0 + $0x16c] sm:$0xf0]  ;;  %v5530_v11 = vor.u32 %v7722_v2, %v5527_v3  ;;  %v7723_v0 = vld [vmem:[%s10316_s0 + $0x84] sm:$0xf]  ;;  %v7724_v3 = vld [vmem:[%s10316_s0 + $0x8c] sm:$0xf] }
  0xe4   :  { %4921 = vmatpush.bf16.msrb.mxu2 %v8018_v8  ;;  %4887 = vmatmul.bf16.vlgmr.msra.gmra.mxu3 %v5514_v14  ;;  %v5518_v7 = vor.u32 %v7753_v63, %v5517_v62  ;;  %v5526_v8 = vor.u32 %v7754_v17, %v5525_v38  ;;  %v8033_v14 = vld [vmem:[%s10314_s1 + $0x830] sm:$0xff]  ;;  %v5533_v62 = vld [vmem:[%s10316_s0 + $0x80] sm:$0xf]  ;;  %v5541_v38 = vld [vmem:[%s10316_s0 + $0x88] sm:$0xf] }
  0xe5   :  { %4935 = vmatpush.bf16.msrb.mxu3 %v8026_v9  ;;  %v7755_v63 = vld [vmem:[%s10316_s0 + $0x17c] sm:$0xf0]  ;;  %v7756_v17 = vld [vmem:[%s10316_s0 + $0x184] sm:$0xf0]  ;;  %v5535_v2 = vld [vmem:[%s10316_s0 + $0x180] sm:$0xf0] }
  0xe6   :  { %4894 = vmatpush.bf16.msrb.mxu0 %v8001_v16  ;;  %v4650_v43 = vpop.f32.mrf.mxu2  ;;  %v9314_v9 = vpop.f32.mrf.mxu0  ;;  %v8049_v16 = vld [vmem:[%s10314_s1 + $0x8b0] sm:$0xff] }
  0xe7   :  { %4908 = vmatpush.bf16.msrb.mxu1 %v8009_v18  ;;  %v4651_v44 = vadd.f32 %v4650_v43, %v4637_v37  ;;  %v4664_v45 = vpop.f32.mrf.mxu3  ;;  %v9316_v13 = vpop.f32.mrf.mxu1  ;;  %v8057_v18 = vld [vmem:[%s10314_s1 + $0x8f0] sm:$0xff] }
  0xe8   :  { %4922 = vmatpush.bf16.msrb.mxu2 %v8017_v19  ;;  %v4541_v19 = vadd.f32 %v9065_v27, %v4527_v6  ;;  %v8048_v27 = vld [vmem:[%s10314_s1 + $0x8a8] sm:$0xff]  ;;  %v8090_v6 = vld [vmem:[%s10314_s1 + $0x9f8] sm:$0xff] }
  0xe9   :  { %4936 = vmatpush.bf16.msrb.mxu3 %v8025_v20  ;;  %v9237_v46 = vadd.f32 %v4664_v45, %v4651_v44  ;;  %v8032_v20 = vld [vmem:[%s10314_s1 + $0x828] sm:$0xff] }
  0xea   :  { %4895 = vmatpush.bf16.msrb.mxu0 %v8000_v21  ;;  %v8040_v21 = vld [vmem:[%s10314_s1 + $0x868] sm:$0xff] }
  0xeb   :  { %4909 = vmatpush.bf16.msrb.mxu1 %v8008_v23 }
  0xec   :  { %4923 = vmatpush.bf16.msrb.mxu2 %v8016_v25  ;;  %v8056_v25 = vld [vmem:[%s10314_s1 + $0x8e8] sm:$0xff] }
  0xed   :  { %4937 = vmatpush.bf16.msrb.mxu3 %v8024_v26  ;;  %v4555_v26 = vadd.f32 %v9079_v32, %v4541_v19  ;;  %v8047_v32 = vld [vmem:[%s10314_s1 + $0x8a0] sm:$0xff]  ;;  %v8089_v19 = vld [vmem:[%s10314_s1 + $0x9f0] sm:$0xff] }
  0xee   :  { %4896 = vmatpush.bf16.msrb.mxu0 %v7999_v31  ;;  %v9337_v23 = vpop.f32.mrf.mxu2 }
  0xef   :  { %4910 = vmatpush.bf16.msrb.mxu1 %v8007_v33  ;;  %v9346_v29 = vpop.f32.mrf.mxu3  ;;  %v8031_v33 = vld [vmem:[%s10314_s1 + $0x820] sm:$0xff]  ;;  %v4569_v37 = vadd.f32 %v9180_v12, %v4555_v26  ;;  %v8054_v12 = vld [vmem:[%s10314_s1 + $0x8d8] sm:$0xff]  ;;  %v8080_v26 = vld [vmem:[%s10314_s1 + $0x9a8] sm:$0xff] }
  0xf0   :  { %4924 = vmatpush.bf16.msrb.mxu2 %v8015_v35 }
  0xf1   :  { %4938 = vmatpush.bf16.msrb.mxu3 %v8023_v36  ;;  %v8055_v36 = vld [vmem:[%s10314_s1 + $0x8e0] sm:$0xff]  ;;  %v4583_v44 = vadd.f32 %v9182_v15, %v4569_v37  ;;  %v8045_v15 = vld [vmem:[%s10314_s1 + $0x890] sm:$0xff] }
  0xf2   :  { %4897 = vmatpush.bf16.msrb.mxu0 %v7998_v39  ;;  %v8079_v37 = vld [vmem:[%s10314_s1 + $0x9a0] sm:$0xff] }
  0xf3   :  { %4911 = vmatpush.bf16.msrb.mxu1 %v8006_v40  ;;  %v8030_v40 = vld [vmem:[%s10314_s1 + $0x818] sm:$0xff] }
  0xf4   :  { %4925 = vmatpush.bf16.msrb.mxu2 %v8014_v41  ;;  %v8038_v41 = vld [vmem:[%s10314_s1 + $0x858] sm:$0xff] }
  0xf5   :  { %4939 = vmatpush.bf16.msrb.mxu3 %v8022_v42  ;;  %v8046_v42 = vld [vmem:[%s10314_s1 + $0x898] sm:$0xff] }
  0xf6   :  { %4898 = vmatpush.bf16.msrb.mxu0 %v7997_v47  ;;  %v4597_v47 = vadd.f32 %v9202_v24, %v4583_v44  ;;  %v8053_v24 = vld [vmem:[%s10314_s1 + $0x8d0] sm:$0xff]  ;;  %v8086_v44 = vld [vmem:[%s10314_s1 + $0x9d8] sm:$0xff] }
  0xf7   :  { %4912 = vmatpush.bf16.msrb.mxu1 %v8005_v48 }
  0xf8   :  { %4926 = vmatpush.bf16.msrb.mxu2 %v8013_v49  ;;  %v8029_v49 = vld [vmem:[%s10314_s1 + $0x810] sm:$0xff] }
  0xf9   :  { %4940 = vmatpush.bf16.msrb.mxu3 %v8021_v50  ;;  %v8037_v50 = vld [vmem:[%s10314_s1 + $0x850] sm:$0xff] }
  0xfa   :  { %4899 = vmatpush.bf16.msrb.mxu0 %v7996_v51  ;;  %v4611_v51 = vadd.f32 %v9210_v28, %v4597_v47  ;;  %v8052_v28 = vld [vmem:[%s10314_s1 + $0x8c8] sm:$0xff] }
  0xfb   :  { %4913 = vmatpush.bf16.msrb.mxu1 %v8004_v52  ;;  %v8028_v52 = vld [vmem:[%s10314_s1 + $0x808] sm:$0xff] }
  0xfc   :  { %4927 = vmatpush.bf16.msrb.mxu2 %v8012_v53  ;;  %v8036_v53 = vld [vmem:[%s10314_s1 + $0x848] sm:$0xff] }
  0xfd   :  { %4941 = vmatpush.bf16.msrb.mxu3 %v8020_v54  ;;  %v8044_v54 = vld [vmem:[%s10314_s1 + $0x888] sm:$0xff] }
  0xfe   :  { %4900 = vmatpush.bf16.msrb.mxu0 %v7995_v55  ;;  %v4678_v30 = vpop.f32.mrf.mxu0  ;;  %v4625_v55 = vadd.f32 %v9314_v9, %v4611_v51  ;;  %v5542_v9 = vor.u32 %v7756_v17, %v5541_v38  ;;  %v8069_v51 = vld [vmem:[%s10314_s1 + $0x950] sm:$0xff]  ;;  %v8075_v38 = vld [vmem:[%s10314_s1 + $0x980] sm:$0xff] }
  0xff   :  { %4914 = vmatpush.bf16.msrb.mxu1 %v8003_v56  ;;  %v4679_v31 = vadd.f32 %v4678_v30, %v9237_v46  ;;  %v4692_v35 = vpop.f32.mrf.mxu1  ;;  %v8027_v56 = vld [vmem:[%s10314_s1 + $0x800] sm:$0xff] }
 0x100   :  { %4928 = vmatpush.bf16.msrb.mxu2 %v8011_v57  ;;  %v8035_v57 = vld [vmem:[%s10314_s1 + $0x840] sm:$0xff]  ;;  %v4639_v1 = vadd.f32 %v9316_v13, %v4625_v55  ;;  %v8060_v55 = vld [vmem:[%s10314_s1 + $0x908] sm:$0xff] }
 0x101   :  { %4942 = vmatpush.bf16.msrb.mxu3 %v8019_v58  ;;  %4901 = vmatmul.bf16.vlgmr.msrb.gmra.mxu0 %v5518_v7  ;;  %v4693_v39 = vadd.f32 %v4692_v35, %v4679_v31  ;;  %v8043_v58 = vld [vmem:[%s10314_s1 + $0x880] sm:$0xff] }
 0x102   :  { %4949 = vmatpush.bf16.msra.mxu0 %v8034_v60  ;;  %4915 = vmatmul.bf16.vlgmr.msrb.gmra.mxu1 %v5522_v10  ;;  %v8066_v60 = vld [vmem:[%s10314_s1 + $0x938] sm:$0xff]  ;;  %v4653_v7 = vadd.f32 %v9337_v23, %v4639_v1  ;;  %v8064_v23 = vld [vmem:[%s10314_s1 + $0x928] sm:$0xff]  ;;  %v8063_v35 = vld [vmem:[%s10314_s1 + $0x920] sm:$0xff] }
 0x103   :  { %4963 = vmatpush.bf16.msra.mxu1 %v8042_v61  ;;  %4929 = vmatmul.bf16.vlgmr.msrb.gmra.mxu2 %v5526_v8  ;;  %v8074_v61 = vld [vmem:[%s10314_s1 + $0x978] sm:$0xff]  ;;  %v5534_v8 = vor.u32 %v7755_v63, %v5533_v62  ;;  %v8059_v62 = vld [vmem:[%s10314_s1 + $0x900] sm:$0xff] }
 0x104   :  { %4977 = vmatpush.bf16.msra.mxu2 %v8050_v4  ;;  %4943 = vmatmul.bf16.vlgmr.msrb.gmra.mxu3 %v5530_v11  ;;  %v5543_v4 = vld [vmem:[%s10316_s0 + $0x188] sm:$0xf0]  ;;  %v5538_v11 = vor.u32 %v7723_v0, %v5535_v2  ;;  %v8067_v63 = vld [vmem:[%s10314_s1 + $0x940] sm:$0xff]  ;;  %v8098_v1 = vld [vmem:[%s10314_s1 + $0xa38] sm:$0xff] }
 0x105   :  { %4991 = vmatpush.bf16.msra.mxu3 %v8058_v5  ;;  %v8082_v5 = vld [vmem:[%s10314_s1 + $0x9b8] sm:$0xff]  ;;  %v5546_v13 = vor.u32 %v7724_v3, %v5543_v4  ;;  %v8083_v17 = vld [vmem:[%s10314_s1 + $0x9c0] sm:$0xff]  ;;  %v5549_v3 = vld [vmem:[%s10316_s0 + $0x90] sm:$0xf] }
 0x106   :  { %4950 = vmatpush.bf16.msra.mxu0 %v8033_v14  ;;  %v4706_v43 = vpop.f32.mrf.mxu2  ;;  %v4680_v10 = vpop.f32.mrf.mxu0  ;;  %v8106_v2 = vld [vmem:[%s10314_s1 + $0xa78] sm:$0xff]  ;;  %v7757_v4 = vld [vmem:[%s10316_s0 + $0x18c] sm:$0xf0] }
 0x107   :  { %4964 = vmatpush.bf16.msra.mxu1 %v8041_v22  ;;  %v4707_v45 = vadd.f32 %v4706_v43, %v4693_v39  ;;  %v4720_v46 = vpop.f32.mrf.mxu3  ;;  %v4694_v14 = vpop.f32.mrf.mxu1  ;;  %v8065_v22 = vld [vmem:[%s10314_s1 + $0x930] sm:$0xff]  ;;  %v8087_v39 = vld [vmem:[%s10314_s1 + $0x9e0] sm:$0xff]  ;;  %v8078_v43 = vld [vmem:[%s10314_s1 + $0x998] sm:$0xff] }
 0x108   :  { %4978 = vmatpush.bf16.msra.mxu2 %v8049_v16  ;;  %v8073_v16 = vld [vmem:[%s10314_s1 + $0x970] sm:$0xff] }
 0x109   :  { %4992 = vmatpush.bf16.msra.mxu3 %v8057_v18  ;;  %v9376_v48 = vadd.f32 %v4720_v46, %v4707_v45  ;;  %v8081_v18 = vld [vmem:[%s10314_s1 + $0x9b0] sm:$0xff] }
 0x10a   :  { %4951 = vmatpush.bf16.msra.mxu0 %v8032_v20  ;;  %v4667_v20 = vadd.f32 %v9346_v29, %v4653_v7  ;;  %v8088_v29 = vld [vmem:[%s10314_s1 + $0x9e8] sm:$0xff]  ;;  %v7725_v7 = vld [vmem:[%s10316_s0 + $0x94] sm:$0xf] }
 0x10b   :  { %4965 = vmatpush.bf16.msra.mxu1 %v8040_v21 }
 0x10c   :  { %4979 = vmatpush.bf16.msra.mxu2 %v8048_v27  ;;  %v4681_v21 = vadd.f32 %v4680_v10, %v4667_v20  ;;  %v8072_v27 = vld [vmem:[%s10314_s1 + $0x968] sm:$0xff]  ;;  %v5559_v10 = vld [vmem:[%s10316_s0 + $0x198] sm:$0xf0]  ;;  %v8105_v20 = vld [vmem:[%s10314_s1 + $0xa70] sm:$0xff] }
 0x10d   :  { %4993 = vmatpush.bf16.msra.mxu3 %v8056_v25 }
 0x10e   :  { %4952 = vmatpush.bf16.msra.mxu0 %v8031_v33  ;;  %v4708_v25 = vpop.f32.mrf.mxu2  ;;  %v4695_v33 = vadd.f32 %v4694_v14, %v4681_v21  ;;  %v5550_v14 = vor.u32 %v7757_v4, %v5549_v3  ;;  %v8113_v21 = vld [vmem:[%s10314_s1 + $0xab0] sm:$0xff]  ;;  %v7727_v3 = vld [vmem:[%s10316_s0 + $0xa4] sm:$0xf] }
 0x10f   :  { %4966 = vmatpush.bf16.msra.mxu1 %v8039_v34  ;;  %v4722_v30 = vpop.f32.mrf.mxu3  ;;  %v5567_v4 = vld [vmem:[%s10316_s0 + $0x1a0] sm:$0xf0] }
 0x110   :  { %4980 = vmatpush.bf16.msra.mxu2 %v8047_v32  ;;  %v8071_v32 = vld [vmem:[%s10314_s1 + $0x960] sm:$0xff] }
 0x111   :  { %4994 = vmatpush.bf16.msra.mxu3 %v8055_v36 }
 0x112   :  { %4953 = vmatpush.bf16.msra.mxu0 %v8030_v40  ;;  %v4709_v40 = vadd.f32 %v4708_v25, %v4695_v33  ;;  %v8104_v25 = vld [vmem:[%s10314_s1 + $0xa68] sm:$0xff]  ;;  %v8095_v33 = vld [vmem:[%s10314_s1 + $0xa20] sm:$0xff] }
 0x113   :  { %4967 = vmatpush.bf16.msra.mxu1 %v8038_v41 }
 0x114   :  { %4981 = vmatpush.bf16.msra.mxu2 %v8046_v42  ;;  %v8062_v42 = vld [vmem:[%s10314_s1 + $0x918] sm:$0xff]  ;;  %v4723_v46 = vadd.f32 %v4722_v30, %v4709_v40 }
 0x115   :  { %4995 = vmatpush.bf16.msra.mxu3 %v8054_v12  ;;  %v8070_v12 = vld [vmem:[%s10314_s1 + $0x958] sm:$0xff] }
 0x116   :  { %4954 = vmatpush.bf16.msra.mxu0 %v8029_v49  ;;  %v8102_v40 = vld [vmem:[%s10314_s1 + $0xa58] sm:$0xff] }
 0x117   :  { %4968 = vmatpush.bf16.msra.mxu1 %v8037_v50 }
 0x118   :  { %4982 = vmatpush.bf16.msra.mxu2 %v8045_v15 }
 0x119   :  { %4996 = vmatpush.bf16.msra.mxu3 %v8053_v24  ;;  %v8061_v24 = vld [vmem:[%s10314_s1 + $0x910] sm:$0xff] }
 0x11a   :  { %4955 = vmatpush.bf16.msra.mxu0 %v8028_v52 }
 0x11b   :  { %4969 = vmatpush.bf16.msra.mxu1 %v8036_v53  ;;  %v8077_v53 = vld [vmem:[%s10314_s1 + $0x990] sm:$0xff] }
 0x11c   :  { %4983 = vmatpush.bf16.msra.mxu2 %v8044_v54  ;;  %v8085_v54 = vld [vmem:[%s10314_s1 + $0x9d0] sm:$0xff] }
 0x11d   :  { %4997 = vmatpush.bf16.msra.mxu3 %v8052_v28 }
 0x11e   :  { %4956 = vmatpush.bf16.msra.mxu0 %v8027_v56  ;;  %v4734_v31 = vpop.f32.mrf.mxu0  ;;  %v8068_v56 = vld [vmem:[%s10314_s1 + $0x948] sm:$0xff] }
 0x11f   :  { %4970 = vmatpush.bf16.msra.mxu1 %v8035_v57  ;;  %v4735_v34 = vadd.f32 %v4734_v31, %v9376_v48  ;;  %v4748_v36 = vpop.f32.mrf.mxu1  ;;  %v8076_v57 = vld [vmem:[%s10314_s1 + $0x988] sm:$0xff] }
 0x120   :  { %4984 = vmatpush.bf16.msra.mxu2 %v8043_v58  ;;  %v8084_v58 = vld [vmem:[%s10314_s1 + $0x9c8] sm:$0xff] }
 0x121   :  { %4998 = vmatpush.bf16.msra.mxu3 %v8051_v59  ;;  %4957 = vmatmul.bf16.vlgmr.msra.gmra.mxu0 %v5534_v8  ;;  %v4749_v41 = vadd.f32 %v4748_v36, %v4735_v34  ;;  %v5551_v8 = vld [vmem:[%s10316_s0 + $0x190] sm:$0xf0]  ;;  %v8103_v34 = vld [vmem:[%s10314_s1 + $0xa60] sm:$0xff] }
 0x122   :  { %5005 = vmatpush.bf16.msrb.mxu0 %v8066_v60  ;;  %4971 = vmatmul.bf16.vlgmr.msra.gmra.mxu1 %v5538_v11  ;;  %v8114_v11 = vld [vmem:[%s10314_s1 + $0xab8] sm:$0xff]  ;;  %v8119_v36 = vld [vmem:[%s10314_s1 + $0xae0] sm:$0xff] }
 0x123   :  { %5019 = vmatpush.bf16.msrb.mxu1 %v8074_v61  ;;  %4985 = vmatmul.bf16.vlgmr.msra.gmra.mxu2 %v5542_v9  ;;  %v7726_v9 = vld [vmem:[%s10316_s0 + $0x9c] sm:$0xf] }
 0x124   :  { %5033 = vmatpush.bf16.msrb.mxu2 %v8082_v5  ;;  %4999 = vmatmul.bf16.vlgmr.msra.gmra.mxu3 %v5546_v13  ;;  %v5557_v5 = vld [vmem:[%s10316_s0 + $0x98] sm:$0xf] }
 0x125   :  { %5047 = vmatpush.bf16.msrb.mxu3 %v8090_v6  ;;  %v7758_v6 = vld [vmem:[%s10316_s0 + $0x194] sm:$0xf0] }
 0x126   :  { %5006 = vmatpush.bf16.msrb.mxu0 %v8065_v22  ;;  %v4762_v45 = vpop.f32.mrf.mxu2  ;;  %v4736_v49 = vpop.f32.mrf.mxu0  ;;  %v8122_v13 = vld [vmem:[%s10314_s1 + $0xaf8] sm:$0xff]  ;;  %v5558_v22 = vor.u32 %v7758_v6, %v5557_v5  ;;  %v7728_v5 = vld [vmem:[%s10316_s0 + $0xac] sm:$0xf] }
 0x127   :  { %5020 = vmatpush.bf16.msrb.mxu1 %v8073_v16  ;;  %v4763_v47 = vadd.f32 %v4762_v45, %v4749_v41  ;;  %v4776_v48 = vpop.f32.mrf.mxu3  ;;  %v4737_v50 = vadd.f32 %v4736_v49, %v4723_v46  ;;  %v4750_v52 = vpop.f32.mrf.mxu1  ;;  %v5554_v16 = vor.u32 %v7725_v7, %v5551_v8  ;;  %v8110_v41 = vld [vmem:[%s10314_s1 + $0xa98] sm:$0xff]  ;;  %v8101_v49 = vld [vmem:[%s10314_s1 + $0xa50] sm:$0xff]  ;;  %v5575_v6 = vld [vmem:[%s10316_s0 + $0x1a8] sm:$0xf0] }
 0x128   :  { %5034 = vmatpush.bf16.msrb.mxu2 %v8081_v18  ;;  %v5562_v18 = vor.u32 %v7726_v9, %v5559_v10  ;;  %v8146_v7 = vld [vmem:[%s10314_s1 + $0xbb8] sm:$0xff] }
 0x129   :  { %5048 = vmatpush.bf16.msrb.mxu3 %v8089_v19  ;;  %v9504_v15 = vadd.f32 %v4776_v48, %v4763_v47  ;;  %v4751_v28 = vadd.f32 %v4750_v52, %v4737_v50  ;;  %v8097_v19 = vld [vmem:[%s10314_s1 + $0xa30] sm:$0xff]  ;;  %v8092_v52 = vld [vmem:[%s10314_s1 + $0xa08] sm:$0xff]  ;;  %v8154_v8 = vld [vmem:[%s10314_s1 + $0xbf8] sm:$0xff] }
 0x12a   :  { %5007 = vmatpush.bf16.msrb.mxu0 %v8064_v23  ;;  %v8121_v23 = vld [vmem:[%s10314_s1 + $0xaf0] sm:$0xff] }
 0x12b   :  { %5021 = vmatpush.bf16.msrb.mxu1 %v8072_v27  ;;  %v8096_v27 = vld [vmem:[%s10314_s1 + $0xa28] sm:$0xff]  ;;  %v8093_v48 = vld [vmem:[%s10314_s1 + $0xa10] sm:$0xff] }
 0x12c   :  { %5035 = vmatpush.bf16.msrb.mxu2 %v8080_v26  ;;  %v8112_v26 = vld [vmem:[%s10314_s1 + $0xaa8] sm:$0xff] }
 0x12d   :  { %5049 = vmatpush.bf16.msrb.mxu3 %v8088_v29  ;;  %v8120_v29 = vld [vmem:[%s10314_s1 + $0xae8] sm:$0xff] }
 0x12e   :  { %5008 = vmatpush.bf16.msrb.mxu0 %v8063_v35  ;;  %v4764_v59 = vpop.f32.mrf.mxu2 }
 0x12f   :  { %5022 = vmatpush.bf16.msrb.mxu1 %v8071_v32  ;;  %v4765_v60 = vadd.f32 %v4764_v59, %v4751_v28  ;;  %v4778_v61 = vpop.f32.mrf.mxu3  ;;  %v8111_v32 = vld [vmem:[%s10314_s1 + $0xaa0] sm:$0xff]  ;;  %v8116_v28 = vld [vmem:[%s10314_s1 + $0xac8] sm:$0xff] }
 0x130   :  { %5036 = vmatpush.bf16.msrb.mxu2 %v8079_v37  ;;  %v8099_v59 = vld [vmem:[%s10314_s1 + $0xa40] sm:$0xff] }
 0x131   :  { %5050 = vmatpush.bf16.msrb.mxu3 %v8087_v39  ;;  %v9542_v0 = vadd.f32 %v4778_v61, %v4765_v60  ;;  %v8094_v39 = vld [vmem:[%s10314_s1 + $0xa18] sm:$0xff]  ;;  %v8107_v60 = vld [vmem:[%s10314_s1 + $0xa80] sm:$0xff] }
 0x132   :  { %5009 = vmatpush.bf16.msrb.mxu0 %v8062_v42  ;;  %v8118_v42 = vld [vmem:[%s10314_s1 + $0xad8] sm:$0xff]  ;;  %v8115_v61 = vld [vmem:[%s10314_s1 + $0xac0] sm:$0xff] }
 0x133   :  { %5023 = vmatpush.bf16.msrb.mxu1 %v8070_v12 }
 0x134   :  { %5037 = vmatpush.bf16.msrb.mxu2 %v8078_v43 }
 0x135   :  { %5051 = vmatpush.bf16.msrb.mxu3 %v8086_v44 }
 0x136   :  { %5010 = vmatpush.bf16.msrb.mxu0 %v8061_v24  ;;  %v8117_v24 = vld [vmem:[%s10314_s1 + $0xad0] sm:$0xff] }
 0x137   :  { %5024 = vmatpush.bf16.msrb.mxu1 %v8069_v51 }
 0x138   :  { %5038 = vmatpush.bf16.msrb.mxu2 %v8077_v53  ;;  %v8100_v53 = vld [vmem:[%s10314_s1 + $0xa48] sm:$0xff] }
 0x139   :  { %5052 = vmatpush.bf16.msrb.mxu3 %v8085_v54  ;;  %v8108_v54 = vld [vmem:[%s10314_s1 + $0xa88] sm:$0xff] }
 0x13a   :  { %5011 = vmatpush.bf16.msrb.mxu0 %v8060_v55 }
 0x13b   :  { %5025 = vmatpush.bf16.msrb.mxu1 %v8068_v56 }
 0x13c   :  { %5039 = vmatpush.bf16.msrb.mxu2 %v8076_v57 }
 0x13d   :  { %5053 = vmatpush.bf16.msrb.mxu3 %v8084_v58  ;;  %v8091_v58 = vld [vmem:[%s10314_s1 + $0xa00] sm:$0xff] }
 0x13e   :  { %5012 = vmatpush.bf16.msrb.mxu0 %v8059_v62  ;;  %v4790_v30 = vpop.f32.mrf.mxu0 }
 0x13f   :  { %5026 = vmatpush.bf16.msrb.mxu1 %v8067_v63  ;;  %v4791_v31 = vadd.f32 %v4790_v30, %v9504_v15  ;;  %v4804_v35 = vpop.f32.mrf.mxu1  ;;  %v8109_v15 = vld [vmem:[%s10314_s1 + $0xa90] sm:$0xff]  ;;  %v8130_v63 = vld [vmem:[%s10314_s1 + $0xb38] sm:$0xff] }
 0x140   :  { %5040 = vmatpush.bf16.msrb.mxu2 %v8075_v38  ;;  %v8138_v38 = vld [vmem:[%s10314_s1 + $0xb78] sm:$0xff] }
 0x141   :  { %5054 = vmatpush.bf16.msrb.mxu3 %v8083_v17  ;;  %5013 = vmatmul.bf16.vlgmr.msrb.gmra.mxu0 %v5550_v14  ;;  %v4805_v37 = vadd.f32 %v4804_v35, %v4791_v31  ;;  %v5565_v17 = vld [vmem:[%s10316_s0 + $0xa0] sm:$0xf]  ;;  %v8129_v14 = vld [vmem:[%s10314_s1 + $0xb30] sm:$0xff]  ;;  %v8126_v35 = vld [vmem:[%s10314_s1 + $0xb18] sm:$0xff] }
 0x142   :  { %5061 = vmatpush.bf16.msra.mxu0 %v8098_v1  ;;  %5027 = vmatmul.bf16.vlgmr.msrb.gmra.mxu1 %v5554_v16  ;;  %v5573_v1 = vld [vmem:[%s10316_s0 + $0xa8] sm:$0xf]  ;;  %v8145_v16 = vld [vmem:[%s10314_s1 + $0xbb0] sm:$0xff]  ;;  %v8143_v31 = vld [vmem:[%s10314_s1 + $0xba0] sm:$0xff] }
 0x143   :  { %5075 = vmatpush.bf16.msra.mxu1 %v8106_v2  ;;  %5041 = vmatmul.bf16.vlgmr.msrb.gmra.mxu2 %v5558_v22  ;;  %v7760_v2 = vld [vmem:[%s10316_s0 + $0x1a4] sm:$0xf0]  ;;  %v8137_v22 = vld [vmem:[%s10314_s1 + $0xb70] sm:$0xff] }
 0x144   :  { %5089 = vmatpush.bf16.msra.mxu2 %v8114_v11  ;;  %5055 = vmatmul.bf16.vlgmr.msrb.gmra.mxu3 %v5562_v18  ;;  %v5574_v10 = vor.u32 %v7760_v2, %v5573_v1  ;;  %v5570_v11 = vor.u32 %v7727_v3, %v5567_v4  ;;  %v8153_v18 = vld [vmem:[%s10314_s1 + $0xbf0] sm:$0xff]  ;;  %v7730_v1 = vld [vmem:[%s10316_s0 + $0xbc] sm:$0xf] }
 0x145   :  { %5103 = vmatpush.bf16.msra.mxu3 %v8122_v13  ;;  %v5578_v13 = vor.u32 %v7728_v5, %v5575_v6  ;;  %v5591_v2 = vld [vmem:[%s10316_s0 + $0x1b8] sm:$0xf0] }
 0x146   :  { %5062 = vmatpush.bf16.msra.mxu0 %v8097_v19  ;;  %v4818_v12 = vpop.f32.mrf.mxu2  ;;  %v4792_v45 = vpop.f32.mrf.mxu0  ;;  %v8128_v19 = vld [vmem:[%s10314_s1 + $0xb28] sm:$0xff]  ;;  %v8178_v3 = vld [vmem:[%s10314_s1 + $0xcb8] sm:$0xff] }
 0x147   :  { %5076 = vmatpush.bf16.msra.mxu1 %v8105_v20  ;;  %v4819_v43 = vadd.f32 %v4818_v12, %v4805_v37  ;;  %v4832_v44 = vpop.f32.mrf.mxu3  ;;  %v4793_v46 = vadd.f32 %v4792_v45, %v9542_v0  ;;  %v4806_v50 = vpop.f32.mrf.mxu1  ;;  %v7759_v0 = vld [vmem:[%s10316_s0 + $0x19c] sm:$0xf0]  ;;  %v8136_v20 = vld [vmem:[%s10314_s1 + $0xb68] sm:$0xff]  ;;  %v8150_v37 = vld [vmem:[%s10314_s1 + $0xbd8] sm:$0xff] }
 0x148   :  { %5090 = vmatpush.bf16.msra.mxu2 %v8113_v21  ;;  %v5566_v9 = vor.u32 %v7759_v0, %v5565_v17  ;;  %v8144_v21 = vld [vmem:[%s10314_s1 + $0xba8] sm:$0xff]  ;;  %v8133_v45 = vld [vmem:[%s10314_s1 + $0xb50] sm:$0xff]  ;;  %v8186_v4 = vld [vmem:[%s10314_s1 + $0xcf8] sm:$0xff] }
 0x149   :  { %5104 = vmatpush.bf16.msra.mxu3 %v8121_v23  ;;  %v9630_v47 = vadd.f32 %v4832_v44, %v4819_v43  ;;  %v4807_v51 = vadd.f32 %v4806_v50, %v4793_v46  ;;  %v8152_v23 = vld [vmem:[%s10314_s1 + $0xbe8] sm:$0xff]  ;;  %v8125_v44 = vld [vmem:[%s10314_s1 + $0xb10] sm:$0xff] }
 0x14a   :  { %5063 = vmatpush.bf16.msra.mxu0 %v8096_v27  ;;  %v8124_v50 = vld [vmem:[%s10314_s1 + $0xb08] sm:$0xff]  ;;  %v7729_v17 = vld [vmem:[%s10316_s0 + $0xb4] sm:$0xf] }
 0x14b   :  { %5077 = vmatpush.bf16.msra.mxu1 %v8104_v25  ;;  %v5583_v0 = vld [vmem:[%s10316_s0 + $0x1b0] sm:$0xf0] }
 0x14c   :  { %5091 = vmatpush.bf16.msra.mxu2 %v8112_v26  ;;  %v8127_v26 = vld [vmem:[%s10314_s1 + $0xb20] sm:$0xff] }
 0x14d   :  { %5105 = vmatpush.bf16.msra.mxu3 %v8120_v29  ;;  %v8135_v29 = vld [vmem:[%s10314_s1 + $0xb60] sm:$0xff] }
 0x14e   :  { %5064 = vmatpush.bf16.msra.mxu0 %v8095_v33  ;;  %v4820_v55 = vpop.f32.mrf.mxu2  ;;  %v8151_v33 = vld [vmem:[%s10314_s1 + $0xbe0] sm:$0xff] }
 0x14f   :  { %5078 = vmatpush.bf16.msra.mxu1 %v8103_v34  ;;  %v4821_v56 = vadd.f32 %v4820_v55, %v4807_v51  ;;  %v4834_v57 = vpop.f32.mrf.mxu3  ;;  %v8148_v51 = vld [vmem:[%s10314_s1 + $0xbc8] sm:$0xff]  ;;  %v8131_v55 = vld [vmem:[%s10314_s1 + $0xb40] sm:$0xff] }
 0x150   :  { %5092 = vmatpush.bf16.msra.mxu2 %v8111_v32  ;;  %v8134_v32 = vld [vmem:[%s10314_s1 + $0xb58] sm:$0xff] }
 0x151   :  { %5106 = vmatpush.bf16.msra.mxu3 %v8119_v36  ;;  %v9668_v62 = vadd.f32 %v4834_v57, %v4821_v56  ;;  %v8142_v36 = vld [vmem:[%s10314_s1 + $0xb98] sm:$0xff]  ;;  %v8139_v56 = vld [vmem:[%s10314_s1 + $0xb80] sm:$0xff] }
 0x152   :  { %5065 = vmatpush.bf16.msra.mxu0 %v8094_v39  ;;  %v8147_v57 = vld [vmem:[%s10314_s1 + $0xbc0] sm:$0xff] }
 0x153   :  { %5079 = vmatpush.bf16.msra.mxu1 %v8102_v40 }
 0x154   :  { %5093 = vmatpush.bf16.msra.mxu2 %v8110_v41 }
 0x155   :  { %5107 = vmatpush.bf16.msra.mxu3 %v8118_v42 }
 0x156   :  { %5066 = vmatpush.bf16.msra.mxu0 %v8093_v48  ;;  %v8149_v48 = vld [vmem:[%s10314_s1 + $0xbd0] sm:$0xff] }
 0x157   :  { %5080 = vmatpush.bf16.msra.mxu1 %v8101_v49 }
 0x158   :  { %5094 = vmatpush.bf16.msra.mxu2 %v8109_v15  ;;  %v8132_v15 = vld [vmem:[%s10314_s1 + $0xb48] sm:$0xff] }
 0x159   :  { %5108 = vmatpush.bf16.msra.mxu3 %v8117_v24  ;;  %v8140_v24 = vld [vmem:[%s10314_s1 + $0xb88] sm:$0xff] }
 0x15a   :  { %5067 = vmatpush.bf16.msra.mxu0 %v8092_v52 }
 0x15b   :  { %5081 = vmatpush.bf16.msra.mxu1 %v8100_v53 }
 0x15c   :  { %5095 = vmatpush.bf16.msra.mxu2 %v8108_v54 }
 0x15d   :  { %5109 = vmatpush.bf16.msra.mxu3 %v8116_v28  ;;  %v8123_v28 = vld [vmem:[%s10314_s1 + $0xb00] sm:$0xff] }
 0x15e   :  { %5068 = vmatpush.bf16.msra.mxu0 %v8091_v58  ;;  %v4846_v27 = vpop.f32.mrf.mxu0 }
 0x15f   :  { %5082 = vmatpush.bf16.msra.mxu1 %v8099_v59  ;;  %v4847_v25 = vadd.f32 %v4846_v27, %v9630_v47  ;;  %v4860_v30 = vpop.f32.mrf.mxu1  ;;  %v8141_v47 = vld [vmem:[%s10314_s1 + $0xb90] sm:$0xff]  ;;  %v8162_v59 = vld [vmem:[%s10314_s1 + $0xc38] sm:$0xff] }
 0x160   :  { %5096 = vmatpush.bf16.msra.mxu2 %v8107_v60  ;;  %v8170_v60 = vld [vmem:[%s10314_s1 + $0xc78] sm:$0xff] }
 0x161   :  { %5110 = vmatpush.bf16.msra.mxu3 %v8115_v61  ;;  %5069 = vmatmul.bf16.vlgmr.msra.gmra.mxu0 %v5566_v9  ;;  %v4861_v34 = vadd.f32 %v4860_v30, %v4847_v25  ;;  %v5581_v61 = vld [vmem:[%s10316_s0 + $0xb0] sm:$0xf]  ;;  %v8175_v25 = vld [vmem:[%s10314_s1 + $0xca0] sm:$0xff]  ;;  %v8158_v30 = vld [vmem:[%s10314_s1 + $0xc18] sm:$0xff] }
 0x162   :  { %5117 = vmatpush.bf16.msrb.mxu0 %v8130_v63  ;;  %5083 = vmatmul.bf16.vlgmr.msra.gmra.mxu1 %v5570_v11  ;;  %v5589_v63 = vld [vmem:[%s10316_s0 + $0xb8] sm:$0xf]  ;;  %v8161_v9 = vld [vmem:[%s10314_s1 + $0xc30] sm:$0xff] }
 0x163   :  { %5131 = vmatpush.bf16.msrb.mxu1 %v8138_v38  ;;  %5097 = vmatmul.bf16.vlgmr.msra.gmra.mxu2 %v5574_v10  ;;  %v7762_v38 = vld [vmem:[%s10316_s0 + $0x1b4] sm:$0xf0]  ;;  %v8169_v10 = vld [vmem:[%s10314_s1 + $0xc70] sm:$0xff] }
 0x164   :  { %5145 = vmatpush.bf16.msrb.mxu2 %v8146_v7  ;;  %5111 = vmatmul.bf16.vlgmr.msra.gmra.mxu3 %v5578_v13  ;;  %v5590_v6 = vor.u32 %v7762_v38, %v5589_v63  ;;  %v5586_v7 = vor.u32 %v7729_v17, %v5583_v0  ;;  %v8177_v11 = vld [vmem:[%s10314_s1 + $0xcb0] sm:$0xff]  ;;  %v7732_v63 = vld [vmem:[%s10316_s0 + $0xcc] sm:$0xf]  ;;  %v8210_v17 = vld [vmem:[%s10314_s1 + $0xdb8] sm:$0xff] }
 0x165   :  { %5159 = vmatpush.bf16.msrb.mxu3 %v8154_v8  ;;  %v5594_v8 = vor.u32 %v7730_v1, %v5591_v2  ;;  %v8185_v13 = vld [vmem:[%s10314_s1 + $0xcf0] sm:$0xff]  ;;  %v5607_v38 = vld [vmem:[%s10316_s0 + $0x1c8] sm:$0xf0]  ;;  %v8218_v0 = vld [vmem:[%s10314_s1 + $0xdf8] sm:$0xff] }
 0x166   :  { %5118 = vmatpush.bf16.msrb.mxu0 %v8129_v14  ;;  %v4874_v39 = vpop.f32.mrf.mxu2  ;;  %v4848_v42 = vpop.f32.mrf.mxu0  ;;  %v8160_v14 = vld [vmem:[%s10314_s1 + $0xc28] sm:$0xff] }
 0x167   :  { %5132 = vmatpush.bf16.msrb.mxu1 %v8137_v22  ;;  %v4875_v40 = vadd.f32 %v4874_v39, %v4861_v34  ;;  %v4888_v41 = vpop.f32.mrf.mxu3  ;;  %v4849_v12 = vadd.f32 %v4848_v42, %v9668_v62  ;;  %v4862_v46 = vpop.f32.mrf.mxu1  ;;  %v7761_v62 = vld [vmem:[%s10316_s0 + $0x1ac] sm:$0xf0]  ;;  %v8168_v22 = vld [vmem:[%s10314_s1 + $0xc68] sm:$0xff]  ;;  %v8182_v34 = vld [vmem:[%s10314_s1 + $0xcd8] sm:$0xff] }
 0x168   :  { %5146 = vmatpush.bf16.msrb.mxu2 %v8145_v16  ;;  %v5582_v5 = vor.u32 %v7761_v62, %v5581_v61  ;;  %v8176_v16 = vld [vmem:[%s10314_s1 + $0xca8] sm:$0xff]  ;;  %v8165_v42 = vld [vmem:[%s10314_s1 + $0xc50] sm:$0xff]  ;;  %v7731_v61 = vld [vmem:[%s10316_s0 + $0xc4] sm:$0xf] }
 0x169   :  { %5160 = vmatpush.bf16.msrb.mxu3 %v8153_v18  ;;  %v9756_v43 = vadd.f32 %v4888_v41, %v4875_v40  ;;  %v4863_v49 = vadd.f32 %v4862_v46, %v4849_v12  ;;  %v8184_v18 = vld [vmem:[%s10314_s1 + $0xce8] sm:$0xff]  ;;  %v8157_v41 = vld [vmem:[%s10314_s1 + $0xc10] sm:$0xff]  ;;  %v5599_v62 = vld [vmem:[%s10316_s0 + $0x1c0] sm:$0xf0] }
 0x16a   :  { %5119 = vmatpush.bf16.msrb.mxu0 %v8128_v19  ;;  %v8156_v46 = vld [vmem:[%s10314_s1 + $0xc08] sm:$0xff] }
 0x16b   :  { %5133 = vmatpush.bf16.msrb.mxu1 %v8136_v20 }
 0x16c   :  { %5147 = vmatpush.bf16.msrb.mxu2 %v8144_v21  ;;  %v8159_v21 = vld [vmem:[%s10314_s1 + $0xc20] sm:$0xff] }
 0x16d   :  { %5161 = vmatpush.bf16.msrb.mxu3 %v8152_v23  ;;  %v8167_v23 = vld [vmem:[%s10314_s1 + $0xc60] sm:$0xff] }
 0x16e   :  { %5120 = vmatpush.bf16.msrb.mxu0 %v8127_v26  ;;  %v4876_v52 = vpop.f32.mrf.mxu2  ;;  %v8183_v26 = vld [vmem:[%s10314_s1 + $0xce0] sm:$0xff] }
 0x16f   :  { %5134 = vmatpush.bf16.msrb.mxu1 %v8135_v29  ;;  %v4877_v53 = vadd.f32 %v4876_v52, %v4863_v49  ;;  %v4890_v54 = vpop.f32.mrf.mxu3  ;;  %v8180_v49 = vld [vmem:[%s10314_s1 + $0xcc8] sm:$0xff]  ;;  %v8163_v52 = vld [vmem:[%s10314_s1 + $0xc40] sm:$0xff] }
 0x170   :  { %5148 = vmatpush.bf16.msrb.mxu2 %v8143_v31  ;;  %v8166_v31 = vld [vmem:[%s10314_s1 + $0xc58] sm:$0xff] }
 0x171   :  { %5162 = vmatpush.bf16.msrb.mxu3 %v8151_v33  ;;  %v9794_v58 = vadd.f32 %v4890_v54, %v4877_v53  ;;  %v8174_v33 = vld [vmem:[%s10314_s1 + $0xc98] sm:$0xff]  ;;  %v8171_v53 = vld [vmem:[%s10314_s1 + $0xc80] sm:$0xff] }
 0x172   :  { %5121 = vmatpush.bf16.msrb.mxu0 %v8126_v35  ;;  %v8179_v54 = vld [vmem:[%s10314_s1 + $0xcc0] sm:$0xff] }
 0x173   :  { %5135 = vmatpush.bf16.msrb.mxu1 %v8134_v32 }
 0x174   :  { %5149 = vmatpush.bf16.msrb.mxu2 %v8142_v36 }
 0x175   :  { %5163 = vmatpush.bf16.msrb.mxu3 %v8150_v37 }
 0x176   :  { %5122 = vmatpush.bf16.msrb.mxu0 %v8125_v44  ;;  %v8181_v44 = vld [vmem:[%s10314_s1 + $0xcd0] sm:$0xff] }
 0x177   :  { %5136 = vmatpush.bf16.msrb.mxu1 %v8133_v45 }
 0x178   :  { %5150 = vmatpush.bf16.msrb.mxu2 %v8141_v47  ;;  %v8164_v47 = vld [vmem:[%s10314_s1 + $0xc48] sm:$0xff] }
 0x179   :  { %5164 = vmatpush.bf16.msrb.mxu3 %v8149_v48  ;;  %v8172_v48 = vld [vmem:[%s10314_s1 + $0xc88] sm:$0xff] }
 0x17a   :  { %5123 = vmatpush.bf16.msrb.mxu0 %v8124_v50 }
 0x17b   :  { %5137 = vmatpush.bf16.msrb.mxu1 %v8132_v15 }
 0x17c   :  { %5151 = vmatpush.bf16.msrb.mxu2 %v8140_v24 }
 0x17d   :  { %5165 = vmatpush.bf16.msrb.mxu3 %v8148_v51  ;;  %v8155_v51 = vld [vmem:[%s10314_s1 + $0xc00] sm:$0xff] }
 0x17e   :  { %5124 = vmatpush.bf16.msrb.mxu0 %v8123_v28  ;;  %v4902_v19 = vpop.f32.mrf.mxu0 }
 0x17f   :  { %5138 = vmatpush.bf16.msrb.mxu1 %v8131_v55  ;;  %v4903_v20 = vadd.f32 %v4902_v19, %v9756_v43  ;;  %v4916_v27 = vpop.f32.mrf.mxu1  ;;  %v8173_v43 = vld [vmem:[%s10314_s1 + $0xc90] sm:$0xff]  ;;  %v8194_v55 = vld [vmem:[%s10314_s1 + $0xd38] sm:$0xff] }
 0x180   :  { %5152 = vmatpush.bf16.msrb.mxu2 %v8139_v56  ;;  %v8202_v56 = vld [vmem:[%s10314_s1 + $0xd78] sm:$0xff] }
 0x181   :  { %5166 = vmatpush.bf16.msrb.mxu3 %v8147_v57  ;;  %5125 = vmatmul.bf16.vlgmr.msrb.gmra.mxu0 %v5582_v5  ;;  %v4917_v29 = vadd.f32 %v4916_v27, %v4903_v20  ;;  %v5597_v57 = vld [vmem:[%s10316_s0 + $0xc0] sm:$0xf]  ;;  %v8193_v5 = vld [vmem:[%s10314_s1 + $0xd30] sm:$0xff]  ;;  %v8190_v19 = vld [vmem:[%s10314_s1 + $0xd18] sm:$0xff] }
 0x182   :  { %5173 = vmatpush.bf16.msra.mxu0 %v8162_v59  ;;  %5139 = vmatmul.bf16.vlgmr.msrb.gmra.mxu1 %v5586_v7  ;;  %v5605_v59 = vld [vmem:[%s10316_s0 + $0xc8] sm:$0xf]  ;;  %v8209_v7 = vld [vmem:[%s10314_s1 + $0xdb0] sm:$0xff]  ;;  %v8198_v20 = vld [vmem:[%s10314_s1 + $0xd58] sm:$0xff] }
 0x183   :  { %5187 = vmatpush.bf16.msra.mxu1 %v8170_v60  ;;  %5153 = vmatmul.bf16.vlgmr.msrb.gmra.mxu2 %v5590_v6  ;;  %v7764_v60 = vld [vmem:[%s10316_s0 + $0x1c4] sm:$0xf0]  ;;  %v8201_v6 = vld [vmem:[%s10314_s1 + $0xd70] sm:$0xff] }
 0x184   :  { %5201 = vmatpush.bf16.msra.mxu2 %v8178_v3  ;;  %5167 = vmatmul.bf16.vlgmr.msrb.gmra.mxu3 %v5594_v8  ;;  %v5606_v2 = vor.u32 %v7764_v60, %v5605_v59  ;;  %v5602_v3 = vor.u32 %v7731_v61, %v5599_v62  ;;  %v8217_v8 = vld [vmem:[%s10314_s1 + $0xdf0] sm:$0xff]  ;;  %v8240_v59 = vld [vmem:[%s10314_s1 + $0xea8] sm:$0xff]  ;;  %v8223_v61 = vld [vmem:[%s10314_s1 + $0xe20] sm:$0xff] }
 0x185   :  { %5215 = vmatpush.bf16.msra.mxu3 %v8186_v4  ;;  %v5610_v4 = vor.u32 %v7732_v63, %v5607_v38  ;;  %v8189_v27 = vld [vmem:[%s10314_s1 + $0xd10] sm:$0xff]  ;;  %v8248_v60 = vld [vmem:[%s10314_s1 + $0xee8] sm:$0xff]  ;;  %v8231_v62 = vld [vmem:[%s10314_s1 + $0xe60] sm:$0xff] }
 0x186   :  { %5174 = vmatpush.bf16.msra.mxu0 %v8161_v9  ;;  %v4930_v35 = vpop.f32.mrf.mxu2  ;;  %v4904_v37 = vpop.f32.mrf.mxu0  ;;  %v8192_v9 = vld [vmem:[%s10314_s1 + $0xd28] sm:$0xff]  ;;  %v8239_v63 = vld [vmem:[%s10314_s1 + $0xea0] sm:$0xff] }
 0x187   :  { %5188 = vmatpush.bf16.msra.mxu1 %v8169_v10  ;;  %v4931_v32 = vadd.f32 %v4930_v35, %v4917_v29  ;;  %v4944_v36 = vpop.f32.mrf.mxu3  ;;  %v4905_v39 = vadd.f32 %v4904_v37, %v9794_v58  ;;  %v4918_v12 = vpop.f32.mrf.mxu1  ;;  %v7763_v58 = vld [vmem:[%s10316_s0 + $0x1bc] sm:$0xf0]  ;;  %v8200_v10 = vld [vmem:[%s10314_s1 + $0xd68] sm:$0xff]  ;;  %v8213_v29 = vld [vmem:[%s10314_s1 + $0xdd0] sm:$0xff] }
 0x188   :  { %5202 = vmatpush.bf16.msra.mxu2 %v8177_v11  ;;  %v5598_v1 = vor.u32 %v7763_v58, %v5597_v57  ;;  %v8208_v11 = vld [vmem:[%s10314_s1 + $0xda8] sm:$0xff]  ;;  %v8187_v35 = vld [vmem:[%s10314_s1 + $0xd00] sm:$0xff] }
 0x189   :  { %5216 = vmatpush.bf16.msra.mxu3 %v8185_v13  ;;  %v9882_v40 = vadd.f32 %v4944_v36, %v4931_v32  ;;  %v4919_v45 = vadd.f32 %v4918_v12, %v4905_v39  ;;  %v8216_v13 = vld [vmem:[%s10314_s1 + $0xde8] sm:$0xff]  ;;  %v8195_v32 = vld [vmem:[%s10314_s1 + $0xd40] sm:$0xff]  ;;  %v8226_v39 = vld [vmem:[%s10314_s1 + $0xe38] sm:$0xff] }
 0x18a   :  { %5175 = vmatpush.bf16.msra.mxu0 %v8160_v14  ;;  %v8191_v14 = vld [vmem:[%s10314_s1 + $0xd20] sm:$0xff]  ;;  %v7765_v12 = vld [vmem:[%s10316_s0 + $0x1cc] sm:$0xf0]  ;;  %v8224_v57 = vld [vmem:[%s10314_s1 + $0xe28] sm:$0xff] }
 0x18b   :  { %5189 = vmatpush.bf16.msra.mxu1 %v8168_v22  ;;  %v8199_v22 = vld [vmem:[%s10314_s1 + $0xd60] sm:$0xff]  ;;  %v8232_v58 = vld [vmem:[%s10314_s1 + $0xe68] sm:$0xff] }
 0x18c   :  { %5203 = vmatpush.bf16.msra.mxu2 %v8176_v16  ;;  %v8207_v16 = vld [vmem:[%s10314_s1 + $0xda0] sm:$0xff] }
 0x18d   :  { %5217 = vmatpush.bf16.msra.mxu3 %v8184_v18  ;;  %v8215_v18 = vld [vmem:[%s10314_s1 + $0xde0] sm:$0xff] }
 0x18e   :  { %5176 = vmatpush.bf16.msra.mxu0 %v8159_v21  ;;  %v4932_v50 = vpop.f32.mrf.mxu2  ;;  %v8206_v21 = vld [vmem:[%s10314_s1 + $0xd98] sm:$0xff]  ;;  %v8203_v36 = vld [vmem:[%s10314_s1 + $0xd80] sm:$0xff] }
 0x18f   :  { %5190 = vmatpush.bf16.msra.mxu1 %v8167_v23  ;;  %v4933_v15 = vadd.f32 %v4932_v50, %v4919_v45  ;;  %v4946_v24 = vpop.f32.mrf.mxu3  ;;  %v8214_v23 = vld [vmem:[%s10314_s1 + $0xdd8] sm:$0xff]  ;;  %v8211_v37 = vld [vmem:[%s10314_s1 + $0xdc0] sm:$0xff]  ;;  %v7733_v45 = vld [vmem:[%s10316_s0 + $0xd4] sm:$0xf] }
 0x190   :  { %5204 = vmatpush.bf16.msra.mxu2 %v8175_v25  ;;  %v8197_v25 = vld [vmem:[%s10314_s1 + $0xd50] sm:$0xff]  ;;  %v8250_v50 = vld [vmem:[%s10314_s1 + $0xef8] sm:$0xff]  ;;  %v8247_v38 = vld [vmem:[%s10314_s1 + $0xee0] sm:$0xff] }
 0x191   :  { %5218 = vmatpush.bf16.msra.mxu3 %v8183_v26  ;;  %v9920_v28 = vadd.f32 %v4946_v24, %v4933_v15  ;;  %v8205_v26 = vld [vmem:[%s10314_s1 + $0xd90] sm:$0xff] }
 0x192   :  { %5177 = vmatpush.bf16.msra.mxu0 %v8158_v30  ;;  %v8188_v30 = vld [vmem:[%s10314_s1 + $0xd08] sm:$0xff] }
 0x193   :  { %5191 = vmatpush.bf16.msra.mxu1 %v8166_v31  ;;  %v8196_v31 = vld [vmem:[%s10314_s1 + $0xd48] sm:$0xff] }
 0x194   :  { %5205 = vmatpush.bf16.msra.mxu2 %v8174_v33  ;;  %v8204_v33 = vld [vmem:[%s10314_s1 + $0xd88] sm:$0xff] }
 0x195   :  { %5219 = vmatpush.bf16.msra.mxu3 %v8182_v34  ;;  %v8212_v34 = vld [vmem:[%s10314_s1 + $0xdc8] sm:$0xff] }
 0x196   :  { %5178 = vmatpush.bf16.msra.mxu0 %v8157_v41  ;;  %v8234_v41 = vld [vmem:[%s10314_s1 + $0xe78] sm:$0xff] }
 0x197   :  { %5192 = vmatpush.bf16.msra.mxu1 %v8165_v42  ;;  %v5613_v42 = vld [vmem:[%s10316_s0 + $0xd0] sm:$0xf] }
 0x198   :  { %5206 = vmatpush.bf16.msra.mxu2 %v8173_v43  ;;  %v5621_v43 = vld [vmem:[%s10316_s0 + $0xd8] sm:$0xf]  ;;  %v5614_v15 = vor.u32 %v7765_v12, %v5613_v42  ;;  %v8256_v42 = vld [vmem:[%s10314_s1 + $0xf28] sm:$0xff] }
 0x199   :  { %5220 = vmatpush.bf16.msra.mxu3 %v8181_v44  ;;  %v7766_v44 = vld [vmem:[%s10316_s0 + $0x1d4] sm:$0xf0]  ;;  %v8264_v12 = vld [vmem:[%s10314_s1 + $0xf68] sm:$0xff] }
 0x19a   :  { %5179 = vmatpush.bf16.msra.mxu0 %v8156_v46  ;;  %v5615_v46 = vld [vmem:[%s10316_s0 + $0x1d0] sm:$0xf0]  ;;  %v5622_v24 = vor.u32 %v7766_v44, %v5621_v43  ;;  %v8272_v43 = vld [vmem:[%s10314_s1 + $0xfa8] sm:$0xff] }
 0x19b   :  { %5193 = vmatpush.bf16.msra.mxu1 %v8164_v47  ;;  %v7734_v47 = vld [vmem:[%s10316_s0 + $0xdc] sm:$0xf]  ;;  %v8280_v44 = vld [vmem:[%s10314_s1 + $0xfe8] sm:$0xff] }
 0x19c   :  { %5207 = vmatpush.bf16.msra.mxu2 %v8172_v48  ;;  %v5623_v48 = vld [vmem:[%s10316_s0 + $0x1d8] sm:$0xf0] }
 0x19d   :  { %5221 = vmatpush.bf16.msra.mxu3 %v8180_v49  ;;  %v8242_v49 = vld [vmem:[%s10314_s1 + $0xeb8] sm:$0xff] }
 0x19e   :  { %5180 = vmatpush.bf16.msra.mxu0 %v8155_v51  ;;  %v5618_v51 = vor.u32 %v7733_v45, %v5615_v46  ;;  %v8255_v45 = vld [vmem:[%s10314_s1 + $0xf20] sm:$0xff] }
 0x19f   :  { %5194 = vmatpush.bf16.msra.mxu1 %v8163_v52  ;;  %v5626_v52 = vor.u32 %v7734_v47, %v5623_v48  ;;  %v8263_v46 = vld [vmem:[%s10314_s1 + $0xf60] sm:$0xff] }
 0x1a0   :  { %5208 = vmatpush.bf16.msra.mxu2 %v8171_v53  ;;  %v8225_v53 = vld [vmem:[%s10314_s1 + $0xe30] sm:$0xff]  ;;  %v8271_v47 = vld [vmem:[%s10314_s1 + $0xfa0] sm:$0xff] }
 0x1a1   :  { %5222 = vmatpush.bf16.msra.mxu3 %v8179_v54  ;;  %5181 = vmatmul.bf16.vlgmr.msra.gmra.mxu0 %v5598_v1  ;;  %v8233_v54 = vld [vmem:[%s10314_s1 + $0xe70] sm:$0xff]  ;;  %v8238_v1 = vld [vmem:[%s10314_s1 + $0xe98] sm:$0xff]  ;;  %v8279_v48 = vld [vmem:[%s10314_s1 + $0xfe0] sm:$0xff] }
 0x1a2   :  { %5229 = vmatpush.bf16.msrb.mxu0 %v8194_v55  ;;  %5195 = vmatmul.bf16.vlgmr.msra.gmra.mxu1 %v5602_v3  ;;  %v8241_v55 = vld [vmem:[%s10314_s1 + $0xeb0] sm:$0xff] }
 0x1a3   :  { %5243 = vmatpush.bf16.msrb.mxu1 %v8202_v56  ;;  %5209 = vmatmul.bf16.vlgmr.msra.gmra.mxu2 %v5606_v2  ;;  %v8249_v56 = vld [vmem:[%s10314_s1 + $0xef0] sm:$0xff]  ;;  %v8246_v2 = vld [vmem:[%s10314_s1 + $0xed8] sm:$0xff] }
 0x1a4   :  { %5257 = vmatpush.bf16.msrb.mxu2 %v8210_v17  ;;  %5223 = vmatmul.bf16.vlgmr.msra.gmra.mxu3 %v5610_v4  ;;  %v8222_v17 = vld [vmem:[%s10314_s1 + $0xe18] sm:$0xff]  ;;  %v8221_v3 = vld [vmem:[%s10314_s1 + $0xe10] sm:$0xff] }
 0x1a5   :  { %5271 = vmatpush.bf16.msrb.mxu3 %v8218_v0  ;;  %v8230_v0 = vld [vmem:[%s10314_s1 + $0xe58] sm:$0xff]  ;;  %v8229_v4 = vld [vmem:[%s10314_s1 + $0xe50] sm:$0xff] }
 0x1a6   :  { %5230 = vmatpush.bf16.msrb.mxu0 %v8193_v5  ;;  %v8237_v5 = vld [vmem:[%s10314_s1 + $0xe90] sm:$0xff] }
 0x1a7   :  { %5244 = vmatpush.bf16.msrb.mxu1 %v8201_v6  ;;  %v8245_v6 = vld [vmem:[%s10314_s1 + $0xed0] sm:$0xff] }
 0x1a8   :  { %5258 = vmatpush.bf16.msrb.mxu2 %v8209_v7  ;;  %v8220_v7 = vld [vmem:[%s10314_s1 + $0xe08] sm:$0xff] }
 0x1a9   :  { %5272 = vmatpush.bf16.msrb.mxu3 %v8217_v8  ;;  %v8228_v8 = vld [vmem:[%s10314_s1 + $0xe48] sm:$0xff] }
 0x1aa   :  { %5231 = vmatpush.bf16.msrb.mxu0 %v8192_v9  ;;  %v8236_v9 = vld [vmem:[%s10314_s1 + $0xe88] sm:$0xff] }
 0x1ab   :  { %5245 = vmatpush.bf16.msrb.mxu1 %v8200_v10  ;;  %v8244_v10 = vld [vmem:[%s10314_s1 + $0xec8] sm:$0xff] }
 0x1ac   :  { %5259 = vmatpush.bf16.msrb.mxu2 %v8208_v11  ;;  %v8219_v11 = vld [vmem:[%s10314_s1 + $0xe00] sm:$0xff] }
 0x1ad   :  { %5273 = vmatpush.bf16.msrb.mxu3 %v8216_v13  ;;  %v8227_v13 = vld [vmem:[%s10314_s1 + $0xe40] sm:$0xff] }
 0x1ae   :  { %5232 = vmatpush.bf16.msrb.mxu0 %v8191_v14  ;;  %v8235_v14 = vld [vmem:[%s10314_s1 + $0xe80] sm:$0xff] }
 0x1af   :  { %5246 = vmatpush.bf16.msrb.mxu1 %v8199_v22  ;;  %v8243_v22 = vld [vmem:[%s10314_s1 + $0xec0] sm:$0xff] }
 0x1b0   :  { %5260 = vmatpush.bf16.msrb.mxu2 %v8207_v16  ;;  %v8258_v16 = vld [vmem:[%s10314_s1 + $0xf38] sm:$0xff] }
 0x1b1   :  { %5274 = vmatpush.bf16.msrb.mxu3 %v8215_v18  ;;  %v8266_v18 = vld [vmem:[%s10314_s1 + $0xf78] sm:$0xff] }
 0x1b2   :  { %5233 = vmatpush.bf16.msrb.mxu0 %v8190_v19  ;;  %v5629_v19 = vld [vmem:[%s10316_s0 + $0xe0] sm:$0xf] }
 0x1b3   :  { %5247 = vmatpush.bf16.msrb.mxu1 %v8198_v20  ;;  %v7767_v20 = vld [vmem:[%s10316_s0 + $0x1dc] sm:$0xf0] }
 0x1b4   :  { %5261 = vmatpush.bf16.msrb.mxu2 %v8206_v21  ;;  %v5637_v21 = vld [vmem:[%s10316_s0 + $0xe8] sm:$0xf] }
 0x1b5   :  { %5275 = vmatpush.bf16.msrb.mxu3 %v8214_v23  ;;  %v7768_v23 = vld [vmem:[%s10316_s0 + $0x1e4] sm:$0xf0] }
 0x1b6   :  { %5234 = vmatpush.bf16.msrb.mxu0 %v8189_v27  ;;  %v7735_v27 = vld [vmem:[%s10316_s0 + $0xe4] sm:$0xf] }
 0x1b7   :  { %5248 = vmatpush.bf16.msrb.mxu1 %v8197_v25  ;;  %v5631_v25 = vld [vmem:[%s10316_s0 + $0x1e0] sm:$0xf0] }
 0x1b8   :  { %5262 = vmatpush.bf16.msrb.mxu2 %v8205_v26  ;;  %v7736_v26 = vld [vmem:[%s10316_s0 + $0xec] sm:$0xf] }
 0x1b9   :  { %5276 = vmatpush.bf16.msrb.mxu3 %v8213_v29  ;;  %v5639_v29 = vld [vmem:[%s10316_s0 + $0x1e8] sm:$0xf0] }
 0x1ba   :  { %5235 = vmatpush.bf16.msrb.mxu0 %v8188_v30  ;;  %v8274_v30 = vld [vmem:[%s10314_s1 + $0xfb8] sm:$0xff] }
 0x1bb   :  { %5249 = vmatpush.bf16.msrb.mxu1 %v8196_v31  ;;  %v8282_v31 = vld [vmem:[%s10314_s1 + $0xff8] sm:$0xff] }
 0x1bc   :  { %5263 = vmatpush.bf16.msrb.mxu2 %v8204_v33  ;;  %v5630_v33 = vor.u32 %v7767_v20, %v5629_v19 }
 0x1bd   :  { %5277 = vmatpush.bf16.msrb.mxu3 %v8212_v34  ;;  %v5638_v34 = vor.u32 %v7768_v23, %v5637_v21 }
 0x1be   :  { %5236 = vmatpush.bf16.msrb.mxu0 %v8187_v35  ;;  %v5634_v35 = vor.u32 %v7735_v27, %v5631_v25 }
 0x1bf   :  { %5250 = vmatpush.bf16.msrb.mxu1 %v8195_v32  ;;  %v5642_v32 = vor.u32 %v7736_v26, %v5639_v29 }
 0x1c0   :  { %5264 = vmatpush.bf16.msrb.mxu2 %v8203_v36  ;;  %v8257_v36 = vld [vmem:[%s10314_s1 + $0xf30] sm:$0xff] }
 0x1c1   :  { %5278 = vmatpush.bf16.msrb.mxu3 %v8211_v37  ;;  %5237 = vmatmul.bf16.vlgmr.msrb.gmra.mxu0 %v5614_v15  ;;  %v8265_v37 = vld [vmem:[%s10314_s1 + $0xf70] sm:$0xff]  ;;  %v8270_v15 = vld [vmem:[%s10314_s1 + $0xf98] sm:$0xff] }
 0x1c2   :  { %5285 = vmatpush.bf16.msra.mxu0 %v8226_v39  ;;  %5251 = vmatmul.bf16.vlgmr.msrb.gmra.mxu1 %v5618_v51  ;;  %v8273_v39 = vld [vmem:[%s10314_s1 + $0xfb0] sm:$0xff] }
 0x1c3   :  { %5299 = vmatpush.bf16.msra.mxu1 %v8234_v41  ;;  %5265 = vmatmul.bf16.vlgmr.msrb.gmra.mxu2 %v5622_v24  ;;  %v8281_v41 = vld [vmem:[%s10314_s1 + $0xff0] sm:$0xff]  ;;  %v8278_v24 = vld [vmem:[%s10314_s1 + $0xfd8] sm:$0xff] }
 0x1c4   :  { %5313 = vmatpush.bf16.msra.mxu2 %v8242_v49  ;;  %5279 = vmatmul.bf16.vlgmr.msrb.gmra.mxu3 %v5626_v52  ;;  %v8254_v49 = vld [vmem:[%s10314_s1 + $0xf18] sm:$0xff]  ;;  %v8253_v51 = vld [vmem:[%s10314_s1 + $0xf10] sm:$0xff] }
 0x1c5   :  { %5327 = vmatpush.bf16.msra.mxu3 %v8250_v50  ;;  %v8262_v50 = vld [vmem:[%s10314_s1 + $0xf58] sm:$0xff]  ;;  %v8261_v52 = vld [vmem:[%s10314_s1 + $0xf50] sm:$0xff] }
 0x1c6   :  { %5286 = vmatpush.bf16.msra.mxu0 %v8225_v53  ;;  %v8269_v53 = vld [vmem:[%s10314_s1 + $0xf90] sm:$0xff] }
 0x1c7   :  { %5300 = vmatpush.bf16.msra.mxu1 %v8233_v54  ;;  %v8277_v54 = vld [vmem:[%s10314_s1 + $0xfd0] sm:$0xff] }
 0x1c8   :  { %5314 = vmatpush.bf16.msra.mxu2 %v8241_v55  ;;  %v8252_v55 = vld [vmem:[%s10314_s1 + $0xf08] sm:$0xff] }
 0x1c9   :  { %5328 = vmatpush.bf16.msra.mxu3 %v8249_v56  ;;  %v8260_v56 = vld [vmem:[%s10314_s1 + $0xf48] sm:$0xff] }
 0x1ca   :  { %5287 = vmatpush.bf16.msra.mxu0 %v8224_v57  ;;  %v8268_v57 = vld [vmem:[%s10314_s1 + $0xf88] sm:$0xff] }
 0x1cb   :  { %5301 = vmatpush.bf16.msra.mxu1 %v8232_v58  ;;  %v8276_v58 = vld [vmem:[%s10314_s1 + $0xfc8] sm:$0xff] }
 0x1cc   :  { %5315 = vmatpush.bf16.msra.mxu2 %v8240_v59  ;;  %v8251_v59 = vld [vmem:[%s10314_s1 + $0xf00] sm:$0xff] }
 0x1cd   :  { %5329 = vmatpush.bf16.msra.mxu3 %v8248_v60  ;;  %v8259_v60 = vld [vmem:[%s10314_s1 + $0xf40] sm:$0xff] }
 0x1ce   :  { %5288 = vmatpush.bf16.msra.mxu0 %v8223_v61  ;;  %v8267_v61 = vld [vmem:[%s10314_s1 + $0xf80] sm:$0xff] }
 0x1cf   :  { %5302 = vmatpush.bf16.msra.mxu1 %v8231_v62  ;;  %v8275_v62 = vld [vmem:[%s10314_s1 + $0xfc0] sm:$0xff] }
 0x1d0   :  { %5316 = vmatpush.bf16.msra.mxu2 %v8239_v63  ;;  %v5645_v63 = vld [vmem:[%s10316_s0 + $0xf0] sm:$0xf] }
 0x1d1   :  { %5330 = vmatpush.bf16.msra.mxu3 %v8247_v38  ;;  %v7769_v38 = vld [vmem:[%s10316_s0 + $0x1ec] sm:$0xf0] }
 0x1d2   :  { %5289 = vmatpush.bf16.msra.mxu0 %v8222_v17  ;;  %v7737_v17 = vld [vmem:[%s10316_s0 + $0xf4] sm:$0xf] }
 0x1d3   :  { %5303 = vmatpush.bf16.msra.mxu1 %v8230_v0  ;;  %v5647_v0 = vld [vmem:[%s10316_s0 + $0x1f0] sm:$0xf0] }
 0x1d4   :  { %5317 = vmatpush.bf16.msra.mxu2 %v8238_v1  ;;  %v5653_v1 = vld [vmem:[%s10316_s0 + $0xf8] sm:$0xf] }
 0x1d5   :  { %5331 = vmatpush.bf16.msra.mxu3 %v8246_v2  ;;  %v7770_v2 = vld [vmem:[%s10316_s0 + $0x1f4] sm:$0xf0] }
 0x1d6   :  { %5290 = vmatpush.bf16.msra.mxu0 %v8221_v3  ;;  %v7738_v3 = vld [vmem:[%s10316_s0 + $0xfc] sm:$0xf] }
 0x1d7   :  { %5304 = vmatpush.bf16.msra.mxu1 %v8229_v4  ;;  %v5655_v4 = vld [vmem:[%s10316_s0 + $0x1f8] sm:$0xf0] }
 0x1d8   :  { %5318 = vmatpush.bf16.msra.mxu2 %v8237_v5  ;;  %v5646_v5 = vor.u32 %v7769_v38, %v5645_v63 }
 0x1d9   :  { %5332 = vmatpush.bf16.msra.mxu3 %v8245_v6  ;;  %v5650_v6 = vor.u32 %v7737_v17, %v5647_v0 }
 0x1da   :  { %5291 = vmatpush.bf16.msra.mxu0 %v8220_v7  ;;  %v5654_v7 = vor.u32 %v7770_v2, %v5653_v1 }
 0x1db   :  { %5305 = vmatpush.bf16.msra.mxu1 %v8228_v8  ;;  %v5658_v8 = vor.u32 %v7738_v3, %v5655_v4 }
 0x1dc   :  { %5319 = vmatpush.bf16.msra.mxu2 %v8236_v9  ;;  %v4958_v9 = vpop.f32.mrf.mxu0 }
 0x1dd   :  { %5333 = vmatpush.bf16.msra.mxu3 %v8244_v10  ;;  %v4972_v10 = vpop.f32.mrf.mxu1 }
 0x1de   :  { %5292 = vmatpush.bf16.msra.mxu0 %v8219_v11  ;;  %v4986_v11 = vpop.f32.mrf.mxu2 }
 0x1df   :  { %5306 = vmatpush.bf16.msra.mxu1 %v8227_v13  ;;  %v5000_v13 = vpop.f32.mrf.mxu3 }
 0x1e0   :  { %5320 = vmatpush.bf16.msra.mxu2 %v8235_v14 }
 0x1e1   :  { %5334 = vmatpush.bf16.msra.mxu3 %v8243_v22  ;;  %5293 = vmatmul.bf16.vlgmr.msra.gmra.mxu0 %v5630_v33 }
 0x1e2   :  { %5341 = vmatpush.bf16.msrb.mxu0 %v8258_v16  ;;  %5307 = vmatmul.bf16.vlgmr.msra.gmra.mxu1 %v5634_v35  ;;  %v4959_v35 = vadd.f32 %v4958_v9, %v9882_v40 }
 0x1e3   :  { %5355 = vmatpush.bf16.msrb.mxu1 %v8266_v18  ;;  %5321 = vmatmul.bf16.vlgmr.msra.gmra.mxu2 %v5638_v34 }
 0x1e4   :  { %5369 = vmatpush.bf16.msrb.mxu2 %v8274_v30  ;;  %5335 = vmatmul.bf16.vlgmr.msra.gmra.mxu3 %v5642_v32  ;;  %v4960_v14 = vpop.f32.mrf.mxu0 }
 0x1e5   :  { %5383 = vmatpush.bf16.msrb.mxu3 %v8282_v31  ;;  %v4974_v22 = vpop.f32.mrf.mxu1 }
 0x1e6   :  { %5342 = vmatpush.bf16.msrb.mxu0 %v8257_v36  ;;  %v4988_v16 = vpop.f32.mrf.mxu2  ;;  %v4973_v36 = vadd.f32 %v4972_v10, %v4959_v35 }
 0x1e7   :  { %5356 = vmatpush.bf16.msrb.mxu1 %v8265_v37  ;;  %v5002_v18 = vpop.f32.mrf.mxu3 }
 0x1e8   :  { %5370 = vmatpush.bf16.msrb.mxu2 %v8273_v39  ;;  %v4987_v39 = vadd.f32 %v4986_v11, %v4973_v36 }
 0x1e9   :  { %5384 = vmatpush.bf16.msrb.mxu3 %v8281_v41  ;;  %v4961_v41 = vadd.f32 %v4960_v14, %v9920_v28 }
 0x1ea   :  { %5343 = vmatpush.bf16.msrb.mxu0 %v8256_v42 }
 0x1eb   :  { %5357 = vmatpush.bf16.msrb.mxu1 %v8264_v12 }
 0x1ec   :  { %5371 = vmatpush.bf16.msrb.mxu2 %v8272_v43  ;;  %v5014_v19 = vpop.f32.mrf.mxu0  ;;  %v5001_v43 = vadd.f32 %v5000_v13, %v4987_v39 }
 0x1ed   :  { %5385 = vmatpush.bf16.msrb.mxu3 %v8280_v44  ;;  %v5028_v20 = vpop.f32.mrf.mxu1 }
 0x1ee   :  { %5344 = vmatpush.bf16.msrb.mxu0 %v8255_v45  ;;  %v5042_v21 = vpop.f32.mrf.mxu2  ;;  %v4975_v45 = vadd.f32 %v4974_v22, %v4961_v41 }
 0x1ef   :  { %5358 = vmatpush.bf16.msrb.mxu1 %v8263_v46  ;;  %v5056_v23 = vpop.f32.mrf.mxu3  ;;  %v5015_v46 = vadd.f32 %v5014_v19, %v5001_v43 }
 0x1f0   :  { %5372 = vmatpush.bf16.msrb.mxu2 %v8271_v47 }
 0x1f1   :  { %5386 = vmatpush.bf16.msrb.mxu3 %v8279_v48  ;;  %v4989_v48 = vadd.f32 %v4988_v16, %v4975_v45 }
 0x1f2   :  { %5345 = vmatpush.bf16.msrb.mxu0 %v8254_v49  ;;  %v5029_v49 = vadd.f32 %v5028_v20, %v5015_v46 }
 0x1f3   :  { %5359 = vmatpush.bf16.msrb.mxu1 %v8262_v50 }
 0x1f4   :  { %5373 = vmatpush.bf16.msrb.mxu2 %v8270_v15  ;;  %v5016_v27 = vpop.f32.mrf.mxu0 }
 0x1f5   :  { %5387 = vmatpush.bf16.msrb.mxu3 %v8278_v24  ;;  %v5030_v25 = vpop.f32.mrf.mxu1  ;;  %v5003_v24 = vadd.f32 %v5002_v18, %v4989_v48 }
 0x1f6   :  { %5346 = vmatpush.bf16.msrb.mxu0 %v8253_v51  ;;  %v5044_v26 = vpop.f32.mrf.mxu2  ;;  %v5043_v51 = vadd.f32 %v5042_v21, %v5029_v49 }
 0x1f7   :  { %5360 = vmatpush.bf16.msrb.mxu1 %v8261_v52  ;;  %v5058_v29 = vpop.f32.mrf.mxu3  ;;  %v5017_v40 = vadd.f32 %v5016_v27, %v5003_v24 }
 0x1f8   :  { %5374 = vmatpush.bf16.msrb.mxu2 %v8269_v53  ;;  %v5057_v53 = vadd.f32 %v5056_v23, %v5043_v51 }
 0x1f9   :  { %5388 = vmatpush.bf16.msrb.mxu3 %v8277_v54 }
 0x1fa   :  { %5347 = vmatpush.bf16.msrb.mxu0 %v8252_v55  ;;  %v5031_v55 = vadd.f32 %v5030_v25, %v5017_v40 }
 0x1fb   :  { %5361 = vmatpush.bf16.msrb.mxu1 %v8260_v56 }
 0x1fc   :  { %5375 = vmatpush.bf16.msrb.mxu2 %v8268_v57  ;;  %v5070_v30 = vpop.f32.mrf.mxu0  ;;  %v5045_v28 = vadd.f32 %v5044_v26, %v5031_v55 }
 0x1fd   :  { %5389 = vmatpush.bf16.msrb.mxu3 %v8276_v58  ;;  %v5084_v31 = vpop.f32.mrf.mxu1  ;;  %v5071_v56 = vadd.f32 %v5070_v30, %v5057_v53 }
 0x1fe   :  { %5348 = vmatpush.bf16.msrb.mxu0 %v8251_v59  ;;  %v5098_v33 = vpop.f32.mrf.mxu2 }
 0x1ff   :  { %5362 = vmatpush.bf16.msrb.mxu1 %v8259_v60  ;;  %v5112_v34 = vpop.f32.mrf.mxu3  ;;  %v5085_v59 = vadd.f32 %v5084_v31, %v5071_v56 }
 0x200   :  { %5376 = vmatpush.bf16.msrb.mxu2 %v8267_v61  ;;  %v5059_v61 = vadd.f32 %v5058_v29, %v5045_v28 }
 0x201   :  { %5390 = vmatpush.bf16.msrb.mxu3 %v8275_v62  ;;  %5349 = vmatmul.bf16.vlgmr.msrb.gmra.mxu0 %v5646_v5  ;;  %v5099_v62 = vadd.f32 %v5098_v33, %v5085_v59 }
 0x202   :  { %5363 = vmatmul.bf16.vlgmr.msrb.gmra.mxu1 %v5650_v6 }
 0x203   :  { %5377 = vmatmul.bf16.vlgmr.msrb.gmra.mxu2 %v5654_v7  ;;  %v5113_v17 = vadd.f32 %v5112_v34, %v5099_v62 }
 0x204   :  { %5391 = vmatmul.bf16.vlgmr.msrb.gmra.mxu3 %v5658_v8  ;;  %v5072_v32 = vpop.f32.mrf.mxu0 }
 0x205   :  { %v5086_v37 = vpop.f32.mrf.mxu1  ;;  %v5073_v38 = vadd.f32 %v5072_v32, %v5059_v61 }
 0x206   :  { %v5100_v42 = vpop.f32.mrf.mxu2 }
 0x207   :  { %v5114_v12 = vpop.f32.mrf.mxu3  ;;  %v5087_v2 = vadd.f32 %v5086_v37, %v5073_v38 }
 0x209   :  { %v5101_v4 = vadd.f32 %v5100_v42, %v5087_v2 }
 0x20b   :  { %v5115_v8 = vadd.f32 %v5114_v12, %v5101_v4 }
 0x20c   :  { %v5126_v44 = vpop.f32.mrf.mxu0 }
 0x20d   :  { %v5140_v47 = vpop.f32.mrf.mxu1  ;;  %v5127_v3 = vadd.f32 %v5126_v44, %v5113_v17 }
 0x20e   :  { %v5154_v50 = vpop.f32.mrf.mxu2 }
 0x20f   :  { %v5168_v15 = vpop.f32.mrf.mxu3  ;;  %v5141_v6 = vadd.f32 %v5140_v47, %v5127_v3 }
 0x211   :  { %v5155_v9 = vadd.f32 %v5154_v50, %v5141_v6 }
 0x213   :  { %v5169_v14 = vadd.f32 %v5168_v15, %v5155_v9 }
 0x214   :  { %v5128_v52 = vpop.f32.mrf.mxu0 }
 0x215   :  { %v5142_v54 = vpop.f32.mrf.mxu1  ;;  %v5129_v10 = vadd.f32 %v5128_v52, %v5115_v8 }
 0x216   :  { %v5156_v57 = vpop.f32.mrf.mxu2 }
 0x217   :  { %v5170_v58 = vpop.f32.mrf.mxu3  ;;  %v5143_v16 = vadd.f32 %v5142_v54, %v5129_v10 }
 0x219   :  { %v5157_v20 = vadd.f32 %v5156_v57, %v5143_v16 }
 0x21b   :  { %v5171_v25 = vadd.f32 %v5170_v58, %v5157_v20 }
 0x21e   :  { %v5182_v60 = vpop.f32.mrf.mxu0 }
 0x21f   :  { %v5196_v63 = vpop.f32.mrf.mxu1  ;;  %v5183_v18 = vadd.f32 %v5182_v60, %v5169_v14 }
 0x221   :  { %v5197_v21 = vadd.f32 %v5196_v63, %v5183_v18 }
 0x226   :  { %v5210_v0 = vpop.f32.mrf.mxu2  ;;  %v5184_v5 = vpop.f32.mrf.mxu0 }
 0x227   :  { %v5224_v1 = vpop.f32.mrf.mxu3  ;;  %v5198_v7 = vpop.f32.mrf.mxu1  ;;  %v5211_v26 = vadd.f32 %v5210_v0, %v5197_v21  ;;  %v5185_v29 = vadd.f32 %v5184_v5, %v5171_v25 }
 0x229   :  { %v5225_v31 = vadd.f32 %v5224_v1, %v5211_v26  ;;  %v5199_v34 = vadd.f32 %v5198_v7, %v5185_v29 }
 0x22e   :  { %v5212_v11 = vpop.f32.mrf.mxu2 }
 0x22f   :  { %v5226_v13 = vpop.f32.mrf.mxu3  ;;  %v5213_v32 = vadd.f32 %v5212_v11, %v5199_v34 }
 0x231   :  { %v5227_v42 = vadd.f32 %v5226_v13, %v5213_v32 }
 0x23e   :  { %v5238_v22 = vpop.f32.mrf.mxu0 }
 0x23f   :  { %v5252_v19 = vpop.f32.mrf.mxu1  ;;  %v5239_v35 = vadd.f32 %v5238_v22, %v5225_v31 }
 0x241   :  { %v5253_v39 = vadd.f32 %v5252_v19, %v5239_v35 }
 0x246   :  { %v5266_v23 = vpop.f32.mrf.mxu2  ;;  %v5240_v30 = vpop.f32.mrf.mxu0 }
 0x247   :  { %v5280_v27 = vpop.f32.mrf.mxu3  ;;  %v5254_v33 = vpop.f32.mrf.mxu1  ;;  %v5267_v12 = vadd.f32 %v5266_v23, %v5253_v39  ;;  %v5241_v44 = vadd.f32 %v5240_v30, %v5227_v42 }
 0x249   :  { %v5281_v45 = vadd.f32 %v5280_v27, %v5267_v12  ;;  %v5255_v48 = vadd.f32 %v5254_v33, %v5241_v44 }
 0x24e   :  { %v5268_v36 = vpop.f32.mrf.mxu2 }
 0x24f   :  { %v5282_v37 = vpop.f32.mrf.mxu3  ;;  %v5269_v50 = vadd.f32 %v5268_v36, %v5255_v48 }
 0x251   :  { %v5283_v40 = vadd.f32 %v5282_v37, %v5269_v50 }
 0x25e   :  { %v5294_v41 = vpop.f32.mrf.mxu0 }
 0x25f   :  { %v5308_v43 = vpop.f32.mrf.mxu1  ;;  %v5295_v49 = vadd.f32 %v5294_v41, %v5281_v45 }
 0x261   :  { %v5309_v24 = vadd.f32 %v5308_v43, %v5295_v49 }
 0x266   :  { %v5322_v46 = vpop.f32.mrf.mxu2  ;;  %v5296_v15 = vpop.f32.mrf.mxu0 }
 0x267   :  { %v5336_v47 = vpop.f32.mrf.mxu3  ;;  %v5310_v51 = vpop.f32.mrf.mxu1  ;;  %v5323_v52 = vadd.f32 %v5322_v46, %v5309_v24  ;;  %v5297_v53 = vadd.f32 %v5296_v15, %v5283_v40 }
 0x269   :  { %v5337_v56 = vadd.f32 %v5336_v47, %v5323_v52  ;;  %v5311_v57 = vadd.f32 %v5310_v51, %v5297_v53 }
 0x26e   :  { %v5324_v54 = vpop.f32.mrf.mxu2 }
 0x26f   :  { %v5338_v55 = vpop.f32.mrf.mxu3  ;;  %v5325_v60 = vadd.f32 %v5324_v54, %v5311_v57 }
 0x271   :  { %v5339_v38 = vadd.f32 %v5338_v55, %v5325_v60 }
 0x27e   :  { %v5350_v28 = vpop.f32.mrf.mxu0 }
 0x27f   :  { %v5351_v58 = vadd.f32 %v5350_v28, %v5337_v56  ;;  %v5364_v59 = vpop.f32.mrf.mxu1 }
 0x281   :  { %v5365_v61 = vadd.f32 %v5364_v59, %v5351_v58 }
 0x286   :  { %v5378_v62 = vpop.f32.mrf.mxu2  ;;  %v5352_v0 = vpop.f32.mrf.mxu0 }
 0x287   :  { %v5392_v63 = vpop.f32.mrf.mxu3  ;;  %v5379_v17 = vadd.f32 %v5378_v62, %v5365_v61  ;;  %v5353_v2 = vadd.f32 %v5352_v0, %v5339_v38  ;;  %v5366_v3 = vpop.f32.mrf.mxu1 }
 0x289   :  { %v5393_v1 = vadd.f32 %v5392_v63, %v5379_v17  ;;  %v5367_v4 = vadd.f32 %v5366_v3, %v5353_v2 }
 0x28b   :  { %5397 = vst [vmem:[%s10318_s4] sm:$0xff] %v5393_v1 }
 0x28e   :  { %v5380_v5 = vpop.f32.mrf.mxu2 }
 0x28f   :  { %v5381_v6 = vadd.f32 %v5380_v5, %v5367_v4  ;;  %v5394_v7 = vpop.f32.mrf.mxu3 }
 0x291   :  { %v5395_v8 = vadd.f32 %v5394_v7, %v5381_v6 }
 0x293   :  { %5398 = vst [vmem:[%s10318_s4 + $0x8] sm:$0xff] %v5395_v8 }

</bundles_post_ra>
